<compile_context>
chip_gen: v5e
topology: v5e:2x2
jax: 0.10.0
libtpu: 0.0.40
codegen_flags: <defaults>
</compile_context>

<pallas_src>
import jax
import jax.numpy as jnp
from jax.experimental import pallas as pl
from jax.experimental.pallas import tpu as pltpu

# ------------------------- configs (consistent with the module) -------------
BATCH = 32        # the PyTorch forward hard-codes .reshape(32, ...) -> batch=32
SEQ = 8
ENC_IN = 4        # configs.enc_in
D_MODEL = 32      # configs.d_model
LAYER_DIM = 2     # configs.layer_dim  (this kernel is specialized to 2 layers)
PRED_LEN = 4      # configs.pred_len
OUT_DIM = PRED_LEN * ENC_IN

# ------------------------- packed-parameter slab layout ---------------------
HP = 128                    # per-gate lane padding (vreg-aligned gate slices)
SLAB_COLS = 4 * HP          # 512 lanes:  r | z | n(input) | n(hidden)
R_WIH0 = 0                  # rows [0:8)    : layer-0 input proj (+ folded bias row)
R_WHH0 = 8                  # rows [8:136)  : layer-0 recurrent weights (128 rows)
R_W1 = 136                  # rows [136:392): layer-1 fused input+recurrent weights
R_FC = 392                  # rows [392:520): FC weights (128 rows)
R_BHN0 = 520                # row  520      : layer-0 hidden n-gate bias
R_B1 = 521                  # row  521      : layer-1 bias slab (r|z|in|hn)
R_FCB = 522                 # row  522      : FC bias
SLAB_ROWS = 528             # multiple of 8
X_COLS = 8                  # features (4) + ones column (1) + zero pad (3)


# --------------------------- fused Pallas kernel -----------------------------
def fused_gru_fc_kernel(x_ref, w_ref, out_ref):
    B = x_ref.shape[0] // SEQ          # 32
    O = out_ref.shape[1]               # 16

    # One-time loads of the parameter blocks (all row-blocks 8-aligned,
    # full 512-lane width so every gate slice below is whole-vreg).
    w_ih0 = w_ref[R_WIH0:R_WHH0, :]        # (8,   512) input proj + folded bias row
    w_hh0 = w_ref[R_WHH0:R_W1, :]          # (128, 512) layer-0 recurrent
    w_l1 = w_ref[R_W1:R_FC, :]             # (256, 512) layer-1 fused (input|recurrent)
    w_fc = w_ref[R_FC:R_BHN0, :]           # (128, 512) FC head (cols 0:16 used)
    # Biases: pre-broadcast ONCE before the unrolled loop (no per-step broadcasts).
    bhn0 = jnp.broadcast_to(w_ref[R_BHN0:R_BHN0 + 1, 0:HP], (B, HP))       # (32, 128)
    b1 = jnp.broadcast_to(w_ref[R_B1:R_B1 + 1, :], (B, SLAB_COLS))         # (32, 512)
    fc_b = w_ref[R_FCB:R_FCB + 1, 0:O]                                     # (1, 16)

    # Hoisted layer-0 input projection: all timesteps in one 256-row matmul.
    # Biases (bih0_r+bhh0_r | bih0_z+bhh0_z | bih0_n) folded via the ones column.
    gi0_all = jnp.dot(x_ref[...], w_ih0,
                      preferred_element_type=jnp.float32)                  # (S*B, 512)

    # Hidden states carried as (B, 128); pad lanes stay exactly zero.
    h0 = jnp.zeros((B, HP), jnp.float32)
    h1 = jnp.zeros((B, HP), jnp.float32)

    for t in range(SEQ):
        gi0 = gi0_all[t * B:(t + 1) * B, :]            # (B, 512) sublane-aligned

        # ---- layer 0 ----
        if t == 0:
            # h0 == 0 -> recurrent projection is zero; specialize.
            r0 = jax.nn.sigmoid(gi0[:, 0:HP])
            z0 = jax.nn.sigmoid(gi0[:, HP:2 * HP])
            n0 = jnp.tanh(gi0[:, 2 * HP:3 * HP] + r0 * bhn0)
            h0 = (1.0 - z0) * n0
        else:
            gh0 = jnp.dot(h0, w_hh0, preferred_element_type=jnp.float32)   # (B, 512)
            r0 = jax.nn.sigmoid(gi0[:, 0:HP] + gh0[:, 0:HP])
            z0 = jax.nn.sigmoid(gi0[:, HP:2 * HP] + gh0[:, HP:2 * HP])
            n0 = jnp.tanh(gi0[:, 2 * HP:3 * HP] + r0 * (gh0[:, 2 * HP:3 * HP] + bhn0))
            h0 = (1.0 - z0) * n0 + z0 * h0

        # ---- layer 1: fused input+recurrent projection (single MXU issue) ----
        if t == 0:
            # h1 == 0: only the input-projection half of the fused weight matters.
            g1 = jnp.dot(h0, w_l1[0:HP, :], preferred_element_type=jnp.float32) + b1
        else:
            cat = jnp.concatenate([h0, h1], axis=1)                        # (B, 256)
            g1 = jnp.dot(cat, w_l1, preferred_element_type=jnp.float32) + b1
        r1 = jax.nn.sigmoid(g1[:, 0:HP])
        z1 = jax.nn.sigmoid(g1[:, HP:2 * HP])
        n1 = jnp.tanh(g1[:, 2 * HP:3 * HP] + r1 * g1[:, 3 * HP:4 * HP])
        if t == 0:
            h1 = (1.0 - z1) * n1
        else:
            h1 = (1.0 - z1) * n1 + z1 * h1

    # FC head on the last hidden state of the top layer (== out[:, -1, :]).
    out = jnp.dot(h1, w_fc, preferred_element_type=jnp.float32)[:, 0:O] + fc_b
    out_ref[...] = out.astype(out_ref.dtype)


# --------------------------- wrapper ----------------------------------------
@jax.jit
def gru_model_forward(src, w_slab):
    """Equivalent of GRU.forward(src, ...): only `src` participates."""
    B, S, F = src.shape
    assert B == BATCH == 32, "PyTorch module hard-codes reshape(32, ...)"
    assert S == SEQ and F == ENC_IN

    # Wrapper-side layout plumbing: time-major, flattened, ones-augmented input
    # so the layer-0 projection + its biases are a single in-kernel matmul.
    x_t = jnp.transpose(src, (1, 0, 2)).reshape(S * B, F).astype(jnp.float32)
    x_aug = jnp.concatenate(
        [x_t,
         jnp.ones((S * B, 1), jnp.float32),
         jnp.zeros((S * B, X_COLS - F - 1), jnp.float32)], axis=1)          # (S*B, 8)

    out = pl.pallas_call(
        fused_gru_fc_kernel,
        out_shape=jax.ShapeDtypeStruct((B, OUT_DIM), jnp.float32),
        in_specs=[pl.BlockSpec(memory_space=pltpu.MemorySpace.VMEM),
                  pl.BlockSpec(memory_space=pltpu.MemorySpace.VMEM)],
        out_specs=pl.BlockSpec(memory_space=pltpu.MemorySpace.VMEM),
    )(x_aug, w_slab)

    return out.reshape(32, PRED_LEN, ENC_IN)   # hard-coded 32, as in the module


# --------------------------- parameter packing -------------------------------
def pack_params(raw):
    """Pack all weights/biases into one (528, 512) f32 slab (2 kernel inputs total).
    Gates live at lane offsets 0 / 128 / 256 (/ 384 for the hidden n-projection)."""
    H = D_MODEL
    slab = jnp.zeros((SLAB_ROWS, SLAB_COLS), jnp.float32)

    def scatter_gates(slab, row0, mat):
        # mat: (rows, 3H) gate-concatenated (r|z|n) -> 128-lane gate blocks.
        rows = mat.shape[0]
        for g in range(3):
            slab = slab.at[row0:row0 + rows, g * HP:g * HP + H].set(
                mat[:, g * H:(g + 1) * H])
        return slab

    l0, l1 = raw["layers"]

    # Layer-0 input projection (rows 0:ENC_IN) + folded-bias row (row ENC_IN).
    slab = scatter_gates(slab, R_WIH0, l0["wih"])
    b0 = jnp.concatenate([l0["bih"][:2 * H] + l0["bhh"][:2 * H], l0["bih"][2 * H:]])
    slab = scatter_gates(slab, R_WIH0 + ENC_IN, b0[None, :])

    # Layer-0 recurrent weights (rows 8:40 of the 128-row block).
    slab = scatter_gates(slab, R_WHH0, l0["whh"])

    # Layer-1 fused weights: rows 136:168 = input proj (r|z|n_in),
    #                        rows 264:296 = recurrent (r|z|-|n_hid).
    slab = scatter_gates(slab, R_W1, l1["wih"])
    whh1 = l1["whh"]
    slab = slab.at[R_W1 + HP:R_W1 + HP + H, 0:H].set(whh1[:, 0:H])
    slab = slab.at[R_W1 + HP:R_W1 + HP + H, HP:HP + H].set(whh1[:, H:2 * H])
    slab = slab.at[R_W1 + HP:R_W1 + HP + H, 3 * HP:3 * HP + H].set(whh1[:, 2 * H:])

    # FC weights (rows 392:424, cols 0:16).
    slab = slab.at[R_FC:R_FC + H, 0:OUT_DIM].set(raw["fc_w"])

    # Bias rows.
    slab = slab.at[R_BHN0, 0:H].set(l0["bhh"][2 * H:])                      # bhn0
    b1_rz = l1["bih"][:2 * H] + l1["bhh"][:2 * H]
    slab = slab.at[R_B1, 0:H].set(b1_rz[:H])
    slab = slab.at[R_B1, HP:HP + H].set(b1_rz[H:])
    slab = slab.at[R_B1, 2 * HP:2 * HP + H].set(l1["bih"][2 * H:])          # bih_n1
    slab = slab.at[R_B1, 3 * HP:3 * HP + H].set(l1["bhh"][2 * H:])          # bhh_n1
    slab = slab.at[R_FCB, 0:OUT_DIM].set(raw["fc_b"])
    return slab


# --------------------------- pure-JAX reference ------------------------------
def gru_model_ref(src, raw):
    H = D_MODEL
    x = jnp.transpose(src, (1, 0, 2))        # (S, B, F), time-major scan
    for layer in raw["layers"]:
        def step(h, x_t, layer=layer):
            gi = x_t @ layer["wih"] + layer["bih"]
            gh = h @ layer["whh"] + layer["bhh"]
            r = jax.nn.sigmoid(gi[:, :H] + gh[:, :H])
            z = jax.nn.sigmoid(gi[:, H:2 * H] + gh[:, H:2 * H])
            n = jnp.tanh(gi[:, 2 * H:] + r * gh[:, 2 * H:])
            h_new = (1.0 - z) * n + z * h
            return h_new, h_new

        h0 = jnp.zeros((x.shape[1], H), jnp.float32)
        _, ys = jax.lax.scan(step, h0, x)
        x = ys
    out = x[-1] @ raw["fc_w"] + raw["fc_b"]
    return out.reshape(32, PRED_LEN, ENC_IN)


# --------------------------- deterministic params ----------------------------
def init_raw_params(key):
    """PyTorch-style uniform init; gate-concatenated (r|z|n) layout."""
    k = 1.0 / jnp.sqrt(jnp.float32(D_MODEL))
    H = D_MODEL
    layers = []
    for layer_idx in range(LAYER_DIM):
        f_in = ENC_IN if layer_idx == 0 else D_MODEL
        key, k1, k2, k3, k4 = jax.random.split(key, 5)
        layers.append(dict(
            wih=jax.random.uniform(k1, (f_in, 3 * H), jnp.float32, -k, k),
            whh=jax.random.uniform(k2, (H, 3 * H), jnp.float32, -k, k),
            bih=jax.random.uniform(k3, (3 * H,), jnp.float32, -k, k),
            bhh=jax.random.uniform(k4, (3 * H,), jnp.float32, -k, k),
        ))
    key, k5, k6 = jax.random.split(key, 3)
    fc_w = jax.random.uniform(k5, (D_MODEL, OUT_DIM), jnp.float32, -k, k)
    fc_b = jax.random.uniform(k6, (OUT_DIM,), jnp.float32, -k, k)
    return dict(layers=layers, fc_w=fc_w, fc_b=fc_b)


# ------------------------------ main -----------------------------------------
if __name__ == "__main__":
    key = jax.random.PRNGKey(0)
    key, ksrc, kparam = jax.random.split(key, 3)
    src = jax.random.normal(ksrc, (BATCH, SEQ, ENC_IN), jnp.float32)
    raw = init_raw_params(kparam)
    w_slab = pack_params(raw)

    out = jax.block_until_ready(gru_model_forward(src, w_slab))
    ref = jax.block_until_ready(jax.jit(gru_model_ref)(src, raw))

    assert out.shape == (32, PRED_LEN, ENC_IN), out.shape
    assert bool(jnp.all(jnp.isfinite(out)))
    max_err = float(jnp.max(jnp.abs(out - ref)))
    assert jnp.allclose(out, ref, atol=2e-5, rtol=2e-5), max_err
    print("KERNEL_OK")
</pallas_src>

<mosaic_0001>
module attributes {stable_mosaic.version = 11 : i64} {
  func.func @fused_gru_fc_kernel(%arg0: memref<256x8xf32, #tpu.memory_space<vmem>>, %arg1: memref<528x512xf32, #tpu.memory_space<vmem>>, %arg2: memref<32x16xf32, #tpu.memory_space<vmem>>) attributes {dimension_semantics = [], scalar_prefetch = 0 : i64, scratch_operands = 0 : i64, tpu.core_type = #tpu.core_type<tc>} {
    %c0 = arith.constant 0 : index
    %c0_0 = arith.constant 0 : index
    %0 = vector.load %arg1[%c0, %c0_0] : memref<528x512xf32, #tpu.memory_space<vmem>>, vector<8x512xf32>
    %c8 = arith.constant 8 : index
    %c0_1 = arith.constant 0 : index
    %1 = vector.load %arg1[%c8, %c0_1] : memref<528x512xf32, #tpu.memory_space<vmem>>, vector<128x512xf32>
    %c136 = arith.constant 136 : index
    %c0_2 = arith.constant 0 : index
    %2 = vector.load %arg1[%c136, %c0_2] : memref<528x512xf32, #tpu.memory_space<vmem>>, vector<256x512xf32>
    %c392 = arith.constant 392 : index
    %c0_3 = arith.constant 0 : index
    %3 = vector.load %arg1[%c392, %c0_3] : memref<528x512xf32, #tpu.memory_space<vmem>>, vector<128x512xf32>
    %c520 = arith.constant 520 : index
    %c0_4 = arith.constant 0 : index
    %4 = vector.load %arg1[%c520, %c0_4] : memref<528x512xf32, #tpu.memory_space<vmem>>, vector<1x128xf32>
    %5 = vector.shape_cast %4 : vector<1x128xf32> to vector<1x128xf32>
    %6 = vector.broadcast %5 : vector<1x128xf32> to vector<32x128xf32>
    %c521 = arith.constant 521 : index
    %c0_5 = arith.constant 0 : index
    %7 = vector.load %arg1[%c521, %c0_5] : memref<528x512xf32, #tpu.memory_space<vmem>>, vector<1x512xf32>
    %8 = vector.shape_cast %7 : vector<1x512xf32> to vector<1x512xf32>
    %9 = vector.broadcast %8 : vector<1x512xf32> to vector<32x512xf32>
    %c522 = arith.constant 522 : index
    %c0_6 = arith.constant 0 : index
    %10 = vector.load %arg1[%c522, %c0_6] : memref<528x512xf32, #tpu.memory_space<vmem>>, vector<1x16xf32>
    %c0_7 = arith.constant 0 : index
    %c0_8 = arith.constant 0 : index
    %11 = vector.load %arg0[%c0_7, %c0_8] : memref<256x8xf32, #tpu.memory_space<vmem>>, vector<256x8xf32>
    %cst = arith.constant dense<0.000000e+00> : vector<256x512xf32>
    %12 = tpu.matmul %11, %0, %cst {dimension_numbers = #tpu.dot_dimension_numbers<[1], [0], [0], [1], [0, 0, 1, 1], [], []>} : vector<256x8xf32>, vector<8x512xf32>, vector<256x512xf32> -> vector<256x512xf32>
    %13 = vector.extract_strided_slice %12 {offsets = [0, 0], sizes = [32, 512], strides = [1, 1]} : vector<256x512xf32> to vector<32x512xf32>
    %14 = vector.extract_strided_slice %13 {offsets = [0, 0], sizes = [32, 128], strides = [1, 1]} : vector<32x512xf32> to vector<32x128xf32>
    %15 = arith.negf %14 : vector<32x128xf32>
    %16 = math.exp %15 : vector<32x128xf32>
    %cst_9 = arith.constant 1.000000e+00 : f32
    %17 = vector.broadcast %cst_9 : f32 to vector<32x128xf32>
    %18 = arith.addf %17, %16 : vector<32x128xf32>
    %19 = arith.divf %17, %18 : vector<32x128xf32>
    %20 = vector.extract_strided_slice %13 {offsets = [0, 128], sizes = [32, 128], strides = [1, 1]} : vector<32x512xf32> to vector<32x128xf32>
    %21 = arith.negf %20 : vector<32x128xf32>
    %22 = math.exp %21 : vector<32x128xf32>
    %cst_10 = arith.constant 1.000000e+00 : f32
    %23 = vector.broadcast %cst_10 : f32 to vector<32x128xf32>
    %24 = arith.addf %23, %22 : vector<32x128xf32>
    %25 = arith.divf %23, %24 : vector<32x128xf32>
    %26 = vector.extract_strided_slice %13 {offsets = [0, 256], sizes = [32, 128], strides = [1, 1]} : vector<32x512xf32> to vector<32x128xf32>
    %27 = arith.mulf %19, %6 : vector<32x128xf32>
    %28 = arith.addf %26, %27 : vector<32x128xf32>
    %29 = math.tanh %28 : vector<32x128xf32>
    %cst_11 = arith.constant 1.000000e+00 : f32
    %30 = vector.broadcast %cst_11 : f32 to vector<32x128xf32>
    %31 = arith.subf %30, %25 : vector<32x128xf32>
    %32 = arith.mulf %31, %29 : vector<32x128xf32>
    %33 = vector.extract_strided_slice %2 {offsets = [0, 0], sizes = [128, 512], strides = [1, 1]} : vector<256x512xf32> to vector<128x512xf32>
    %cst_12 = arith.constant dense<0.000000e+00> : vector<32x512xf32>
    %34 = tpu.matmul %32, %33, %cst_12 {dimension_numbers = #tpu.dot_dimension_numbers<[1], [0], [0], [1], [0, 0, 1, 1], [], []>} : vector<32x128xf32>, vector<128x512xf32>, vector<32x512xf32> -> vector<32x512xf32>
    %35 = arith.addf %34, %9 : vector<32x512xf32>
    %36 = vector.extract_strided_slice %35 {offsets = [0, 0], sizes = [32, 128], strides = [1, 1]} : vector<32x512xf32> to vector<32x128xf32>
    %37 = arith.negf %36 : vector<32x128xf32>
    %38 = math.exp %37 : vector<32x128xf32>
    %cst_13 = arith.constant 1.000000e+00 : f32
    %39 = vector.broadcast %cst_13 : f32 to vector<32x128xf32>
    %40 = arith.addf %39, %38 : vector<32x128xf32>
    %41 = arith.divf %39, %40 : vector<32x128xf32>
    %42 = vector.extract_strided_slice %35 {offsets = [0, 128], sizes = [32, 128], strides = [1, 1]} : vector<32x512xf32> to vector<32x128xf32>
    %43 = arith.negf %42 : vector<32x128xf32>
    %44 = math.exp %43 : vector<32x128xf32>
    %cst_14 = arith.constant 1.000000e+00 : f32
    %45 = vector.broadcast %cst_14 : f32 to vector<32x128xf32>
    %46 = arith.addf %45, %44 : vector<32x128xf32>
    %47 = arith.divf %45, %46 : vector<32x128xf32>
    %48 = vector.extract_strided_slice %35 {offsets = [0, 256], sizes = [32, 128], strides = [1, 1]} : vector<32x512xf32> to vector<32x128xf32>
    %49 = vector.extract_strided_slice %35 {offsets = [0, 384], sizes = [32, 128], strides = [1, 1]} : vector<32x512xf32> to vector<32x128xf32>
    %50 = arith.mulf %41, %49 : vector<32x128xf32>
    %51 = arith.addf %48, %50 : vector<32x128xf32>
    %52 = math.tanh %51 : vector<32x128xf32>
    %cst_15 = arith.constant 1.000000e+00 : f32
    %53 = vector.broadcast %cst_15 : f32 to vector<32x128xf32>
    %54 = arith.subf %53, %47 : vector<32x128xf32>
    %55 = arith.mulf %54, %52 : vector<32x128xf32>
    %56 = vector.extract_strided_slice %12 {offsets = [32, 0], sizes = [32, 512], strides = [1, 1]} : vector<256x512xf32> to vector<32x512xf32>
    %cst_16 = arith.constant dense<0.000000e+00> : vector<32x512xf32>
    %57 = tpu.matmul %32, %1, %cst_16 {dimension_numbers = #tpu.dot_dimension_numbers<[1], [0], [0], [1], [0, 0, 1, 1], [], []>} : vector<32x128xf32>, vector<128x512xf32>, vector<32x512xf32> -> vector<32x512xf32>
    %58 = vector.extract_strided_slice %56 {offsets = [0, 0], sizes = [32, 128], strides = [1, 1]} : vector<32x512xf32> to vector<32x128xf32>
    %59 = vector.extract_strided_slice %57 {offsets = [0, 0], sizes = [32, 128], strides = [1, 1]} : vector<32x512xf32> to vector<32x128xf32>
    %60 = arith.addf %58, %59 : vector<32x128xf32>
    %61 = arith.negf %60 : vector<32x128xf32>
    %62 = math.exp %61 : vector<32x128xf32>
    %cst_17 = arith.constant 1.000000e+00 : f32
    %63 = vector.broadcast %cst_17 : f32 to vector<32x128xf32>
    %64 = arith.addf %63, %62 : vector<32x128xf32>
    %65 = arith.divf %63, %64 : vector<32x128xf32>
    %66 = vector.extract_strided_slice %56 {offsets = [0, 128], sizes = [32, 128], strides = [1, 1]} : vector<32x512xf32> to vector<32x128xf32>
    %67 = vector.extract_strided_slice %57 {offsets = [0, 128], sizes = [32, 128], strides = [1, 1]} : vector<32x512xf32> to vector<32x128xf32>
    %68 = arith.addf %66, %67 : vector<32x128xf32>
    %69 = arith.negf %68 : vector<32x128xf32>
    %70 = math.exp %69 : vector<32x128xf32>
    %cst_18 = arith.constant 1.000000e+00 : f32
    %71 = vector.broadcast %cst_18 : f32 to vector<32x128xf32>
    %72 = arith.addf %71, %70 : vector<32x128xf32>
    %73 = arith.divf %71, %72 : vector<32x128xf32>
    %74 = vector.extract_strided_slice %56 {offsets = [0, 256], sizes = [32, 128], strides = [1, 1]} : vector<32x512xf32> to vector<32x128xf32>
    %75 = vector.extract_strided_slice %57 {offsets = [0, 256], sizes = [32, 128], strides = [1, 1]} : vector<32x512xf32> to vector<32x128xf32>
    %76 = arith.addf %75, %6 : vector<32x128xf32>
    %77 = arith.mulf %65, %76 : vector<32x128xf32>
    %78 = arith.addf %74, %77 : vector<32x128xf32>
    %79 = math.tanh %78 : vector<32x128xf32>
    %cst_19 = arith.constant 1.000000e+00 : f32
    %80 = vector.broadcast %cst_19 : f32 to vector<32x128xf32>
    %81 = arith.subf %80, %73 : vector<32x128xf32>
    %82 = arith.mulf %81, %79 : vector<32x128xf32>
    %83 = arith.mulf %73, %32 : vector<32x128xf32>
    %84 = arith.addf %82, %83 : vector<32x128xf32>
    %85 = tpu.concatenate %84, %55 in 1 : vector<32x128xf32>, vector<32x128xf32> -> vector<32x256xf32>
    %cst_20 = arith.constant dense<0.000000e+00> : vector<32x512xf32>
    %86 = tpu.matmul %85, %2, %cst_20 {dimension_numbers = #tpu.dot_dimension_numbers<[1], [0], [0], [1], [0, 0, 1, 1], [], []>} : vector<32x256xf32>, vector<256x512xf32>, vector<32x512xf32> -> vector<32x512xf32>
    %87 = arith.addf %86, %9 : vector<32x512xf32>
    %88 = vector.extract_strided_slice %87 {offsets = [0, 0], sizes = [32, 128], strides = [1, 1]} : vector<32x512xf32> to vector<32x128xf32>
    %89 = arith.negf %88 : vector<32x128xf32>
    %90 = math.exp %89 : vector<32x128xf32>
    %cst_21 = arith.constant 1.000000e+00 : f32
    %91 = vector.broadcast %cst_21 : f32 to vector<32x128xf32>
    %92 = arith.addf %91, %90 : vector<32x128xf32>
    %93 = arith.divf %91, %92 : vector<32x128xf32>
    %94 = vector.extract_strided_slice %87 {offsets = [0, 128], sizes = [32, 128], strides = [1, 1]} : vector<32x512xf32> to vector<32x128xf32>
    %95 = arith.negf %94 : vector<32x128xf32>
    %96 = math.exp %95 : vector<32x128xf32>
    %cst_22 = arith.constant 1.000000e+00 : f32
    %97 = vector.broadcast %cst_22 : f32 to vector<32x128xf32>
    %98 = arith.addf %97, %96 : vector<32x128xf32>
    %99 = arith.divf %97, %98 : vector<32x128xf32>
    %100 = vector.extract_strided_slice %87 {offsets = [0, 256], sizes = [32, 128], strides = [1, 1]} : vector<32x512xf32> to vector<32x128xf32>
    %101 = vector.extract_strided_slice %87 {offsets = [0, 384], sizes = [32, 128], strides = [1, 1]} : vector<32x512xf32> to vector<32x128xf32>
    %102 = arith.mulf %93, %101 : vector<32x128xf32>
    %103 = arith.addf %100, %102 : vector<32x128xf32>
    %104 = math.tanh %103 : vector<32x128xf32>
    %cst_23 = arith.constant 1.000000e+00 : f32
    %105 = vector.broadcast %cst_23 : f32 to vector<32x128xf32>
    %106 = arith.subf %105, %99 : vector<32x128xf32>
    %107 = arith.mulf %106, %104 : vector<32x128xf32>
    %108 = arith.mulf %99, %55 : vector<32x128xf32>
    %109 = arith.addf %107, %108 : vector<32x128xf32>
    %110 = vector.extract_strided_slice %12 {offsets = [64, 0], sizes = [32, 512], strides = [1, 1]} : vector<256x512xf32> to vector<32x512xf32>
    %cst_24 = arith.constant dense<0.000000e+00> : vector<32x512xf32>
    %111 = tpu.matmul %84, %1, %cst_24 {dimension_numbers = #tpu.dot_dimension_numbers<[1], [0], [0], [1], [0, 0, 1, 1], [], []>} : vector<32x128xf32>, vector<128x512xf32>, vector<32x512xf32> -> vector<32x512xf32>
    %112 = vector.extract_strided_slice %110 {offsets = [0, 0], sizes = [32, 128], strides = [1, 1]} : vector<32x512xf32> to vector<32x128xf32>
    %113 = vector.extract_strided_slice %111 {offsets = [0, 0], sizes = [32, 128], strides = [1, 1]} : vector<32x512xf32> to vector<32x128xf32>
    %114 = arith.addf %112, %113 : vector<32x128xf32>
    %115 = arith.negf %114 : vector<32x128xf32>
    %116 = math.exp %115 : vector<32x128xf32>
    %cst_25 = arith.constant 1.000000e+00 : f32
    %117 = vector.broadcast %cst_25 : f32 to vector<32x128xf32>
    %118 = arith.addf %117, %116 : vector<32x128xf32>
    %119 = arith.divf %117, %118 : vector<32x128xf32>
    %120 = vector.extract_strided_slice %110 {offsets = [0, 128], sizes = [32, 128], strides = [1, 1]} : vector<32x512xf32> to vector<32x128xf32>
    %121 = vector.extract_strided_slice %111 {offsets = [0, 128], sizes = [32, 128], strides = [1, 1]} : vector<32x512xf32> to vector<32x128xf32>
    %122 = arith.addf %120, %121 : vector<32x128xf32>
    %123 = arith.negf %122 : vector<32x128xf32>
    %124 = math.exp %123 : vector<32x128xf32>
    %cst_26 = arith.constant 1.000000e+00 : f32
    %125 = vector.broadcast %cst_26 : f32 to vector<32x128xf32>
    %126 = arith.addf %125, %124 : vector<32x128xf32>
    %127 = arith.divf %125, %126 : vector<32x128xf32>
    %128 = vector.extract_strided_slice %110 {offsets = [0, 256], sizes = [32, 128], strides = [1, 1]} : vector<32x512xf32> to vector<32x128xf32>
    %129 = vector.extract_strided_slice %111 {offsets = [0, 256], sizes = [32, 128], strides = [1, 1]} : vector<32x512xf32> to vector<32x128xf32>
    %130 = arith.addf %129, %6 : vector<32x128xf32>
    %131 = arith.mulf %119, %130 : vector<32x128xf32>
    %132 = arith.addf %128, %131 : vector<32x128xf32>
    %133 = math.tanh %132 : vector<32x128xf32>
    %cst_27 = arith.constant 1.000000e+00 : f32
    %134 = vector.broadcast %cst_27 : f32 to vector<32x128xf32>
    %135 = arith.subf %134, %127 : vector<32x128xf32>
    %136 = arith.mulf %135, %133 : vector<32x128xf32>
    %137 = arith.mulf %127, %84 : vector<32x128xf32>
    %138 = arith.addf %136, %137 : vector<32x128xf32>
    %139 = tpu.concatenate %138, %109 in 1 : vector<32x128xf32>, vector<32x128xf32> -> vector<32x256xf32>
    %cst_28 = arith.constant dense<0.000000e+00> : vector<32x512xf32>
    %140 = tpu.matmul %139, %2, %cst_28 {dimension_numbers = #tpu.dot_dimension_numbers<[1], [0], [0], [1], [0, 0, 1, 1], [], []>} : vector<32x256xf32>, vector<256x512xf32>, vector<32x512xf32> -> vector<32x512xf32>
    %141 = arith.addf %140, %9 : vector<32x512xf32>
    %142 = vector.extract_strided_slice %141 {offsets = [0, 0], sizes = [32, 128], strides = [1, 1]} : vector<32x512xf32> to vector<32x128xf32>
    %143 = arith.negf %142 : vector<32x128xf32>
    %144 = math.exp %143 : vector<32x128xf32>
    %cst_29 = arith.constant 1.000000e+00 : f32
    %145 = vector.broadcast %cst_29 : f32 to vector<32x128xf32>
    %146 = arith.addf %145, %144 : vector<32x128xf32>
    %147 = arith.divf %145, %146 : vector<32x128xf32>
    %148 = vector.extract_strided_slice %141 {offsets = [0, 128], sizes = [32, 128], strides = [1, 1]} : vector<32x512xf32> to vector<32x128xf32>
    %149 = arith.negf %148 : vector<32x128xf32>
    %150 = math.exp %149 : vector<32x128xf32>
    %cst_30 = arith.constant 1.000000e+00 : f32
    %151 = vector.broadcast %cst_30 : f32 to vector<32x128xf32>
    %152 = arith.addf %151, %150 : vector<32x128xf32>
    %153 = arith.divf %151, %152 : vector<32x128xf32>
    %154 = vector.extract_strided_slice %141 {offsets = [0, 256], sizes = [32, 128], strides = [1, 1]} : vector<32x512xf32> to vector<32x128xf32>
    %155 = vector.extract_strided_slice %141 {offsets = [0, 384], sizes = [32, 128], strides = [1, 1]} : vector<32x512xf32> to vector<32x128xf32>
    %156 = arith.mulf %147, %155 : vector<32x128xf32>
    %157 = arith.addf %154, %156 : vector<32x128xf32>
    %158 = math.tanh %157 : vector<32x128xf32>
    %cst_31 = arith.constant 1.000000e+00 : f32
    %159 = vector.broadcast %cst_31 : f32 to vector<32x128xf32>
    %160 = arith.subf %159, %153 : vector<32x128xf32>
    %161 = arith.mulf %160, %158 : vector<32x128xf32>
    %162 = arith.mulf %153, %109 : vector<32x128xf32>
    %163 = arith.addf %161, %162 : vector<32x128xf32>
    %164 = vector.extract_strided_slice %12 {offsets = [96, 0], sizes = [32, 512], strides = [1, 1]} : vector<256x512xf32> to vector<32x512xf32>
    %cst_32 = arith.constant dense<0.000000e+00> : vector<32x512xf32>
    %165 = tpu.matmul %138, %1, %cst_32 {dimension_numbers = #tpu.dot_dimension_numbers<[1], [0], [0], [1], [0, 0, 1, 1], [], []>} : vector<32x128xf32>, vector<128x512xf32>, vector<32x512xf32> -> vector<32x512xf32>
    %166 = vector.extract_strided_slice %164 {offsets = [0, 0], sizes = [32, 128], strides = [1, 1]} : vector<32x512xf32> to vector<32x128xf32>
    %167 = vector.extract_strided_slice %165 {offsets = [0, 0], sizes = [32, 128], strides = [1, 1]} : vector<32x512xf32> to vector<32x128xf32>
    %168 = arith.addf %166, %167 : vector<32x128xf32>
    %169 = arith.negf %168 : vector<32x128xf32>
    %170 = math.exp %169 : vector<32x128xf32>
    %cst_33 = arith.constant 1.000000e+00 : f32
    %171 = vector.broadcast %cst_33 : f32 to vector<32x128xf32>
    %172 = arith.addf %171, %170 : vector<32x128xf32>
    %173 = arith.divf %171, %172 : vector<32x128xf32>
    %174 = vector.extract_strided_slice %164 {offsets = [0, 128], sizes = [32, 128], strides = [1, 1]} : vector<32x512xf32> to vector<32x128xf32>
    %175 = vector.extract_strided_slice %165 {offsets = [0, 128], sizes = [32, 128], strides = [1, 1]} : vector<32x512xf32> to vector<32x128xf32>
    %176 = arith.addf %174, %175 : vector<32x128xf32>
    %177 = arith.negf %176 : vector<32x128xf32>
    %178 = math.exp %177 : vector<32x128xf32>
    %cst_34 = arith.constant 1.000000e+00 : f32
    %179 = vector.broadcast %cst_34 : f32 to vector<32x128xf32>
    %180 = arith.addf %179, %178 : vector<32x128xf32>
    %181 = arith.divf %179, %180 : vector<32x128xf32>
    %182 = vector.extract_strided_slice %164 {offsets = [0, 256], sizes = [32, 128], strides = [1, 1]} : vector<32x512xf32> to vector<32x128xf32>
    %183 = vector.extract_strided_slice %165 {offsets = [0, 256], sizes = [32, 128], strides = [1, 1]} : vector<32x512xf32> to vector<32x128xf32>
    %184 = arith.addf %183, %6 : vector<32x128xf32>
    %185 = arith.mulf %173, %184 : vector<32x128xf32>
    %186 = arith.addf %182, %185 : vector<32x128xf32>
    %187 = math.tanh %186 : vector<32x128xf32>
    %cst_35 = arith.constant 1.000000e+00 : f32
    %188 = vector.broadcast %cst_35 : f32 to vector<32x128xf32>
    %189 = arith.subf %188, %181 : vector<32x128xf32>
    %190 = arith.mulf %189, %187 : vector<32x128xf32>
    %191 = arith.mulf %181, %138 : vector<32x128xf32>
    %192 = arith.addf %190, %191 : vector<32x128xf32>
    %193 = tpu.concatenate %192, %163 in 1 : vector<32x128xf32>, vector<32x128xf32> -> vector<32x256xf32>
    %cst_36 = arith.constant dense<0.000000e+00> : vector<32x512xf32>
    %194 = tpu.matmul %193, %2, %cst_36 {dimension_numbers = #tpu.dot_dimension_numbers<[1], [0], [0], [1], [0, 0, 1, 1], [], []>} : vector<32x256xf32>, vector<256x512xf32>, vector<32x512xf32> -> vector<32x512xf32>
    %195 = arith.addf %194, %9 : vector<32x512xf32>
    %196 = vector.extract_strided_slice %195 {offsets = [0, 0], sizes = [32, 128], strides = [1, 1]} : vector<32x512xf32> to vector<32x128xf32>
    %197 = arith.negf %196 : vector<32x128xf32>
    %198 = math.exp %197 : vector<32x128xf32>
    %cst_37 = arith.constant 1.000000e+00 : f32
    %199 = vector.broadcast %cst_37 : f32 to vector<32x128xf32>
    %200 = arith.addf %199, %198 : vector<32x128xf32>
    %201 = arith.divf %199, %200 : vector<32x128xf32>
    %202 = vector.extract_strided_slice %195 {offsets = [0, 128], sizes = [32, 128], strides = [1, 1]} : vector<32x512xf32> to vector<32x128xf32>
    %203 = arith.negf %202 : vector<32x128xf32>
    %204 = math.exp %203 : vector<32x128xf32>
    %cst_38 = arith.constant 1.000000e+00 : f32
    %205 = vector.broadcast %cst_38 : f32 to vector<32x128xf32>
    %206 = arith.addf %205, %204 : vector<32x128xf32>
    %207 = arith.divf %205, %206 : vector<32x128xf32>
    %208 = vector.extract_strided_slice %195 {offsets = [0, 256], sizes = [32, 128], strides = [1, 1]} : vector<32x512xf32> to vector<32x128xf32>
    %209 = vector.extract_strided_slice %195 {offsets = [0, 384], sizes = [32, 128], strides = [1, 1]} : vector<32x512xf32> to vector<32x128xf32>
    %210 = arith.mulf %201, %209 : vector<32x128xf32>
    %211 = arith.addf %208, %210 : vector<32x128xf32>
    %212 = math.tanh %211 : vector<32x128xf32>
    %cst_39 = arith.constant 1.000000e+00 : f32
    %213 = vector.broadcast %cst_39 : f32 to vector<32x128xf32>
    %214 = arith.subf %213, %207 : vector<32x128xf32>
    %215 = arith.mulf %214, %212 : vector<32x128xf32>
    %216 = arith.mulf %207, %163 : vector<32x128xf32>
    %217 = arith.addf %215, %216 : vector<32x128xf32>
    %218 = vector.extract_strided_slice %12 {offsets = [128, 0], sizes = [32, 512], strides = [1, 1]} : vector<256x512xf32> to vector<32x512xf32>
    %cst_40 = arith.constant dense<0.000000e+00> : vector<32x512xf32>
    %219 = tpu.matmul %192, %1, %cst_40 {dimension_numbers = #tpu.dot_dimension_numbers<[1], [0], [0], [1], [0, 0, 1, 1], [], []>} : vector<32x128xf32>, vector<128x512xf32>, vector<32x512xf32> -> vector<32x512xf32>
    %220 = vector.extract_strided_slice %218 {offsets = [0, 0], sizes = [32, 128], strides = [1, 1]} : vector<32x512xf32> to vector<32x128xf32>
    %221 = vector.extract_strided_slice %219 {offsets = [0, 0], sizes = [32, 128], strides = [1, 1]} : vector<32x512xf32> to vector<32x128xf32>
    %222 = arith.addf %220, %221 : vector<32x128xf32>
    %223 = arith.negf %222 : vector<32x128xf32>
    %224 = math.exp %223 : vector<32x128xf32>
    %cst_41 = arith.constant 1.000000e+00 : f32
    %225 = vector.broadcast %cst_41 : f32 to vector<32x128xf32>
    %226 = arith.addf %225, %224 : vector<32x128xf32>
    %227 = arith.divf %225, %226 : vector<32x128xf32>
    %228 = vector.extract_strided_slice %218 {offsets = [0, 128], sizes = [32, 128], strides = [1, 1]} : vector<32x512xf32> to vector<32x128xf32>
    %229 = vector.extract_strided_slice %219 {offsets = [0, 128], sizes = [32, 128], strides = [1, 1]} : vector<32x512xf32> to vector<32x128xf32>
    %230 = arith.addf %228, %229 : vector<32x128xf32>
    %231 = arith.negf %230 : vector<32x128xf32>
    %232 = math.exp %231 : vector<32x128xf32>
    %cst_42 = arith.constant 1.000000e+00 : f32
    %233 = vector.broadcast %cst_42 : f32 to vector<32x128xf32>
    %234 = arith.addf %233, %232 : vector<32x128xf32>
    %235 = arith.divf %233, %234 : vector<32x128xf32>
    %236 = vector.extract_strided_slice %218 {offsets = [0, 256], sizes = [32, 128], strides = [1, 1]} : vector<32x512xf32> to vector<32x128xf32>
    %237 = vector.extract_strided_slice %219 {offsets = [0, 256], sizes = [32, 128], strides = [1, 1]} : vector<32x512xf32> to vector<32x128xf32>
    %238 = arith.addf %237, %6 : vector<32x128xf32>
    %239 = arith.mulf %227, %238 : vector<32x128xf32>
    %240 = arith.addf %236, %239 : vector<32x128xf32>
    %241 = math.tanh %240 : vector<32x128xf32>
    %cst_43 = arith.constant 1.000000e+00 : f32
    %242 = vector.broadcast %cst_43 : f32 to vector<32x128xf32>
    %243 = arith.subf %242, %235 : vector<32x128xf32>
    %244 = arith.mulf %243, %241 : vector<32x128xf32>
    %245 = arith.mulf %235, %192 : vector<32x128xf32>
    %246 = arith.addf %244, %245 : vector<32x128xf32>
    %247 = tpu.concatenate %246, %217 in 1 : vector<32x128xf32>, vector<32x128xf32> -> vector<32x256xf32>
    %cst_44 = arith.constant dense<0.000000e+00> : vector<32x512xf32>
    %248 = tpu.matmul %247, %2, %cst_44 {dimension_numbers = #tpu.dot_dimension_numbers<[1], [0], [0], [1], [0, 0, 1, 1], [], []>} : vector<32x256xf32>, vector<256x512xf32>, vector<32x512xf32> -> vector<32x512xf32>
    %249 = arith.addf %248, %9 : vector<32x512xf32>
    %250 = vector.extract_strided_slice %249 {offsets = [0, 0], sizes = [32, 128], strides = [1, 1]} : vector<32x512xf32> to vector<32x128xf32>
    %251 = arith.negf %250 : vector<32x128xf32>
    %252 = math.exp %251 : vector<32x128xf32>
    %cst_45 = arith.constant 1.000000e+00 : f32
    %253 = vector.broadcast %cst_45 : f32 to vector<32x128xf32>
    %254 = arith.addf %253, %252 : vector<32x128xf32>
    %255 = arith.divf %253, %254 : vector<32x128xf32>
    %256 = vector.extract_strided_slice %249 {offsets = [0, 128], sizes = [32, 128], strides = [1, 1]} : vector<32x512xf32> to vector<32x128xf32>
    %257 = arith.negf %256 : vector<32x128xf32>
    %258 = math.exp %257 : vector<32x128xf32>
    %cst_46 = arith.constant 1.000000e+00 : f32
    %259 = vector.broadcast %cst_46 : f32 to vector<32x128xf32>
    %260 = arith.addf %259, %258 : vector<32x128xf32>
    %261 = arith.divf %259, %260 : vector<32x128xf32>
    %262 = vector.extract_strided_slice %249 {offsets = [0, 256], sizes = [32, 128], strides = [1, 1]} : vector<32x512xf32> to vector<32x128xf32>
    %263 = vector.extract_strided_slice %249 {offsets = [0, 384], sizes = [32, 128], strides = [1, 1]} : vector<32x512xf32> to vector<32x128xf32>
    %264 = arith.mulf %255, %263 : vector<32x128xf32>
    %265 = arith.addf %262, %264 : vector<32x128xf32>
    %266 = math.tanh %265 : vector<32x128xf32>
    %cst_47 = arith.constant 1.000000e+00 : f32
    %267 = vector.broadcast %cst_47 : f32 to vector<32x128xf32>
    %268 = arith.subf %267, %261 : vector<32x128xf32>
    %269 = arith.mulf %268, %266 : vector<32x128xf32>
    %270 = arith.mulf %261, %217 : vector<32x128xf32>
    %271 = arith.addf %269, %270 : vector<32x128xf32>
    %272 = vector.extract_strided_slice %12 {offsets = [160, 0], sizes = [32, 512], strides = [1, 1]} : vector<256x512xf32> to vector<32x512xf32>
    %cst_48 = arith.constant dense<0.000000e+00> : vector<32x512xf32>
    %273 = tpu.matmul %246, %1, %cst_48 {dimension_numbers = #tpu.dot_dimension_numbers<[1], [0], [0], [1], [0, 0, 1, 1], [], []>} : vector<32x128xf32>, vector<128x512xf32>, vector<32x512xf32> -> vector<32x512xf32>
    %274 = vector.extract_strided_slice %272 {offsets = [0, 0], sizes = [32, 128], strides = [1, 1]} : vector<32x512xf32> to vector<32x128xf32>
    %275 = vector.extract_strided_slice %273 {offsets = [0, 0], sizes = [32, 128], strides = [1, 1]} : vector<32x512xf32> to vector<32x128xf32>
    %276 = arith.addf %274, %275 : vector<32x128xf32>
    %277 = arith.negf %276 : vector<32x128xf32>
    %278 = math.exp %277 : vector<32x128xf32>
    %cst_49 = arith.constant 1.000000e+00 : f32
    %279 = vector.broadcast %cst_49 : f32 to vector<32x128xf32>
    %280 = arith.addf %279, %278 : vector<32x128xf32>
    %281 = arith.divf %279, %280 : vector<32x128xf32>
    %282 = vector.extract_strided_slice %272 {offsets = [0, 128], sizes = [32, 128], strides = [1, 1]} : vector<32x512xf32> to vector<32x128xf32>
    %283 = vector.extract_strided_slice %273 {offsets = [0, 128], sizes = [32, 128], strides = [1, 1]} : vector<32x512xf32> to vector<32x128xf32>
    %284 = arith.addf %282, %283 : vector<32x128xf32>
    %285 = arith.negf %284 : vector<32x128xf32>
    %286 = math.exp %285 : vector<32x128xf32>
    %cst_50 = arith.constant 1.000000e+00 : f32
    %287 = vector.broadcast %cst_50 : f32 to vector<32x128xf32>
    %288 = arith.addf %287, %286 : vector<32x128xf32>
    %289 = arith.divf %287, %288 : vector<32x128xf32>
    %290 = vector.extract_strided_slice %272 {offsets = [0, 256], sizes = [32, 128], strides = [1, 1]} : vector<32x512xf32> to vector<32x128xf32>
    %291 = vector.extract_strided_slice %273 {offsets = [0, 256], sizes = [32, 128], strides = [1, 1]} : vector<32x512xf32> to vector<32x128xf32>
    %292 = arith.addf %291, %6 : vector<32x128xf32>
    %293 = arith.mulf %281, %292 : vector<32x128xf32>
    %294 = arith.addf %290, %293 : vector<32x128xf32>
    %295 = math.tanh %294 : vector<32x128xf32>
    %cst_51 = arith.constant 1.000000e+00 : f32
    %296 = vector.broadcast %cst_51 : f32 to vector<32x128xf32>
    %297 = arith.subf %296, %289 : vector<32x128xf32>
    %298 = arith.mulf %297, %295 : vector<32x128xf32>
    %299 = arith.mulf %289, %246 : vector<32x128xf32>
    %300 = arith.addf %298, %299 : vector<32x128xf32>
    %301 = tpu.concatenate %300, %271 in 1 : vector<32x128xf32>, vector<32x128xf32> -> vector<32x256xf32>
    %cst_52 = arith.constant dense<0.000000e+00> : vector<32x512xf32>
    %302 = tpu.matmul %301, %2, %cst_52 {dimension_numbers = #tpu.dot_dimension_numbers<[1], [0], [0], [1], [0, 0, 1, 1], [], []>} : vector<32x256xf32>, vector<256x512xf32>, vector<32x512xf32> -> vector<32x512xf32>
    %303 = arith.addf %302, %9 : vector<32x512xf32>
    %304 = vector.extract_strided_slice %303 {offsets = [0, 0], sizes = [32, 128], strides = [1, 1]} : vector<32x512xf32> to vector<32x128xf32>
    %305 = arith.negf %304 : vector<32x128xf32>
    %306 = math.exp %305 : vector<32x128xf32>
    %cst_53 = arith.constant 1.000000e+00 : f32
    %307 = vector.broadcast %cst_53 : f32 to vector<32x128xf32>
    %308 = arith.addf %307, %306 : vector<32x128xf32>
    %309 = arith.divf %307, %308 : vector<32x128xf32>
    %310 = vector.extract_strided_slice %303 {offsets = [0, 128], sizes = [32, 128], strides = [1, 1]} : vector<32x512xf32> to vector<32x128xf32>
    %311 = arith.negf %310 : vector<32x128xf32>
    %312 = math.exp %311 : vector<32x128xf32>
    %cst_54 = arith.constant 1.000000e+00 : f32
    %313 = vector.broadcast %cst_54 : f32 to vector<32x128xf32>
    %314 = arith.addf %313, %312 : vector<32x128xf32>
    %315 = arith.divf %313, %314 : vector<32x128xf32>
    %316 = vector.extract_strided_slice %303 {offsets = [0, 256], sizes = [32, 128], strides = [1, 1]} : vector<32x512xf32> to vector<32x128xf32>
    %317 = vector.extract_strided_slice %303 {offsets = [0, 384], sizes = [32, 128], strides = [1, 1]} : vector<32x512xf32> to vector<32x128xf32>
    %318 = arith.mulf %309, %317 : vector<32x128xf32>
    %319 = arith.addf %316, %318 : vector<32x128xf32>
    %320 = math.tanh %319 : vector<32x128xf32>
    %cst_55 = arith.constant 1.000000e+00 : f32
    %321 = vector.broadcast %cst_55 : f32 to vector<32x128xf32>
    %322 = arith.subf %321, %315 : vector<32x128xf32>
    %323 = arith.mulf %322, %320 : vector<32x128xf32>
    %324 = arith.mulf %315, %271 : vector<32x128xf32>
    %325 = arith.addf %323, %324 : vector<32x128xf32>
    %326 = vector.extract_strided_slice %12 {offsets = [192, 0], sizes = [32, 512], strides = [1, 1]} : vector<256x512xf32> to vector<32x512xf32>
    %cst_56 = arith.constant dense<0.000000e+00> : vector<32x512xf32>
    %327 = tpu.matmul %300, %1, %cst_56 {dimension_numbers = #tpu.dot_dimension_numbers<[1], [0], [0], [1], [0, 0, 1, 1], [], []>} : vector<32x128xf32>, vector<128x512xf32>, vector<32x512xf32> -> vector<32x512xf32>
    %328 = vector.extract_strided_slice %326 {offsets = [0, 0], sizes = [32, 128], strides = [1, 1]} : vector<32x512xf32> to vector<32x128xf32>
    %329 = vector.extract_strided_slice %327 {offsets = [0, 0], sizes = [32, 128], strides = [1, 1]} : vector<32x512xf32> to vector<32x128xf32>
    %330 = arith.addf %328, %329 : vector<32x128xf32>
    %331 = arith.negf %330 : vector<32x128xf32>
    %332 = math.exp %331 : vector<32x128xf32>
    %cst_57 = arith.constant 1.000000e+00 : f32
    %333 = vector.broadcast %cst_57 : f32 to vector<32x128xf32>
    %334 = arith.addf %333, %332 : vector<32x128xf32>
    %335 = arith.divf %333, %334 : vector<32x128xf32>
    %336 = vector.extract_strided_slice %326 {offsets = [0, 128], sizes = [32, 128], strides = [1, 1]} : vector<32x512xf32> to vector<32x128xf32>
    %337 = vector.extract_strided_slice %327 {offsets = [0, 128], sizes = [32, 128], strides = [1, 1]} : vector<32x512xf32> to vector<32x128xf32>
    %338 = arith.addf %336, %337 : vector<32x128xf32>
    %339 = arith.negf %338 : vector<32x128xf32>
    %340 = math.exp %339 : vector<32x128xf32>
    %cst_58 = arith.constant 1.000000e+00 : f32
    %341 = vector.broadcast %cst_58 : f32 to vector<32x128xf32>
    %342 = arith.addf %341, %340 : vector<32x128xf32>
    %343 = arith.divf %341, %342 : vector<32x128xf32>
    %344 = vector.extract_strided_slice %326 {offsets = [0, 256], sizes = [32, 128], strides = [1, 1]} : vector<32x512xf32> to vector<32x128xf32>
    %345 = vector.extract_strided_slice %327 {offsets = [0, 256], sizes = [32, 128], strides = [1, 1]} : vector<32x512xf32> to vector<32x128xf32>
    %346 = arith.addf %345, %6 : vector<32x128xf32>
    %347 = arith.mulf %335, %346 : vector<32x128xf32>
    %348 = arith.addf %344, %347 : vector<32x128xf32>
    %349 = math.tanh %348 : vector<32x128xf32>
    %cst_59 = arith.constant 1.000000e+00 : f32
    %350 = vector.broadcast %cst_59 : f32 to vector<32x128xf32>
    %351 = arith.subf %350, %343 : vector<32x128xf32>
    %352 = arith.mulf %351, %349 : vector<32x128xf32>
    %353 = arith.mulf %343, %300 : vector<32x128xf32>
    %354 = arith.addf %352, %353 : vector<32x128xf32>
    %355 = tpu.concatenate %354, %325 in 1 : vector<32x128xf32>, vector<32x128xf32> -> vector<32x256xf32>
    %cst_60 = arith.constant dense<0.000000e+00> : vector<32x512xf32>
    %356 = tpu.matmul %355, %2, %cst_60 {dimension_numbers = #tpu.dot_dimension_numbers<[1], [0], [0], [1], [0, 0, 1, 1], [], []>} : vector<32x256xf32>, vector<256x512xf32>, vector<32x512xf32> -> vector<32x512xf32>
    %357 = arith.addf %356, %9 : vector<32x512xf32>
    %358 = vector.extract_strided_slice %357 {offsets = [0, 0], sizes = [32, 128], strides = [1, 1]} : vector<32x512xf32> to vector<32x128xf32>
    %359 = arith.negf %358 : vector<32x128xf32>
    %360 = math.exp %359 : vector<32x128xf32>
    %cst_61 = arith.constant 1.000000e+00 : f32
    %361 = vector.broadcast %cst_61 : f32 to vector<32x128xf32>
    %362 = arith.addf %361, %360 : vector<32x128xf32>
    %363 = arith.divf %361, %362 : vector<32x128xf32>
    %364 = vector.extract_strided_slice %357 {offsets = [0, 128], sizes = [32, 128], strides = [1, 1]} : vector<32x512xf32> to vector<32x128xf32>
    %365 = arith.negf %364 : vector<32x128xf32>
    %366 = math.exp %365 : vector<32x128xf32>
    %cst_62 = arith.constant 1.000000e+00 : f32
    %367 = vector.broadcast %cst_62 : f32 to vector<32x128xf32>
    %368 = arith.addf %367, %366 : vector<32x128xf32>
    %369 = arith.divf %367, %368 : vector<32x128xf32>
    %370 = vector.extract_strided_slice %357 {offsets = [0, 256], sizes = [32, 128], strides = [1, 1]} : vector<32x512xf32> to vector<32x128xf32>
    %371 = vector.extract_strided_slice %357 {offsets = [0, 384], sizes = [32, 128], strides = [1, 1]} : vector<32x512xf32> to vector<32x128xf32>
    %372 = arith.mulf %363, %371 : vector<32x128xf32>
    %373 = arith.addf %370, %372 : vector<32x128xf32>
    %374 = math.tanh %373 : vector<32x128xf32>
    %cst_63 = arith.constant 1.000000e+00 : f32
    %375 = vector.broadcast %cst_63 : f32 to vector<32x128xf32>
    %376 = arith.subf %375, %369 : vector<32x128xf32>
    %377 = arith.mulf %376, %374 : vector<32x128xf32>
    %378 = arith.mulf %369, %325 : vector<32x128xf32>
    %379 = arith.addf %377, %378 : vector<32x128xf32>
    %380 = vector.extract_strided_slice %12 {offsets = [224, 0], sizes = [32, 512], strides = [1, 1]} : vector<256x512xf32> to vector<32x512xf32>
    %cst_64 = arith.constant dense<0.000000e+00> : vector<32x512xf32>
    %381 = tpu.matmul %354, %1, %cst_64 {dimension_numbers = #tpu.dot_dimension_numbers<[1], [0], [0], [1], [0, 0, 1, 1], [], []>} : vector<32x128xf32>, vector<128x512xf32>, vector<32x512xf32> -> vector<32x512xf32>
    %382 = vector.extract_strided_slice %380 {offsets = [0, 0], sizes = [32, 128], strides = [1, 1]} : vector<32x512xf32> to vector<32x128xf32>
    %383 = vector.extract_strided_slice %381 {offsets = [0, 0], sizes = [32, 128], strides = [1, 1]} : vector<32x512xf32> to vector<32x128xf32>
    %384 = arith.addf %382, %383 : vector<32x128xf32>
    %385 = arith.negf %384 : vector<32x128xf32>
    %386 = math.exp %385 : vector<32x128xf32>
    %cst_65 = arith.constant 1.000000e+00 : f32
    %387 = vector.broadcast %cst_65 : f32 to vector<32x128xf32>
    %388 = arith.addf %387, %386 : vector<32x128xf32>
    %389 = arith.divf %387, %388 : vector<32x128xf32>
    %390 = vector.extract_strided_slice %380 {offsets = [0, 128], sizes = [32, 128], strides = [1, 1]} : vector<32x512xf32> to vector<32x128xf32>
    %391 = vector.extract_strided_slice %381 {offsets = [0, 128], sizes = [32, 128], strides = [1, 1]} : vector<32x512xf32> to vector<32x128xf32>
    %392 = arith.addf %390, %391 : vector<32x128xf32>
    %393 = arith.negf %392 : vector<32x128xf32>
    %394 = math.exp %393 : vector<32x128xf32>
    %cst_66 = arith.constant 1.000000e+00 : f32
    %395 = vector.broadcast %cst_66 : f32 to vector<32x128xf32>
    %396 = arith.addf %395, %394 : vector<32x128xf32>
    %397 = arith.divf %395, %396 : vector<32x128xf32>
    %398 = vector.extract_strided_slice %380 {offsets = [0, 256], sizes = [32, 128], strides = [1, 1]} : vector<32x512xf32> to vector<32x128xf32>
    %399 = vector.extract_strided_slice %381 {offsets = [0, 256], sizes = [32, 128], strides = [1, 1]} : vector<32x512xf32> to vector<32x128xf32>
    %400 = arith.addf %399, %6 : vector<32x128xf32>
    %401 = arith.mulf %389, %400 : vector<32x128xf32>
    %402 = arith.addf %398, %401 : vector<32x128xf32>
    %403 = math.tanh %402 : vector<32x128xf32>
    %cst_67 = arith.constant 1.000000e+00 : f32
    %404 = vector.broadcast %cst_67 : f32 to vector<32x128xf32>
    %405 = arith.subf %404, %397 : vector<32x128xf32>
    %406 = arith.mulf %405, %403 : vector<32x128xf32>
    %407 = arith.mulf %397, %354 : vector<32x128xf32>
    %408 = arith.addf %406, %407 : vector<32x128xf32>
    %409 = tpu.concatenate %408, %379 in 1 : vector<32x128xf32>, vector<32x128xf32> -> vector<32x256xf32>
    %cst_68 = arith.constant dense<0.000000e+00> : vector<32x512xf32>
    %410 = tpu.matmul %409, %2, %cst_68 {dimension_numbers = #tpu.dot_dimension_numbers<[1], [0], [0], [1], [0, 0, 1, 1], [], []>} : vector<32x256xf32>, vector<256x512xf32>, vector<32x512xf32> -> vector<32x512xf32>
    %411 = arith.addf %410, %9 : vector<32x512xf32>
    %412 = vector.extract_strided_slice %411 {offsets = [0, 0], sizes = [32, 128], strides = [1, 1]} : vector<32x512xf32> to vector<32x128xf32>
    %413 = arith.negf %412 : vector<32x128xf32>
    %414 = math.exp %413 : vector<32x128xf32>
    %cst_69 = arith.constant 1.000000e+00 : f32
    %415 = vector.broadcast %cst_69 : f32 to vector<32x128xf32>
    %416 = arith.addf %415, %414 : vector<32x128xf32>
    %417 = arith.divf %415, %416 : vector<32x128xf32>
    %418 = vector.extract_strided_slice %411 {offsets = [0, 128], sizes = [32, 128], strides = [1, 1]} : vector<32x512xf32> to vector<32x128xf32>
    %419 = arith.negf %418 : vector<32x128xf32>
    %420 = math.exp %419 : vector<32x128xf32>
    %cst_70 = arith.constant 1.000000e+00 : f32
    %421 = vector.broadcast %cst_70 : f32 to vector<32x128xf32>
    %422 = arith.addf %421, %420 : vector<32x128xf32>
    %423 = arith.divf %421, %422 : vector<32x128xf32>
    %424 = vector.extract_strided_slice %411 {offsets = [0, 256], sizes = [32, 128], strides = [1, 1]} : vector<32x512xf32> to vector<32x128xf32>
    %425 = vector.extract_strided_slice %411 {offsets = [0, 384], sizes = [32, 128], strides = [1, 1]} : vector<32x512xf32> to vector<32x128xf32>
    %426 = arith.mulf %417, %425 : vector<32x128xf32>
    %427 = arith.addf %424, %426 : vector<32x128xf32>
    %428 = math.tanh %427 : vector<32x128xf32>
    %cst_71 = arith.constant 1.000000e+00 : f32
    %429 = vector.broadcast %cst_71 : f32 to vector<32x128xf32>
    %430 = arith.subf %429, %423 : vector<32x128xf32>
    %431 = arith.mulf %430, %428 : vector<32x128xf32>
    %432 = arith.mulf %423, %379 : vector<32x128xf32>
    %433 = arith.addf %431, %432 : vector<32x128xf32>
    %cst_72 = arith.constant dense<0.000000e+00> : vector<32x512xf32>
    %434 = tpu.matmul %433, %3, %cst_72 {dimension_numbers = #tpu.dot_dimension_numbers<[1], [0], [0], [1], [0, 0, 1, 1], [], []>} : vector<32x128xf32>, vector<128x512xf32>, vector<32x512xf32> -> vector<32x512xf32>
    %435 = vector.extract_strided_slice %434 {offsets = [0, 0], sizes = [32, 16], strides = [1, 1]} : vector<32x512xf32> to vector<32x16xf32>
    %436 = vector.broadcast %10 : vector<1x16xf32> to vector<32x16xf32>
    %437 = arith.addf %435, %436 : vector<32x16xf32>
    %c0_73 = arith.constant 0 : index
    %c0_74 = arith.constant 0 : index
    %438 = vector.load %arg2[%c0_73, %c0_74] : memref<32x16xf32, #tpu.memory_space<vmem>>, vector<32x16xf32>
    tpu.vector_store %arg2[%c0_73, %c0_74], %437 {strides = array<i32>} : memref<32x16xf32, #tpu.memory_space<vmem>>, vector<32x16xf32>,
    return
  }
}

</mosaic_0001>

<bundles_post_ra>
// kernel: gru_model_forward.1
= control target key start
LH: loop header
LB: loop body
LE: loop exit
PB: predicated region body
PF: predicated region fallthrough
CT: control target
= control target key end

     0   :  { %7 = vsyncpa [#allocation3], 0  ;;  %s7999_s12 = smov [#allocation2]   ;;  %s8000_s14 = smov 512   ;;  %s12174_s0 = inlined_call_operand.vmem [shape: f32[256,8], index: 0, kind: input, shape index: {}]   ;;  %s12175_s1 = inlined_call_operand.hbm [shape: f32[528,512], index: 1, kind: input, shape index: {}]   ;;  %s12176_s2 = inlined_call_operand.vmem [shape: f32[32,16], index: 2, kind: output, shape index: {}]  }
   0x1   :  { %s14_s11 = sshll.u32 %s12175_s1, 4  ;;  %s16_s13 = sshll.u32 %s7999_s12, 4  ;;  %s15_s11 = int_to_ptr.hbm [resolvable:$true] %s14_s11  ;;  %s17_s13 = int_to_ptr.vmem [resolvable:$true] %s16_s13 }
   0x2   :  { %s8001_s15 = smov 32  }
   0x3   :  { %22 = dma.hbm_to_vmem [thread:$0]  %s15_s11, 33792, %s17_s13, [#allocation3], %s8000_s14, %s8000_s14, %s8001_s15  }
   0x4   :  { %7997 = dma.done.wait [#allocation3], 33792  }
   0x5   :  { %7998 = vsyncadd [#allocation3], 4294933504  ;;  %vm267_vm0 = vcmask 64512   ;;  %v27_v0 = vld [vmem:[#allocation2] sm:$0xff]  ;;  %v28_v1 = vld [vmem:[#allocation2 + $0x8] sm:$0xff] }
   0x6   :  { %v235_v2 = vld [vmem:[%s12174_s0] sm:$0xff]  ;;  %379 = vmatpush.msra.mxu0 %v27_v0  ;;  %492 = vmatpush.msra.mxu1 %v28_v1  ;;  %v266_v3 = vld [vmem:[%s12174_s0 + $0xf8] sm:$0xff]  ;;  %v29_v4 = vld [vmem:[#allocation2 + $0x10] sm:$0xff] }
   0x7   :  { %6043 = vmatmul.msk.f32.vlgmr.msra.gmra.mxu0 %vm267_vm0, %v235_v2  ;;  %6075 = vmatmul.msk.f32.vlgmr.msra.gmra.mxu1 %vm267_vm0, %v235_v2  ;;  %v236_v5 = vld [vmem:[%s12174_s0 + $0x8] sm:$0xff]  ;;  %v237_v6 = vld [vmem:[%s12174_s0 + $0x10] sm:$0xff]  ;;  %v238_v7 = vld [vmem:[%s12174_s0 + $0x18] sm:$0xff] }
   0x8   :  { %6267 = vmatpush.msra.mxu2 %v27_v0  ;;  %v138_v8 = vld [vmem:[#allocation2 + $0x400] sm:$0xff]  ;;  %v139_v37 = vld [vmem:[#allocation2 + $0x408] sm:$0xff] }
   0x9   :  { %6074 = vmatmul.msk.f32.vlgmr.msra.gmra.mxu2 %vm267_vm0, %v266_v3  ;;  %875 = vmatpush.msra.mxu3 %v138_v8  ;;  %v134_v9 = vld [vmem:[#allocation2 + $0x3e0] sm:$0xff]  ;;  %v135_v38 = vld [vmem:[#allocation2 + $0x3e8] sm:$0xff] }
   0xa   :  { %6268 = vmatpush.msrb.mxu2 %v28_v1  ;;  %v130_v10 = vld [vmem:[#allocation2 + $0x3c0] sm:$0xff]  ;;  %1500 = vmatpush.msrb.mxu1 %v139_v37  ;;  %v131_v47 = vld [vmem:[#allocation2 + $0x3c8] sm:$0xff] }
   0xb   :  { %876 = vmatpush.msra.mxu3 %v134_v9  ;;  %v126_v11 = vld [vmem:[#allocation2 + $0x3a0] sm:$0xff]  ;;  %v127_v52 = vld [vmem:[#allocation2 + $0x3a8] sm:$0xff] }
   0xc   :  { %605 = vmatpush.msra.mxu2 %v29_v4  ;;  %v122_v12 = vld [vmem:[#allocation2 + $0x380] sm:$0xff]  ;;  %1501 = vmatpush.msrb.mxu1 %v135_v38  ;;  %v123_v58 = vld [vmem:[#allocation2 + $0x388] sm:$0xff] }
   0xd   :  { %877 = vmatpush.msra.mxu3 %v130_v10  ;;  %v118_v13 = vld [vmem:[#allocation2 + $0x360] sm:$0xff]  ;;  %v119_v63 = vld [vmem:[#allocation2 + $0x368] sm:$0xff] }
   0xe   :  { %v114_v14 = vld [vmem:[#allocation2 + $0x340] sm:$0xff]  ;;  %1502 = vmatpush.msrb.mxu1 %v131_v47 }
   0xf   :  { %6044 = vmatmul.msk.f32.gmra.mxu0 %vm267_vm0, %v236_v5  ;;  %6076 = vmatmul.msk.f32.gmra.mxu1 %vm267_vm0, %v236_v5  ;;  %v110_v15 = vld [vmem:[#allocation2 + $0x320] sm:$0xff] }
  0x10   :  { %878 = vmatpush.msra.mxu3 %v126_v11  ;;  %v106_v16 = vld [vmem:[#allocation2 + $0x300] sm:$0xff]  ;;  %1503 = vmatpush.msrb.mxu1 %v127_v52 }
  0x11   :  { %6106 = vmatmul.msk.f32.vlgmr.msrb.gmra.mxu2 %vm267_vm0, %v266_v3  ;;  %v102_v17 = vld [vmem:[#allocation2 + $0x2e0] sm:$0xff] }
  0x12   :  { %879 = vmatpush.msra.mxu3 %v122_v12  ;;  %v98_v22 = vld [vmem:[#allocation2 + $0x2c0] sm:$0xff]  ;;  %1504 = vmatpush.msrb.mxu1 %v123_v58 }
  0x13   :  { %v94_v23 = vld [vmem:[#allocation2 + $0x2a0] sm:$0xff] }
  0x14   :  { %880 = vmatpush.msra.mxu3 %v118_v13  ;;  %v90_v24 = vld [vmem:[#allocation2 + $0x280] sm:$0xff]  ;;  %1505 = vmatpush.msrb.mxu1 %v119_v63 }
  0x15   :  { %v86_v25 = vld [vmem:[#allocation2 + $0x260] sm:$0xff] }
  0x16   :  { %881 = vmatpush.msra.mxu3 %v114_v14  ;;  %v82_v31 = vld [vmem:[#allocation2 + $0x240] sm:$0xff] }
  0x17   :  { %6045 = vmatmul.msk.f32.gmra.mxu0 %vm267_vm0, %v237_v6  ;;  %6077 = vmatmul.msk.f32.gmra.mxu1 %vm267_vm0, %v237_v6  ;;  %v78_v36 = vld [vmem:[#allocation2 + $0x220] sm:$0xff] }
  0x18   :  { %882 = vmatpush.msra.mxu3 %v110_v15  ;;  %v8080_v8 = vld [vmem:[#allocation2 + $0x820] ss:$0 sm:$0xff] }
  0x19   :  { %6107 = vmatmul.msk.f32.vlgmr.msra.gmra.mxu2 %vm267_vm0, %v235_v2 }
  0x1a   :  { %883 = vmatpush.msra.mxu3 %v106_v16 }
  0x1c   :  { %884 = vmatpush.msra.mxu3 %v102_v17  ;;  %v115_v17 = vld [vmem:[#allocation2 + $0x348] sm:$0xff] }
  0x1d   :  { %1506 = vmatpush.msrb.mxu1 %v115_v17 }
  0x1e   :  { %885 = vmatpush.msra.mxu3 %v98_v22 }
  0x1f   :  { %6046 = vmatmul.msk.f32.gmra.mxu0 %vm267_vm0, %v238_v7  ;;  %6078 = vmatmul.msk.f32.gmra.mxu1 %vm267_vm0, %v238_v7 }
  0x20   :  { %886 = vmatpush.msra.mxu3 %v94_v23 }
  0x21   :  { %6108 = vmatmul.msk.f32.gmra.mxu2 %vm267_vm0, %v236_v5 }
  0x22   :  { %887 = vmatpush.msra.mxu3 %v90_v24  ;;  %v111_v24 = vld [vmem:[#allocation2 + $0x328] sm:$0xff] }
  0x23   :  { %1507 = vmatpush.msrb.mxu1 %v111_v24 }
  0x24   :  { %888 = vmatpush.msra.mxu3 %v86_v25  ;;  %v83_v25 = vld [vmem:[#allocation2 + $0x248] sm:$0xff] }
  0x26   :  { %889 = vmatpush.msra.mxu3 %v82_v31 }
  0x28   :  { %890 = vmatpush.msra.mxu3 %v78_v36 }
  0x29   :  { %6109 = vmatmul.msk.f32.gmra.mxu2 %vm267_vm0, %v237_v6 }
  0x2a   :  { %904 = vmatpush.msrb.mxu3 %v139_v37  ;;  %v107_v37 = vld [vmem:[#allocation2 + $0x308] sm:$0xff] }
  0x2b   :  { %1508 = vmatpush.msrb.mxu1 %v107_v37 }
  0x2c   :  { %905 = vmatpush.msrb.mxu3 %v135_v38  ;;  %v103_v38 = vld [vmem:[#allocation2 + $0x2e8] sm:$0xff] }
  0x2d   :  { %1509 = vmatpush.msrb.mxu1 %v103_v38 }
  0x2e   :  { %906 = vmatpush.msrb.mxu3 %v131_v47 }
  0x30   :  { %907 = vmatpush.msrb.mxu3 %v127_v52 }
  0x31   :  { %6110 = vmatmul.msk.f32.gmra.mxu2 %vm267_vm0, %v238_v7 }
  0x32   :  { %908 = vmatpush.msrb.mxu3 %v123_v58 }
  0x34   :  { %909 = vmatpush.msrb.mxu3 %v119_v63 }
  0x36   :  { %910 = vmatpush.msrb.mxu3 %v115_v17 }
  0x38   :  { %911 = vmatpush.msrb.mxu3 %v111_v24 }
  0x3a   :  { %912 = vmatpush.msrb.mxu3 %v107_v37  ;;  %v101_v37 = vld [vmem:[#allocation2 + $0x2d8] sm:$0xff] }
  0x3c   :  { %913 = vmatpush.msrb.mxu3 %v103_v38 }
  0x84   :  { %v381_v18 = vpop.f32.mrf.mxu0  ;;  %v494_v19 = vpop.f32.mrf.mxu1 }
  0x85   :  { %v6139_v20 = vmul.f32 -1.442695, %v381_v18  ;;  %v6143_v21 = vmul.f32 -1.442695, %v494_v19 }
  0x87   :  { %6272 = vpow2.f32 %v6139_v20 }
  0x88   :  { %6274 = vpow2.f32 %v6143_v21 }
  0x8c   :  { %v384_v26 = vpop.f32.mrf.mxu0  ;;  %v497_v27 = vpop.f32.mrf.mxu1 }
  0x8d   :  { %v6273_v28 = vpop.eup %6272  ;;  %v6140_v29 = vmul.f32 -1.442695, %v384_v26  ;;  %v8049_v30 = vpop.f32.mrf.mxu2  ;;  %v6144_v34 = vmul.f32 -1.442695, %v497_v27 }
  0x8e   :  { %12185 = vst [vmem:[#allocation5_spill] sm:$0xff] %v8049_v30  ;;  %v6275_v32 = vpop.eup %6274  ;;  %v8051_v33 = vadd.f32 1.0, %v6273_v28 }
  0x8f   :  { %v8053_v35 = vadd.f32 1.0, %v6275_v32  ;;  %6276 = vpow2.f32 %v6140_v29 }
  0x90   :  { %6278 = vrcp.f32 %v8051_v33  ;;  %v728_v56 = vand.u32 2147483647, %v8051_v33  ;;  %v730_v57 = vand.u32 2147483648, %v8051_v33  ;;  %vm724_vm3 = vweird.f32 %v8051_v33 }
  0x91   :  { %6280 = vrcp.f32 %v8053_v35  ;;  %vm800_vm2 = vweird.f32 %v8053_v35  ;;  %v804_v5 = vand.u32 2147483647, %v8053_v35  ;;  %v806_v10 = vand.u32 2147483648, %v8053_v35 }
  0x92   :  { %6282 = vpow2.f32 %v6144_v34  ;;  %vm729_vm5 = vcmp.eq.f32.partialorder %v728_v56, 8.507059e+37  ;;  %v731_v9 = vor.u32 1.1754944e-38, %v730_v57 }
  0x93   :  { %vm8107_vm8 = vcmp.eq.f32.partialorder %v804_v5, 8.507059e+37  ;;  %v807_v32 = vor.u32 1.1754944e-38, %v806_v10 }
  0x94   :  { %v387_v39 = vpop.f32.mrf.mxu0  ;;  %v500_v40 = vpop.f32.mrf.mxu1 }
  0x95   :  { %v6277_v41 = vpop.eup %6276  ;;  %v6141_v42 = vmul.f32 -1.442695, %v387_v39  ;;  %v6145_v43 = vmul.f32 -1.442695, %v500_v40  ;;  %v8057_v44 = vpop.f32.mrf.mxu2  ;;  %v239_v39 = vld [vmem:[%s12174_s0 + $0x20] sm:$0xff] }
  0x96   :  { %12186 = vst [vmem:[#allocation6_spill] sm:$0xff] %v8057_v44  ;;  %v6279_v45 = vpop.eup %6278  ;;  %v8059_v46 = vadd.f32 1.0, %v6277_v41  ;;  %6111 = vmatmul.msk.f32.gmra.mxu2 %vm267_vm0, %v239_v39  ;;  %6047 = vmatmul.msk.f32.gmra.mxu0 %vm267_vm0, %v239_v39 }
  0x97   :  { %v8061_v48 = vpop.eup %6280  ;;  %6284 = vpow2.f32 %v6141_v42  ;;  %v720_v49 = vmul.f32 %v6279_v45, %v8051_v33  ;;  %vm725_vm1 = vweird.f32 %v6279_v45  ;;  %6079 = vmatmul.msk.f32.gmra.mxu1 %vm267_vm0, %v239_v39 }
  0x98   :  { %v6283_v50 = vpop.eup %6282  ;;  %v796_v51 = vmul.f32 %v8061_v48, %v8053_v35  ;;  %6286 = vrcp.f32 %v8059_v46  ;;  %vm726_vm4 = vmor %vm724_vm3, %vm725_vm1  ;;  %vm801_vm6 = vweird.f32 %v8061_v48  ;;  %v743_v21 = vand.u32 2147483647, %v8059_v46 }
  0x99   :  { %v8067_v53 = vadd.f32 1.0, %v6283_v50  ;;  %6288 = vpow2.f32 %v6145_v43  ;;  %v721_v54 = vsub.f32 1.0, %v720_v49  ;;  %v745_v23 = vand.u32 2147483648, %v8059_v46  ;;  %vm8103_vm7 = vmor %vm800_vm2, %vm801_vm6 }
  0x9a   :  { %v797_v55 = vsub.f32 1.0, %v796_v51  ;;  %vm739_vm10 = vweird.f32 %v8059_v46  ;;  %vm8119_vm12 = vcmp.eq.f32.partialorder %v743_v21, 8.507059e+37  ;;  %v99_v51 = vld [vmem:[#allocation2 + $0x2c8] sm:$0xff] }
  0x9b   :  { %6290 = vrcp.f32 %v8067_v53  ;;  %v722_v59 = vmul.f32 %v6279_v45, %v721_v54  ;;  %vm815_vm11 = vweird.f32 %v8067_v53  ;;  %v819_v58 = vand.u32 2147483647, %v8067_v53  ;;  %914 = vmatpush.msrb.mxu3 %v99_v51  ;;  %1510 = vmatpush.msrb.mxu1 %v99_v51 }
  0x9c   :  { %v798_v60 = vmul.f32 %v8061_v48, %v797_v55  ;;  %v390_v61 = vpop.f32.mrf.mxu0  ;;  %v503_v62 = vpop.f32.mrf.mxu1 }
  0x9d   :  { %v6285_v0 = vpop.eup %6284  ;;  %v6142_v1 = vmul.f32 -1.442695, %v390_v61  ;;  %v6146_v2 = vmul.f32 -1.442695, %v503_v62  ;;  %v607_v3 = vpop.f32.mrf.mxu2  ;;  %v723_v4 = vadd.f32 %v6279_v45, %v722_v59  ;;  %v95_v61 = vld [vmem:[#allocation2 + $0x2a8] sm:$0xff] }
  0x9e   :  { %v8076_v6 = vpop.eup %6286  ;;  %v8078_v7 = vadd.f32 1.0, %v6285_v0  ;;  %v799_v16 = vadd.f32 %v8061_v48, %v798_v60  ;;  %915 = vmatpush.msrb.mxu3 %v95_v61  ;;  %1511 = vmatpush.msrb.mxu1 %v95_v61  ;;  %v8250_v61 = vld [vmem:[#allocation2 + $0x3b0] sm:$0xff] }
  0x9f   :  { %v6289_v11 = vpop.eup %6288  ;;  %6292 = vpow2.f32 %v6142_v1  ;;  %v727_v12 = vsel %vm726_vm4, %v6279_v45, %v723_v4  ;;  %v735_v13 = vmul.f32 %v8076_v6, %v8059_v46  ;;  %vm740_vm9 = vweird.f32 %v8076_v6 }
  0xa0   :  { %6294 = vrcp.f32 %v8078_v7  ;;  %v8088_v14 = vadd.f32 1.0, %v6289_v11  ;;  %v732_v15 = vsel %vm729_vm5, %v731_v9, %v727_v12  ;;  %v803_v31 = vsel %vm8103_vm7, %v8061_v48, %v799_v16  ;;  %vm8133_vm13 = vmor %vm739_vm10, %vm740_vm9  ;;  %v91_v11 = vld [vmem:[#allocation2 + $0x288] sm:$0xff] }
  0xa1   :  { %v8091_v18 = vpop.eup %6290  ;;  %6296 = vpow2.f32 %v6146_v2  ;;  %v855_v19 = vmul.f32 %v732_v15, %v8080_v8  ;;  %v736_v20 = vsub.f32 1.0, %v735_v13  ;;  %v746_v45 = vor.u32 1.1754944e-38, %v745_v23  ;;  %916 = vmatpush.msrb.mxu3 %v91_v11  ;;  %1512 = vmatpush.msrb.mxu1 %v91_v11 }
  0xa2   :  { %v811_v22 = vmul.f32 %v8091_v18, %v8067_v53  ;;  %6298 = vrcp.f32 %v8088_v14  ;;  %v821_v46 = vand.u32 2147483648, %v8067_v53  ;;  %v808_v48 = vsel %vm8107_vm8, %v807_v32, %v803_v31 }
  0xa3   :  { %v859_v27 = vadd.f32 %v855_v19, %v607_v3  ;;  %v737_v28 = vmul.f32 %v8076_v6, %v736_v20  ;;  %vm816_vm14 = vweird.f32 %v8091_v18  ;;  %v867_v62 = vsub.f32 1.0, %v808_v48  ;;  %v8267_v3 = vld [vmem:[#allocation2 + $0x390] sm:$0xff] }
  0xa4   :  { %v812_v29 = vsub.f32 1.0, %v811_v22  ;;  %v758_v63 = vand.u32 2147483647, %v8078_v7  ;;  %v760_v0 = vand.u32 2147483648, %v8078_v7  ;;  %vm8168_vm15 = vmor %vm815_vm11, %vm816_vm14  ;;  %v822_v53 = vor.u32 1.1754944e-38, %v821_v46 }
  0xa5   :  { %v6293_v33 = vpop.eup %6292  ;;  %6300 = vtanh.f32 %v859_v27  ;;  %v610_v34 = vpop.f32.mrf.mxu2  ;;  %v738_v35 = vadd.f32 %v8076_v6, %v737_v28  ;;  %vm754_vm2 = vweird.f32 %v8078_v7  ;;  %vm830_vm3 = vweird.f32 %v8088_v14 }
  0xa6   :  { %v8126_v40 = vpop.eup %6294  ;;  %v813_v41 = vmul.f32 %v8091_v18, %v812_v29  ;;  %v8129_v42 = vadd.f32 1.0, %v6293_v33  ;;  %vm820_vm4 = vcmp.eq.f32.partialorder %v819_v58, 8.507059e+37  ;;  %v761_v17 = vor.u32 1.1754944e-38, %v760_v0 }
  0xa7   :  { %v6297_v47 = vpop.eup %6296  ;;  %v742_v49 = vsel %vm8133_vm13, %v8076_v6, %v738_v35  ;;  %v750_v50 = vmul.f32 %v8126_v40, %v8078_v7  ;;  %vm755_vm1 = vweird.f32 %v8126_v40  ;;  %v240_v6 = vld [vmem:[%s12174_s0 + $0x28] sm:$0xff]  ;;  %vm759_vm6 = vcmp.eq.f32.partialorder %v758_v63, 8.507059e+37  ;;  %v51_v63 = vld [vmem:[#allocation2 + $0x100] sm:$0xff] }
  0xa8   :  { %v8149_v52 = vpop.eup %6298  ;;  %6302 = vrcp.f32 %v8129_v42  ;;  %v8152_v54 = vadd.f32 1.0, %v6297_v47  ;;  %v747_v55 = vsel %vm8119_vm12, %v746_v45, %v742_v49  ;;  %v814_v56 = vadd.f32 %v8091_v18, %v813_v41  ;;  %vm756_vm5 = vmor %vm754_vm2, %vm755_vm1  ;;  %6112 = vmatmul.msk.f32.gmra.mxu2 %vm267_vm0, %v240_v6  ;;  %6048 = vmatmul.msk.f32.gmra.mxu0 %vm267_vm0, %v240_v6  ;;  %v8226_v45 = vld [vmem:[#allocation2 + $0x410] sm:$0xff] }
  0xa9   :  { %v826_v57 = vmul.f32 %v8149_v52, %v8088_v14  ;;  %v856_v59 = vmul.f32 %v747_v55, %v8080_v8  ;;  %v751_v60 = vsub.f32 1.0, %v750_v50  ;;  %vm831_vm7 = vweird.f32 %v8149_v52  ;;  %6080 = vmatmul.msk.f32.gmra.mxu1 %vm267_vm0, %v240_v6  ;;  %v8234_v49 = vld [vmem:[#allocation2 + $0x3f0] sm:$0xff] }
  0xaa   :  { %6304 = vrcp.f32 %v8152_v54  ;;  %v818_v10 = vsel %vm8168_vm15, %v8091_v18, %v814_v56  ;;  %v87_v18 = vld [vmem:[#allocation2 + $0x268] sm:$0xff]  ;;  %v836_v24 = vand.u32 2147483648, %v8088_v14  ;;  %v834_v27 = vand.u32 2147483647, %v8088_v14  ;;  %vm8212_vm8 = vmor %vm830_vm3, %vm831_vm7  ;;  %v8243_v56 = vld [vmem:[#allocation2 + $0x3d0] sm:$0xff] }
  0xab   :  { %v6301_v1 = vpop.eup %6300  ;;  %v827_v2 = vsub.f32 1.0, %v826_v57  ;;  %v860_v4 = vadd.f32 %v856_v59, %v610_v34  ;;  %v752_v5 = vmul.f32 %v8126_v40, %v751_v60  ;;  %v823_v19 = vsel %vm820_vm4, %v822_v53, %v818_v10  ;;  %917 = vmatpush.msrb.mxu3 %v87_v18  ;;  %v79_v34 = vld [vmem:[#allocation2 + $0x228] sm:$0xff]  ;;  %1513 = vmatpush.msrb.mxu1 %v87_v18  ;;  %v8276_v6 = vld [vmem:[#allocation2 + $0x350] sm:$0xff] }
  0xac   :  { %v8177_v9 = vmul.f32 %v6301_v1, %v867_v62  ;;  %v868_v31 = vsub.f32 1.0, %v823_v19  ;;  %v773_v32 = vand.u32 2147483647, %v8129_v42  ;;  %v775_v33 = vand.u32 2147483648, %v8129_v42  ;;  %v8280_v53 = vld [vmem:[#allocation2 + $0x330] sm:$0xff]  ;;  %v244_v19 = vld [vmem:[%s12174_s0 + $0x48] sm:$0xff] }
  0xad   :  { %v828_v12 = vmul.f32 %v8149_v52, %v827_v2  ;;  %6306 = vtanh.f32 %v860_v4  ;;  %v753_v13 = vadd.f32 %v8126_v40, %v752_v5  ;;  %v613_v16 = vpop.f32.mrf.mxu2  ;;  %918 = vmatpush.msrb.mxu3 %v83_v25  ;;  %v837_v43 = vor.u32 1.1754944e-38, %v836_v24  ;;  %1514 = vmatpush.msrb.mxu1 %v83_v25  ;;  %v8271_v4 = vld [vmem:[#allocation2 + $0x370] sm:$0xff]  ;;  %v137_v24 = vld [vmem:[#allocation2 + $0x3f8] sm:$0xff] }
  0xae   :  { %12197 = vst [vmem:[#allocation7_spill] sm:$0xff] %v8177_v9  ;;  %v8185_v15 = vpop.eup %6302  ;;  %891 = vmatmul.f32.vlgmr.msra.gmra.mxu3 %v8177_v9  ;;  %vm769_vm10 = vweird.f32 %v8129_v42  ;;  %vm835_vm11 = vcmp.eq.f32.partialorder %v834_v27, 8.507059e+37  ;;  %v776_v48 = vor.u32 1.1754944e-38, %v775_v33  ;;  %vm774_vm13 = vcmp.eq.f32.partialorder %v773_v32, 8.507059e+37  ;;  %v8301_v18 = vld [vmem:[#allocation2 + $0x2b0] sm:$0xff]  ;;  %v129_v27 = vld [vmem:[#allocation2 + $0x3b8] sm:$0xff] }
  0xaf   :  { %v757_v20 = vsel %vm756_vm5, %v8126_v40, %v753_v13  ;;  %v765_v7 = vmul.f32 %v8185_v15, %v8129_v42  ;;  %v829_v23 = vadd.f32 %v8149_v52, %v828_v12  ;;  %vm770_vm9 = vweird.f32 %v8185_v15  ;;  %v241_v40 = vld [vmem:[%s12174_s0 + $0x30] sm:$0xff]  ;;  %919 = vmatpush.msrb.mxu3 %v79_v34  ;;  %1515 = vmatpush.msrb.mxu1 %v79_v34  ;;  %v243_v12 = vld [vmem:[%s12174_s0 + $0x40] sm:$0xff]  ;;  %v117_v32 = vld [vmem:[#allocation2 + $0x358] sm:$0xff] }
  0xb0   :  { %v8196_v21 = vpop.eup %6304  ;;  %v762_v22 = vsel %vm759_vm6, %v761_v17, %v757_v20  ;;  %vm771_vm12 = vmor %vm769_vm10, %vm770_vm9  ;;  %6113 = vmatmul.msk.f32.gmra.mxu2 %vm267_vm0, %v241_v40  ;;  %6049 = vmatmul.msk.f32.gmra.mxu0 %vm267_vm0, %v241_v40  ;;  %vm845_vm14 = vweird.f32 %v8152_v54  ;;  %v851_v57 = vand.u32 2147483648, %v8152_v54  ;;  %v849_v60 = vand.u32 2147483647, %v8152_v54  ;;  %v8297_v17 = vld [vmem:[#allocation2 + $0x2d0] sm:$0xff]  ;;  %v113_v33 = vld [vmem:[#allocation2 + $0x338] sm:$0xff] }
  0xb1   :  { %v841_v26 = vmul.f32 %v8196_v21, %v8152_v54  ;;  %v857_v28 = vmul.f32 %v762_v22, %v8080_v8  ;;  %v766_v29 = vsub.f32 1.0, %v765_v7  ;;  %v833_v14 = vsel %vm8212_vm8, %v8149_v52, %v829_v23  ;;  %933 = vmatpush.msra.mxu3 %v8226_v45  ;;  %6081 = vmatmul.msk.f32.gmra.mxu1 %vm267_vm0, %v241_v40  ;;  %v8307_v20 = vld [vmem:[#allocation2 + $0x290] sm:$0xff]  ;;  %v141_v22 = vld [vmem:[#allocation2 + $0x418] sm:$0xff]  ;;  %v247_v34 = vld [vmem:[%s12174_s0 + $0x60] sm:$0xff] }
  0xb2   :  { %v838_v50 = vsel %vm835_vm11, %v837_v43, %v833_v14  ;;  %vm846_vm15 = vweird.f32 %v8196_v21  ;;  %v852_v54 = vor.u32 1.1754944e-38, %v851_v57  ;;  %vm850_vm2 = vcmp.eq.f32.partialorder %v849_v60, 8.507059e+37  ;;  %v88_v7 = vld [vmem:[#allocation2 + $0x270] sm:$0xff]  ;;  %1616 = vmatpush.msra.mxu1 %v141_v22  ;;  %v93_v40 = vld [vmem:[#allocation2 + $0x298] sm:$0xff]  ;;  %v63_v57 = vld [vmem:[#allocation2 + $0x180] sm:$0xff] }
  0xb3   :  { %v6307_v35 = vpop.eup %6306  ;;  %v842_v36 = vsub.f32 1.0, %v841_v26  ;;  %v861_v38 = vadd.f32 %v857_v28, %v613_v16  ;;  %v767_v39 = vmul.f32 %v8185_v15, %v766_v29  ;;  %934 = vmatpush.msra.mxu3 %v8234_v49  ;;  %v869_v59 = vsub.f32 1.0, %v838_v50  ;;  %vm8254_vm1 = vmor %vm845_vm14, %vm846_vm15  ;;  %v8292_v16 = vld [vmem:[#allocation2 + $0x2f0] sm:$0xff]  ;;  %v133_v26 = vld [vmem:[#allocation2 + $0x3d8] sm:$0xff] }
  0xb4   :  { %v8221_v41 = vmul.f32 %v6307_v35, %v868_v31  ;;  %v80_v23 = vld [vmem:[#allocation2 + $0x230] sm:$0xff]  ;;  %1617 = vmatpush.msra.mxu1 %v137_v24  ;;  %v125_v28 = vld [vmem:[#allocation2 + $0x398] sm:$0xff]  ;;  %v72_v50 = vld [vmem:[#allocation2 + $0x1e0] sm:$0xff] }
  0xb5   :  { %v843_v46 = vmul.f32 %v8196_v21, %v842_v36  ;;  %6308 = vtanh.f32 %v861_v38  ;;  %v768_v47 = vadd.f32 %v8185_v15, %v767_v39  ;;  %v616_v42 = vpop.f32.mrf.mxu2  ;;  %935 = vmatpush.msra.mxu3 %v8243_v56  ;;  %v245_v25 = vld [vmem:[%s12174_s0 + $0x50] sm:$0xff]  ;;  %v246_v29 = vld [vmem:[%s12174_s0 + $0x58] sm:$0xff]  ;;  %v248_v39 = vld [vmem:[%s12174_s0 + $0x68] sm:$0xff] }
  0xb6   :  { %12200 = vst [vmem:[#allocation8_spill] sm:$0xff] %v8221_v41  ;;  %894 = vmatmul.f32.gmra.mxu3 %v8221_v41  ;;  %1618 = vmatpush.msra.mxu1 %v133_v26  ;;  %v121_v31 = vld [vmem:[#allocation2 + $0x378] sm:$0xff]  ;;  %v54_v60 = vld [vmem:[#allocation2 + $0x120] sm:$0xff] }
  0xb7   :  { %v772_v51 = vsel %vm771_vm12, %v8185_v15, %v768_v47  ;;  %v844_v55 = vadd.f32 %v8196_v21, %v843_v46  ;;  %936 = vmatpush.msra.mxu3 %v8250_v61  ;;  %v8288_v15 = vld [vmem:[#allocation2 + $0x310] sm:$0xff]  ;;  %v109_v35 = vld [vmem:[#allocation2 + $0x318] sm:$0xff] }
  0xb8   :  { %v777_v52 = vsel %vm774_vm13, %v776_v48, %v772_v51  ;;  %1619 = vmatpush.msra.mxu1 %v129_v27  ;;  %v105_v36 = vld [vmem:[#allocation2 + $0x2f8] sm:$0xff]  ;;  %v249_v47 = vld [vmem:[%s12174_s0 + $0x70] sm:$0xff]  ;;  %v75_v48 = vld [vmem:[#allocation2 + $0x200] sm:$0xff] }
  0xb9   :  { %v858_v58 = vmul.f32 %v777_v52, %v8080_v8  ;;  %v242_v8 = vld [vmem:[%s12174_s0 + $0x38] sm:$0xff]  ;;  %v848_v2 = vsel %vm8254_vm1, %v8196_v21, %v844_v55  ;;  %937 = vmatpush.msra.mxu3 %v8267_v3  ;;  %v84_v21 = vld [vmem:[#allocation2 + $0x250] sm:$0xff]  ;;  %v202_v51 = vld [vmem:[#allocation2 + $0x600] sm:$0xff] }
  0xba   :  { %6114 = vmatmul.msk.f32.gmra.mxu2 %vm267_vm0, %v242_v8  ;;  %v853_v5 = vsel %vm850_vm2, %v852_v54, %v848_v2  ;;  %6050 = vmatmul.msk.f32.gmra.mxu0 %vm267_vm0, %v242_v8  ;;  %v97_v38 = vld [vmem:[#allocation2 + $0x2b8] sm:$0xff]  ;;  %v66_v52 = vld [vmem:[#allocation2 + $0x1a0] sm:$0xff] }
  0xbb   :  { %v6309_v62 = vpop.eup %6308  ;;  %v862_v0 = vadd.f32 %v858_v58, %v616_v42  ;;  %6082 = vmatmul.msk.f32.gmra.mxu1 %vm267_vm0, %v242_v8  ;;  %938 = vmatpush.msra.mxu3 %v8271_v4  ;;  %v870_v10 = vsub.f32 1.0, %v853_v5  ;;  %v89_v14 = vld [vmem:[#allocation2 + $0x278] sm:$0xff]  ;;  %v69_v42 = vld [vmem:[#allocation2 + $0x1c0] sm:$0xff]  ;;  %v252_v5 = vld [vmem:[%s12174_s0 + $0x88] sm:$0xff] }
  0xbc   :  { %v8262_v1 = vmul.f32 %v6309_v62, %v869_v59  ;;  %1620 = vmatpush.msra.mxu1 %v125_v28  ;;  %v85_v43 = vld [vmem:[#allocation2 + $0x258] sm:$0xff]  ;;  %1471 = vmatpush.msrb.mxu0 %v202_v51  ;;  %v60_v58 = vld [vmem:[#allocation2 + $0x160] sm:$0xff] }
  0xbd   :  { %6310 = vtanh.f32 %v862_v0  ;;  %939 = vmatpush.msra.mxu3 %v8276_v6  ;;  %v81_v46 = vld [vmem:[#allocation2 + $0x238] sm:$0xff]  ;;  %v57_v59 = vld [vmem:[#allocation2 + $0x140] sm:$0xff] }
  0xbe   :  { %12203 = vst [vmem:[#allocation9_spill] sm:$0xff] %v8262_v1  ;;  %897 = vmatmul.f32.gmra.mxu3 %v8262_v1  ;;  %1621 = vmatpush.msra.mxu1 %v121_v31  ;;  %v250_v55 = vld [vmem:[%s12174_s0 + $0x78] sm:$0xff]  ;;  %v251_v62 = vld [vmem:[%s12174_s0 + $0x80] sm:$0xff] }
  0xbf   :  { %940 = vmatpush.msra.mxu3 %v8280_v53  ;;  %v48_v0 = vld [vmem:[#allocation2 + $0xe0] sm:$0xff] }
  0xc0   :  { %1622 = vmatpush.msra.mxu1 %v117_v32  ;;  %v198_v8 = vld [vmem:[#allocation2 + $0x5e0] sm:$0xff] }
  0xc1   :  { %941 = vmatpush.msra.mxu3 %v8288_v15  ;;  %v45_v2 = vld [vmem:[#allocation2 + $0xc0] sm:$0xff]  ;;  %1472 = vmatpush.msrb.mxu0 %v198_v8  ;;  %v53_v8 = vld [vmem:[#allocation2 + $0x110] sm:$0xff] }
  0xc2   :  { %6115 = vmatmul.msk.f32.gmra.mxu2 %vm267_vm0, %v243_v12  ;;  %6051 = vmatmul.msk.f32.gmra.mxu0 %vm267_vm0, %v243_v12  ;;  %v42_v54 = vld [vmem:[#allocation2 + $0xa0] sm:$0xff] }
  0xc3   :  { %v6311_v11 = vpop.eup %6310  ;;  %6083 = vmatmul.msk.f32.gmra.mxu1 %vm267_vm0, %v243_v12  ;;  %942 = vmatpush.msra.mxu3 %v8292_v16  ;;  %v33_v12 = vld [vmem:[#allocation2 + $0x40] sm:$0xff] }
  0xc4   :  { %v8286_v13 = vmul.f32 %v6311_v11, %v870_v10  ;;  %1623 = vmatpush.msra.mxu1 %v113_v33  ;;  %v39_v10 = vld [vmem:[#allocation2 + $0x80] sm:$0xff] }
  0xc5   :  { %943 = vmatpush.msra.mxu3 %v8297_v17  ;;  %v36_v11 = vld [vmem:[#allocation2 + $0x60] sm:$0xff] }
  0xc6   :  { %12204 = vst [vmem:[#allocation10_spill] sm:$0xff] %v8286_v13  ;;  %900 = vmatmul.f32.gmra.mxu3 %v8286_v13  ;;  %1624 = vmatpush.msra.mxu1 %v109_v35  ;;  %v190_v51 = vld [vmem:[#allocation2 + $0x5a0] sm:$0xff] }
  0xc7   :  { %944 = vmatpush.msra.mxu3 %v8301_v18 }
  0xc8   :  { %1625 = vmatpush.msra.mxu1 %v105_v36 }
  0xc9   :  { %945 = vmatpush.msra.mxu3 %v8307_v20 }
  0xca   :  { %6116 = vmatmul.msk.f32.gmra.mxu2 %vm267_vm0, %v244_v19  ;;  %6052 = vmatmul.msk.f32.gmra.mxu0 %vm267_vm0, %v244_v19 }
  0xcb   :  { %6084 = vmatmul.msk.f32.gmra.mxu1 %vm267_vm0, %v244_v19  ;;  %946 = vmatpush.msra.mxu3 %v88_v7  ;;  %v30_v19 = vld [vmem:[#allocation2 + $0x20] sm:$0xff]  ;;  %v253_v7 = vld [vmem:[%s12174_s0 + $0x90] sm:$0xff] }
  0xcc   :  { %1626 = vmatpush.msra.mxu1 %v101_v37 }
  0xcd   :  { %947 = vmatpush.msra.mxu3 %v84_v21  ;;  %v8374_v21 = vld [vmem:[#allocation2 + $0x208] sm:$0xff] }
  0xce   :  { %920 = vmatmul.f32.vlgmr.msrb.gmra.mxu3 %v8177_v9  ;;  %1627 = vmatpush.msra.mxu1 %v97_v38 }
  0xcf   :  { %948 = vmatpush.msra.mxu3 %v80_v23  ;;  %v8382_v23 = vld [vmem:[#allocation2 + $0x1c8] sm:$0xff] }
  0xd0   :  { %1628 = vmatpush.msra.mxu1 %v93_v40 }
  0xd1   :  { %962 = vmatpush.msrb.mxu3 %v141_v22  ;;  %v8377_v22 = vld [vmem:[#allocation2 + $0x1e8] sm:$0xff] }
  0xd2   :  { %6117 = vmatmul.msk.f32.gmra.mxu2 %vm267_vm0, %v245_v25  ;;  %6053 = vmatmul.msk.f32.gmra.mxu0 %vm267_vm0, %v245_v25 }
  0xd3   :  { %6085 = vmatmul.msk.f32.gmra.mxu1 %vm267_vm0, %v245_v25  ;;  %963 = vmatpush.msrb.mxu3 %v137_v24  ;;  %v67_v24 = vld [vmem:[#allocation2 + $0x1a8] sm:$0xff] }
  0xd4   :  { %1629 = vmatpush.msra.mxu1 %v89_v14  ;;  %v64_v25 = vld [vmem:[#allocation2 + $0x188] sm:$0xff] }
  0xd5   :  { %964 = vmatpush.msrb.mxu3 %v133_v26  ;;  %v61_v26 = vld [vmem:[#allocation2 + $0x168] sm:$0xff] }
  0xd6   :  { %923 = vmatmul.f32.gmra.mxu3 %v8221_v41  ;;  %1630 = vmatpush.msra.mxu1 %v85_v43 }
  0xd7   :  { %965 = vmatpush.msrb.mxu3 %v129_v27  ;;  %v254_v27 = vld [vmem:[%s12174_s0 + $0x98] sm:$0xff] }
  0xd8   :  { %1631 = vmatpush.msra.mxu1 %v81_v46 }
  0xd9   :  { %966 = vmatpush.msrb.mxu3 %v125_v28  ;;  %v58_v28 = vld [vmem:[#allocation2 + $0x148] sm:$0xff] }
  0xda   :  { %6118 = vmatmul.msk.f32.gmra.mxu2 %vm267_vm0, %v246_v29  ;;  %6054 = vmatmul.msk.f32.gmra.mxu0 %vm267_vm0, %v246_v29 }
  0xdb   :  { %6086 = vmatmul.msk.f32.gmra.mxu1 %vm267_vm0, %v246_v29  ;;  %967 = vmatpush.msrb.mxu3 %v121_v31  ;;  %v55_v29 = vld [vmem:[#allocation2 + $0x128] sm:$0xff] }
  0xdc   :  { %v52_v31 = vld [vmem:[#allocation2 + $0x108] sm:$0xff] }
  0xdd   :  { %968 = vmatpush.msrb.mxu3 %v117_v32  ;;  %v49_v32 = vld [vmem:[#allocation2 + $0xe8] sm:$0xff] }
  0xde   :  { %926 = vmatmul.f32.gmra.mxu3 %v8262_v1 }
  0xdf   :  { %969 = vmatpush.msrb.mxu3 %v113_v33  ;;  %v255_v33 = vld [vmem:[%s12174_s0 + $0xa0] sm:$0xff] }
  0xe1   :  { %970 = vmatpush.msrb.mxu3 %v109_v35  ;;  %v46_v35 = vld [vmem:[#allocation2 + $0xc8] sm:$0xff] }
  0xe2   :  { %6119 = vmatmul.msk.f32.gmra.mxu2 %vm267_vm0, %v247_v34  ;;  %6055 = vmatmul.msk.f32.gmra.mxu0 %vm267_vm0, %v247_v34 }
  0xe3   :  { %6087 = vmatmul.msk.f32.gmra.mxu1 %vm267_vm0, %v247_v34  ;;  %971 = vmatpush.msrb.mxu3 %v105_v36  ;;  %v194_v34 = vld [vmem:[#allocation2 + $0x5c0] sm:$0xff]  ;;  %v43_v36 = vld [vmem:[#allocation2 + $0xa8] sm:$0xff] }
  0xe4   :  { %1473 = vmatpush.msrb.mxu0 %v194_v34  ;;  %v8459_v34 = vld [vmem:[#allocation2 + $0x821] ss:$8 sm:$0xf] }
  0xe5   :  { %972 = vmatpush.msrb.mxu3 %v101_v37  ;;  %v40_v37 = vld [vmem:[#allocation2 + $0x88] sm:$0xff] }
  0xe6   :  { %929 = vmatmul.f32.gmra.mxu3 %v8286_v13  ;;  %1474 = vmatpush.msrb.mxu0 %v190_v51  ;;  %v8489_v51 = vld [vmem:[#allocation2 + $0x380] sm:$0xff] }
  0xe7   :  { %973 = vmatpush.msrb.mxu3 %v97_v38  ;;  %v37_v38 = vld [vmem:[#allocation2 + $0x68] sm:$0xff] }
  0xe9   :  { %974 = vmatpush.msrb.mxu3 %v93_v40  ;;  %v203_v40 = vld [vmem:[#allocation2 + $0x608] sm:$0xff] }
  0xea   :  { %6120 = vmatmul.msk.f32.gmra.mxu2 %vm267_vm0, %v248_v39  ;;  %6056 = vmatmul.msk.f32.gmra.mxu0 %vm267_vm0, %v248_v39 }
  0xeb   :  { %6088 = vmatmul.msk.f32.gmra.mxu1 %vm267_vm0, %v248_v39  ;;  %975 = vmatpush.msrb.mxu3 %v89_v14  ;;  %v256_v39 = vld [vmem:[%s12174_s0 + $0xa8] sm:$0xff] }
  0xec   :  { %1529 = vmatpush.msrb.mxu2 %v203_v40  ;;  %v34_v14 = vld [vmem:[#allocation2 + $0x48] sm:$0xff]  ;;  %v8470_v40 = vld [vmem:[#allocation2 + $0x3c0] sm:$0xff] }
  0xed   :  { %976 = vmatpush.msrb.mxu3 %v85_v43 }
  0xee   :  { %949 = vmatmul.f32.vlgmr.msra.gmra.mxu3 %v8177_v9 }
  0xef   :  { %977 = vmatpush.msrb.mxu3 %v81_v46  ;;  %v31_v46 = vld [vmem:[#allocation2 + $0x28] sm:$0xff] }
  0xf1   :  { %1163 = vmatpush.msra.mxu3 %v75_v48  ;;  %v74_v48 = vld [vmem:[#allocation2 + $0x1f0] sm:$0xff] }
  0xf2   :  { %6121 = vmatmul.msk.f32.gmra.mxu2 %vm267_vm0, %v249_v47  ;;  %6057 = vmatmul.msk.f32.gmra.mxu0 %vm267_vm0, %v249_v47 }
  0xf3   :  { %6089 = vmatmul.msk.f32.gmra.mxu1 %vm267_vm0, %v249_v47  ;;  %1164 = vmatpush.msra.mxu3 %v72_v50  ;;  %v77_v47 = vld [vmem:[#allocation2 + $0x210] sm:$0xff] }
  0xf4   :  { %v257_v50 = vld [vmem:[%s12174_s0 + $0xb0] sm:$0xff] }
  0xf5   :  { %1165 = vmatpush.msra.mxu3 %v69_v42  ;;  %v71_v42 = vld [vmem:[#allocation2 + $0x1d0] sm:$0xff] }
  0xf6   :  { %952 = vmatmul.f32.gmra.mxu3 %v8221_v41 }
  0xf7   :  { %1166 = vmatpush.msra.mxu3 %v66_v52 }
  0xf9   :  { %1167 = vmatpush.msra.mxu3 %v63_v57  ;;  %v65_v57 = vld [vmem:[#allocation2 + $0x190] sm:$0xff] }
  0xfa   :  { %6122 = vmatmul.msk.f32.gmra.mxu2 %vm267_vm0, %v250_v55  ;;  %6058 = vmatmul.msk.f32.gmra.mxu0 %vm267_vm0, %v250_v55 }
  0xfb   :  { %6090 = vmatmul.msk.f32.gmra.mxu1 %vm267_vm0, %v250_v55  ;;  %1168 = vmatpush.msra.mxu3 %v60_v58  ;;  %v68_v55 = vld [vmem:[#allocation2 + $0x1b0] sm:$0xff] }
  0xfc   :  { %v62_v58 = vld [vmem:[#allocation2 + $0x170] sm:$0xff] }
  0xfd   :  { %1169 = vmatpush.msra.mxu3 %v57_v59  ;;  %v258_v59 = vld [vmem:[%s12174_s0 + $0xb8] sm:$0xff] }
  0xfe   :  { %955 = vmatmul.f32.gmra.mxu3 %v8262_v1 }
  0xff   :  { %1170 = vmatpush.msra.mxu3 %v54_v60  ;;  %v59_v60 = vld [vmem:[#allocation2 + $0x150] sm:$0xff] }
 0x101   :  { %1171 = vmatpush.msra.mxu3 %v51_v63 }
 0x102   :  { %6123 = vmatmul.msk.f32.gmra.mxu2 %vm267_vm0, %v251_v62  ;;  %6059 = vmatmul.msk.f32.gmra.mxu0 %vm267_vm0, %v251_v62 }
 0x103   :  { %6091 = vmatmul.msk.f32.gmra.mxu1 %vm267_vm0, %v251_v62  ;;  %1172 = vmatpush.msra.mxu3 %v48_v0  ;;  %v56_v0 = vld [vmem:[#allocation2 + $0x130] sm:$0xff] }
 0x105   :  { %1173 = vmatpush.msra.mxu3 %v45_v2  ;;  %v50_v2 = vld [vmem:[#allocation2 + $0xf0] sm:$0xff] }
 0x106   :  { %958 = vmatmul.f32.gmra.mxu3 %v8286_v13 }
 0x107   :  { %1174 = vmatpush.msra.mxu3 %v42_v54  ;;  %v259_v54 = vld [vmem:[%s12174_s0 + $0xc0] sm:$0xff] }
 0x109   :  { %1175 = vmatpush.msra.mxu3 %v39_v10  ;;  %v47_v10 = vld [vmem:[#allocation2 + $0xd0] sm:$0xff] }
 0x10a   :  { %6124 = vmatmul.msk.f32.gmra.mxu2 %vm267_vm0, %v252_v5  ;;  %6060 = vmatmul.msk.f32.gmra.mxu0 %vm267_vm0, %v252_v5 }
 0x10b   :  { %6092 = vmatmul.msk.f32.gmra.mxu1 %vm267_vm0, %v252_v5  ;;  %1176 = vmatpush.msra.mxu3 %v36_v11  ;;  %v186_v11 = vld [vmem:[#allocation2 + $0x580] sm:$0xff] }
 0x10c   :  { %1475 = vmatpush.msrb.mxu0 %v186_v11 }
 0x10d   :  { %1177 = vmatpush.msra.mxu3 %v33_v12  ;;  %v199_v12 = vld [vmem:[#allocation2 + $0x5e8] sm:$0xff] }
 0x10e   :  { %978 = vmatmul.f32.vlgmr.msrb.gmra.mxu3 %v8177_v9  ;;  %1530 = vmatpush.msrb.mxu2 %v199_v12 }
 0x10f   :  { %1178 = vmatpush.msra.mxu3 %v30_v19 }
 0x111   :  { %1192 = vmatpush.msrb.mxu3 %v8374_v21 }
 0x112   :  { %6125 = vmatmul.msk.f32.gmra.mxu2 %vm267_vm0, %v253_v7  ;;  %6061 = vmatmul.msk.f32.gmra.mxu0 %vm267_vm0, %v253_v7 }
 0x113   :  { %6093 = vmatmul.msk.f32.gmra.mxu1 %vm267_vm0, %v253_v7  ;;  %1193 = vmatpush.msrb.mxu3 %v8377_v22  ;;  %v8428_v63 = vpop.f32.mrf.mxu0  ;;  %v44_v7 = vld [vmem:[#allocation2 + $0xb0] sm:$0xff] }
 0x115   :  { %1194 = vmatpush.msrb.mxu3 %v8382_v23 }
 0x116   :  { %981 = vmatmul.f32.gmra.mxu3 %v8221_v41 }
 0x117   :  { %1195 = vmatpush.msrb.mxu3 %v67_v24  ;;  %v41_v24 = vld [vmem:[#allocation2 + $0x90] sm:$0xff] }
 0x119   :  { %1196 = vmatpush.msrb.mxu3 %v64_v25  ;;  %v260_v25 = vld [vmem:[%s12174_s0 + $0xc8] sm:$0xff] }
 0x11a   :  { %6126 = vmatmul.msk.f32.gmra.mxu2 %vm267_vm0, %v254_v27  ;;  %6062 = vmatmul.msk.f32.gmra.mxu0 %vm267_vm0, %v254_v27 }
 0x11b   :  { %6094 = vmatmul.msk.f32.gmra.mxu1 %vm267_vm0, %v254_v27  ;;  %1197 = vmatpush.msrb.mxu3 %v61_v26  ;;  %v38_v26 = vld [vmem:[#allocation2 + $0x70] sm:$0xff] }
 0x11d   :  { %1198 = vmatpush.msrb.mxu3 %v58_v28  ;;  %v35_v28 = vld [vmem:[#allocation2 + $0x50] sm:$0xff] }
 0x11e   :  { %984 = vmatmul.f32.gmra.mxu3 %v8262_v1 }
 0x11f   :  { %1199 = vmatpush.msrb.mxu3 %v55_v29  ;;  %v32_v29 = vld [vmem:[#allocation2 + $0x30] sm:$0xff] }
 0x121   :  { %1200 = vmatpush.msrb.mxu3 %v52_v31 }
 0x122   :  { %6127 = vmatmul.msk.f32.gmra.mxu2 %vm267_vm0, %v255_v33  ;;  %6063 = vmatmul.msk.f32.gmra.mxu0 %vm267_vm0, %v255_v33 }
 0x123   :  { %6095 = vmatmul.msk.f32.gmra.mxu1 %vm267_vm0, %v255_v33  ;;  %1201 = vmatpush.msrb.mxu3 %v49_v32  ;;  %v261_v32 = vld [vmem:[%s12174_s0 + $0xd0] sm:$0xff]  ;;  %v8456_v33 = vld [vmem:[#allocation2 + $0x400] sm:$0xff] }
 0x125   :  { %1202 = vmatpush.msrb.mxu3 %v46_v35  ;;  %v8439_v19 = vpop.f32.mrf.mxu0 }
 0x126   :  { %987 = vmatmul.f32.gmra.mxu3 %v8286_v13 }
 0x127   :  { %1203 = vmatpush.msrb.mxu3 %v43_v36  ;;  %v182_v36 = vld [vmem:[#allocation2 + $0x560] sm:$0xff] }
 0x128   :  { %1476 = vmatpush.msrb.mxu0 %v182_v36 }
 0x129   :  { %1204 = vmatpush.msrb.mxu3 %v40_v37  ;;  %v195_v37 = vld [vmem:[#allocation2 + $0x5c8] sm:$0xff] }
 0x12a   :  { %6128 = vmatmul.msk.f32.gmra.mxu2 %vm267_vm0, %v256_v39  ;;  %6064 = vmatmul.msk.f32.gmra.mxu0 %vm267_vm0, %v256_v39 }
 0x12b   :  { %6096 = vmatmul.msk.f32.gmra.mxu1 %vm267_vm0, %v256_v39  ;;  %1205 = vmatpush.msrb.mxu3 %v37_v38  ;;  %v8464_v38 = vld [vmem:[#allocation2 + $0x3e0] sm:$0xff]  ;;  %v8468_v39 = vperm.slane %v8459_v34, 0 }
 0x12c   :  { %1531 = vmatpush.msrb.mxu2 %v195_v37  ;;  %v8536_v37 = vld [vmem:[#allocation2 + $0x2e0] sm:$0xff] }
 0x12d   :  { %1206 = vmatpush.msrb.mxu3 %v34_v14  ;;  %v8448_v31 = vpop.f32.mrf.mxu0  ;;  %12205 = vst [vmem:[#allocation11_spill] sm:$0xff] %v8468_v39  ;;  %v262_v14 = vld [vmem:[%s12174_s0 + $0xd8] sm:$0xff] }
 0x12e   :  { %1179 = vmatmul.f32.vlgmr.msra.gmra.mxu3 %v8177_v9 }
 0x12f   :  { %1207 = vmatpush.msrb.mxu3 %v31_v46  ;;  %v8478_v46 = vld [vmem:[#allocation2 + $0x3a0] sm:$0xff] }
 0x131   :  { %v8407_v43 = vpop.f32.mrf.mxu3  ;;  %1221 = vmatpush.msra.mxu3 %v77_v47 }
 0x132   :  { %6129 = vmatmul.msk.f32.gmra.mxu2 %vm267_vm0, %v257_v50  ;;  %6065 = vmatmul.msk.f32.gmra.mxu0 %vm267_vm0, %v257_v50  ;;  %v893_v47 = vadd.f32 %v8407_v43, %v8468_v39  ;;  %v8497_v43 = vld [vmem:[%s12174_s0 + $0xe0] sm:$0xff] }
 0x133   :  { %6097 = vmatmul.msk.f32.gmra.mxu1 %vm267_vm0, %v257_v50  ;;  %1222 = vmatpush.msra.mxu3 %v74_v48 }
 0x135   :  { %1223 = vmatpush.msra.mxu3 %v71_v42  ;;  %v8492_v42 = vpop.f32.mrf.mxu2 }
 0x136   :  { %1182 = vmatmul.f32.gmra.mxu3 %v8221_v41  ;;  %12207 = vst [vmem:[#allocation13_spill] sm:$0xff] %v8492_v42  ;;  %v193_v42 = vld [vmem:[#allocation2 + $0x5b8] sm:$0xff] }
 0x137   :  { %1224 = vmatpush.msra.mxu3 %v68_v55  ;;  %v8483_v48 = vpop.f32.mrf.mxu0  ;;  %v178_v55 = vld [vmem:[#allocation2 + $0x540] sm:$0xff] }
 0x138   :  { %12206 = vst [vmem:[#allocation12_spill] sm:$0xff] %v8483_v48  ;;  %1477 = vmatpush.msrb.mxu0 %v178_v55 }
 0x139   :  { %v8416_v52 = vpop.f32.mrf.mxu3  ;;  %1225 = vmatpush.msra.mxu3 %v65_v57  ;;  %v191_v57 = vld [vmem:[#allocation2 + $0x5a8] sm:$0xff] }
 0x13a   :  { %6130 = vmatmul.msk.f32.gmra.mxu2 %vm267_vm0, %v258_v59  ;;  %6066 = vmatmul.msk.f32.gmra.mxu0 %vm267_vm0, %v258_v59 }
 0x13b   :  { %6098 = vmatmul.msk.f32.gmra.mxu1 %vm267_vm0, %v258_v59  ;;  %1226 = vmatpush.msra.mxu3 %v62_v58  ;;  %v6147_v58 = vmul.f32 -1.442695, %v893_v47  ;;  %v8499_v59 = vld [vmem:[#allocation2 + $0x360] sm:$0xff] }
 0x13c   :  { %1532 = vmatpush.msrb.mxu2 %v191_v57 }
 0x13d   :  { %1227 = vmatpush.msra.mxu3 %v59_v60  ;;  %v8503_v60 = vperm.slane %v8459_v34, 1  ;;  %6312 = vpow2.f32 %v6147_v58  ;;  %v8549_v58 = vld [vmem:[#allocation2 + $0x2c0] sm:$0xff] }
 0x13e   :  { %1185 = vmatmul.f32.gmra.mxu3 %v8262_v1 }
 0x13f   :  { %1228 = vmatpush.msra.mxu3 %v56_v0  ;;  %12208 = vst [vmem:[#allocation14_spill] sm:$0xff] %v8503_v60  ;;  %v174_v0 = vld [vmem:[#allocation2 + $0x520] sm:$0xff]  ;;  %v8518_v12 = vpop.f32.mrf.mxu0 }
 0x140   :  { %1478 = vmatpush.msrb.mxu0 %v174_v0  ;;  %12209 = vst [vmem:[#allocation15_spill] sm:$0xff] %v8518_v12  ;;  %v8552_v0 = vld [vmem:[#allocation2 + $0x2a0] sm:$0xff] }
 0x141   :  { %v8425_v62 = vpop.f32.mrf.mxu3  ;;  %1229 = vmatpush.msra.mxu3 %v53_v8  ;;  %v187_v8 = vld [vmem:[#allocation2 + $0x588] sm:$0xff]  ;;  %v162_v12 = vld [vmem:[#allocation2 + $0x4c0] sm:$0xff] }
 0x142   :  { %6131 = vmatmul.msk.f32.gmra.mxu2 %vm267_vm0, %v259_v54  ;;  %6067 = vmatmul.msk.f32.gmra.mxu0 %vm267_vm0, %v259_v54 }
 0x143   :  { %6099 = vmatmul.msk.f32.gmra.mxu1 %vm267_vm0, %v259_v54  ;;  %1230 = vmatpush.msra.mxu3 %v50_v2  ;;  %v896_v2 = vadd.f32 %v8416_v52, %v8468_v39  ;;  %v8510_v54 = vld [vmem:[#allocation2 + $0x340] sm:$0xff]  ;;  %v6313_v36 = vpop.eup %6312 }
 0x144   :  { %1533 = vmatpush.msrb.mxu2 %v187_v8  ;;  %v8541_v47 = vadd.f32 1.0, %v6313_v36  ;;  %v8571_v36 = vld [vmem:[#allocation2 + $0x260] sm:$0xff] }
 0x145   :  { %1231 = vmatpush.msra.mxu3 %v47_v10  ;;  %v6148_v52 = vmul.f32 -1.442695, %v896_v2 }
 0x146   :  { %1188 = vmatmul.f32.gmra.mxu3 %v8286_v13  ;;  %vm1012_vm4 = vweird.f32 %v8541_v47 }
 0x147   :  { %1232 = vmatpush.msra.mxu3 %v44_v7  ;;  %v183_v7 = vld [vmem:[#allocation2 + $0x568] sm:$0xff]  ;;  %6314 = vpow2.f32 %v6148_v52  ;;  %v8555_v8 = vpop.f32.mrf.mxu0 }
 0x148   :  { %1534 = vmatpush.msrb.mxu2 %v183_v7  ;;  %12211 = vst [vmem:[#allocation17_spill] sm:$0xff] %v8555_v8 }
 0x149   :  { %v8436_v5 = vpop.f32.mrf.mxu3  ;;  %1233 = vmatpush.msra.mxu3 %v41_v24  ;;  %v179_v24 = vld [vmem:[#allocation2 + $0x548] sm:$0xff] }
 0x14a   :  { %6132 = vmatmul.msk.f32.gmra.mxu2 %vm267_vm0, %v260_v25  ;;  %6068 = vmatmul.msk.f32.gmra.mxu0 %vm267_vm0, %v260_v25 }
 0x14b   :  { %6100 = vmatmul.msk.f32.gmra.mxu1 %vm267_vm0, %v260_v25  ;;  %1234 = vmatpush.msra.mxu3 %v38_v26  ;;  %v8520_v25 = vld [vmem:[#allocation2 + $0x320] sm:$0xff]  ;;  %v8523_v26 = vpop.f32.mrf.mxu2 }
 0x14c   :  { %12210 = vst [vmem:[#allocation16_spill] sm:$0xff] %v8523_v26  ;;  %1535 = vmatpush.msrb.mxu2 %v179_v24 }
 0x14d   :  { %1235 = vmatpush.msra.mxu3 %v35_v28  ;;  %v8530_v28 = vld [vmem:[#allocation2 + $0x300] sm:$0xff]  ;;  %v6315_v7 = vpop.eup %6314 }
 0x14e   :  { %1208 = vmatmul.f32.vlgmr.msrb.gmra.mxu3 %v8177_v9  ;;  %v8574_v30 = vadd.f32 1.0, %v6315_v7 }
 0x14f   :  { %1236 = vmatpush.msra.mxu3 %v32_v29 }
 0x150   :  { %vm1027_vm7 = vweird.f32 %v8574_v30 }
 0x151   :  { %v921_v27 = vpop.f32.mrf.mxu3  ;;  %1442 = vmatpush.msrb.mxu3 %v8456_v33 }
 0x152   :  { %6133 = vmatmul.msk.f32.gmra.mxu2 %vm267_vm0, %v261_v32  ;;  %6069 = vmatmul.msk.f32.gmra.mxu0 %vm267_vm0, %v261_v32  ;;  %v922_v10 = vadd.f32 %v921_v27, %v8503_v60  ;;  %v8528_v27 = vld [vmem:[%s12174_s0 + $0xe8] sm:$0xff] }
 0x153   :  { %6101 = vmatmul.msk.f32.gmra.mxu1 %vm267_vm0, %v261_v32  ;;  %1443 = vmatpush.msrb.mxu3 %v8464_v38  ;;  %v175_v32 = vld [vmem:[#allocation2 + $0x528] sm:$0xff]  ;;  %v8566_v24 = vpop.f32.mrf.mxu2 }
 0x154   :  { %v6151_v29 = vmul.f32 -1.442695, %v922_v10  ;;  %1536 = vmatpush.msrb.mxu2 %v175_v32  ;;  %v8563_v10 = vld [vmem:[#allocation2 + $0x280] sm:$0xff]  ;;  %12212 = vst [vmem:[#allocation18_spill] sm:$0xff] %v8566_v24  ;;  %v171_v32 = vld [vmem:[#allocation2 + $0x508] sm:$0xff] }
 0x155   :  { %1444 = vmatpush.msrb.mxu3 %v8470_v40  ;;  %v163_v24 = vld [vmem:[#allocation2 + $0x4c8] sm:$0xff] }
 0x156   :  { %1211 = vmatmul.f32.gmra.mxu3 %v8221_v41  ;;  %6316 = vpow2.f32 %v6151_v29  ;;  %v170_v29 = vld [vmem:[#allocation2 + $0x500] sm:$0xff]  ;;  %1537 = vmatpush.msrb.mxu2 %v171_v32  ;;  %v159_v32 = vld [vmem:[#allocation2 + $0x4a8] sm:$0xff] }
 0x157   :  { %1445 = vmatpush.msrb.mxu3 %v8478_v46  ;;  %6318 = vrcp.f32 %v8541_v47  ;;  %1479 = vmatpush.msrb.mxu0 %v170_v29  ;;  %v8591_v29 = vld [vmem:[#allocation2 + $0x220] sm:$0xff] }
 0x159   :  { %v8461_v35 = vpop.f32.mrf.mxu3  ;;  %1446 = vmatpush.msrb.mxu3 %v8489_v51 }
 0x15a   :  { %6134 = vmatmul.msk.f32.gmra.mxu2 %vm267_vm0, %v262_v14  ;;  %6070 = vmatmul.msk.f32.gmra.mxu0 %vm267_vm0, %v262_v14  ;;  %v925_v55 = vadd.f32 %v8461_v35, %v8503_v60  ;;  %v8560_v35 = vld [vmem:[%s12174_s0 + $0xf0] sm:$0xff] }
 0x15b   :  { %6102 = vmatmul.msk.f32.gmra.mxu1 %vm267_vm0, %v262_v14  ;;  %1447 = vmatpush.msrb.mxu3 %v8499_v59  ;;  %v899_v14 = vadd.f32 %v8425_v62, %v8468_v39 }
 0x15c   :  { %v6152_v2 = vmul.f32 -1.442695, %v925_v55  ;;  %v6317_v52 = vpop.eup %6316  ;;  %v167_v55 = vld [vmem:[#allocation2 + $0x4e8] sm:$0xff] }
 0x15d   :  { %1448 = vmatpush.msrb.mxu3 %v8510_v54  ;;  %v6149_v62 = vmul.f32 -1.442695, %v899_v14  ;;  %v166_v14 = vld [vmem:[#allocation2 + $0x4e0] sm:$0xff]  ;;  %v8587_v7 = vadd.f32 1.0, %v6317_v52  ;;  %1538 = vmatpush.msrb.mxu2 %v167_v55 }
 0x15e   :  { %1214 = vmatmul.f32.gmra.mxu3 %v8262_v1  ;;  %1480 = vmatpush.msrb.mxu0 %v166_v14  ;;  %v8597_v14 = vpop.f32.mrf.mxu0 }
 0x15f   :  { %1449 = vmatpush.msrb.mxu3 %v8520_v25  ;;  %6320 = vpow2.f32 %v6149_v62  ;;  %v902_v62 = vadd.f32 %v8436_v5, %v8468_v39  ;;  %1539 = vmatpush.msrb.mxu2 %v163_v24  ;;  %12213 = vst [vmem:[#allocation19_spill] sm:$0xff] %v8597_v14  ;;  %v154_v24 = vld [vmem:[#allocation2 + $0x480] sm:$0xff]  ;;  %v155_v39 = vld [vmem:[#allocation2 + $0x488] sm:$0xff]  ;;  %vm1088_vm10 = vweird.f32 %v8587_v7 }
 0x160   :  { %6322 = vpow2.f32 %v6152_v2  ;;  %v8589_v2 = vpop.eup %6318  ;;  %1481 = vmatpush.msrb.mxu0 %v162_v12  ;;  %v151_v14 = vld [vmem:[#allocation2 + $0x468] sm:$0xff] }
 0x161   :  { %v8486_v50 = vpop.f32.mrf.mxu3  ;;  %1450 = vmatpush.msrb.mxu3 %v8530_v28  ;;  %6324 = vrcp.f32 %v8574_v30  ;;  %v6150_v52 = vmul.f32 -1.442695, %v902_v62  ;;  %v1008_v55 = vmul.f32 %v8589_v2, %v8541_v47  ;;  %1540 = vmatpush.msrb.mxu2 %v159_v32  ;;  %v150_v62 = vld [vmem:[#allocation2 + $0x460] sm:$0xff]  ;;  %vm1013_vm3 = vweird.f32 %v8589_v2 }
 0x162   :  { %6135 = vmatmul.msk.f32.gmra.mxu2 %vm267_vm0, %v8497_v43  ;;  %6071 = vmatmul.msk.f32.gmra.mxu0 %vm267_vm0, %v8497_v43  ;;  %v928_v44 = vadd.f32 %v8486_v50, %v8503_v60  ;;  %v158_v50 = vld [vmem:[#allocation2 + $0x4a0] sm:$0xff]  ;;  %6326 = vrcp.f32 %v8587_v7  ;;  %vm8657_vm5 = vmor %vm1012_vm4, %vm1013_vm3 }
 0x163   :  { %1451 = vmatpush.msrb.mxu3 %v8536_v37  ;;  %1482 = vmatpush.msrb.mxu0 %v158_v50 }
 0x164   :  { %v6153_v26 = vmul.f32 -1.442695, %v928_v44  ;;  %v8603_v44 = vpop.f32.mrf.mxu2  ;;  %1541 = vmatpush.msrb.mxu2 %v155_v39 }
 0x165   :  { %1452 = vmatpush.msrb.mxu3 %v8549_v58  ;;  %v6321_v5 = vpop.eup %6320  ;;  %12214 = vst [vmem:[#allocation20_spill] sm:$0xff] %v8603_v44  ;;  %1483 = vmatpush.msrb.mxu0 %v154_v24  ;;  %v147_v24 = vld [vmem:[#allocation2 + $0x448] sm:$0xff] }
 0x166   :  { %1217 = vmatmul.f32.gmra.mxu3 %v8286_v13  ;;  %v6323_v12 = vpop.eup %6322  ;;  %6328 = vpow2.f32 %v6153_v26  ;;  %1542 = vmatpush.msrb.mxu2 %v151_v14 }
 0x167   :  { %1453 = vmatpush.msrb.mxu3 %v8552_v0  ;;  %6330 = vpow2.f32 %v6150_v52  ;;  %v8616_v44 = vadd.f32 1.0, %v6323_v12  ;;  %1484 = vmatpush.msrb.mxu0 %v150_v62  ;;  %v205_v12 = vld [vmem:[#allocation2 + $0x618] sm:$0xff]  ;;  %v8633_v62 = vpop.f32.mrf.mxu0 }
 0x168   :  { %1543 = vmatpush.msrb.mxu2 %v147_v24  ;;  %12215 = vst [vmem:[#allocation21_spill] sm:$0xff] %v8633_v62 }
 0x169   :  { %v8514_v11 = vpop.f32.mrf.mxu3  ;;  %1454 = vmatpush.msrb.mxu3 %v8563_v10  ;;  %vm1103_vm2 = vweird.f32 %v8616_v44 }
 0x16a   :  { %6136 = vmatmul.msk.f32.gmra.mxu2 %vm267_vm0, %v8528_v27  ;;  %6072 = vmatmul.msk.f32.gmra.mxu0 %vm267_vm0, %v8528_v27  ;;  %v931_v50 = vadd.f32 %v8514_v11, %v8503_v60  ;;  %v143_v11 = vld [vmem:[#allocation2 + $0x428] sm:$0xff]  ;;  %v197_v60 = vld [vmem:[#allocation2 + $0x5d8] sm:$0xff] }
 0x16b   :  { %1455 = vmatpush.msrb.mxu3 %v8571_v36  ;;  %1544 = vmatpush.msrb.mxu2 %v143_v11 }
 0x16c   :  { %v6154_v39 = vmul.f32 -1.442695, %v931_v50  ;;  %v200_v50 = vld [vmem:[#allocation2 + $0x5f0] sm:$0xff] }
 0x16d   :  { %1645 = vmatpush.msra.mxu2 %v205_v12 }
 0x16e   :  { %1237 = vmatmul.f32.vlgmr.msra.gmra.mxu3 %v8177_v9  ;;  %v1009_v9 = vsub.f32 1.0, %v1008_v55  ;;  %v204_v55 = vld [vmem:[#allocation2 + $0x610] sm:$0xff] }
 0x171   :  { %v8545_v57 = vpop.f32.mrf.mxu3 }
 0x172   :  { %6137 = vmatmul.msk.f32.gmra.mxu2 %vm267_vm0, %v8560_v35  ;;  %6073 = vmatmul.msk.f32.gmra.mxu0 %vm267_vm0, %v8560_v35 }
 0x176   :  { %1240 = vmatmul.f32.gmra.mxu3 %v8221_v41  ;;  %v8582_v41 = vld [vmem:[#allocation2 + $0x240] sm:$0xff] }
 0x177   :  { %1456 = vmatpush.msrb.mxu3 %v8582_v41 }
 0x179   :  { %v8578_v8 = vpop.f32.mrf.mxu3  ;;  %1457 = vmatpush.msrb.mxu3 %v8591_v29 }
 0x17b   :  { %1558 = vmatpush.msra.mxu3 %v8226_v45  ;;  %v6928_v45 = vld [vmem:[%s12174_s0 + $0xf8] sm:$0xff] }
 0x17c   :  { %6138 = vmatmul.msk.f32.gmra.mxu2 %vm267_vm0, %v6928_v45  ;;  %v8618_v45 = vpop.eup %6324 }
 0x17d   :  { %1559 = vmatpush.msra.mxu3 %v8234_v49  ;;  %v146_v49 = vld [vmem:[#allocation2 + $0x440] sm:$0xff]  ;;  %v8621_v26 = vpop.eup %6326  ;;  %v1023_v52 = vmul.f32 %v8618_v45, %v8574_v30  ;;  %vm1028_vm8 = vweird.f32 %v8618_v45 }
 0x17e   :  { %1243 = vmatmul.f32.gmra.mxu3 %v8262_v1  ;;  %v8609_v1 = vadd.f32 1.0, %v6321_v5  ;;  %v142_v5 = vld [vmem:[#allocation2 + $0x420] sm:$0xff]  ;;  %1485 = vmatpush.msrb.mxu0 %v146_v49  ;;  %v1084_v14 = vmul.f32 %v8621_v26, %v8587_v7  ;;  %v8635_v49 = vpop.f32.mrf.mxu1  ;;  %vm1089_vm9 = vweird.f32 %v8621_v26  ;;  %vm8712_vm11 = vmor %vm1027_vm7, %vm1028_vm8 }
 0x17f   :  { %1560 = vmatpush.msra.mxu3 %v8243_v56  ;;  %v1010_v56 = vmul.f32 %v8589_v2, %v1009_v9  ;;  %v201_v9 = vld [vmem:[#allocation2 + $0x5f8] sm:$0xff]  ;;  %12216 = vst [vmem:[#allocation22_spill] sm:$0xff] %v8635_v49  ;;  %6103 = vmatmul.msk.f32.gmra.mxu1 %vm267_vm0, %v8497_v43  ;;  %vm8721_vm12 = vmor %vm1088_vm10, %vm1089_vm9 }
 0x180   :  { %6332 = vrcp.f32 %v8609_v1  ;;  %1486 = vmatpush.msrb.mxu0 %v142_v5  ;;  %v196_v5 = vld [vmem:[#allocation2 + $0x5d0] sm:$0xff]  ;;  %1646 = vmatpush.msra.mxu2 %v201_v9  ;;  %v1085_v62 = vsub.f32 1.0, %v1084_v14  ;;  %v177_v49 = vld [vmem:[#allocation2 + $0x538] sm:$0xff]  ;;  %vm1042_vm4 = vweird.f32 %v8609_v1 }
 0x181   :  { %v8613_v32 = vpop.f32.mrf.mxu3  ;;  %1561 = vmatpush.msra.mxu3 %v8250_v61  ;;  %6334 = vrcp.f32 %v8616_v44  ;;  %v6329_v61 = vpop.eup %6328  ;;  %v1011_v11 = vadd.f32 %v8589_v2, %v1010_v56  ;;  %v188_v9 = vld [vmem:[#allocation2 + $0x590] sm:$0xff]  ;;  %v181_v56 = vld [vmem:[#allocation2 + $0x558] sm:$0xff] }
 0x182   :  { %1587 = vmatpush.msra.mxu0 %v204_v55  ;;  %6336 = vpow2.f32 %v6154_v39  ;;  %v1024_v55 = vsub.f32 1.0, %v1023_v52  ;;  %1647 = vmatpush.msra.mxu2 %v197_v60  ;;  %v1016_v52 = vand.u32 2147483647, %v8541_v47 }
 0x183   :  { %1562 = vmatpush.msra.mxu3 %v8267_v3  ;;  %v6331_v3 = vpop.eup %6330 }
 0x184   :  { %1588 = vmatpush.msra.mxu0 %v200_v50  ;;  %v8648_v39 = vadd.f32 1.0, %v6331_v3  ;;  %v1025_v60 = vmul.f32 %v8618_v45, %v1024_v55  ;;  %1648 = vmatpush.msra.mxu2 %v193_v42  ;;  %v8675_v3 = vpop.f32.mrf.mxu2  ;;  %vm1017_vm6 = vcmp.eq.f32.partialorder %v1016_v52, 8.507059e+37  ;;  %v180_v55 = vld [vmem:[#allocation2 + $0x550] sm:$0xff] }
 0x185   :  { %1563 = vmatpush.msra.mxu3 %v8271_v4  ;;  %v8642_v4 = vadd.f32 1.0, %v6329_v61  ;;  %v1015_v61 = vsel %vm8657_vm5, %v8589_v2, %v1011_v11  ;;  %12219 = vst [vmem:[#allocation23_spill] sm:$0xff] %v8675_v3  ;;  %v184_v2 = vld [vmem:[#allocation2 + $0x570] sm:$0xff] }
 0x186   :  { %1246 = vmatmul.f32.gmra.mxu3 %v8286_v13  ;;  %v8646_v12 = vpop.eup %6332  ;;  %v192_v13 = vld [vmem:[#allocation2 + $0x5b0] sm:$0xff]  ;;  %1589 = vmatpush.msra.mxu0 %v196_v5  ;;  %v189_v5 = vld [vmem:[#allocation2 + $0x598] sm:$0xff]  ;;  %v8685_v3 = vpop.f32.mrf.mxu1 }
 0x187   :  { %1564 = vmatpush.msra.mxu3 %v8276_v6  ;;  %v8651_v43 = vpop.eup %6334  ;;  %v1018_v6 = vand.u32 2147483648, %v8541_v47  ;;  %6338 = vrcp.f32 %v8642_v4  ;;  %v1086_v47 = vmul.f32 %v8621_v26, %v1085_v62  ;;  %v1038_v50 = vmul.f32 %v8646_v12, %v8609_v1  ;;  %1649 = vmatpush.msra.mxu2 %v189_v5  ;;  %v185_v62 = vld [vmem:[#allocation2 + $0x578] sm:$0xff]  ;;  %12220 = vst [vmem:[#allocation24_spill] sm:$0xff] %v8685_v3 }
 0x188   :  { %1590 = vmatpush.msra.mxu0 %v192_v13  ;;  %v6337_v14 = vpop.eup %6336  ;;  %6340 = vrcp.f32 %v8648_v39  ;;  %v8681_v13 = vperm.slane %v8459_v34, 2  ;;  %6104 = vmatmul.msk.f32.gmra.mxu1 %vm267_vm0, %v8528_v27  ;;  %v176_v27 = vld [vmem:[#allocation2 + $0x530] sm:$0xff]  ;;  %vm1043_vm15 = vweird.f32 %v8646_v12  ;;  %vm1104_vm1 = vweird.f32 %v8651_v43 }
 0x189   :  { %v8637_v24 = vpop.f32.mrf.mxu3  ;;  %1565 = vmatpush.msra.mxu3 %v8280_v53  ;;  %v8665_v53 = vperm.slane %v8459_v34, 3  ;;  %v1019_v42 = vor.u32 1.1754944e-38, %v1018_v6  ;;  %v8692_v34 = vpop.f32.mrf.mxu0  ;;  %1650 = vmatpush.msra.mxu2 %v185_v62  ;;  %v1039_v3 = vsub.f32 1.0, %v1038_v50  ;;  %v1087_v48 = vadd.f32 %v8621_v26, %v1086_v47  ;;  %v8751_v50 = vld [vmem:[#allocation2 + $0x230] sm:$0xff]  ;;  %vm8766_vm3 = vmor %vm1103_vm2, %vm1104_vm1 }
 0x18a   :  { %1591 = vmatpush.msra.mxu0 %v188_v9  ;;  %v1026_v9 = vadd.f32 %v8618_v45, %v1025_v60  ;;  %v1031_v47 = vand.u32 2147483647, %v8574_v30  ;;  %vm8779_vm5 = vmor %vm1042_vm4, %vm1043_vm15  ;;  %vm1118_vm9 = vweird.f32 %v8642_v4 }
 0x18b   :  { %1566 = vmatpush.msra.mxu3 %v8288_v15  ;;  %v1099_v15 = vmul.f32 %v8651_v43, %v8616_v44  ;;  %v1020_v52 = vsel %vm1017_vm6, %v1019_v42, %v1015_v61  ;;  %v951_v61 = vadd.f32 %v8545_v57, %v8681_v13  ;;  %v1033_v42 = vand.u32 2147483648, %v8574_v30  ;;  %1651 = vmatpush.msra.mxu2 %v181_v56  ;;  %v173_v56 = vld [vmem:[#allocation2 + $0x518] sm:$0xff] }
 0x18c   :  { %1592 = vmatpush.msra.mxu0 %v184_v2  ;;  %v1092_v57 = vand.u32 2147483647, %v8587_v7  ;;  %v1030_v62 = vsel %vm8712_vm11, %v8618_v45, %v1026_v9  ;;  %v8741_v9 = vpop.f32.mrf.mxu2  ;;  %vm1032_vm13 = vcmp.eq.f32.partialorder %v1031_v47, 8.507059e+37  ;;  %v164_v47 = vld [vmem:[#allocation2 + $0x4d0] sm:$0xff]  ;;  %vm1057_vm11 = vweird.f32 %v8648_v39 }
 0x18d   :  { %1567 = vmatpush.msra.mxu3 %v8292_v16  ;;  %v8690_v16 = vadd.f32 1.0, %v6337_v14  ;;  %v1100_v5 = vsub.f32 1.0, %v1099_v15  ;;  %v1094_v14 = vand.u32 2147483648, %v8587_v7  ;;  %1652 = vmatpush.msra.mxu2 %v177_v49  ;;  %v1040_v7 = vmul.f32 %v8646_v12, %v1039_v3 }
 0x18e   :  { %1593 = vmatpush.msra.mxu0 %v180_v55  ;;  %v172_v55 = vld [vmem:[#allocation2 + $0x510] sm:$0xff]  ;;  %v1034_v49 = vor.u32 1.1754944e-38, %v1033_v42  ;;  %vm1093_vm14 = vcmp.eq.f32.partialorder %v1092_v57, 8.507059e+37  ;;  %v165_v57 = vld [vmem:[#allocation2 + $0x4d8] sm:$0xff] }
 0x18f   :  { %1568 = vmatpush.msra.mxu3 %v8297_v17  ;;  %v8699_v17 = vpop.eup %6338  ;;  %6342 = vrcp.f32 %v8690_v16  ;;  %v1101_v30 = vmul.f32 %v8651_v43, %v1100_v5  ;;  %v1095_v45 = vor.u32 1.1754944e-38, %v1094_v14  ;;  %1653 = vmatpush.msra.mxu2 %v173_v56  ;;  %v8743_v5 = vld [vmem:[#allocation2 + $0x250] sm:$0xff]  ;;  %v1041_v42 = vadd.f32 %v8646_v12, %v1040_v7 }
 0x190   :  { %v8705_v15 = vpop.eup %6340  ;;  %1594 = vmatpush.msra.mxu0 %v176_v27  ;;  %v1035_v14 = vsel %vm1032_vm13, %v1034_v49, %v1030_v62  ;;  %v1109_v62 = vand.u32 2147483648, %v8616_v44  ;;  %v160_v49 = vld [vmem:[#allocation2 + $0x4b0] sm:$0xff]  ;;  %vm1119_vm8 = vweird.f32 %v8699_v17  ;;  %vm1133_vm1 = vweird.f32 %v8690_v16 }
 0x191   :  { %v979_v11 = vpop.f32.mrf.mxu3  ;;  %1569 = vmatpush.msra.mxu3 %v8301_v18  ;;  %v1102_v18 = vadd.f32 %v8651_v43, %v1101_v30  ;;  %v1048_v30 = vand.u32 2147483648, %v8609_v1  ;;  %vm1058_vm7 = vweird.f32 %v8705_v15  ;;  %vm8811_vm10 = vmor %vm1118_vm9, %vm1119_vm8 }
 0x192   :  { %v980_v6 = vadd.f32 %v979_v11, %v8665_v53  ;;  %v1091_v11 = vsel %vm8721_vm12, %v8621_v26, %v1087_v48  ;;  %1595 = vmatpush.msra.mxu0 %v172_v55  ;;  %v168_v48 = vld [vmem:[#allocation2 + $0x4f0] sm:$0xff]  ;;  %v169_v26 = vld [vmem:[#allocation2 + $0x4f8] sm:$0xff]  ;;  %v8759_v55 = vpop.f32.mrf.mxu0  ;;  %vm8824_vm12 = vmor %vm1057_vm11, %vm1058_vm7 }
 0x193   :  { %1570 = vmatpush.msra.mxu3 %v8307_v20  ;;  %v1114_v20 = vmul.f32 %v8699_v17, %v8642_v4  ;;  %1654 = vmatpush.msra.mxu2 %v169_v26 }
 0x194   :  { %v1143_v60 = vmul.f32 %v1020_v52, %v980_v6  ;;  %v8736_v6 = vld [vmem:[#allocation2 + $0x270] sm:$0xff]  ;;  %v1053_v52 = vmul.f32 %v8705_v15, %v8648_v39  ;;  %1596 = vmatpush.msra.mxu0 %v168_v48 }
 0x195   :  { %1571 = vmatpush.msra.mxu3 %v8736_v6  ;;  %1655 = vmatpush.msra.mxu2 %v165_v57  ;;  %v156_v57 = vld [vmem:[#allocation2 + $0x490] sm:$0xff] }
 0x196   :  { %v1147_v2 = vadd.f32 %v1143_v60, %v951_v61  ;;  %v1096_v61 = vsel %vm1093_vm14, %v1095_v45, %v1091_v11  ;;  %v1115_v60 = vsub.f32 1.0, %v1114_v20  ;;  %v954_v11 = vadd.f32 %v8578_v8, %v8681_v13  ;;  %1597 = vmatpush.msra.mxu0 %v164_v47 }
 0x197   :  { %1572 = vmatpush.msra.mxu3 %v8743_v5  ;;  %v1054_v56 = vsub.f32 1.0, %v1053_v52  ;;  %v1155_v7 = vsub.f32 1.0, %v1096_v61  ;;  %v1107_v45 = vand.u32 2147483647, %v8616_v44  ;;  %v1046_v52 = vand.u32 2147483647, %v8609_v1 }
 0x198   :  { %6344 = vtanh.f32 %v1147_v2  ;;  %v8754_v2 = vpop.eup %6342  ;;  %1598 = vmatpush.msra.mxu0 %v160_v49  ;;  %v1116_v44 = vmul.f32 %v8699_v17, %v1115_v60  ;;  %v1106_v1 = vsel %vm8766_vm3, %v8651_v43, %v1102_v18  ;;  %v1110_v60 = vor.u32 1.1754944e-38, %v1109_v62  ;;  %v152_v43 = vld [vmem:[#allocation2 + $0x470] sm:$0xff]  ;;  %v153_v18 = vld [vmem:[#allocation2 + $0x478] sm:$0xff] }
 0x199   :  { %v982_v3 = vpop.f32.mrf.mxu3  ;;  %1573 = vmatpush.msra.mxu3 %v8751_v50  ;;  %v1055_v49 = vmul.f32 %v8705_v15, %v1054_v56  ;;  %vm1108_vm6 = vcmp.eq.f32.partialorder %v1107_v45, 8.507059e+37  ;;  %v149_v45 = vld [vmem:[#allocation2 + $0x458] sm:$0xff]  ;;  %v1124_v8 = vand.u32 2147483648, %v8642_v4  ;;  %vm1134_vm15 = vweird.f32 %v8754_v2 }
 0x19a   :  { %v983_v27 = vadd.f32 %v982_v3, %v8665_v53  ;;  %v161_v3 = vld [vmem:[#allocation2 + $0x4b8] sm:$0xff]  ;;  %1599 = vmatpush.msra.mxu0 %v156_v57  ;;  %v1111_v62 = vsel %vm1108_vm6, %v1110_v60, %v1106_v1  ;;  %v1122_v57 = vand.u32 2147483647, %v8642_v4  ;;  %vm8854_vm2 = vmor %vm1133_vm1, %vm1134_vm15 }
 0x19b   :  { %1656 = vmatpush.msra.mxu2 %v161_v3  ;;  %v1049_v3 = vor.u32 1.1754944e-38, %v1048_v30  ;;  %v1117_v30 = vadd.f32 %v8699_v17, %v1116_v44  ;;  %v1056_v61 = vadd.f32 %v8705_v15, %v1055_v49  ;;  %v1156_v1 = vsub.f32 1.0, %v1111_v62  ;;  %v144_v44 = vld [vmem:[#allocation2 + $0x430] sm:$0xff] }
 0x19c   :  { %v1144_v20 = vmul.f32 %v1035_v14, %v983_v27  ;;  %v8772_v27 = vpop.f32.mrf.mxu1  ;;  %v1129_v14 = vmul.f32 %v8754_v2, %v8690_v16  ;;  %6105 = vmatmul.msk.f32.gmra.mxu1 %vm267_vm0, %v8560_v35  ;;  %vm1047_vm0 = vcmp.eq.f32.partialorder %v1046_v52, 8.507059e+37  ;;  %1600 = vmatpush.msra.mxu0 %v152_v43  ;;  %vm1123_vm13 = vcmp.eq.f32.partialorder %v1122_v57, 8.507059e+37  ;;  %v6933_v57 = vld [vmem:[#allocation2 + $0x188] sm:$0xff] }
 0x19d   :  { %v1060_v62 = vsel %vm8824_vm12, %v8705_v15, %v1056_v61  ;;  %v1139_v15 = vand.u32 2147483648, %v8690_v16  ;;  %v6937_v43 = vld [vmem:[#allocation2 + $0x108] sm:$0xff] }
 0x19e   :  { %v6345_v48 = vpop.eup %6344  ;;  %v1148_v26 = vadd.f32 %v1144_v20, %v954_v11  ;;  %v157_v11 = vld [vmem:[#allocation2 + $0x498] sm:$0xff]  ;;  %v1045_v20 = vsel %vm8779_vm5, %v8646_v12, %v1041_v42  ;;  %v1130_v12 = vsub.f32 1.0, %v1129_v14  ;;  %v8799_v42 = vpop.f32.mrf.mxu2  ;;  %v1063_v14 = vand.u32 2147483648, %v8648_v39 }
 0x19f   :  { %v8783_v47 = vmul.f32 %v6345_v48, %v1155_v7  ;;  %1657 = vmatpush.msra.mxu2 %v157_v11  ;;  %v1050_v56 = vsel %vm1047_vm0, %v1049_v3, %v1045_v20  ;;  %v148_v48 = vld [vmem:[#allocation2 + $0x450] sm:$0xff]  ;;  %v145_v11 = vld [vmem:[#allocation2 + $0x438] sm:$0xff] }
 0x1a0   :  { %6346 = vtanh.f32 %v1148_v26  ;;  %v957_v26 = vadd.f32 %v8613_v32, %v8681_v13  ;;  %1601 = vmatpush.msra.mxu0 %v148_v48  ;;  %v8815_v32 = vpop.f32.mrf.mxu0  ;;  %v1131_v4 = vmul.f32 %v8754_v2, %v1130_v12 }
 0x1a1   :  { %v985_v7 = vpop.f32.mrf.mxu3  ;;  %1487 = vmatmul.f32.vlgmr.msrb.gmra.mxu0 %v8783_v47  ;;  %1545 = vmatmul.f32.vlgmr.msrb.gmra.mxu2 %v8783_v47 }
 0x1a2   :  { %v986_v35 = vadd.f32 %v985_v7, %v8665_v53  ;;  %1658 = vmatpush.msra.mxu2 %v153_v18  ;;  %v1061_v7 = vand.u32 2147483647, %v8648_v39  ;;  %1602 = vmatpush.msra.mxu0 %v144_v44  ;;  %v1125_v39 = vor.u32 1.1754944e-38, %v1124_v8  ;;  %v1137_v8 = vand.u32 2147483647, %v8690_v16 }
 0x1a4   :  { %v1145_v52 = vmul.f32 %v1050_v56, %v986_v35  ;;  %1659 = vmatpush.msra.mxu2 %v149_v45  ;;  %v8819_v3 = vpop.f32.mrf.mxu1  ;;  %v1121_v35 = vsel %vm8811_vm10, %v8699_v17, %v1117_v30  ;;  %1883 = vmatpush.msrb.mxu0 %v8374_v21  ;;  %v1064_v56 = vor.u32 1.1754944e-38, %v1063_v14  ;;  %vm1062_vm14 = vcmp.eq.f32.partialorder %v1061_v7, 8.507059e+37 }
 0x1a5   :  { %v1126_v17 = vsel %vm1123_vm13, %v1125_v39, %v1121_v35  ;;  %v960_v30 = vadd.f32 %v8637_v24, %v8681_v13  ;;  %v6932_v24 = vld [vmem:[#allocation2 + $0x1a8] sm:$0xff]  ;;  %vm1138_vm3 = vcmp.eq.f32.partialorder %v1137_v8, 8.507059e+37  ;;  %v6950_v8 = vld [vmem:[#allocation2 + $0x3d0] sm:$0xff] }
 0x1a6   :  { %v6347_v60 = vpop.eup %6346  ;;  %v1149_v49 = vadd.f32 %v1145_v52, %v957_v26  ;;  %1660 = vmatpush.msra.mxu2 %v145_v11  ;;  %1884 = vmatpush.msrb.mxu0 %v8377_v22  ;;  %v1065_v21 = vsel %vm1062_vm14, %v1064_v56, %v1060_v62  ;;  %v8851_v22 = vpop.f32.mrf.mxu2  ;;  %v6934_v11 = vld [vmem:[#allocation2 + $0x168] sm:$0xff] }
 0x1a7   :  { %v8828_v18 = vmul.f32 %v6347_v60, %v1156_v1  ;;  %v1140_v1 = vor.u32 1.1754944e-38, %v1139_v15  ;;  %v6938_v35 = vld [vmem:[#allocation2 + $0xe8] sm:$0xff] }
 0x1a8   :  { %2133 = vmatpush.msrb.mxu2 %v8456_v33  ;;  %6348 = vtanh.f32 %v1149_v49  ;;  %v1132_v33 = vadd.f32 %v8754_v2, %v1131_v4  ;;  %1885 = vmatpush.msrb.mxu0 %v8382_v23  ;;  %v8866_v16 = vpop.f32.mrf.mxu0  ;;  %v6940_v62 = vld [vmem:[#allocation2 + $0xa8] sm:$0xff] }
 0x1a9   :  { %v988_v12 = vpop.f32.mrf.mxu3  ;;  %1490 = vmatmul.f32.gmra.mxu0 %v8828_v18  ;;  %1548 = vmatmul.f32.gmra.mxu2 %v8828_v18  ;;  %12235 = vst [vmem:[#allocation25_spill] sm:$0xff] %v8866_v16  ;;  %v6951_v52 = vld [vmem:[#allocation2 + $0x3a8] sm:$0xff] }
 0x1aa   :  { %v989_v48 = vadd.f32 %v988_v12, %v8665_v53  ;;  %2134 = vmatpush.msrb.mxu2 %v8464_v38  ;;  %v1157_v38 = vsub.f32 1.0, %v1126_v17  ;;  %1886 = vmatpush.msrb.mxu0 %v6932_v24 }
 0x1ac   :  { %v1146_v45 = vmul.f32 %v1065_v21, %v989_v48  ;;  %2135 = vmatpush.msrb.mxu2 %v8470_v40  ;;  %v8858_v14 = vpop.f32.mrf.mxu1  ;;  %v1136_v40 = vsel %vm8854_vm2, %v8754_v2, %v1132_v33  ;;  %1887 = vmatpush.msrb.mxu0 %v6933_v57  ;;  %v6935_v2 = vld [vmem:[#allocation2 + $0x148] sm:$0xff]  ;;  %v6954_v57 = vld [vmem:[#allocation2 + $0x390] sm:$0xff] }
 0x1ad   :  { %v6944_v21 = vld [vmem:[#allocation2 + $0x28] sm:$0xff] }
 0x1ae   :  { %v6349_v26 = vpop.eup %6348  ;;  %v1150_v61 = vadd.f32 %v1146_v45, %v960_v30  ;;  %2136 = vmatpush.msrb.mxu2 %v8478_v46  ;;  %v1141_v46 = vsel %vm1138_vm3, %v1140_v1, %v1136_v40  ;;  %1888 = vmatpush.msrb.mxu0 %v6934_v11  ;;  %v8876_v7 = vpop.f32.mrf.mxu2  ;;  %v6945_v33 = vld [vmem:[#allocation2 + $0x408] sm:$0xff]  ;;  %v6948_v30 = vld [vmem:[#allocation2 + $0x3f0] sm:$0xff] }
 0x1af   :  { %v8861_v23 = vmul.f32 %v6349_v26, %v1157_v38  ;;  %v1158_v60 = vsub.f32 1.0, %v1141_v46  ;;  %12236 = vst [vmem:[#allocation26_spill] sm:$0xff] %v8876_v7  ;;  %v6953_v1 = vld [vmem:[#allocation2 + $0x388] sm:$0xff] }
 0x1b0   :  { %6350 = vtanh.f32 %v1150_v61  ;;  %2137 = vmatpush.msrb.mxu2 %v8489_v51  ;;  %1889 = vmatpush.msrb.mxu0 %v6935_v2  ;;  %v6936_v51 = vld [vmem:[#allocation2 + $0x128] sm:$0xff]  ;;  %v6952_v61 = vld [vmem:[#allocation2 + $0x3b0] sm:$0xff] }
 0x1b1   :  { %v1180_v44 = vpop.f32.mrf.mxu3  ;;  %1493 = vmatmul.f32.gmra.mxu0 %v8861_v23  ;;  %1551 = vmatmul.f32.gmra.mxu2 %v8861_v23  ;;  %v12242_v46 = vld [vmem:[#allocation22_spill] sm:$0xff] }
 0x1b2   :  { %2138 = vmatpush.msrb.mxu2 %v8499_v59  ;;  %1890 = vmatpush.msrb.mxu0 %v6936_v51  ;;  %v6955_v2 = vld [vmem:[#allocation2 + $0x368] sm:$0xff] }
 0x1b4   :  { %2139 = vmatpush.msrb.mxu2 %v8510_v54  ;;  %v8873_v49 = vpop.f32.mrf.mxu1  ;;  %1891 = vmatpush.msrb.mxu0 %v6937_v43  ;;  %v8883_v54 = vpop.f32.mrf.mxu0 }
 0x1b5   :  { %12237 = vst [vmem:[#allocation27_spill] sm:$0xff] %v8883_v54 }
 0x1b6   :  { %v6351_v20 = vpop.eup %6350  ;;  %2140 = vmatpush.msrb.mxu2 %v8520_v25  ;;  %1892 = vmatpush.msrb.mxu0 %v6938_v35  ;;  %v6939_v25 = vld [vmem:[#allocation2 + $0xc8] sm:$0xff]  ;;  %v8891_v12 = vpop.f32.mrf.mxu2 }
 0x1b7   :  { %v8878_v4 = vmul.f32 %v6351_v20, %v1158_v60  ;;  %12238 = vst [vmem:[#allocation28_spill] sm:$0xff] %v8891_v12  ;;  %v6956_v60 = vld [vmem:[#allocation2 + $0x370] sm:$0xff] }
 0x1b8   :  { %2141 = vmatpush.msrb.mxu2 %v8530_v28  ;;  %1893 = vmatpush.msrb.mxu0 %v6939_v25  ;;  %v6941_v28 = vld [vmem:[#allocation2 + $0x88] sm:$0xff] }
 0x1b9   :  { %v1183_v59 = vpop.f32.mrf.mxu3  ;;  %1496 = vmatmul.f32.gmra.mxu0 %v8878_v4  ;;  %1554 = vmatmul.f32.gmra.mxu2 %v8878_v4 }
 0x1ba   :  { %2142 = vmatpush.msrb.mxu2 %v8536_v37  ;;  %1894 = vmatpush.msrb.mxu0 %v6940_v62  ;;  %v1250_v37 = vadd.f32 %v1180_v44, %v8428_v63  ;;  %v6946_v63 = vld [vmem:[#allocation2 + $0x410] sm:$0xff]  ;;  %v1251_v15 = vadd.f32 %v1183_v59, %v8439_v19 }
 0x1bb   :  { %v6958_v59 = vld [vmem:[#allocation2 + $0x350] sm:$0xff] }
 0x1bc   :  { %2143 = vmatpush.msrb.mxu2 %v8549_v58  ;;  %v8887_v39 = vpop.f32.mrf.mxu1  ;;  %1895 = vmatpush.msrb.mxu0 %v6941_v28  ;;  %v6942_v58 = vld [vmem:[#allocation2 + $0x68] sm:$0xff]  ;;  %v8897_v48 = vpop.f32.mrf.mxu0  ;;  %v6156_v38 = vmul.f32 -1.442695, %v1251_v15  ;;  %v12246_v15 = vld [vmem:[#allocation24_spill] sm:$0xff] }
 0x1bd   :  { %12239 = vst [vmem:[#allocation29_spill] sm:$0xff] %v8897_v48  ;;  %v6959_v28 = vld [vmem:[#allocation2 + $0x328] sm:$0xff] }
 0x1be   :  { %2144 = vmatpush.msrb.mxu2 %v8552_v0  ;;  %1896 = vmatpush.msrb.mxu0 %v6942_v58  ;;  %v6943_v0 = vld [vmem:[#allocation2 + $0x48] sm:$0xff]  ;;  %v8906_v45 = vpop.f32.mrf.mxu2  ;;  %v12245_v58 = vld [vmem:[#allocation12_spill] sm:$0xff] }
 0x1bf   :  { %12240 = vst [vmem:[#allocation30_spill] sm:$0xff] %v8906_v45 }
 0x1c0   :  { %2145 = vmatpush.msrb.mxu2 %v8563_v10  ;;  %1897 = vmatpush.msrb.mxu0 %v6943_v0  ;;  %v6155_v10 = vmul.f32 -1.442695, %v1250_v37 }
 0x1c1   :  { %v1186_v56 = vpop.f32.mrf.mxu3  ;;  %1603 = vmatmul.f32.vlgmr.msra.gmra.mxu0 %v8783_v47  ;;  %1661 = vmatmul.f32.vlgmr.msra.gmra.mxu2 %v8783_v47 }
 0x1c2   :  { %2146 = vmatpush.msrb.mxu2 %v8571_v36  ;;  %1898 = vmatpush.msrb.mxu0 %v6944_v21  ;;  %6352 = vpow2.f32 %v6155_v10  ;;  %v1252_v40 = vadd.f32 %v1186_v56, %v8448_v31  ;;  %v6957_v31 = vld [vmem:[#allocation2 + $0x348] sm:$0xff]  ;;  %v6960_v56 = vld [vmem:[#allocation2 + $0x330] sm:$0xff] }
 0x1c3   :  { %6354 = vpow2.f32 %v6156_v38  ;;  %v6961_v10 = vld [vmem:[#allocation2 + $0x308] sm:$0xff]  ;;  %v6962_v21 = vld [vmem:[#allocation2 + $0x310] sm:$0xff] }
 0x1c4   :  { %2147 = vmatpush.msrb.mxu2 %v8582_v41  ;;  %v8900_v17 = vpop.f32.mrf.mxu1  ;;  %2191 = vmatpush.msra.mxu0 %v6945_v33  ;;  %v6947_v41 = vld [vmem:[#allocation2 + $0x3e8] sm:$0xff]  ;;  %v8908_v26 = vpop.f32.mrf.mxu0  ;;  %v6157_v51 = vmul.f32 -1.442695, %v1252_v40  ;;  %v6964_v38 = vld [vmem:[#allocation2 + $0x2f0] sm:$0xff] }
 0x1c5   :  { %12241 = vst [vmem:[#allocation31_spill] sm:$0xff] %v8908_v26 }
 0x1c6   :  { %2148 = vmatpush.msrb.mxu2 %v8591_v29  ;;  %2192 = vmatpush.msra.mxu0 %v6947_v41  ;;  %v6949_v29 = vld [vmem:[#allocation2 + $0x3c8] sm:$0xff]  ;;  %v8918_v35 = vpop.f32.mrf.mxu2 }
 0x1c7   :  { %12243 = vst [vmem:[#allocation22_spill] sm:$0xff] %v8918_v35 }
 0x1c8   :  { %2249 = vmatpush.msra.mxu2 %v6946_v63  ;;  %2193 = vmatpush.msra.mxu0 %v6949_v29  ;;  %v6353_v24 = vpop.eup %6352 }
 0x1c9   :  { %v1189_v36 = vpop.f32.mrf.mxu3  ;;  %1606 = vmatmul.f32.gmra.mxu0 %v8828_v18  ;;  %1664 = vmatmul.f32.gmra.mxu2 %v8828_v18  ;;  %v8916_v20 = vadd.f32 1.0, %v6353_v24  ;;  %v6355_v25 = vpop.eup %6354 }
 0x1ca   :  { %2250 = vmatpush.msra.mxu2 %v6948_v30  ;;  %2194 = vmatpush.msra.mxu0 %v6951_v52  ;;  %v1253_v0 = vadd.f32 %v1189_v36, %v12245_v58  ;;  %v8926_v33 = vadd.f32 1.0, %v6355_v25  ;;  %v6963_v30 = vld [vmem:[#allocation2 + $0x2e8] sm:$0xff] }
 0x1cb   :  { %v6965_v52 = vld [vmem:[#allocation2 + $0x2c8] sm:$0xff]  ;;  %vm1275_vm5 = vweird.f32 %v8916_v20 }
 0x1cc   :  { %2251 = vmatpush.msra.mxu2 %v6950_v8  ;;  %v8910_v19 = vpop.f32.mrf.mxu1  ;;  %2195 = vmatpush.msra.mxu0 %v6953_v1  ;;  %v8923_v37 = vpop.f32.mrf.mxu0  ;;  %v6158_v8 = vmul.f32 -1.442695, %v1253_v0  ;;  %vm1290_vm9 = vweird.f32 %v8926_v33 }
 0x1cd   :  { %12244 = vst [vmem:[#allocation32_spill] sm:$0xff] %v8923_v37 }
 0x1ce   :  { %2252 = vmatpush.msra.mxu2 %v6952_v61  ;;  %2196 = vmatpush.msra.mxu0 %v6955_v2  ;;  %v6966_v61 = vld [vmem:[#allocation2 + $0x2d0] sm:$0xff] }
 0x1d0   :  { %2253 = vmatpush.msra.mxu2 %v6954_v57  ;;  %2197 = vmatpush.msra.mxu0 %v6957_v31 }
 0x1d1   :  { %v1209_v44 = vpop.f32.mrf.mxu3  ;;  %1609 = vmatmul.f32.gmra.mxu0 %v8861_v23  ;;  %1667 = vmatmul.f32.gmra.mxu2 %v8861_v23 }
 0x1d2   :  { %v1330_v11 = vadd.f32 %v1209_v44, %v12242_v46  ;;  %2254 = vmatpush.msra.mxu2 %v6956_v60  ;;  %2198 = vmatpush.msra.mxu0 %v6959_v28  ;;  %v6967_v44 = vld [vmem:[#allocation2 + $0x2a8] sm:$0xff]  ;;  %v6968_v46 = vld [vmem:[#allocation2 + $0x2b0] sm:$0xff] }
 0x1d3   :  { %v6969_v60 = vld [vmem:[#allocation2 + $0x288] sm:$0xff] }
 0x1d4   :  { %v6159_v43 = vmul.f32 -1.442695, %v1330_v11  ;;  %2255 = vmatpush.msra.mxu2 %v6958_v59  ;;  %v8920_v62 = vpop.f32.mrf.mxu1  ;;  %2199 = vmatpush.msra.mxu0 %v6961_v10  ;;  %v8938_v11 = vpop.f32.mrf.mxu2  ;;  %v6971_v28 = vld [vmem:[#allocation2 + $0x268] sm:$0xff] }
 0x1d5   :  { %12247 = vst [vmem:[#allocation12_spill] sm:$0xff] %v8938_v11  ;;  %v8945_v59 = vpop.f32.mrf.mxu0 }
 0x1d6   :  { %6356 = vpow2.f32 %v6159_v43  ;;  %2256 = vmatpush.msra.mxu2 %v6960_v56  ;;  %2200 = vmatpush.msra.mxu0 %v6963_v30  ;;  %12248 = vst [vmem:[#allocation24_spill] sm:$0xff] %v8945_v59  ;;  %v6973_v30 = vld [vmem:[#allocation2 + $0x228] sm:$0xff] }
 0x1d7   :  { %6358 = vrcp.f32 %v8916_v20 }
 0x1d8   :  { %6360 = vpow2.f32 %v6157_v51  ;;  %2257 = vmatpush.msra.mxu2 %v6962_v21  ;;  %2201 = vmatpush.msra.mxu0 %v6965_v52  ;;  %v6970_v51 = vld [vmem:[#allocation2 + $0x290] sm:$0xff]  ;;  %v6972_v21 = vld [vmem:[#allocation2 + $0x248] sm:$0xff] }
 0x1d9   :  { %v1212_v63 = vpop.f32.mrf.mxu3  ;;  %1612 = vmatmul.f32.gmra.mxu0 %v8878_v4  ;;  %1670 = vmatmul.f32.gmra.mxu2 %v8878_v4  ;;  %6362 = vrcp.f32 %v8926_v33 }
 0x1da   :  { %v1331_v41 = vadd.f32 %v1212_v63, %v12246_v15  ;;  %2258 = vmatpush.msra.mxu2 %v6964_v38  ;;  %2202 = vmatpush.msra.mxu0 %v6967_v44 }
 0x1dc   :  { %v6357_v29 = vpop.eup %6356  ;;  %v6160_v36 = vmul.f32 -1.442695, %v1331_v41  ;;  %2259 = vmatpush.msra.mxu2 %v6966_v61  ;;  %v8936_v57 = vpop.f32.mrf.mxu1  ;;  %2203 = vmatpush.msra.mxu0 %v6969_v60 }
 0x1dd   :  { %v8931_v24 = vpop.eup %6358  ;;  %v8934_v40 = vadd.f32 1.0, %v6357_v29  ;;  %v8966_v29 = vpop.f32.mrf.mxu2 }
 0x1de   :  { %v6361_v1 = vpop.eup %6360  ;;  %6364 = vpow2.f32 %v6160_v36  ;;  %2260 = vmatpush.msra.mxu2 %v6968_v46  ;;  %v1271_v2 = vmul.f32 %v8931_v24, %v8916_v20  ;;  %2204 = vmatpush.msra.mxu0 %v6971_v28  ;;  %12249 = vst [vmem:[#allocation33_spill] sm:$0xff] %v8966_v29  ;;  %vm1276_vm4 = vweird.f32 %v8931_v24 }
 0x1df   :  { %6366 = vrcp.f32 %v8934_v40  ;;  %v8943_v43 = vadd.f32 1.0, %v6361_v1  ;;  %v8949_v56 = vpop.eup %6362  ;;  %vm8992_vm6 = vmor %vm1275_vm5, %vm1276_vm4  ;;  %vm1355_vm10 = vweird.f32 %v8934_v40 }
 0x1e0   :  { %6368 = vpow2.f32 %v6158_v8  ;;  %2261 = vmatpush.msra.mxu2 %v6970_v51  ;;  %v1272_v10 = vsub.f32 1.0, %v1271_v2  ;;  %2205 = vmatpush.msra.mxu0 %v6972_v21  ;;  %vm1291_vm7 = vweird.f32 %v8949_v56  ;;  %v1359_v21 = vand.u32 2147483647, %v8934_v40 }
 0x1e1   :  { %v1215_v31 = vpop.f32.mrf.mxu3  ;;  %6370 = vrcp.f32 %v8943_v43  ;;  %vm9022_vm11 = vmor %vm1290_vm9, %vm1291_vm7  ;;  %vm1305_vm4 = vweird.f32 %v8943_v43 }
 0x1e2   :  { %v1332_v25 = vadd.f32 %v1215_v31, %v8772_v27  ;;  %2262 = vmatpush.msra.mxu2 %v8736_v6  ;;  %v1286_v6 = vmul.f32 %v8949_v56, %v8926_v33  ;;  %2206 = vmatpush.msra.mxu0 %v6973_v30  ;;  %v1273_v38 = vmul.f32 %v8931_v24, %v1272_v10  ;;  %vm1360_vm13 = vcmp.eq.f32.partialorder %v1359_v21, 8.507059e+37 }
 0x1e4   :  { %v6365_v58 = vpop.eup %6364  ;;  %v6161_v0 = vmul.f32 -1.442695, %v1332_v25  ;;  %2263 = vmatpush.msra.mxu2 %v8743_v5  ;;  %v8959_v41 = vpop.f32.mrf.mxu1  ;;  %v1287_v61 = vsub.f32 1.0, %v1286_v6  ;;  %v1274_v60 = vadd.f32 %v8931_v24, %v1273_v38  ;;  %v1279_v25 = vand.u32 2147483647, %v8916_v20 }
 0x1e5   :  { %v8952_v63 = vpop.eup %6366  ;;  %v8955_v15 = vadd.f32 1.0, %v6365_v58 }
 0x1e6   :  { %v6369_v27 = vpop.eup %6368  ;;  %6372 = vpow2.f32 %v6161_v0  ;;  %2264 = vmatpush.msra.mxu2 %v8751_v50  ;;  %v1351_v5 = vmul.f32 %v8952_v63, %v8934_v40  ;;  %v8973_v50 = vpop.f32.mrf.mxu0  ;;  %v1288_v28 = vmul.f32 %v8949_v56, %v1287_v61  ;;  %vm1280_vm0 = vcmp.eq.f32.partialorder %v1279_v25, 8.507059e+37 }
 0x1e7   :  { %6374 = vrcp.f32 %v8955_v15  ;;  %v8968_v8 = vadd.f32 1.0, %v6369_v27  ;;  %v8971_v1 = vpop.eup %6370  ;;  %12250 = vst [vmem:[#allocation34_spill] sm:$0xff] %v8973_v50  ;;  %v1278_v27 = vsel %vm8992_vm6, %v8931_v24, %v1274_v60  ;;  %v9008_v61 = vpop.f32.mrf.mxu2  ;;  %vm1356_vm8 = vweird.f32 %v8952_v63 }
 0x1e8   :  { %v1352_v44 = vsub.f32 1.0, %v1351_v5  ;;  %v9001_v5 = vld [vmem:[#allocation2 + $0x820] ss:$0 sm:$0xff]  ;;  %12254 = vst [vmem:[#allocation36_spill] sm:$0xff] %v9008_v61  ;;  %v1361_v60 = vand.u32 2147483648, %v8934_v40  ;;  %vm9027_vm12 = vmor %vm1355_vm10, %vm1356_vm8  ;;  %vm1306_vm15 = vweird.f32 %v8971_v1  ;;  %vm1370_vm2 = vweird.f32 %v8955_v15 }
 0x1e9   :  { %v1218_v36 = vpop.f32.mrf.mxu3  ;;  %6376 = vrcp.f32 %v8968_v8  ;;  %vm9081_vm5 = vmor %vm1305_vm4, %vm1306_vm15 }
 0x1ea   :  { %v1333_v52 = vadd.f32 %v1218_v36, %v8819_v3  ;;  %v1281_v3 = vand.u32 2147483648, %v8916_v20  ;;  %v1353_v0 = vmul.f32 %v8952_v63, %v1352_v44  ;;  %v1301_v20 = vmul.f32 %v8971_v1, %v8943_v43 }
 0x1eb   :  { %v1289_v36 = vadd.f32 %v8949_v56, %v1288_v28 }
 0x1ec   :  { %v6373_v46 = vpop.eup %6372  ;;  %v6162_v2 = vmul.f32 -1.442695, %v1333_v52  ;;  %v8986_v58 = vpop.f32.mrf.mxu1  ;;  %v1282_v30 = vor.u32 1.1754944e-38, %v1281_v3  ;;  %v1354_v24 = vadd.f32 %v8952_v63, %v1353_v0  ;;  %v1302_v25 = vsub.f32 1.0, %v1301_v20 }
 0x1ed   :  { %v8977_v51 = vpop.eup %6374  ;;  %v8980_v31 = vadd.f32 1.0, %v6373_v46  ;;  %12251 = vst [vmem:[#allocation35_spill] sm:$0xff] %v8986_v58  ;;  %v1293_v40 = vsel %vm9022_vm11, %v8949_v56, %v1289_v36  ;;  %vm1320_vm11 = vweird.f32 %v8968_v8 }
 0x1ee   :  { %6378 = vpow2.f32 %v6162_v2  ;;  %v1366_v10 = vmul.f32 %v8977_v51, %v8955_v15  ;;  %v1283_v46 = vsel %vm1280_vm0, %v1282_v30, %v1278_v27  ;;  %v9031_v20 = vpop.f32.mrf.mxu0  ;;  %v12260_v30 = vld [vmem:[#allocation13_spill] sm:$0xff]  ;;  %v1303_v0 = vmul.f32 %v8971_v1, %v1302_v25 }
 0x1ef   :  { %6380 = vrcp.f32 %v8980_v31  ;;  %v9006_v52 = vpop.eup %6376  ;;  %12259 = vst [vmem:[#allocation37_spill] sm:$0xff] %v9031_v20  ;;  %v1358_v20 = vsel %vm9027_vm12, %v8952_v63, %v1354_v24  ;;  %vm1371_vm1 = vweird.f32 %v8977_v51  ;;  %vm1385_vm9 = vweird.f32 %v8980_v31 }
 0x1f0   :  { %v1367_v44 = vsub.f32 1.0, %v1366_v10  ;;  %v1296_v10 = vand.u32 2147483648, %v8926_v33  ;;  %v1304_v27 = vadd.f32 %v8971_v1, %v1303_v0  ;;  %vm9063_vm3 = vmor %vm1370_vm2, %vm1371_vm1  ;;  %v12266_v0 = vld [vmem:[#allocation16_spill] sm:$0xff]  ;;  %vm1321_vm8 = vweird.f32 %v9006_v52 }
 0x1f1   :  { %v1238_v6 = vpop.f32.mrf.mxu3  ;;  %vm9123_vm12 = vmor %vm1320_vm11, %vm1321_vm8 }
 0x1f2   :  { %v1410_v38 = vadd.f32 %v9001_v5, %v1238_v6  ;;  %v1368_v50 = vmul.f32 %v8977_v51, %v1367_v44  ;;  %v1297_v36 = vor.u32 1.1754944e-38, %v1296_v10  ;;  %v9058_v10 = vpop.f32.mrf.mxu2 }
 0x1f3   :  { %12262 = vst [vmem:[#allocation38_spill] sm:$0xff] %v9058_v10 }
 0x1f4   :  { %v6379_v2 = vpop.eup %6378  ;;  %v1414_v3 = vmul.f32 %v1410_v38, %v1283_v46  ;;  %v1294_v46 = vand.u32 2147483647, %v8926_v33  ;;  %v1316_v33 = vmul.f32 %v9006_v52, %v8968_v8  ;;  %v1369_v61 = vadd.f32 %v8977_v51, %v1368_v50 }
 0x1f5   :  { %v9014_v28 = vpop.eup %6380  ;;  %v9018_v6 = vadd.f32 1.0, %v6379_v2  ;;  %v9038_v2 = vpop.f32.mrf.mxu1  ;;  %v1311_v50 = vand.u32 2147483648, %v8943_v43 }
 0x1f6   :  { %v1418_v38 = vadd.f32 %v1414_v3, %v12260_v30  ;;  %12261 = vst [vmem:[#allocation13_spill] sm:$0xff] %v9038_v2  ;;  %v1381_v59 = vmul.f32 %v9014_v28, %v8980_v31  ;;  %v1362_v3 = vor.u32 1.1754944e-38, %v1361_v60  ;;  %vm1295_vm14 = vcmp.eq.f32.partialorder %v1294_v46, 8.507059e+37 }
 0x1f7   :  { %6382 = vrcp.f32 %v9018_v6  ;;  %v1298_v24 = vsel %vm1295_vm14, %v1297_v36, %v1293_v40  ;;  %v1376_v60 = vand.u32 2147483648, %v8955_v15  ;;  %v1317_v21 = vsub.f32 1.0, %v1316_v33  ;;  %v12265_v40 = vld [vmem:[#allocation7_spill] sm:$0xff] }
 0x1f8   :  { %6384 = vtanh.f32 %v1418_v38  ;;  %v1363_v44 = vsel %vm1360_vm13, %v1362_v3, %v1358_v20  ;;  %v1382_v63 = vsub.f32 1.0, %v1381_v59  ;;  %v1374_v20 = vand.u32 2147483647, %v8955_v15 }
 0x1f9   :  { %v1241_v56 = vpop.f32.mrf.mxu3  ;;  %v1426_v46 = vsub.f32 1.0, %v1363_v44  ;;  %v1309_v36 = vand.u32 2147483647, %v8943_v43  ;;  %v1373_v29 = vsel %vm9063_vm3, %v8977_v51, %v1369_v61  ;;  %v9085_v43 = vpop.f32.mrf.mxu0  ;;  %v1312_v61 = vor.u32 1.1754944e-38, %v1311_v50 }
 0x1fa   :  { %v1411_v30 = vadd.f32 %v9001_v5, %v1241_v56  ;;  %v1434_v56 = vmul.f32 %v1363_v44, %v12265_v40  ;;  %v1383_v15 = vmul.f32 %v9014_v28, %v1382_v63  ;;  %12270 = vst [vmem:[#allocation16_spill] sm:$0xff] %v9085_v43  ;;  %v1308_v63 = vsel %vm9081_vm5, %v8971_v1, %v1304_v27  ;;  %v12273_v44 = vld [vmem:[#allocation8_spill] sm:$0xff] }
 0x1fb   :  { %vm1375_vm6 = vcmp.eq.f32.partialorder %v1374_v20, 8.507059e+37  ;;  %vm1310_vm0 = vcmp.eq.f32.partialorder %v1309_v36, 8.507059e+37  ;;  %vm1386_vm7 = vweird.f32 %v9014_v28  ;;  %v1391_v1 = vand.u32 2147483648, %v8980_v31  ;;  %v6977_v36 = vld [vmem:[#allocation2 + $0x418] sm:$0xff] }
 0x1fc   :  { %v1415_v25 = vmul.f32 %v1411_v30, %v1298_v24  ;;  %v1326_v50 = vand.u32 2147483648, %v8968_v8  ;;  %vm9107_vm10 = vmor %vm1385_vm9, %vm1386_vm7  ;;  %vm1400_vm1 = vweird.f32 %v9018_v6 }
 0x1fd   :  { %v9056_v38 = vpop.eup %6382  ;;  %v9071_v30 = vpop.f32.mrf.mxu1 }
 0x1fe   :  { %v6385_v3 = vpop.eup %6384  ;;  %v1419_v33 = vadd.f32 %v1415_v25, %v12266_v0  ;;  %12267 = vst [vmem:[#allocation7_spill] sm:$0xff] %v9071_v30  ;;  %v1396_v24 = vmul.f32 %v9056_v38, %v9018_v6  ;;  %v1377_v25 = vor.u32 1.1754944e-38, %v1376_v60  ;;  %v1384_v60 = vadd.f32 %v9014_v28, %v1383_v15 }
 0x1ff   :  { %v1430_v10 = vmul.f32 %v6385_v3, %v1426_v46  ;;  %v1318_v46 = vmul.f32 %v9006_v52, %v1317_v21  ;;  %v6975_v21 = vld [vmem:[#allocation2 + $0x200] sm:$0xff]  ;;  %vm1401_vm15 = vweird.f32 %v9056_v38 }
 0x200   :  { %6386 = vtanh.f32 %v1419_v33  ;;  %v1378_v59 = vsel %vm1375_vm6, %v1377_v25, %v1373_v29  ;;  %v1397_v0 = vsub.f32 1.0, %v1396_v24  ;;  %v1313_v33 = vsel %vm1310_vm0, %v1312_v61, %v1308_v63  ;;  %v12274_v63 = vld [vmem:[#allocation18_spill] sm:$0xff]  ;;  %v9115_v61 = vpop.f32.mrf.mxu2  ;;  %v6982_v24 = vld [vmem:[#allocation2 + $0x1d0] sm:$0xff]  ;;  %vm9147_vm2 = vmor %vm1400_vm1, %vm1401_vm15 }
 0x201   :  { %v9091_v3 = vadd.f32 %v1434_v56, %v1430_v10  ;;  %v1244_v51 = vpop.f32.mrf.mxu3  ;;  %v1319_v29 = vadd.f32 %v9006_v52, %v1318_v46  ;;  %v1389_v10 = vand.u32 2147483647, %v8980_v31  ;;  %v1427_v20 = vsub.f32 1.0, %v1378_v59  ;;  %v6976_v56 = vld [vmem:[#allocation2 + $0x210] sm:$0xff]  ;;  %12275 = vst [vmem:[#allocation8_spill] sm:$0xff] %v9115_v61 }
 0x202   :  { %v1412_v40 = vadd.f32 %v9001_v5, %v1244_v51  ;;  %v1435_v25 = vmul.f32 %v1378_v59, %v12273_v44  ;;  %v1324_v31 = vand.u32 2147483647, %v8968_v8  ;;  %v6978_v51 = vld [vmem:[#allocation2 + $0x1e0] sm:$0xff]  ;;  %v6980_v8 = vld [vmem:[#allocation2 + $0x3f8] sm:$0xff] }
 0x203   :  { %1458 = vmatmul.f32.vlgmr.msrb.gmra.mxu3 %v9091_v3  ;;  %1516 = vmatmul.f32.vlgmr.msrb.gmra.mxu1 %v9091_v3  ;;  %vm1390_vm13 = vcmp.eq.f32.partialorder %v1389_v10, 8.507059e+37  ;;  %v6983_v44 = vld [vmem:[#allocation2 + $0x3d8] sm:$0xff]  ;;  %v6998_v59 = vld [vmem:[#allocation2 + $0x100] sm:$0xff] }
 0x204   :  { %v1416_v27 = vmul.f32 %v1412_v40, %v1313_v33  ;;  %1899 = vmatmul.f32.vlgmr.msrb.gmra.mxu0 %v9091_v3  ;;  %1854 = vmatpush.msrb.mxu3 %v6975_v21  ;;  %v1398_v40 = vmul.f32 %v9056_v38, %v1397_v0  ;;  %v1388_v21 = vsel %vm9107_vm10, %v9014_v28, %v1384_v60  ;;  %vm1325_vm14 = vcmp.eq.f32.partialorder %v1324_v31, 8.507059e+37 }
 0x205   :  { %1912 = vmatpush.msrb.mxu1 %v6976_v56  ;;  %2307 = vmatpush.msrb.mxu0 %v6977_v36  ;;  %v1392_v56 = vor.u32 1.1754944e-38, %v1391_v1  ;;  %v1323_v0 = vsel %vm9123_vm12, %v9006_v52, %v1319_v29  ;;  %v6981_v36 = vld [vmem:[#allocation2 + $0x1c0] sm:$0xff] }
 0x206   :  { %v6387_v15 = vpop.eup %6386  ;;  %v1420_v46 = vadd.f32 %v1416_v27, %v12274_v63  ;;  %1855 = vmatpush.msrb.mxu3 %v6978_v51  ;;  %v6979_v27 = vld [vmem:[#allocation2 + $0x1f0] sm:$0xff]  ;;  %v9134_v63 = vpop.f32.mrf.mxu0  ;;  %v6984_v52 = vld [vmem:[#allocation2 + $0x1a0] sm:$0xff]  ;;  %v1399_v29 = vadd.f32 %v9056_v38, %v1398_v40 }
 0x207   :  { %v1431_v33 = vmul.f32 %v6387_v15, %v1427_v20  ;;  %1913 = vmatpush.msrb.mxu1 %v6979_v27  ;;  %2308 = vmatpush.msrb.mxu0 %v6980_v8  ;;  %v9130_v20 = vpop.f32.mrf.mxu1  ;;  %v1327_v15 = vor.u32 1.1754944e-38, %v1326_v50  ;;  %12279 = vst [vmem:[#allocation39_spill] sm:$0xff] %v9134_v63  ;;  %v1393_v1 = vsel %vm1390_vm13, %v1392_v56, %v1388_v21  ;;  %v1406_v50 = vand.u32 2147483648, %v9018_v6  ;;  %v6985_v51 = vld [vmem:[#allocation2 + $0x1b0] sm:$0xff]  ;;  %v6986_v40 = vld [vmem:[#allocation2 + $0x180] sm:$0xff]  ;;  %v12282_v27 = vld [vmem:[#allocation20_spill] sm:$0xff] }
 0x208   :  { %6388 = vtanh.f32 %v1420_v46  ;;  %12278 = vst [vmem:[#allocation18_spill] sm:$0xff] %v9130_v20  ;;  %1856 = vmatpush.msrb.mxu3 %v6981_v36  ;;  %v1428_v31 = vsub.f32 1.0, %v1393_v1  ;;  %v6988_v56 = vld [vmem:[#allocation2 + $0x190] sm:$0xff]  ;;  %v12283_v36 = vld [vmem:[#allocation9_spill] sm:$0xff] }
 0x209   :  { %v9132_v28 = vadd.f32 %v1435_v25, %v1431_v33  ;;  %v1247_v60 = vpop.f32.mrf.mxu3  ;;  %1914 = vmatpush.msrb.mxu1 %v6982_v24  ;;  %2309 = vmatpush.msrb.mxu0 %v6983_v44  ;;  %v1328_v10 = vsel %vm1325_vm14, %v1327_v15, %v1323_v0  ;;  %v6987_v33 = vld [vmem:[#allocation2 + $0x3b8] sm:$0xff]  ;;  %v6989_v15 = vld [vmem:[#allocation2 + $0x160] sm:$0xff]  ;;  %v1407_v44 = vor.u32 1.1754944e-38, %v1406_v50 }
 0x20a   :  { %v1413_v46 = vadd.f32 %v9001_v5, %v1247_v60  ;;  %1857 = vmatpush.msrb.mxu3 %v6984_v52  ;;  %v1404_v5 = vand.u32 2147483647, %v9018_v6  ;;  %v1436_v60 = vmul.f32 %v1393_v1, %v12283_v36  ;;  %v1403_v6 = vsel %vm9147_vm2, %v9056_v38, %v1399_v29  ;;  %v6990_v24 = vld [vmem:[#allocation2 + $0x398] sm:$0xff]  ;;  %v9156_v52 = vpop.f32.mrf.mxu2  ;;  %v6994_v38 = vld [vmem:[#allocation2 + $0x150] sm:$0xff]  ;;  %v6995_v50 = vld [vmem:[#allocation2 + $0x120] sm:$0xff] }
 0x20b   :  { %1461 = vmatmul.f32.gmra.mxu3 %v9132_v28  ;;  %1519 = vmatmul.f32.gmra.mxu1 %v9132_v28  ;;  %12284 = vst [vmem:[#allocation20_spill] sm:$0xff] %v9156_v52  ;;  %v6993_v1 = vld [vmem:[#allocation2 + $0x378] sm:$0xff] }
 0x20c   :  { %v1417_v25 = vmul.f32 %v1413_v46, %v1328_v10  ;;  %1902 = vmatmul.f32.gmra.mxu0 %v9132_v28  ;;  %1915 = vmatpush.msrb.mxu1 %v6985_v51  ;;  %v6991_v46 = vld [vmem:[#allocation2 + $0x170] sm:$0xff]  ;;  %vm1405_vm3 = vcmp.eq.f32.partialorder %v1404_v5, 8.507059e+37  ;;  %v7000_v36 = vld [vmem:[#allocation2 + $0x338] sm:$0xff] }
 0x20d   :  { %1858 = vmatpush.msrb.mxu3 %v6986_v40  ;;  %2310 = vmatpush.msrb.mxu0 %v6987_v33  ;;  %v1408_v51 = vsel %vm1405_vm3, %v1407_v44, %v1403_v6  ;;  %v6996_v40 = vld [vmem:[#allocation2 + $0x130] sm:$0xff]  ;;  %v6997_v33 = vld [vmem:[#allocation2 + $0x358] sm:$0xff]  ;;  %v7004_v44 = vld [vmem:[#allocation2 + $0xc0] sm:$0xff] }
 0x20e   :  { %v6389_v21 = vpop.eup %6388  ;;  %v1421_v8 = vadd.f32 %v1417_v25, %v12282_v27  ;;  %1916 = vmatpush.msrb.mxu1 %v6988_v56  ;;  %v6992_v25 = vld [vmem:[#allocation2 + $0x140] sm:$0xff]  ;;  %v9164_v29 = vpop.f32.mrf.mxu0  ;;  %v1429_v5 = vsub.f32 1.0, %v1408_v51 }
 0x20f   :  { %v1432_v0 = vmul.f32 %v6389_v21, %v1428_v31  ;;  %1859 = vmatpush.msrb.mxu3 %v6989_v15  ;;  %2311 = vmatpush.msrb.mxu0 %v6990_v24  ;;  %v9160_v31 = vpop.f32.mrf.mxu1  ;;  %12286 = vst [vmem:[#allocation40_spill] sm:$0xff] %v9164_v29  ;;  %v7002_v15 = vld [vmem:[#allocation2 + $0xf0] sm:$0xff]  ;;  %v7003_v24 = vld [vmem:[#allocation2 + $0x318] sm:$0xff] }
 0x210   :  { %6390 = vtanh.f32 %v1421_v8  ;;  %1917 = vmatpush.msrb.mxu1 %v6991_v46  ;;  %12285 = vst [vmem:[#allocation9_spill] sm:$0xff] %v9160_v31  ;;  %v12287_v8 = vld [vmem:[#allocation10_spill] sm:$0xff] }
 0x211   :  { %v9158_v10 = vadd.f32 %v1436_v60, %v1432_v0  ;;  %1860 = vmatpush.msrb.mxu3 %v6992_v25  ;;  %2312 = vmatpush.msrb.mxu0 %v6993_v1  ;;  %v1437_v56 = vmul.f32 %v1408_v51, %v12287_v8  ;;  %v6999_v0 = vld [vmem:[#allocation2 + $0x110] sm:$0xff]  ;;  %v7001_v60 = vld [vmem:[#allocation2 + $0xe0] sm:$0xff] }
 0x212   :  { %1918 = vmatpush.msrb.mxu1 %v6994_v38  ;;  %v9170_v46 = vpop.f32.mrf.mxu2  ;;  %v7005_v1 = vld [vmem:[#allocation2 + $0xd0] sm:$0xff]  ;;  %v7006_v51 = vld [vmem:[#allocation2 + $0xa0] sm:$0xff]  ;;  %v7007_v38 = vld [vmem:[#allocation2 + $0x2f8] sm:$0xff] }
 0x213   :  { %1464 = vmatmul.f32.gmra.mxu3 %v9158_v10  ;;  %1522 = vmatmul.f32.gmra.mxu1 %v9158_v10  ;;  %12288 = vst [vmem:[#allocation10_spill] sm:$0xff] %v9170_v46  ;;  %v7014_v8 = vld [vmem:[#allocation2 + $0x70] sm:$0xff] }
 0x214   :  { %1905 = vmatmul.f32.gmra.mxu0 %v9158_v10  ;;  %1861 = vmatpush.msrb.mxu3 %v6995_v50 }
 0x215   :  { %1919 = vmatpush.msrb.mxu1 %v6996_v40  ;;  %2313 = vmatpush.msrb.mxu0 %v6997_v33  ;;  %v7009_v40 = vld [vmem:[#allocation2 + $0x80] sm:$0xff]  ;;  %v7010_v33 = vld [vmem:[#allocation2 + $0x2d8] sm:$0xff] }
 0x216   :  { %v6391_v21 = vpop.eup %6390  ;;  %1862 = vmatpush.msrb.mxu3 %v6998_v59  ;;  %v9177_v50 = vpop.f32.mrf.mxu0  ;;  %v7012_v59 = vld [vmem:[#allocation2 + $0x60] sm:$0xff] }
 0x217   :  { %v1433_v27 = vmul.f32 %v6391_v21, %v1429_v5  ;;  %1920 = vmatpush.msrb.mxu1 %v6999_v0  ;;  %2314 = vmatpush.msrb.mxu0 %v7000_v36  ;;  %v9175_v25 = vpop.f32.mrf.mxu1  ;;  %12290 = vst [vmem:[#allocation42_spill] sm:$0xff] %v9177_v50  ;;  %v7008_v5 = vld [vmem:[#allocation2 + $0xb0] sm:$0xff]  ;;  %v7074_v50 = vld [vmem:[#allocation2 + $0x4f8] sm:$0xff] }
 0x218   :  { %1863 = vmatpush.msrb.mxu3 %v7001_v60  ;;  %12289 = vst [vmem:[#allocation41_spill] sm:$0xff] %v9175_v25  ;;  %v7011_v21 = vld [vmem:[#allocation2 + $0x90] sm:$0xff]  ;;  %v7017_v60 = vld [vmem:[#allocation2 + $0x298] sm:$0xff] }
 0x219   :  { %v9168_v6 = vadd.f32 %v1437_v56, %v1433_v27  ;;  %1921 = vmatpush.msrb.mxu1 %v7002_v15  ;;  %2315 = vmatpush.msrb.mxu0 %v7003_v24  ;;  %v7013_v27 = vld [vmem:[#allocation2 + $0x2b8] sm:$0xff]  ;;  %v7015_v56 = vld [vmem:[#allocation2 + $0x40] sm:$0xff]  ;;  %v7016_v0 = vld [vmem:[#allocation2 + $0x50] sm:$0xff] }
 0x21a   :  { %1864 = vmatpush.msrb.mxu3 %v7004_v44  ;;  %v9181_v36 = vpop.f32.mrf.mxu2  ;;  %v7018_v24 = vld [vmem:[#allocation2 + $0x20] sm:$0xff]  ;;  %v7019_v44 = vld [vmem:[#allocation2 + $0x30] sm:$0xff] }
 0x21b   :  { %1467 = vmatmul.f32.gmra.mxu3 %v9168_v6  ;;  %1525 = vmatmul.f32.gmra.mxu1 %v9168_v6  ;;  %12291 = vst [vmem:[#allocation43_spill] sm:$0xff] %v9181_v36 }
 0x21c   :  { %1908 = vmatmul.f32.gmra.mxu0 %v9168_v6  ;;  %1922 = vmatpush.msrb.mxu1 %v7005_v1  ;;  %v7020_v1 = vld [vmem:[#allocation2 + $0x600] sm:$0xff] }
 0x21d   :  { %1865 = vmatpush.msrb.mxu3 %v7006_v51  ;;  %2316 = vmatpush.msrb.mxu0 %v7007_v38  ;;  %v7021_v51 = vld [vmem:[#allocation2 + $0x608] sm:$0xff] }
 0x21e   :  { %1923 = vmatpush.msrb.mxu1 %v7008_v5  ;;  %v9185_v38 = vpop.f32.mrf.mxu0  ;;  %v7022_v5 = vld [vmem:[#allocation2 + $0x278] sm:$0xff] }
 0x21f   :  { %1866 = vmatpush.msrb.mxu3 %v7009_v40  ;;  %2317 = vmatpush.msrb.mxu0 %v7010_v33  ;;  %v9183_v15 = vpop.f32.mrf.mxu1  ;;  %12293 = vst [vmem:[#allocation45_spill] sm:$0xff] %v9185_v38  ;;  %v7023_v40 = vld [vmem:[#allocation2 + $0x5e0] sm:$0xff]  ;;  %v7024_v33 = vld [vmem:[#allocation2 + $0x5e8] sm:$0xff]  ;;  %v7073_v38 = vld [vmem:[#allocation2 + $0x4f0] sm:$0xff] }
 0x220   :  { %1924 = vmatpush.msrb.mxu1 %v7011_v21  ;;  %12292 = vst [vmem:[#allocation44_spill] sm:$0xff] %v9183_v15  ;;  %v7025_v21 = vld [vmem:[#allocation2 + $0x258] sm:$0xff] }
 0x221   :  { %1867 = vmatpush.msrb.mxu3 %v7012_v59  ;;  %2318 = vmatpush.msrb.mxu0 %v7013_v27  ;;  %v7026_v59 = vld [vmem:[#allocation2 + $0x5c0] sm:$0xff]  ;;  %v7027_v27 = vld [vmem:[#allocation2 + $0x5c8] sm:$0xff] }
 0x222   :  { %1925 = vmatpush.msrb.mxu1 %v7014_v8  ;;  %v7028_v8 = vld [vmem:[#allocation2 + $0x238] sm:$0xff] }
 0x223   :  { %1574 = vmatmul.f32.vlgmr.msra.gmra.mxu3 %v9091_v3  ;;  %1632 = vmatmul.f32.vlgmr.msra.gmra.mxu1 %v9091_v3 }
 0x224   :  { %1868 = vmatpush.msrb.mxu3 %v7015_v56  ;;  %1926 = vmatpush.msrb.mxu1 %v7016_v0  ;;  %v7029_v56 = vld [vmem:[#allocation2 + $0x5a0] sm:$0xff]  ;;  %v7030_v0 = vld [vmem:[#allocation2 + $0x5a8] sm:$0xff] }
 0x225   :  { %2319 = vmatpush.msrb.mxu0 %v7017_v60  ;;  %v9189_v60 = vpop.f32.mrf.mxu2 }
 0x226   :  { %1869 = vmatpush.msrb.mxu3 %v7018_v24  ;;  %1927 = vmatpush.msrb.mxu1 %v7019_v44  ;;  %12294 = vst [vmem:[#allocation46_spill] sm:$0xff] %v9189_v60  ;;  %v7031_v44 = vld [vmem:[#allocation2 + $0x580] sm:$0xff]  ;;  %v7066_v60 = vld [vmem:[#allocation2 + $0x578] sm:$0xff] }
 0x227   :  { %2320 = vmatpush.msrb.mxu0 %v7022_v5  ;;  %v9191_v24 = vpop.f32.mrf.mxu1  ;;  %v7033_v5 = vld [vmem:[#allocation2 + $0x560] sm:$0xff] }
 0x228   :  { %2162 = vmatpush.msra.mxu3 %v7020_v1  ;;  %2220 = vmatpush.msra.mxu1 %v7021_v51  ;;  %12295 = vst [vmem:[#allocation47_spill] sm:$0xff] %v9191_v24  ;;  %v7032_v1 = vld [vmem:[#allocation2 + $0x588] sm:$0xff]  ;;  %v9193_v51 = vpop.f32.mrf.mxu0 }
 0x229   :  { %2321 = vmatpush.msrb.mxu0 %v7025_v21  ;;  %12296 = vst [vmem:[#allocation48_spill] sm:$0xff] %v9193_v51  ;;  %v7036_v21 = vld [vmem:[#allocation2 + $0x548] sm:$0xff] }
 0x22a   :  { %2163 = vmatpush.msra.mxu3 %v7023_v40  ;;  %2221 = vmatpush.msra.mxu1 %v7024_v33  ;;  %v7034_v40 = vld [vmem:[#allocation2 + $0x568] sm:$0xff]  ;;  %v7035_v33 = vld [vmem:[#allocation2 + $0x540] sm:$0xff] }
 0x22b   :  { %1577 = vmatmul.f32.gmra.mxu3 %v9132_v28  ;;  %1635 = vmatmul.f32.gmra.mxu1 %v9132_v28 }
 0x22c   :  { %2164 = vmatpush.msra.mxu3 %v7026_v59  ;;  %2222 = vmatpush.msra.mxu1 %v7027_v27  ;;  %v7037_v59 = vld [vmem:[#allocation2 + $0x520] sm:$0xff]  ;;  %v7038_v27 = vld [vmem:[#allocation2 + $0x528] sm:$0xff] }
 0x22d   :  { %2322 = vmatpush.msrb.mxu0 %v7028_v8  ;;  %v7039_v8 = vld [vmem:[#allocation2 + $0x500] sm:$0xff] }
 0x22e   :  { %2165 = vmatpush.msra.mxu3 %v7029_v56  ;;  %2223 = vmatpush.msra.mxu1 %v7030_v0  ;;  %v7040_v56 = vld [vmem:[#allocation2 + $0x508] sm:$0xff]  ;;  %v9197_v0 = vpop.f32.mrf.mxu2 }
 0x22f   :  { %12297 = vst [vmem:[#allocation49_spill] sm:$0xff] %v9197_v0  ;;  %v7065_v0 = vld [vmem:[#allocation2 + $0x570] sm:$0xff] }
 0x230   :  { %2166 = vmatpush.msra.mxu3 %v7031_v44  ;;  %2224 = vmatpush.msra.mxu1 %v7032_v1  ;;  %v9199_v44 = vpop.f32.mrf.mxu1  ;;  %v7041_v1 = vld [vmem:[#allocation2 + $0x4e0] sm:$0xff] }
 0x231   :  { %12298 = vst [vmem:[#allocation50_spill] sm:$0xff] %v9199_v44  ;;  %v12314_v44 = vld [vmem:[#allocation11_spill] sm:$0xff] }
 0x232   :  { %2167 = vmatpush.msra.mxu3 %v7033_v5  ;;  %2225 = vmatpush.msra.mxu1 %v7034_v40  ;;  %v7042_v5 = vld [vmem:[#allocation2 + $0x4e8] sm:$0xff]  ;;  %v9203_v40 = vpop.f32.mrf.mxu0 }
 0x233   :  { %1580 = vmatmul.f32.gmra.mxu3 %v9158_v10  ;;  %1638 = vmatmul.f32.gmra.mxu1 %v9158_v10  ;;  %12299 = vst [vmem:[#allocation51_spill] sm:$0xff] %v9203_v40  ;;  %v7057_v40 = vld [vmem:[#allocation2 + $0x5f0] sm:$0xff] }
 0x234   :  { %2168 = vmatpush.msra.mxu3 %v7035_v33  ;;  %2226 = vmatpush.msra.mxu1 %v7036_v21  ;;  %v7043_v33 = vld [vmem:[#allocation2 + $0x4c0] sm:$0xff]  ;;  %v7044_v21 = vld [vmem:[#allocation2 + $0x4c8] sm:$0xff] }
 0x236   :  { %2169 = vmatpush.msra.mxu3 %v7037_v59  ;;  %2227 = vmatpush.msra.mxu1 %v7038_v27  ;;  %v7045_v59 = vld [vmem:[#allocation2 + $0x4a0] sm:$0xff]  ;;  %v7046_v27 = vld [vmem:[#allocation2 + $0x4a8] sm:$0xff]  ;;  %v9205_v51 = vpop.f32.mrf.mxu2 }
 0x237   :  { %12300 = vst [vmem:[#allocation52_spill] sm:$0xff] %v9205_v51  ;;  %v7058_v51 = vld [vmem:[#allocation2 + $0x5f8] sm:$0xff] }
 0x238   :  { %2170 = vmatpush.msra.mxu3 %v7039_v8  ;;  %2228 = vmatpush.msra.mxu1 %v7040_v56  ;;  %v7047_v8 = vld [vmem:[#allocation2 + $0x480] sm:$0xff]  ;;  %v7048_v56 = vld [vmem:[#allocation2 + $0x488] sm:$0xff] }
 0x23a   :  { %2171 = vmatpush.msra.mxu3 %v7041_v1  ;;  %2229 = vmatpush.msra.mxu1 %v7042_v5  ;;  %v7049_v1 = vld [vmem:[#allocation2 + $0x460] sm:$0xff]  ;;  %v7050_v5 = vld [vmem:[#allocation2 + $0x468] sm:$0xff] }
 0x23b   :  { %1583 = vmatmul.f32.gmra.mxu3 %v9168_v6  ;;  %1641 = vmatmul.f32.gmra.mxu1 %v9168_v6 }
 0x23c   :  { %2172 = vmatpush.msra.mxu3 %v7043_v33  ;;  %2230 = vmatpush.msra.mxu1 %v7044_v21  ;;  %v9209_v33 = vpop.f32.mrf.mxu1  ;;  %v7051_v21 = vld [vmem:[#allocation2 + $0x440] sm:$0xff] }
 0x23d   :  { %12301 = vst [vmem:[#allocation53_spill] sm:$0xff] %v9209_v33  ;;  %v12313_v33 = vld [vmem:[#allocation14_spill] sm:$0xff] }
 0x23e   :  { %2173 = vmatpush.msra.mxu3 %v7045_v59  ;;  %2231 = vmatpush.msra.mxu1 %v7046_v27  ;;  %v7052_v59 = vld [vmem:[#allocation2 + $0x448] sm:$0xff]  ;;  %v9211_v27 = vpop.f32.mrf.mxu0 }
 0x23f   :  { %12302 = vst [vmem:[#allocation54_spill] sm:$0xff] %v9211_v27  ;;  %v9215_v27 = vpop.f32.mrf.mxu2 }
 0x240   :  { %2174 = vmatpush.msra.mxu3 %v7047_v8  ;;  %2232 = vmatpush.msra.mxu1 %v7048_v56  ;;  %v7053_v8 = vld [vmem:[#allocation2 + $0x420] sm:$0xff]  ;;  %v7054_v56 = vld [vmem:[#allocation2 + $0x428] sm:$0xff]  ;;  %12303 = vst [vmem:[#allocation55_spill] sm:$0xff] %v9215_v27 }
 0x242   :  { %2175 = vmatpush.msra.mxu3 %v7049_v1  ;;  %2233 = vmatpush.msra.mxu1 %v7050_v5  ;;  %v7055_v1 = vld [vmem:[#allocation2 + $0x610] sm:$0xff]  ;;  %v7056_v5 = vld [vmem:[#allocation2 + $0x618] sm:$0xff] }
 0x243   :  { %1870 = vmatmul.f32.vlgmr.msrb.gmra.mxu3 %v9091_v3  ;;  %1928 = vmatmul.f32.vlgmr.msrb.gmra.mxu1 %v9091_v3 }
 0x244   :  { %2176 = vmatpush.msra.mxu3 %v7051_v21  ;;  %2234 = vmatpush.msra.mxu1 %v7052_v59  ;;  %v7059_v21 = vld [vmem:[#allocation2 + $0x5d0] sm:$0xff]  ;;  %v7060_v59 = vld [vmem:[#allocation2 + $0x5d8] sm:$0xff] }
 0x246   :  { %2177 = vmatpush.msra.mxu3 %v7053_v8  ;;  %2235 = vmatpush.msra.mxu1 %v7054_v56  ;;  %v9217_v8 = vpop.f32.mrf.mxu1  ;;  %v7061_v56 = vld [vmem:[#allocation2 + $0x5b0] sm:$0xff] }
 0x247   :  { %12304 = vst [vmem:[#allocation56_spill] sm:$0xff] %v9217_v8  ;;  %v9223_v27 = vpop.f32.mrf.mxu2 }
 0x248   :  { %2278 = vmatpush.msrb.mxu3 %v7055_v1  ;;  %2336 = vmatpush.msrb.mxu1 %v7056_v5  ;;  %v7062_v1 = vld [vmem:[#allocation2 + $0x5b8] sm:$0xff]  ;;  %v9219_v5 = vpop.f32.mrf.mxu0  ;;  %12305 = vst [vmem:[#allocation57_spill] sm:$0xff] %v9223_v27 }
 0x24a   :  { %2279 = vmatpush.msrb.mxu3 %v7057_v40  ;;  %2337 = vmatpush.msrb.mxu1 %v7058_v51  ;;  %v7063_v40 = vld [vmem:[#allocation2 + $0x590] sm:$0xff]  ;;  %v7064_v51 = vld [vmem:[#allocation2 + $0x598] sm:$0xff] }
 0x24b   :  { %1873 = vmatmul.f32.gmra.mxu3 %v9132_v28  ;;  %1931 = vmatmul.f32.gmra.mxu1 %v9132_v28 }
 0x24c   :  { %2280 = vmatpush.msrb.mxu3 %v7059_v21  ;;  %2338 = vmatpush.msrb.mxu1 %v7060_v59  ;;  %v7067_v21 = vld [vmem:[#allocation2 + $0x550] sm:$0xff]  ;;  %v7068_v59 = vld [vmem:[#allocation2 + $0x558] sm:$0xff] }
 0x24e   :  { %2281 = vmatpush.msrb.mxu3 %v7061_v56  ;;  %2339 = vmatpush.msrb.mxu1 %v7062_v1  ;;  %v7069_v56 = vld [vmem:[#allocation2 + $0x530] sm:$0xff]  ;;  %v7070_v1 = vld [vmem:[#allocation2 + $0x538] sm:$0xff] }
 0x24f   :  { %v9229_v27 = vpop.f32.mrf.mxu2 }
 0x250   :  { %2282 = vmatpush.msrb.mxu3 %v7063_v40  ;;  %2340 = vmatpush.msrb.mxu1 %v7064_v51  ;;  %v9225_v40 = vpop.f32.mrf.mxu1  ;;  %v7071_v51 = vld [vmem:[#allocation2 + $0x510] sm:$0xff]  ;;  %12307 = vst [vmem:[#allocation59_spill] sm:$0xff] %v9229_v27 }
 0x251   :  { %12306 = vst [vmem:[#allocation58_spill] sm:$0xff] %v9225_v40  ;;  %v7082_v40 = vld [vmem:[#allocation2 + $0x478] sm:$0xff] }
 0x252   :  { %2283 = vmatpush.msrb.mxu3 %v7065_v0  ;;  %2341 = vmatpush.msrb.mxu1 %v7066_v60  ;;  %v7072_v0 = vld [vmem:[#allocation2 + $0x518] sm:$0xff]  ;;  %v1491_v60 = vpop.f32.mrf.mxu0 }
 0x253   :  { %1876 = vmatmul.f32.gmra.mxu3 %v9158_v10  ;;  %1934 = vmatmul.f32.gmra.mxu1 %v9158_v10 }
 0x254   :  { %2284 = vmatpush.msrb.mxu3 %v7067_v21  ;;  %2342 = vmatpush.msrb.mxu1 %v7068_v59  ;;  %v7075_v21 = vld [vmem:[#allocation2 + $0x4d0] sm:$0xff]  ;;  %v7076_v59 = vld [vmem:[#allocation2 + $0x4d8] sm:$0xff] }
 0x256   :  { %2285 = vmatpush.msrb.mxu3 %v7069_v56  ;;  %2343 = vmatpush.msrb.mxu1 %v7070_v1  ;;  %v7077_v56 = vld [vmem:[#allocation2 + $0x4b0] sm:$0xff]  ;;  %v7078_v1 = vld [vmem:[#allocation2 + $0x4b8] sm:$0xff] }
 0x258   :  { %2286 = vmatpush.msrb.mxu3 %v7071_v51  ;;  %2344 = vmatpush.msrb.mxu1 %v7072_v0  ;;  %v7079_v51 = vld [vmem:[#allocation2 + $0x490] sm:$0xff]  ;;  %v7080_v0 = vld [vmem:[#allocation2 + $0x498] sm:$0xff] }
 0x25a   :  { %2287 = vmatpush.msrb.mxu3 %v7073_v38  ;;  %2345 = vmatpush.msrb.mxu1 %v7074_v50  ;;  %v9231_v38 = vpop.f32.mrf.mxu1  ;;  %v7081_v50 = vld [vmem:[#allocation2 + $0x470] sm:$0xff]  ;;  %v1494_v29 = vpop.f32.mrf.mxu0 }
 0x25b   :  { %1879 = vmatmul.f32.gmra.mxu3 %v9168_v6  ;;  %1937 = vmatmul.f32.gmra.mxu1 %v9168_v6  ;;  %12308 = vst [vmem:[#allocation60_spill] sm:$0xff] %v9231_v38 }
 0x25c   :  { %2288 = vmatpush.msrb.mxu3 %v7075_v21  ;;  %2346 = vmatpush.msrb.mxu1 %v7076_v59  ;;  %v7083_v21 = vld [vmem:[#allocation2 + $0x450] sm:$0xff]  ;;  %v7084_v59 = vld [vmem:[#allocation2 + $0x458] sm:$0xff] }
 0x25e   :  { %2289 = vmatpush.msrb.mxu3 %v7077_v56  ;;  %2347 = vmatpush.msrb.mxu1 %v7078_v1  ;;  %v7085_v56 = vld [vmem:[#allocation2 + $0x430] sm:$0xff]  ;;  %v7086_v1 = vld [vmem:[#allocation2 + $0x438] sm:$0xff] }
 0x260   :  { %2290 = vmatpush.msrb.mxu3 %v7079_v51  ;;  %2348 = vmatpush.msrb.mxu1 %v7080_v0  ;;  %v9233_v51 = vpop.f32.mrf.mxu2 }
 0x261   :  { %12309 = vst [vmem:[#allocation61_spill] sm:$0xff] %v9233_v51 }
 0x262   :  { %2291 = vmatpush.msrb.mxu3 %v7081_v50  ;;  %2349 = vmatpush.msrb.mxu1 %v7082_v40  ;;  %v9235_v0 = vpop.f32.mrf.mxu1  ;;  %v1497_v27 = vpop.f32.mrf.mxu0 }
 0x263   :  { %12310 = vst [vmem:[#allocation62_spill] sm:$0xff] %v9235_v0 }
 0x264   :  { %2292 = vmatpush.msrb.mxu3 %v7083_v21  ;;  %2350 = vmatpush.msrb.mxu1 %v7084_v59 }
 0x266   :  { %2293 = vmatpush.msrb.mxu3 %v7085_v56  ;;  %2351 = vmatpush.msrb.mxu1 %v7086_v1 }
 0x268   :  { %v9237_v8 = vpop.f32.mrf.mxu2 }
 0x269   :  { %12311 = vst [vmem:[#allocation63_spill] sm:$0xff] %v9237_v8 }
 0x26a   :  { %v9239_v38 = vpop.f32.mrf.mxu1  ;;  %v9241_v50 = vpop.f32.mrf.mxu0 }
 0x26b   :  { %12312 = vst [vmem:[#allocation64_spill] sm:$0xff] %v9239_v38 }
 0x270   :  { %v1546_v40 = vpop.f32.mrf.mxu2 }
 0x272   :  { %v9243_v21 = vpop.f32.mrf.mxu0 }
 0x278   :  { %v1549_v51 = vpop.f32.mrf.mxu2 }
 0x27a   :  { %v9248_v8 = vpop.f32.mrf.mxu0 }
 0x280   :  { %v1517_v63 = vpop.f32.mrf.mxu1 }
 0x281   :  { %v1518_v56 = vadd.f32 %v1517_v63, %v12313_v33  ;;  %v1552_v63 = vpop.f32.mrf.mxu2 }
 0x282   :  { %v9252_v37 = vpop.f32.mrf.mxu0 }
 0x283   :  { %v1547_v46 = vadd.f32 %v1546_v40, %v1518_v56 }
 0x285   :  { %v6167_v43 = vmul.f32 -1.442695, %v1547_v46 }
 0x286   :  { %v1459_v59 = vpop.f32.mrf.mxu3 }
 0x287   :  { %v1460_v1 = vadd.f32 %v1459_v59, %v12314_v44 }
 0x288   :  { %v1520_v36 = vpop.f32.mrf.mxu1 }
 0x289   :  { %v1489_v0 = vadd.f32 %v9219_v5, %v1460_v1  ;;  %v1521_v38 = vadd.f32 %v1520_v36, %v12313_v33 }
 0x28b   :  { %v6163_v52 = vmul.f32 -1.442695, %v1489_v0  ;;  %v1550_v25 = vadd.f32 %v1549_v51, %v1521_v38 }
 0x28d   :  { %6392 = vpow2.f32 %v6163_v52  ;;  %v6168_v11 = vmul.f32 -1.442695, %v1550_v25  ;;  %v1555_v25 = vpop.f32.mrf.mxu2 }
 0x28e   :  { %v1462_v61 = vpop.f32.mrf.mxu3  ;;  %6394 = vpow2.f32 %v6167_v43 }
 0x28f   :  { %v1463_v24 = vadd.f32 %v1462_v61, %v12314_v44  ;;  %6396 = vpow2.f32 %v6168_v11 }
 0x290   :  { %v1523_v15 = vpop.f32.mrf.mxu1 }
 0x291   :  { %v1492_v59 = vadd.f32 %v1491_v60, %v1463_v24  ;;  %v1524_v5 = vadd.f32 %v1523_v15, %v12313_v33  ;;  %v1900_v15 = vpop.f32.mrf.mxu0 }
 0x293   :  { %v6393_v31 = vpop.eup %6392  ;;  %v6164_v40 = vmul.f32 -1.442695, %v1492_v59  ;;  %v1553_v52 = vadd.f32 %v1552_v63, %v1524_v5 }
 0x294   :  { %v9255_v56 = vadd.f32 1.0, %v6393_v31  ;;  %v6395_v46 = vpop.eup %6394 }
 0x295   :  { %6398 = vpow2.f32 %v6164_v40  ;;  %v9259_v24 = vadd.f32 1.0, %v6395_v46  ;;  %v6169_v38 = vmul.f32 -1.442695, %v1553_v52  ;;  %v6397_v31 = vpop.eup %6396 }
 0x296   :  { %v1465_v0 = vpop.f32.mrf.mxu3  ;;  %6400 = vrcp.f32 %v9255_v56  ;;  %v9265_v40 = vadd.f32 1.0, %v6397_v31  ;;  %v1662_v31 = vpop.f32.mrf.mxu2  ;;  %v1699_v20 = vand.u32 2147483647, %v9255_v56  ;;  %vm1695_vm5 = vweird.f32 %v9255_v56 }
 0x297   :  { %v1466_v61 = vadd.f32 %v1465_v0, %v12314_v44  ;;  %6402 = vrcp.f32 %v9259_v24  ;;  %v2021_v0 = vadd.f32 %v1900_v15, %v8858_v14  ;;  %vm1771_vm7 = vweird.f32 %v9259_v24 }
 0x298   :  { %v1526_v36 = vpop.f32.mrf.mxu1  ;;  %6404 = vpow2.f32 %v6169_v38  ;;  %vm1700_vm0 = vcmp.eq.f32.partialorder %v1699_v20, 8.507059e+37  ;;  %v1792_v7 = vand.u32 2147483648, %v9265_v40  ;;  %vm1786_vm10 = vweird.f32 %v9265_v40 }
 0x299   :  { %v1527_v43 = vadd.f32 %v1526_v36, %v12313_v33  ;;  %v1495_v60 = vadd.f32 %v1494_v29, %v1466_v61  ;;  %v1903_v14 = vpop.f32.mrf.mxu0 }
 0x29b   :  { %v1556_v1 = vadd.f32 %v1555_v25, %v1527_v43  ;;  %v6399_v59 = vpop.eup %6398  ;;  %v6165_v63 = vmul.f32 -1.442695, %v1495_v60  ;;  %v6175_v25 = vmul.f32 -1.442695, %v2021_v0 }
 0x29c   :  { %v6401_v5 = vpop.eup %6400  ;;  %v9267_v46 = vadd.f32 1.0, %v6399_v59 }
 0x29d   :  { %v6170_v36 = vmul.f32 -1.442695, %v1556_v1  ;;  %6406 = vpow2.f32 %v6165_v63  ;;  %v1691_v52 = vmul.f32 %v6401_v5, %v9255_v56  ;;  %v9270_v43 = vpop.eup %6402  ;;  %vm1696_vm4 = vweird.f32 %v6401_v5 }
 0x29e   :  { %v1468_v51 = vpop.f32.mrf.mxu3  ;;  %6408 = vrcp.f32 %v9265_v40  ;;  %v1767_v38 = vmul.f32 %v9270_v43, %v9259_v24  ;;  %vm1697_vm6 = vmor %vm1695_vm5, %vm1696_vm4  ;;  %vm1772_vm9 = vweird.f32 %v9270_v43  ;;  %vm1710_vm13 = vweird.f32 %v9267_v46 }
 0x29f   :  { %v1469_v11 = vadd.f32 %v1468_v51, %v12314_v44  ;;  %6410 = vpow2.f32 %v6170_v36  ;;  %v6405_v51 = vpop.eup %6404  ;;  %v1701_v36 = vand.u32 2147483648, %v9255_v56  ;;  %vm9336_vm12 = vmor %vm1771_vm7, %vm1772_vm9 }
 0x2a0   :  { %v1633_v61 = vpop.f32.mrf.mxu1  ;;  %6412 = vrcp.f32 %v9267_v46  ;;  %v9277_v59 = vadd.f32 1.0, %v6405_v51  ;;  %v1768_v48 = vsub.f32 1.0, %v1767_v38 }
 0x2a1   :  { %v1498_v29 = vadd.f32 %v1497_v27, %v1469_v11  ;;  %v1692_v27 = vsub.f32 1.0, %v1691_v52  ;;  %6414 = vpow2.f32 %v6175_v25  ;;  %v2022_v11 = vadd.f32 %v1903_v14, %v8873_v49 }
 0x2a2   :  { %v1634_v49 = vadd.f32 %v1633_v61, %v8665_v53  ;;  %v1702_v61 = vor.u32 1.1754944e-38, %v1701_v36  ;;  %v1665_v36 = vpop.f32.mrf.mxu2  ;;  %vm1801_vm4 = vweird.f32 %v9277_v59 }
 0x2a3   :  { %v6166_v15 = vmul.f32 -1.442695, %v1498_v29  ;;  %v6407_v1 = vpop.eup %6406  ;;  %v1693_v63 = vmul.f32 %v6401_v5, %v1692_v27  ;;  %v6176_v54 = vmul.f32 -1.442695, %v2022_v11 }
 0x2a4   :  { %v9279_v0 = vpop.eup %6408  ;;  %v9285_v25 = vadd.f32 1.0, %v6407_v1  ;;  %v1769_v1 = vmul.f32 %v9270_v43, %v1768_v48  ;;  %v1663_v56 = vadd.f32 %v1662_v31, %v1634_v49 }
 0x2a5   :  { %6416 = vpow2.f32 %v6166_v15  ;;  %v6411_v26 = vpop.eup %6410  ;;  %v1694_v29 = vadd.f32 %v6401_v5, %v1693_v63  ;;  %v1777_v15 = vand.u32 2147483648, %v9259_v24  ;;  %v1782_v63 = vmul.f32 %v9279_v0, %v9265_v40 }
 0x2a6   :  { %v1575_v60 = vpop.f32.mrf.mxu3  ;;  %v9283_v52 = vpop.eup %6412  ;;  %6418 = vrcp.f32 %v9277_v59  ;;  %v9294_v30 = vadd.f32 1.0, %v6411_v26  ;;  %vm1787_vm1 = vweird.f32 %v9279_v0 }
 0x2a7   :  { %v1576_v51 = vadd.f32 %v1575_v60, %v8681_v13  ;;  %v6415_v38 = vpop.eup %6414  ;;  %v1775_v60 = vand.u32 2147483647, %v9259_v24  ;;  %v1698_v2 = vsel %vm1697_vm6, %v6401_v5, %v1694_v29  ;;  %v1706_v11 = vmul.f32 %v9283_v52, %v9267_v46  ;;  %vm9370_vm3 = vmor %vm1786_vm10, %vm1787_vm1 }
 0x2a8   :  { %v1636_v14 = vpop.f32.mrf.mxu1  ;;  %6420 = vrcp.f32 %v9285_v25  ;;  %v1703_v35 = vsel %vm1700_vm0, %v1702_v61, %v1698_v2  ;;  %v9304_v45 = vadd.f32 1.0, %v6415_v38  ;;  %v1783_v12 = vsub.f32 1.0, %v1782_v63 }
 0x2a9   :  { %v1605_v26 = vadd.f32 %v9241_v50, %v1576_v51  ;;  %6422 = vpow2.f32 %v6176_v54  ;;  %v1826_v48 = vmul.f32 %v1703_v35, %v1663_v56  ;;  %v1707_v20 = vsub.f32 1.0, %v1706_v11 }
 0x2aa   :  { %6424 = vrcp.f32 %v9294_v30  ;;  %v1778_v29 = vor.u32 1.1754944e-38, %v1777_v15  ;;  %vm9312_vm8 = vcmp.eq.f32.partialorder %v1775_v60, 8.507059e+37  ;;  %v1770_v54 = vadd.f32 %v9270_v43, %v1769_v1 }
 0x2ab   :  { %v6417_v58 = vpop.eup %6416  ;;  %v1830_v50 = vadd.f32 %v1826_v48, %v1605_v26  ;;  %v1637_v49 = vadd.f32 %v1636_v14, %v8665_v53  ;;  %v1708_v51 = vmul.f32 %v9283_v52, %v1707_v20  ;;  %vm1711_vm11 = vweird.f32 %v9283_v52 }
 0x2ac   :  { %v9307_v5 = vpop.eup %6418  ;;  %v9310_v31 = vadd.f32 1.0, %v6417_v58  ;;  %v1714_v58 = vand.u32 2147483647, %v9267_v46  ;;  %v1784_v38 = vmul.f32 %v9279_v0, %v1783_v12  ;;  %v1716_v61 = vand.u32 2147483648, %v9267_v46  ;;  %vm1712_vm14 = vmor %vm1710_vm13, %vm1711_vm11 }
 0x2ad   :  { %v1797_v63 = vmul.f32 %v9307_v5, %v9277_v59  ;;  %v1793_v56 = vor.u32 1.1754944e-38, %v1792_v7  ;;  %v1709_v12 = vadd.f32 %v9283_v52, %v1708_v51  ;;  %v1666_v48 = vadd.f32 %v1665_v36, %v1637_v49  ;;  %v1668_v49 = vpop.f32.mrf.mxu2 }
 0x2ae   :  { %v1578_v27 = vpop.f32.mrf.mxu3  ;;  %v9323_v15 = vpop.eup %6420  ;;  %6426 = vrcp.f32 %v9310_v31  ;;  %v1717_v24 = vor.u32 1.1754944e-38, %v1716_v61  ;;  %vm1715_vm15 = vcmp.eq.f32.partialorder %v1714_v58, 8.507059e+37  ;;  %vm1802_vm5 = vweird.f32 %v9307_v5 }
 0x2af   :  { %v1579_v14 = vadd.f32 %v1578_v27, %v8681_v13  ;;  %v9330_v1 = vpop.eup %6422  ;;  %v1774_v27 = vsel %vm9336_vm12, %v9270_v43, %v1770_v54  ;;  %6428 = vtanh.f32 %v1830_v50  ;;  %v1713_v7 = vsel %vm1712_vm14, %v9283_v52, %v1709_v12  ;;  %vm9405_vm10 = vmor %vm1801_vm4, %vm1802_vm5 }
 0x2b0   :  { %v1639_v60 = vpop.f32.mrf.mxu1  ;;  %v9343_v26 = vpop.eup %6424  ;;  %v1721_v46 = vmul.f32 %v9323_v15, %v9285_v25  ;;  %v1798_v51 = vsub.f32 1.0, %v1797_v63  ;;  %v1718_v16 = vsel %vm1715_vm15, %v1717_v24, %v1713_v7  ;;  %v1785_v43 = vadd.f32 %v9279_v0, %v1784_v38 }
 0x2b1   :  { %v1608_v20 = vadd.f32 %v9243_v21, %v1579_v14  ;;  %v1812_v36 = vmul.f32 %v9343_v26, %v9294_v30  ;;  %v1779_v54 = vsel %vm9312_vm8, %v1778_v29, %v1774_v27  ;;  %v1827_v50 = vmul.f32 %v1718_v16, %v1666_v48 }
 0x2b2   :  { %v1722_v52 = vsub.f32 1.0, %v1721_v46  ;;  %v1790_v21 = vand.u32 2147483647, %v9265_v40  ;;  %v1640_v58 = vadd.f32 %v1639_v60, %v8665_v53  ;;  %vm1726_vm2 = vweird.f32 %v9323_v15 }
 0x2b3   :  { %v1731_v63 = vand.u32 2147483648, %v9285_v25  ;;  %v1831_v16 = vadd.f32 %v1827_v50, %v1608_v20  ;;  %v1729_v38 = vand.u32 2147483647, %v9285_v25  ;;  %v1799_v12 = vmul.f32 %v9307_v5, %v1798_v51 }
 0x2b4   :  { %v9364_v14 = vpop.eup %6426  ;;  %v1723_v2 = vmul.f32 %v9323_v15, %v1722_v52  ;;  %v1838_v27 = vsub.f32 1.0, %v1779_v54  ;;  %v1789_v40 = vsel %vm9370_vm3, %v9279_v0, %v1785_v43  ;;  %v1813_v48 = vsub.f32 1.0, %v1812_v36 }
 0x2b5   :  { %v6429_v11 = vpop.eup %6428  ;;  %6430 = vtanh.f32 %v1831_v16  ;;  %vm1725_vm6 = vweird.f32 %v9285_v25  ;;  %vm1791_vm0 = vcmp.eq.f32.partialorder %v1790_v21, 8.507059e+37  ;;  %v1669_v7 = vadd.f32 %v1668_v49, %v1640_v58 }
 0x2b6   :  { %v1581_v35 = vpop.f32.mrf.mxu3  ;;  %v1724_v24 = vadd.f32 %v9323_v15, %v1723_v2  ;;  %vm1727_vm7 = vmor %vm1725_vm6, %vm1726_vm2  ;;  %v1736_v46 = vmul.f32 %v9364_v14, %v9310_v31  ;;  %v1794_v51 = vsel %vm1791_vm0, %v1793_v56, %v1789_v40  ;;  %vm1730_vm8 = vcmp.eq.f32.partialorder %v1729_v38, 8.507059e+37  ;;  %v1906_v40 = vpop.f32.mrf.mxu0 }
 0x2b7   :  { %v1582_v60 = vadd.f32 %v1581_v35, %v8681_v13  ;;  %v1732_v35 = vor.u32 1.1754944e-38, %v1731_v63  ;;  %v1842_v43 = vmul.f32 %v6429_v11, %v1838_v27  ;;  %v1800_v25 = vadd.f32 %v9307_v5, %v1799_v12  ;;  %v1671_v11 = vpop.f32.mrf.mxu2 }
 0x2b8   :  { %v1642_v20 = vpop.f32.mrf.mxu1  ;;  %v1728_v50 = vsel %vm1727_vm7, %v9323_v15, %v1724_v24  ;;  %v1737_v52 = vsub.f32 1.0, %v1736_v46  ;;  %vm1741_vm9 = vweird.f32 %v9364_v14  ;;  %v1746_v58 = vand.u32 2147483648, %v9310_v31 }
 0x2b9   :  { %v1611_v0 = vadd.f32 %v9248_v8, %v1582_v60  ;;  %v1733_v36 = vsel %vm1730_vm8, %v1732_v35, %v1728_v50  ;;  %v1643_v21 = vadd.f32 %v1642_v20, %v8665_v53  ;;  %v1744_v56 = vand.u32 2147483647, %v9310_v31  ;;  %v12323_v50 = vld [vmem:[#allocation15_spill] sm:$0xff] }
 0x2ba   :  { %v1828_v49 = vmul.f32 %v1733_v36, %v1669_v7  ;;  %v1738_v63 = vmul.f32 %v9364_v14, %v1737_v52  ;;  %v1846_v15 = vmul.f32 %v1779_v54, %v8783_v47  ;;  %v1807_v16 = vand.u32 2147483648, %v9277_v59 }
 0x2bb   :  { %v6431_v29 = vpop.eup %6430  ;;  %v1814_v2 = vmul.f32 %v9343_v26, %v1813_v48  ;;  %v1839_v38 = vsub.f32 1.0, %v1794_v51  ;;  %v1805_v47 = vand.u32 2147483647, %v9277_v59  ;;  %vm1740_vm11 = vweird.f32 %v9310_v31 }
 0x2bc   :  { %v1832_v60 = vadd.f32 %v1828_v49, %v1611_v0  ;;  %v1739_v54 = vadd.f32 %v9364_v14, %v1738_v63  ;;  %v1804_v48 = vsel %vm9405_vm10, %v9307_v5, %v1800_v25  ;;  %v1672_v24 = vadd.f32 %v1671_v11, %v1643_v21  ;;  %vm1742_vm12 = vmor %vm1740_vm11, %vm1741_vm9  ;;  %v7087_v0 = vld [vmem:[#allocation2 + $0x208] sm:$0xff] }
 0x2bd   :  { %v1747_v7 = vor.u32 1.1754944e-38, %v1746_v58  ;;  %v1843_v35 = vmul.f32 %v6431_v29, %v1839_v38  ;;  %vm1745_vm13 = vcmp.eq.f32.partialorder %v1744_v56, 8.507059e+37  ;;  %v1808_v20 = vor.u32 1.1754944e-38, %v1807_v16  ;;  %v7089_v21 = vld [vmem:[#allocation2 + $0x1e8] sm:$0xff] }
 0x2be   :  { %v1584_v61 = vpop.f32.mrf.mxu3  ;;  %6432 = vtanh.f32 %v1832_v60  ;;  %v1743_v59 = vsel %vm1742_vm12, %v9364_v14, %v1739_v54  ;;  %v2023_v36 = vadd.f32 %v1906_v40, %v8887_v39  ;;  %vm1806_vm14 = vcmp.eq.f32.partialorder %v1805_v47, 8.507059e+37  ;;  %v7093_v38 = vld [vmem:[#allocation2 + $0x1a8] sm:$0xff]  ;;  %v7094_v60 = vld [vmem:[#allocation2 + $0x3a0] sm:$0xff] }
 0x2bf   :  { %v1585_v8 = vadd.f32 %v1584_v61, %v8681_v13  ;;  %v9412_v61 = vadd.f32 %v1846_v15, %v1842_v43  ;;  %v1748_v46 = vsel %vm1745_vm13, %v1747_v7, %v1743_v59  ;;  %v7088_v43 = vld [vmem:[#allocation2 + $0x400] sm:$0xff]  ;;  %v1847_v14 = vmul.f32 %v1794_v51, %v8828_v18  ;;  %v7091_v18 = vld [vmem:[#allocation2 + $0x1c8] sm:$0xff] }
 0x2c0   :  { %v1829_v25 = vmul.f32 %v1748_v46, %v1672_v24  ;;  %6434 = vrcp.f32 %v9304_v45  ;;  %v1809_v52 = vsel %vm1806_vm14, %v1808_v20, %v1804_v48  ;;  %vm1817_vm15 = vweird.f32 %v9343_v26  ;;  %v7092_v51 = vld [vmem:[#allocation2 + $0x3c0] sm:$0xff]  ;;  %v7095_v40 = vld [vmem:[#allocation2 + $0x188] sm:$0xff]  ;;  %v1909_v24 = vpop.f32.mrf.mxu0 }
 0x2c1   :  { %2178 = vmatmul.f32.vlgmr.msra.gmra.mxu3 %v9412_v61  ;;  %2236 = vmatmul.f32.vlgmr.msra.gmra.mxu1 %v9412_v61  ;;  %v1614_v31 = vadd.f32 %v9252_v37, %v1585_v8  ;;  %v7090_v37 = vld [vmem:[#allocation2 + $0x3e0] sm:$0xff]  ;;  %v1815_v58 = vadd.f32 %v9343_v26, %v1814_v2  ;;  %v9429_v56 = vadd.f32 %v1847_v14, %v1843_v35  ;;  %v1822_v15 = vand.u32 2147483648, %v9294_v30  ;;  %v7097_v20 = vld [vmem:[#allocation2 + $0x168] sm:$0xff] }
 0x2c2   :  { %2574 = vmatpush.msra.mxu3 %v7087_v0  ;;  %2824 = vmatpush.msra.mxu1 %v7088_v43  ;;  %v6177_v8 = vmul.f32 -1.442695, %v2023_v36  ;;  %vm1816_vm1 = vweird.f32 %v9294_v30  ;;  %v1840_v29 = vsub.f32 1.0, %v1809_v52  ;;  %v1820_v16 = vand.u32 2147483647, %v9294_v30  ;;  %v7096_v48 = vld [vmem:[#allocation2 + $0x380] sm:$0xff] }
 0x2c3   :  { %v1833_v63 = vadd.f32 %v1829_v25, %v1614_v31  ;;  %vm9436_vm2 = vmor %vm1816_vm1, %vm1817_vm15  ;;  %v9448_v47 = vadd.f32 1.0, %v9330_v1  ;;  %v1823_v54 = vor.u32 1.1754944e-38, %v1822_v15  ;;  %v12326_v7 = vld [vmem:[#allocation17_spill] sm:$0xff]  ;;  %v2024_v43 = vadd.f32 %v1909_v24, %v8900_v17  ;;  %v7099_v36 = vld [vmem:[#allocation2 + $0x148] sm:$0xff] }
 0x2c4   :  { %2575 = vmatpush.msra.mxu3 %v7089_v21  ;;  %2825 = vmatpush.msra.mxu1 %v7090_v37  ;;  %v6433_v39 = vpop.eup %6432  ;;  %v1819_v12 = vsel %vm9436_vm2, %v9343_v26, %v1815_v58  ;;  %vm1821_vm3 = vcmp.eq.f32.partialorder %v1820_v16, 8.507059e+37  ;;  %v1848_v26 = vmul.f32 %v1809_v52, %v8861_v23  ;;  %v7098_v46 = vld [vmem:[#allocation2 + $0x360] sm:$0xff]  ;;  %v7101_v14 = vld [vmem:[#allocation2 + $0x128] sm:$0xff]  ;;  %vm2046_vm8 = vweird.f32 %v9304_v45 }
 0x2c5   :  { %v1844_v11 = vmul.f32 %v6433_v39, %v1840_v29  ;;  %v1824_v31 = vsel %vm1821_vm3, %v1823_v54, %v1819_v12  ;;  %v7100_v23 = vld [vmem:[#allocation2 + $0x340] sm:$0xff]  ;;  %v6178_v17 = vmul.f32 -1.442695, %v2024_v43  ;;  %v7105_v16 = vld [vmem:[#allocation2 + $0xe8] sm:$0xff]  ;;  %vm2061_vm12 = vweird.f32 %v9448_v47 }
 0x2c6   :  { %v1871_v27 = vpop.f32.mrf.mxu3  ;;  %2576 = vmatpush.msra.mxu3 %v7091_v18  ;;  %2826 = vmatpush.msra.mxu1 %v7092_v51  ;;  %v9445_v30 = vpop.eup %6434  ;;  %v1841_v25 = vsub.f32 1.0, %v1824_v31  ;;  %v7102_v52 = vld [vmem:[#allocation2 + $0x320] sm:$0xff]  ;;  %v1849_v15 = vmul.f32 %v1824_v31, %v8878_v4  ;;  %v12327_v18 = vld [vmem:[#allocation19_spill] sm:$0xff]  ;;  %v7111_v43 = vld [vmem:[#allocation2 + $0x88] sm:$0xff] }
 0x2c7   :  { %v1941_v5 = vadd.f32 %v1871_v27, %v12323_v50  ;;  %v9454_v50 = vadd.f32 %v1848_v26, %v1844_v11  ;;  %v2042_v21 = vmul.f32 %v9445_v30, %v9304_v45  ;;  %v7104_v39 = vld [vmem:[#allocation2 + $0x300] sm:$0xff]  ;;  %vm2047_vm5 = vweird.f32 %v9445_v30 }
 0x2c8   :  { %2577 = vmatpush.msra.mxu3 %v7093_v38  ;;  %2827 = vmatpush.msra.mxu1 %v7094_v60  ;;  %v7106_v2 = vld [vmem:[#allocation2 + $0x2e0] sm:$0xff]  ;;  %vm9521_vm9 = vmor %vm2046_vm8, %vm2047_vm5 }
 0x2c9   :  { %v6171_v49 = vmul.f32 -1.442695, %v1941_v5  ;;  %2181 = vmatmul.f32.gmra.mxu3 %v9429_v56  ;;  %2239 = vmatmul.f32.gmra.mxu1 %v9429_v56  ;;  %v2043_v60 = vsub.f32 1.0, %v2042_v21  ;;  %v7113_v21 = vld [vmem:[#allocation2 + $0x68] sm:$0xff] }
 0x2ca   :  { %2578 = vmatpush.msra.mxu3 %v7095_v40  ;;  %2828 = vmatpush.msra.mxu1 %v7096_v48  ;;  %v7107_v40 = vld [vmem:[#allocation2 + $0xc8] sm:$0xff]  ;;  %v7108_v48 = vld [vmem:[#allocation2 + $0x2c0] sm:$0xff] }
 0x2cb   :  { %6436 = vpow2.f32 %v6171_v49 }
 0x2cc   :  { %6438 = vtanh.f32 %v1833_v63  ;;  %2579 = vmatpush.msra.mxu3 %v7097_v20  ;;  %2829 = vmatpush.msra.mxu1 %v7098_v46  ;;  %v7103_v63 = vld [vmem:[#allocation2 + $0x108] sm:$0xff] }
 0x2cd   :  { %6440 = vpow2.f32 %v6177_v8 }
 0x2ce   :  { %v1874_v27 = vpop.f32.mrf.mxu3  ;;  %6442 = vrcp.f32 %v9448_v47  ;;  %2580 = vmatpush.msra.mxu3 %v7099_v36  ;;  %2830 = vmatpush.msra.mxu1 %v7100_v23  ;;  %v7112_v36 = vld [vmem:[#allocation2 + $0x280] sm:$0xff] }
 0x2cf   :  { %v1942_v35 = vadd.f32 %v1874_v27, %v12326_v7  ;;  %v1929_v27 = vpop.f32.mrf.mxu1  ;;  %v7109_v7 = vld [vmem:[#allocation2 + $0xa8] sm:$0xff]  ;;  %v12328_v23 = vld [vmem:[#allocation21_spill] sm:$0xff] }
 0x2d0   :  { %2581 = vmatpush.msra.mxu3 %v7101_v14  ;;  %2831 = vmatpush.msra.mxu1 %v7102_v52  ;;  %v2050_v52 = vand.u32 2147483647, %v9304_v45 }
 0x2d1   :  { %v6437_v59 = vpop.eup %6436  ;;  %v6172_v5 = vmul.f32 -1.442695, %v1942_v35  ;;  %2184 = vmatmul.f32.gmra.mxu3 %v9454_v50  ;;  %2242 = vmatmul.f32.gmra.mxu1 %v9454_v50  ;;  %v7110_v35 = vld [vmem:[#allocation2 + $0x2a0] sm:$0xff] }
 0x2d2   :  { %v9452_v1 = vadd.f32 1.0, %v6437_v59  ;;  %v6439_v0 = vpop.eup %6438  ;;  %2582 = vmatpush.msra.mxu3 %v7103_v63  ;;  %2832 = vmatpush.msra.mxu1 %v7104_v39  ;;  %v2044_v59 = vmul.f32 %v9445_v30, %v2043_v60  ;;  %vm9525_vm10 = vcmp.eq.f32.partialorder %v2050_v52, 8.507059e+37  ;;  %v2067_v52 = vand.u32 2147483648, %v9448_v47 }
 0x2d3   :  { %v6441_v49 = vpop.eup %6440  ;;  %v1845_v37 = vmul.f32 %v6439_v0, %v1841_v25 }
 0x2d4   :  { %6444 = vrcp.f32 %v9452_v1  ;;  %v9465_v8 = vpop.eup %6442  ;;  %v9467_v29 = vadd.f32 1.0, %v6441_v49  ;;  %2583 = vmatpush.msra.mxu3 %v7105_v16  ;;  %2833 = vmatpush.msra.mxu1 %v7106_v2  ;;  %v1972_v20 = vand.u32 2147483648, %v9452_v1  ;;  %vm1966_vm6 = vweird.f32 %v9452_v1  ;;  %v9502_v16 = vld [vmem:[#allocation2 + $0x820] ss:$0 sm:$0xff] }
 0x2d5   :  { %6446 = vpow2.f32 %v6172_v5  ;;  %v9471_v11 = vadd.f32 %v1849_v15, %v1845_v37  ;;  %v2057_v31 = vmul.f32 %v9465_v8, %v9448_v47  ;;  %v1970_v5 = vand.u32 2147483647, %v9452_v1  ;;  %v7114_v37 = vld [vmem:[#allocation2 + $0x260] sm:$0xff] }
 0x2d6   :  { %v1877_v58 = vpop.f32.mrf.mxu3  ;;  %6448 = vpow2.f32 %v6178_v17  ;;  %2584 = vmatpush.msra.mxu3 %v7107_v40  ;;  %2834 = vmatpush.msra.mxu1 %v7108_v48  ;;  %v1973_v15 = vor.u32 1.1754944e-38, %v1972_v20  ;;  %v2052_v40 = vand.u32 2147483648, %v9304_v45  ;;  %vm2062_vm13 = vweird.f32 %v9465_v8  ;;  %v7127_v20 = vld [vmem:[#allocation2 + $0x3b0] sm:$0xff] }
 0x2d7   :  { %v1943_v51 = vadd.f32 %v1877_v58, %v12327_v18  ;;  %v2045_v58 = vadd.f32 %v9445_v30, %v2044_v59  ;;  %v2058_v63 = vsub.f32 1.0, %v2057_v31  ;;  %vm1971_vm7 = vcmp.eq.f32.partialorder %v1970_v5, 8.507059e+37  ;;  %v7119_v59 = vld [vmem:[#allocation2 + $0x220] sm:$0xff]  ;;  %v7126_v31 = vld [vmem:[#allocation2 + $0x3a8] sm:$0xff]  ;;  %vm9576_vm2 = vmor %vm2061_vm12, %vm2062_vm13 }
 0x2d8   :  { %2585 = vmatpush.msra.mxu3 %v7109_v7  ;;  %2835 = vmatpush.msra.mxu1 %v7110_v35  ;;  %v1932_v7 = vpop.f32.mrf.mxu1  ;;  %v7118_v35 = vld [vmem:[#allocation2 + $0x28] sm:$0xff]  ;;  %vm2076_vm5 = vweird.f32 %v9467_v29 }
 0x2d9   :  { %v6173_v12 = vmul.f32 -1.442695, %v1943_v51  ;;  %2187 = vmatmul.f32.gmra.mxu3 %v9471_v11  ;;  %2245 = vmatmul.f32.gmra.mxu1 %v9471_v11  ;;  %v2059_v45 = vmul.f32 %v9465_v8, %v2058_v63 }
 0x2da   :  { %v9469_v38 = vpop.eup %6444  ;;  %2586 = vmatpush.msra.mxu3 %v7111_v43  ;;  %2836 = vmatpush.msra.mxu1 %v7112_v36 }
 0x2db   :  { %v6447_v54 = vpop.eup %6446  ;;  %v1962_v4 = vmul.f32 %v9469_v38, %v9452_v1  ;;  %6450 = vpow2.f32 %v6173_v12  ;;  %vm1967_vm4 = vweird.f32 %v9469_v38  ;;  %v2101_v1 = vadd.f32 %v9502_v16, %v1929_v27  ;;  %v7116_v12 = vld [vmem:[#allocation2 + $0x48] sm:$0xff] }
 0x2dc   :  { %v9475_v24 = vadd.f32 1.0, %v6447_v54  ;;  %6452 = vrcp.f32 %v9467_v29  ;;  %v6449_v14 = vpop.eup %6448  ;;  %2587 = vmatpush.msra.mxu3 %v7113_v21  ;;  %2837 = vmatpush.msra.mxu1 %v7114_v37  ;;  %vm9496_vm0 = vmor %vm1966_vm6, %vm1967_vm4  ;;  %v7117_v54 = vld [vmem:[#allocation2 + $0x240] sm:$0xff]  ;;  %v7122_v37 = vld [vmem:[#allocation2 + $0x3e8] sm:$0xff]  ;;  %v2060_v39 = vadd.f32 %v9465_v8, %v2059_v45 }
 0x2dd   :  { %v1963_v26 = vsub.f32 1.0, %v1962_v4  ;;  %v9513_v48 = vadd.f32 1.0, %v6449_v14  ;;  %v2053_v14 = vor.u32 1.1754944e-38, %v2052_v40  ;;  %v2065_v40 = vand.u32 2147483647, %v9448_v47 }
 0x2de   :  { %6454 = vrcp.f32 %v9475_v24  ;;  %v1880_v0 = vpop.f32.mrf.mxu3  ;;  %2588 = vmatpush.msra.mxu3 %v7116_v12  ;;  %2838 = vmatpush.msra.mxu1 %v7117_v54  ;;  %v1985_v21 = vand.u32 2147483647, %v9475_v24  ;;  %vm1981_vm14 = vweird.f32 %v9475_v24  ;;  %v7124_v12 = vld [vmem:[#allocation2 + $0x3c8] sm:$0xff]  ;;  %v7125_v54 = vld [vmem:[#allocation2 + $0x3d0] sm:$0xff] }
 0x2df   :  { %v1964_v46 = vmul.f32 %v9469_v38, %v1963_v26  ;;  %v1944_v25 = vadd.f32 %v1880_v0, %v12328_v23  ;;  %v12335_v0 = vld [vmem:[#allocation23_spill] sm:$0xff]  ;;  %v7120_v23 = vld [vmem:[#allocation2 + $0x408] sm:$0xff]  ;;  %vm2066_vm4 = vcmp.eq.f32.partialorder %v2065_v40, 8.507059e+37 }
 0x2e0   :  { %2589 = vmatpush.msra.mxu3 %v7118_v35  ;;  %2839 = vmatpush.msra.mxu1 %v7119_v59  ;;  %vm1986_vm1 = vcmp.eq.f32.partialorder %v1985_v21, 8.507059e+37  ;;  %v7132_v40 = vld [vmem:[#allocation2 + $0x348] sm:$0xff] }
 0x2e1   :  { %v1965_v49 = vadd.f32 %v9469_v38, %v1964_v46  ;;  %v6451_v17 = vpop.eup %6450  ;;  %v6174_v18 = vmul.f32 -1.442695, %v1944_v25  ;;  %2294 = vmatmul.f32.vlgmr.msrb.gmra.mxu3 %v9412_v61  ;;  %2352 = vmatmul.f32.vlgmr.msrb.gmra.mxu1 %v9412_v61  ;;  %v2049_v46 = vsel %vm9521_vm9, %v9445_v30, %v2045_v58  ;;  %v7121_v25 = vld [vmem:[#allocation2 + $0x410] sm:$0xff] }
 0x2e2   :  { %v9500_v51 = vpop.eup %6452  ;;  %v9508_v60 = vadd.f32 1.0, %v6451_v17  ;;  %2882 = vmatpush.msrb.mxu3 %v7120_v23  ;;  %2940 = vmatpush.msrb.mxu1 %v7121_v25  ;;  %v7123_v17 = vld [vmem:[#allocation2 + $0x3f0] sm:$0xff]  ;;  %v2054_v63 = vsel %vm9525_vm10, %v2053_v14, %v2049_v46  ;;  %v1935_v25 = vpop.f32.mrf.mxu1  ;;  %v7128_v14 = vld [vmem:[#allocation2 + $0x388] sm:$0xff] }
 0x2e3   :  { %v1969_v2 = vsel %vm9496_vm0, %v9469_v38, %v1965_v49  ;;  %6456 = vpow2.f32 %v6174_v18  ;;  %v2072_v5 = vmul.f32 %v9500_v51, %v9467_v29  ;;  %v1987_v49 = vand.u32 2147483648, %v9475_v24 }
 0x2e4   :  { %v9510_v4 = vpop.eup %6454  ;;  %v1974_v26 = vsel %vm1971_vm7, %v1973_v15, %v1969_v2  ;;  %6458 = vrcp.f32 %v9508_v60  ;;  %2883 = vmatpush.msrb.mxu3 %v7122_v37  ;;  %2941 = vmatpush.msrb.mxu1 %v7123_v17  ;;  %v2117_v46 = vsub.f32 1.0, %v2054_v63  ;;  %v2002_v47 = vand.u32 2147483648, %v9508_v60  ;;  %v7130_v17 = vld [vmem:[#allocation2 + $0x368] sm:$0xff] }
 0x2e5   :  { %v2105_v27 = vmul.f32 %v2101_v1, %v1974_v26  ;;  %v1977_v38 = vmul.f32 %v9510_v4, %v9475_v24  ;;  %6460 = vrcp.f32 %v9513_v48  ;;  %vm1982_vm11 = vweird.f32 %v9510_v4 }
 0x2e6   :  { %v2073_v18 = vsub.f32 1.0, %v2072_v5  ;;  %2884 = vmatpush.msrb.mxu3 %v7124_v12  ;;  %2942 = vmatpush.msrb.mxu1 %v7125_v54  ;;  %v2068_v26 = vor.u32 1.1754944e-38, %v2067_v52  ;;  %vm9558_vm15 = vmor %vm1981_vm14, %vm1982_vm11  ;;  %v2102_v24 = vadd.f32 %v9502_v16, %v1932_v7  ;;  %v2125_v5 = vmul.f32 %v2054_v63, %v9091_v3  ;;  %v7129_v52 = vld [vmem:[#allocation2 + $0x390] sm:$0xff] }
 0x2e7   :  { %v2109_v43 = vadd.f32 %v2105_v27, %v12335_v0  ;;  %v1978_v36 = vsub.f32 1.0, %v1977_v38  ;;  %v1988_v38 = vor.u32 1.1754944e-38, %v1987_v49  ;;  %v2000_v21 = vand.u32 2147483647, %v9508_v60 }
 0x2e8   :  { %2885 = vmatpush.msrb.mxu3 %v7126_v31  ;;  %2943 = vmatpush.msrb.mxu1 %v7127_v20  ;;  %v2074_v3 = vmul.f32 %v9500_v51, %v2073_v18  ;;  %vm1996_vm6 = vweird.f32 %v9508_v60  ;;  %vm2077_vm0 = vweird.f32 %v9500_v51  ;;  %v2003_v54 = vor.u32 1.1754944e-38, %v2002_v47  ;;  %v7134_v20 = vld [vmem:[#allocation2 + $0x200] sm:$0xff]  ;;  %v7138_v47 = vld [vmem:[#allocation2 + $0x328] sm:$0xff] }
 0x2e9   :  { %6462 = vtanh.f32 %v2109_v43  ;;  %v1979_v30 = vmul.f32 %v9510_v4, %v1978_v36  ;;  %v6457_v58 = vpop.eup %6456  ;;  %2297 = vmatmul.f32.gmra.mxu3 %v9429_v56  ;;  %2355 = vmatmul.f32.gmra.mxu1 %v9429_v56  ;;  %v2064_v36 = vsel %vm9576_vm2, %v9465_v8, %v2060_v39  ;;  %vm2001_vm8 = vcmp.eq.f32.partialorder %v2000_v21, 8.507059e+37  ;;  %vm9624_vm9 = vmor %vm2076_vm5, %vm2077_vm0 }
 0x2ea   :  { %v9549_v15 = vpop.eup %6458  ;;  %v9553_v2 = vadd.f32 1.0, %v6457_v58  ;;  %2886 = vmatpush.msrb.mxu3 %v7128_v14  ;;  %2944 = vmatpush.msrb.mxu1 %v7129_v52  ;;  %v7131_v58 = vld [vmem:[#allocation2 + $0x370] sm:$0xff]  ;;  %v2069_v63 = vsel %vm2066_vm4, %v2068_v26, %v2064_v36  ;;  %v9601_v12 = vadd.f32 %v9500_v51, %v2074_v3  ;;  %v2103_v26 = vadd.f32 %v9502_v16, %v1935_v25  ;;  %v7136_v36 = vld [vmem:[#allocation2 + $0x1e0] sm:$0xff]  ;;  %v1938_v21 = vpop.f32.mrf.mxu1 }
 0x2eb   :  { %v1980_v1 = vadd.f32 %v9510_v4, %v1979_v30  ;;  %v1992_v35 = vmul.f32 %v9549_v15, %v9508_v60  ;;  %v9569_v45 = vpop.eup %6460  ;;  %vm1997_vm3 = vweird.f32 %v9549_v15  ;;  %v7133_v60 = vld [vmem:[#allocation2 + $0x350] sm:$0xff] }
 0x2ec   :  { %6464 = vrcp.f32 %v9553_v2  ;;  %v2087_v8 = vmul.f32 %v9569_v45, %v9513_v48  ;;  %2887 = vmatpush.msrb.mxu3 %v7130_v17  ;;  %2945 = vmatpush.msrb.mxu1 %v7131_v58  ;;  %vm9606_vm7 = vmor %vm1996_vm6, %vm1997_vm3  ;;  %v2015_v25 = vand.u32 2147483647, %v9553_v2  ;;  %v7139_v14 = vld [vmem:[#allocation2 + $0x330] sm:$0xff]  ;;  %vm2011_vm12 = vweird.f32 %v9553_v2 }
 0x2ed   :  { %v1984_v59 = vsel %vm9558_vm15, %v9510_v4, %v1980_v1  ;;  %v1993_v0 = vsub.f32 1.0, %v1992_v35  ;;  %v2080_v35 = vand.u32 2147483647, %v9467_v29  ;;  %vm2092_vm15 = vweird.f32 %v9569_v45 }
 0x2ee   :  { %v1989_v4 = vsel %vm1986_vm1, %v1988_v38, %v1984_v59  ;;  %2888 = vmatpush.msrb.mxu3 %v7132_v40  ;;  %2946 = vmatpush.msrb.mxu1 %v7133_v60  ;;  %v2088_v59 = vsub.f32 1.0, %v2087_v8  ;;  %v7140_v8 = vld [vmem:[#allocation2 + $0x1c0] sm:$0xff]  ;;  %v7145_v40 = vld [vmem:[#allocation2 + $0x1b0] sm:$0xff]  ;;  %vm2016_vm14 = vcmp.eq.f32.partialorder %v2015_v25, 8.507059e+37  ;;  %vm2091_vm1 = vweird.f32 %v9513_v48 }
 0x2ef   :  { %v6463_v43 = vpop.eup %6462  ;;  %v2106_v23 = vmul.f32 %v2102_v24, %v1989_v4  ;;  %v1994_v30 = vmul.f32 %v9549_v15, %v1993_v0  ;;  %v2082_v24 = vand.u32 2147483648, %v9467_v29  ;;  %v2118_v4 = vsub.f32 1.0, %v2069_v63  ;;  %v7137_v29 = vld [vmem:[#allocation2 + $0x1f0] sm:$0xff]  ;;  %vm9672_vm2 = vmor %vm2091_vm1, %vm2092_vm15  ;;  %v7154_v25 = vld [vmem:[#allocation2 + $0x140] sm:$0xff] }
 0x2f0   :  { %v2121_v49 = vmul.f32 %v6463_v43, %v2117_v46  ;;  %v7135_v46 = vld [vmem:[#allocation2 + $0x210] sm:$0xff]  ;;  %v2079_v0 = vsel %vm9624_vm9, %v9500_v51, %v9601_v12  ;;  %v2017_v43 = vand.u32 2147483648, %v9553_v2  ;;  %2889 = vmatpush.msrb.mxu3 %v7138_v47  ;;  %2947 = vmatpush.msrb.mxu1 %v7139_v14  ;;  %v2126_v51 = vmul.f32 %v2069_v63, %v9132_v28  ;;  %v7156_v14 = vld [vmem:[#allocation2 + $0x2a8] sm:$0xff] }
 0x2f1   :  { %v2110_v37 = vadd.f32 %v2106_v23, %v8741_v9  ;;  %v1995_v39 = vadd.f32 %v9549_v15, %v1994_v30  ;;  %2300 = vmatmul.f32.gmra.mxu3 %v9454_v50  ;;  %2358 = vmatmul.f32.gmra.mxu1 %v9454_v50  ;;  %vm9640_vm11 = vcmp.eq.f32.partialorder %v2080_v35, 8.507059e+37  ;;  %v2083_v30 = vor.u32 1.1754944e-38, %v2082_v24  ;;  %v7143_v28 = vld [vmem:[#allocation2 + $0x310] sm:$0xff] }
 0x2f2   :  { %v9596_v18 = vadd.f32 %v2125_v5, %v2121_v49  ;;  %v9598_v1 = vpop.eup %6464  ;;  %2948 = vmatpush.msrb.mxu1 %v7143_v28  ;;  %v2018_v9 = vor.u32 1.1754944e-38, %v2017_v43  ;;  %v7160_v49 = vld [vmem:[#allocation2 + $0x288] sm:$0xff]  ;;  %v7167_v12 = vld [vmem:[#allocation2 + $0xf0] sm:$0xff] }
 0x2f3   :  { %6466 = vtanh.f32 %v2110_v37  ;;  %v1999_v27 = vsel %vm9606_vm7, %v9549_v15, %v1995_v39  ;;  %v2007_v38 = vmul.f32 %v9598_v1, %v9553_v2  ;;  %vm2012_vm10 = vweird.f32 %v9598_v1  ;;  %v7141_v37 = vld [vmem:[#allocation2 + $0x1d0] sm:$0xff]  ;;  %v7142_v39 = vld [vmem:[#allocation2 + $0x308] sm:$0xff] }
 0x2f4   :  { %2149 = vmatmul.f32.vlgmr.msrb.gmra.mxu2 %v9596_v18  ;;  %2207 = vmatmul.f32.vlgmr.msra.gmra.mxu0 %v9596_v18  ;;  %v2004_v31 = vsel %vm2001_vm8, %v2003_v54, %v1999_v27  ;;  %v2084_v63 = vsel %vm9640_vm11, %v2083_v30, %v2079_v0  ;;  %vm9651_vm13 = vmor %vm2011_vm12, %vm2012_vm10  ;;  %v7144_v54 = vld [vmem:[#allocation2 + $0x1a0] sm:$0xff]  ;;  %v2104_v2 = vadd.f32 %v9502_v16, %v1938_v21  ;;  %v7146_v27 = vld [vmem:[#allocation2 + $0x2e8] sm:$0xff]  ;;  %v2097_v16 = vand.u32 2147483648, %v9513_v48 }
 0x2f5   :  { %2545 = vmatpush.msrb.mxu2 %v7134_v20  ;;  %2603 = vmatpush.msra.mxu0 %v7135_v46  ;;  %v2107_v5 = vmul.f32 %v2103_v26, %v2004_v31  ;;  %v2008_v7 = vsub.f32 1.0, %v2007_v38  ;;  %v7147_v38 = vld [vmem:[#allocation2 + $0x2f0] sm:$0xff]  ;;  %v2095_v46 = vand.u32 2147483647, %v9513_v48  ;;  %v2127_v43 = vmul.f32 %v2084_v63, %v9158_v10  ;;  %v7165_v28 = vld [vmem:[#allocation2 + $0x268] sm:$0xff] }
 0x2f6   :  { %2890 = vmatpush.msrb.mxu3 %v7142_v39  ;;  %2949 = vmatpush.msrb.mxu1 %v7147_v38  ;;  %v7149_v31 = vld [vmem:[#allocation2 + $0x190] sm:$0xff] }
 0x2f7   :  { %2546 = vmatpush.msrb.mxu2 %v7136_v36  ;;  %2604 = vmatpush.msra.mxu0 %v7137_v29  ;;  %v2111_v3 = vadd.f32 %v2107_v5, %v8799_v42  ;;  %v2009_v23 = vmul.f32 %v9598_v1, %v2008_v7  ;;  %v2089_v42 = vmul.f32 %v9569_v45, %v2088_v59  ;;  %v7148_v59 = vld [vmem:[#allocation2 + $0x180] sm:$0xff]  ;;  %v7151_v0 = vld [vmem:[#allocation2 + $0x170] sm:$0xff]  ;;  %v7152_v29 = vld [vmem:[#allocation2 + $0x2c8] sm:$0xff]  ;;  %vm2096_vm3 = vcmp.eq.f32.partialorder %v2095_v46, 8.507059e+37 }
 0x2f8   :  { %2891 = vmatpush.msrb.mxu3 %v7146_v27  ;;  %v7157_v10 = vld [vmem:[#allocation2 + $0x2b0] sm:$0xff]  ;;  %v7172_v27 = vld [vmem:[#allocation2 + $0xa0] sm:$0xff]  ;;  %v7184_v5 = vld [vmem:[#allocation2 + $0x3d8] sm:$0xff] }
 0x2f9   :  { %v6467_v52 = vpop.eup %6466  ;;  %2547 = vmatpush.msrb.mxu2 %v7140_v8  ;;  %2605 = vmatpush.msra.mxu0 %v7141_v37  ;;  %6468 = vtanh.f32 %v2111_v3  ;;  %v2010_v58 = vadd.f32 %v9598_v1, %v2009_v23  ;;  %v2090_v35 = vadd.f32 %v9569_v45, %v2089_v42  ;;  %v7153_v3 = vld [vmem:[#allocation2 + $0x2d0] sm:$0xff]  ;;  %v2098_v23 = vor.u32 1.1754944e-38, %v2097_v16  ;;  %v7162_v42 = vld [vmem:[#allocation2 + $0x100] sm:$0xff] }
 0x2fa   :  { %v2122_v17 = vmul.f32 %v6467_v52, %v2118_v4  ;;  %2303 = vmatmul.f32.gmra.mxu3 %v9471_v11  ;;  %2361 = vmatmul.f32.gmra.mxu1 %v9471_v11  ;;  %v7150_v4 = vld [vmem:[#allocation2 + $0x160] sm:$0xff]  ;;  %v7161_v30 = vld [vmem:[#allocation2 + $0x290] sm:$0xff] }
 0x2fb   :  { %2548 = vmatpush.msrb.mxu2 %v7144_v54  ;;  %2606 = vmatpush.msra.mxu0 %v7145_v40  ;;  %v2014_v60 = vsel %vm9651_vm13, %v9598_v1, %v2010_v58  ;;  %v2119_v1 = vsub.f32 1.0, %v2084_v63  ;;  %v2094_v48 = vsel %vm9672_vm2, %v9569_v45, %v2090_v35  ;;  %v7158_v45 = vld [vmem:[#allocation2 + $0x120] sm:$0xff]  ;;  %v7163_v37 = vld [vmem:[#allocation2 + $0x110] sm:$0xff]  ;;  %v7169_v40 = vld [vmem:[#allocation2 + $0x248] sm:$0xff] }
 0x2fc   :  { %v9659_v26 = vadd.f32 %v2126_v51, %v2122_v17  ;;  %v2019_v24 = vsel %vm2016_vm14, %v2018_v9, %v2014_v60  ;;  %2892 = vmatpush.msrb.mxu3 %v7152_v29  ;;  %2950 = vmatpush.msrb.mxu1 %v7153_v3  ;;  %v2099_v52 = vsel %vm2096_vm3, %v2098_v23, %v2094_v48  ;;  %v7159_v51 = vld [vmem:[#allocation2 + $0x130] sm:$0xff]  ;;  %v7164_v17 = vld [vmem:[#allocation2 + $0xe0] sm:$0xff]  ;;  %v7189_v48 = vld [vmem:[#allocation2 + $0x3b8] sm:$0xff] }
 0x2fd   :  { %2549 = vmatpush.msrb.mxu2 %v7148_v59  ;;  %2607 = vmatpush.msra.mxu0 %v7149_v31  ;;  %v2108_v20 = vmul.f32 %v2104_v2, %v2019_v24  ;;  %v2120_v21 = vsub.f32 1.0, %v2099_v52  ;;  %v2128_v58 = vmul.f32 %v2099_v52, %v9168_v6  ;;  %v7166_v63 = vld [vmem:[#allocation2 + $0x270] sm:$0xff]  ;;  %v7168_v9 = vld [vmem:[#allocation2 + $0xc0] sm:$0xff]  ;;  %v7173_v6 = vld [vmem:[#allocation2 + $0x228] sm:$0xff] }
 0x2fe   :  { %2152 = vmatmul.f32.gmra.mxu2 %v9659_v26  ;;  %2210 = vmatmul.f32.gmra.mxu0 %v9659_v26  ;;  %v7170_v2 = vld [vmem:[#allocation2 + $0x250] sm:$0xff]  ;;  %v7176_v24 = vld [vmem:[#allocation2 + $0x80] sm:$0xff]  ;;  %v7178_v31 = vld [vmem:[#allocation2 + $0x418] sm:$0xff] }
 0x2ff   :  { %v6469_v15 = vpop.eup %6468  ;;  %v2112_v7 = vadd.f32 %v2108_v20, %v8851_v22  ;;  %2550 = vmatpush.msrb.mxu2 %v7150_v4  ;;  %2608 = vmatpush.msra.mxu0 %v7151_v0  ;;  %v7155_v22 = vld [vmem:[#allocation2 + $0x150] sm:$0xff]  ;;  %v7179_v16 = vld [vmem:[#allocation2 + $0x60] sm:$0xff]  ;;  %v7191_v29 = vld [vmem:[#allocation2 + $0x5e8] sm:$0xff] }
 0x300   :  { %v2123_v36 = vmul.f32 %v6469_v15, %v2119_v1  ;;  %2893 = vmatpush.msrb.mxu3 %v7156_v14  ;;  %2951 = vmatpush.msrb.mxu1 %v7157_v10  ;;  %v7171_v60 = vld [vmem:[#allocation2 + $0xd0] sm:$0xff]  ;;  %v7181_v1 = vld [vmem:[#allocation2 + $0x3f8] sm:$0xff]  ;;  %v7182_v46 = vld [vmem:[#allocation2 + $0x40] sm:$0xff] }
 0x301   :  { %6470 = vtanh.f32 %v2112_v7  ;;  %2551 = vmatpush.msrb.mxu2 %v7154_v25  ;;  %2609 = vmatpush.msra.mxu0 %v7155_v22  ;;  %v7174_v38 = vld [vmem:[#allocation2 + $0x230] sm:$0xff]  ;;  %v7185_v7 = vld [vmem:[#allocation2 + $0x20] sm:$0xff]  ;;  %v7192_v3 = vld [vmem:[#allocation2 + $0x398] sm:$0xff] }
 0x302   :  { %v9681_v47 = vadd.f32 %v2127_v43, %v2123_v36  ;;  %2894 = vmatpush.msrb.mxu3 %v7160_v49  ;;  %2952 = vmatpush.msrb.mxu1 %v7161_v30  ;;  %v7175_v35 = vld [vmem:[#allocation2 + $0xb0] sm:$0xff]  ;;  %v7187_v0 = vld [vmem:[#allocation2 + $0x600] sm:$0xff]  ;;  %v7188_v43 = vld [vmem:[#allocation2 + $0x608] sm:$0xff] }
 0x303   :  { %2552 = vmatpush.msrb.mxu2 %v7158_v45  ;;  %2610 = vmatpush.msra.mxu0 %v7159_v51  ;;  %v7177_v59 = vld [vmem:[#allocation2 + $0x90] sm:$0xff]  ;;  %v7190_v36 = vld [vmem:[#allocation2 + $0x5e0] sm:$0xff]  ;;  %v7194_v25 = vld [vmem:[#allocation2 + $0x5c8] sm:$0xff] }
 0x304   :  { %2590 = vmatmul.f32.vlgmr.msra.gmra.mxu3 %v9596_v18  ;;  %2953 = vmatpush.msrb.mxu1 %v7166_v63  ;;  %v7180_v20 = vld [vmem:[#allocation2 + $0x70] sm:$0xff]  ;;  %v7193_v23 = vld [vmem:[#allocation2 + $0x5c0] sm:$0xff]  ;;  %v7195_v22 = vld [vmem:[#allocation2 + $0x378] sm:$0xff] }
 0x305   :  { %2553 = vmatpush.msrb.mxu2 %v7162_v42  ;;  %2611 = vmatpush.msra.mxu0 %v7163_v37  ;;  %v7183_v15 = vld [vmem:[#allocation2 + $0x50] sm:$0xff]  ;;  %v7196_v14 = vld [vmem:[#allocation2 + $0x5a0] sm:$0xff]  ;;  %v7197_v10 = vld [vmem:[#allocation2 + $0x5a8] sm:$0xff] }
 0x306   :  { %2155 = vmatmul.f32.gmra.mxu2 %v9681_v47  ;;  %2213 = vmatmul.f32.gmra.mxu0 %v9681_v47  ;;  %v7186_v4 = vld [vmem:[#allocation2 + $0x30] sm:$0xff]  ;;  %v7198_v52 = vld [vmem:[#allocation2 + $0x580] sm:$0xff]  ;;  %v7199_v45 = vld [vmem:[#allocation2 + $0x358] sm:$0xff] }
 0x307   :  { %v6471_v8 = vpop.eup %6470  ;;  %2554 = vmatpush.msrb.mxu2 %v7164_v17  ;;  %2895 = vmatpush.msrb.mxu3 %v7165_v28  ;;  %v7200_v51 = vld [vmem:[#allocation2 + $0x588] sm:$0xff]  ;;  %v7201_v49 = vld [vmem:[#allocation2 + $0x560] sm:$0xff]  ;;  %v7202_v30 = vld [vmem:[#allocation2 + $0x338] sm:$0xff] }
 0x308   :  { %v2124_v39 = vmul.f32 %v6471_v8, %v2120_v21  ;;  %2612 = vmatpush.msra.mxu0 %v7167_v12  ;;  %2954 = vmatpush.msrb.mxu1 %v7170_v2  ;;  %v7203_v42 = vld [vmem:[#allocation2 + $0x568] sm:$0xff]  ;;  %v7204_v21 = vld [vmem:[#allocation2 + $0x540] sm:$0xff]  ;;  %v7205_v8 = vld [vmem:[#allocation2 + $0x318] sm:$0xff] }
 0x309   :  { %2555 = vmatpush.msrb.mxu2 %v7168_v9  ;;  %2896 = vmatpush.msrb.mxu3 %v7169_v40  ;;  %v7206_v37 = vld [vmem:[#allocation2 + $0x548] sm:$0xff]  ;;  %v7207_v17 = vld [vmem:[#allocation2 + $0x520] sm:$0xff]  ;;  %v7210_v28 = vld [vmem:[#allocation2 + $0x2f8] sm:$0xff] }
 0x30a   :  { %v9687_v54 = vadd.f32 %v2128_v58, %v2124_v39  ;;  %2613 = vmatpush.msra.mxu0 %v7171_v60  ;;  %2955 = vmatpush.msrb.mxu1 %v7174_v38  ;;  %v7208_v58 = vld [vmem:[#allocation2 + $0x528] sm:$0xff]  ;;  %v7209_v39 = vld [vmem:[#allocation2 + $0x500] sm:$0xff]  ;;  %v7213_v9 = vld [vmem:[#allocation2 + $0x2d8] sm:$0xff] }
 0x30b   :  { %2556 = vmatpush.msrb.mxu2 %v7172_v27  ;;  %2897 = vmatpush.msrb.mxu3 %v7173_v6  ;;  %v7211_v63 = vld [vmem:[#allocation2 + $0x508] sm:$0xff]  ;;  %v7212_v12 = vld [vmem:[#allocation2 + $0x4e0] sm:$0xff]  ;;  %v7216_v60 = vld [vmem:[#allocation2 + $0x2b8] sm:$0xff] }
 0x30c   :  { %2593 = vmatmul.f32.gmra.mxu3 %v9659_v26  ;;  %2614 = vmatpush.msra.mxu0 %v7175_v35  ;;  %v7214_v40 = vld [vmem:[#allocation2 + $0x4e8] sm:$0xff]  ;;  %v7215_v2 = vld [vmem:[#allocation2 + $0x4c0] sm:$0xff] }
 0x30d   :  { %2557 = vmatpush.msrb.mxu2 %v7176_v24  ;;  %2998 = vmatpush.msra.mxu3 %v7178_v31  ;;  %v7217_v27 = vld [vmem:[#allocation2 + $0x4c8] sm:$0xff]  ;;  %v7218_v6 = vld [vmem:[#allocation2 + $0x4a0] sm:$0xff]  ;;  %v7221_v24 = vld [vmem:[#allocation2 + $0x298] sm:$0xff] }
 0x30e   :  { %2158 = vmatmul.f32.gmra.mxu2 %v9687_v54  ;;  %2216 = vmatmul.f32.gmra.mxu0 %v9687_v54  ;;  %v7219_v38 = vld [vmem:[#allocation2 + $0x4a8] sm:$0xff]  ;;  %v7220_v35 = vld [vmem:[#allocation2 + $0x480] sm:$0xff] }
 0x30f   :  { %2615 = vmatpush.msra.mxu0 %v7177_v59  ;;  %2558 = vmatpush.msrb.mxu2 %v7179_v16  ;;  %v7222_v59 = vld [vmem:[#allocation2 + $0x488] sm:$0xff]  ;;  %v7223_v31 = vld [vmem:[#allocation2 + $0x460] sm:$0xff]  ;;  %v7224_v16 = vld [vmem:[#allocation2 + $0x278] sm:$0xff] }
 0x310   :  { %2999 = vmatpush.msra.mxu3 %v7181_v1  ;;  %v7226_v1 = vld [vmem:[#allocation2 + $0x440] sm:$0xff] }
 0x311   :  { %2616 = vmatpush.msra.mxu0 %v7180_v20  ;;  %2559 = vmatpush.msrb.mxu2 %v7182_v46  ;;  %v7225_v20 = vld [vmem:[#allocation2 + $0x468] sm:$0xff]  ;;  %v7227_v46 = vld [vmem:[#allocation2 + $0x258] sm:$0xff] }
 0x312   :  { %3000 = vmatpush.msra.mxu3 %v7184_v5  ;;  %v7229_v5 = vld [vmem:[#allocation2 + $0x420] sm:$0xff] }
 0x313   :  { %2617 = vmatpush.msra.mxu0 %v7183_v15  ;;  %2560 = vmatpush.msrb.mxu2 %v7185_v7  ;;  %v7228_v15 = vld [vmem:[#allocation2 + $0x448] sm:$0xff] }
 0x314   :  { %2596 = vmatmul.f32.gmra.mxu3 %v9681_v47  ;;  %v7230_v7 = vld [vmem:[#allocation2 + $0x428] sm:$0xff] }
 0x315   :  { %2618 = vmatpush.msra.mxu0 %v7186_v4  ;;  %3001 = vmatpush.msra.mxu3 %v7189_v48  ;;  %v7231_v4 = vld [vmem:[#allocation2 + $0x610] sm:$0xff] }
 0x316   :  { %2265 = vmatmul.f32.vlgmr.msra.gmra.mxu2 %v9596_v18  ;;  %2323 = vmatmul.f32.vlgmr.msrb.gmra.mxu0 %v9596_v18  ;;  %v7234_v48 = vld [vmem:[#allocation2 + $0x5f0] sm:$0xff] }
 0x317   :  { %2853 = vmatpush.msra.mxu2 %v7187_v0  ;;  %2911 = vmatpush.msrb.mxu0 %v7188_v43  ;;  %v7232_v0 = vld [vmem:[#allocation2 + $0x618] sm:$0xff] }
 0x318   :  { %3002 = vmatpush.msra.mxu3 %v7192_v3  ;;  %v7233_v43 = vld [vmem:[#allocation2 + $0x238] sm:$0xff] }
 0x319   :  { %2854 = vmatpush.msra.mxu2 %v7190_v36  ;;  %2912 = vmatpush.msrb.mxu0 %v7191_v29  ;;  %v7235_v36 = vld [vmem:[#allocation2 + $0x5f8] sm:$0xff]  ;;  %v7236_v29 = vld [vmem:[#allocation2 + $0x5d0] sm:$0xff] }
 0x31a   :  { %3003 = vmatpush.msra.mxu3 %v7195_v22  ;;  %v7237_v3 = vld [vmem:[#allocation2 + $0x5d8] sm:$0xff]  ;;  %v7240_v22 = vld [vmem:[#allocation2 + $0x590] sm:$0xff] }
 0x31b   :  { %2855 = vmatpush.msra.mxu2 %v7193_v23  ;;  %2913 = vmatpush.msrb.mxu0 %v7194_v25  ;;  %v7238_v23 = vld [vmem:[#allocation2 + $0x5b0] sm:$0xff]  ;;  %v7239_v25 = vld [vmem:[#allocation2 + $0x5b8] sm:$0xff] }
 0x31c   :  { %2599 = vmatmul.f32.gmra.mxu3 %v9687_v54 }
 0x31d   :  { %2856 = vmatpush.msra.mxu2 %v7196_v14  ;;  %2914 = vmatpush.msrb.mxu0 %v7197_v10  ;;  %v7241_v14 = vld [vmem:[#allocation2 + $0x598] sm:$0xff]  ;;  %v7242_v10 = vld [vmem:[#allocation2 + $0x570] sm:$0xff] }
 0x31e   :  { %2268 = vmatmul.f32.gmra.mxu2 %v9659_v26  ;;  %2326 = vmatmul.f32.gmra.mxu0 %v9659_v26 }
 0x31f   :  { %2857 = vmatpush.msra.mxu2 %v7198_v52  ;;  %3004 = vmatpush.msra.mxu3 %v7199_v45  ;;  %v7243_v52 = vld [vmem:[#allocation2 + $0x578] sm:$0xff]  ;;  %v7244_v45 = vld [vmem:[#allocation2 + $0x550] sm:$0xff] }
 0x320   :  { %2915 = vmatpush.msrb.mxu0 %v7200_v51  ;;  %v7245_v51 = vld [vmem:[#allocation2 + $0x558] sm:$0xff] }
 0x321   :  { %2858 = vmatpush.msra.mxu2 %v7201_v49  ;;  %3005 = vmatpush.msra.mxu3 %v7202_v30  ;;  %v7246_v49 = vld [vmem:[#allocation2 + $0x530] sm:$0xff]  ;;  %v7247_v30 = vld [vmem:[#allocation2 + $0x538] sm:$0xff] }
 0x322   :  { %2916 = vmatpush.msrb.mxu0 %v7203_v42  ;;  %v7248_v42 = vld [vmem:[#allocation2 + $0x510] sm:$0xff] }
 0x323   :  { %2859 = vmatpush.msra.mxu2 %v7204_v21  ;;  %3006 = vmatpush.msra.mxu3 %v7205_v8  ;;  %v7249_v21 = vld [vmem:[#allocation2 + $0x518] sm:$0xff]  ;;  %v7250_v8 = vld [vmem:[#allocation2 + $0x4f0] sm:$0xff] }
 0x324   :  { %2917 = vmatpush.msrb.mxu0 %v7206_v37  ;;  %v7251_v37 = vld [vmem:[#allocation2 + $0x4f8] sm:$0xff] }
 0x325   :  { %2860 = vmatpush.msra.mxu2 %v7207_v17  ;;  %3007 = vmatpush.msra.mxu3 %v7210_v28  ;;  %v7252_v17 = vld [vmem:[#allocation2 + $0x4d0] sm:$0xff]  ;;  %v7255_v28 = vld [vmem:[#allocation2 + $0x4b8] sm:$0xff] }
 0x326   :  { %2271 = vmatmul.f32.gmra.mxu2 %v9681_v47  ;;  %2329 = vmatmul.f32.gmra.mxu0 %v9681_v47 }
 0x327   :  { %2918 = vmatpush.msrb.mxu0 %v7208_v58  ;;  %2861 = vmatpush.msra.mxu2 %v7209_v39  ;;  %v7253_v58 = vld [vmem:[#allocation2 + $0x4d8] sm:$0xff]  ;;  %v7254_v39 = vld [vmem:[#allocation2 + $0x4b0] sm:$0xff] }
 0x328   :  { %3008 = vmatpush.msra.mxu3 %v7213_v9  ;;  %v7258_v9 = vld [vmem:[#allocation2 + $0x470] sm:$0xff] }
 0x329   :  { %2919 = vmatpush.msrb.mxu0 %v7211_v63  ;;  %2862 = vmatpush.msra.mxu2 %v7212_v12  ;;  %v7256_v63 = vld [vmem:[#allocation2 + $0x490] sm:$0xff]  ;;  %v7257_v12 = vld [vmem:[#allocation2 + $0x498] sm:$0xff] }
 0x32a   :  { %3009 = vmatpush.msra.mxu3 %v7216_v60  ;;  %v7261_v60 = vld [vmem:[#allocation2 + $0x458] sm:$0xff] }
 0x32b   :  { %2920 = vmatpush.msrb.mxu0 %v7214_v40  ;;  %2863 = vmatpush.msra.mxu2 %v7215_v2  ;;  %v7259_v40 = vld [vmem:[#allocation2 + $0x478] sm:$0xff]  ;;  %v7260_v2 = vld [vmem:[#allocation2 + $0x450] sm:$0xff] }
 0x32c   :  { %3010 = vmatpush.msra.mxu3 %v7221_v24 }
 0x32d   :  { %2921 = vmatpush.msrb.mxu0 %v7217_v27  ;;  %2864 = vmatpush.msra.mxu2 %v7218_v6  ;;  %v7262_v27 = vld [vmem:[#allocation2 + $0x430] sm:$0xff] }
 0x32e   :  { %2274 = vmatmul.f32.gmra.mxu2 %v9687_v54  ;;  %2332 = vmatmul.f32.gmra.mxu0 %v9687_v54 }
 0x32f   :  { %2922 = vmatpush.msrb.mxu0 %v7219_v38  ;;  %2865 = vmatpush.msra.mxu2 %v7220_v35  ;;  %v7263_v38 = vld [vmem:[#allocation2 + $0x438] sm:$0xff] }
 0x330   :  { %3011 = vmatpush.msra.mxu3 %v7224_v16 }
 0x331   :  { %2923 = vmatpush.msrb.mxu0 %v7222_v59  ;;  %2866 = vmatpush.msra.mxu2 %v7223_v31 }
 0x332   :  { %3012 = vmatpush.msra.mxu3 %v7227_v46 }
 0x333   :  { %2924 = vmatpush.msrb.mxu0 %v7225_v20  ;;  %2867 = vmatpush.msra.mxu2 %v7226_v1 }
 0x334   :  { %3013 = vmatpush.msra.mxu3 %v7233_v43 }
 0x335   :  { %2925 = vmatpush.msrb.mxu0 %v7228_v15  ;;  %2868 = vmatpush.msra.mxu2 %v7229_v5 }
 0x336   :  { %2561 = vmatmul.f32.vlgmr.msrb.gmra.mxu2 %v9596_v18  ;;  %2619 = vmatmul.f32.vlgmr.msra.gmra.mxu0 %v9596_v18 }
 0x337   :  { %2926 = vmatpush.msrb.mxu0 %v7230_v7  ;;  %2969 = vmatpush.msrb.mxu2 %v7231_v4 }
 0x339   :  { %3027 = vmatpush.msra.mxu0 %v7232_v0  ;;  %2970 = vmatpush.msrb.mxu2 %v7234_v48 }
 0x33b   :  { %3028 = vmatpush.msra.mxu0 %v7235_v36  ;;  %2971 = vmatpush.msrb.mxu2 %v7236_v29 }
 0x33d   :  { %3029 = vmatpush.msra.mxu0 %v7237_v3  ;;  %2972 = vmatpush.msrb.mxu2 %v7238_v23 }
 0x33e   :  { %2564 = vmatmul.f32.gmra.mxu2 %v9659_v26  ;;  %2622 = vmatmul.f32.gmra.mxu0 %v9659_v26  ;;  %v2237_v1 = vpop.f32.mrf.mxu1 }
 0x33f   :  { %3030 = vmatpush.msra.mxu0 %v7239_v25  ;;  %2973 = vmatpush.msrb.mxu2 %v7240_v22 }
 0x341   :  { %3031 = vmatpush.msra.mxu0 %v7241_v14  ;;  %2974 = vmatpush.msrb.mxu2 %v7242_v10 }
 0x343   :  { %3032 = vmatpush.msra.mxu0 %v7243_v52  ;;  %2975 = vmatpush.msrb.mxu2 %v7244_v45 }
 0x344   :  { %v2179_v6 = vpop.f32.mrf.mxu3 }
 0x345   :  { %3033 = vmatpush.msra.mxu0 %v7245_v51  ;;  %2976 = vmatpush.msrb.mxu2 %v7246_v49 }
 0x346   :  { %2567 = vmatmul.f32.gmra.mxu2 %v9681_v47  ;;  %2625 = vmatmul.f32.gmra.mxu0 %v9681_v47  ;;  %v2240_v48 = vpop.f32.mrf.mxu1 }
 0x347   :  { %3034 = vmatpush.msra.mxu0 %v7247_v30  ;;  %2977 = vmatpush.msrb.mxu2 %v7248_v42 }
 0x349   :  { %3035 = vmatpush.msra.mxu0 %v7249_v21  ;;  %2978 = vmatpush.msrb.mxu2 %v7250_v8 }
 0x34b   :  { %3036 = vmatpush.msra.mxu0 %v7251_v37  ;;  %2979 = vmatpush.msrb.mxu2 %v7252_v17 }
 0x34c   :  { %v2182_v35 = vpop.f32.mrf.mxu3 }
 0x34d   :  { %3037 = vmatpush.msra.mxu0 %v7253_v58  ;;  %2980 = vmatpush.msrb.mxu2 %v7254_v39 }
 0x34e   :  { %2570 = vmatmul.f32.gmra.mxu2 %v9687_v54  ;;  %2628 = vmatmul.f32.gmra.mxu0 %v9687_v54  ;;  %v2243_v42 = vpop.f32.mrf.mxu1 }
 0x34f   :  { %3038 = vmatpush.msra.mxu0 %v7255_v28  ;;  %2981 = vmatpush.msrb.mxu2 %v7256_v63 }
 0x351   :  { %3039 = vmatpush.msra.mxu0 %v7257_v12  ;;  %2982 = vmatpush.msrb.mxu2 %v7258_v9 }
 0x353   :  { %3040 = vmatpush.msra.mxu0 %v7259_v40  ;;  %2983 = vmatpush.msrb.mxu2 %v7260_v2 }
 0x354   :  { %v2185_v24 = vpop.f32.mrf.mxu3 }
 0x355   :  { %3041 = vmatpush.msra.mxu0 %v7261_v60  ;;  %2984 = vmatpush.msrb.mxu2 %v7262_v27 }
 0x357   :  { %3042 = vmatpush.msra.mxu0 %v7263_v38 }
 0x35c   :  { %v2188_v31 = vpop.f32.mrf.mxu3 }
 0x364   :  { %v9712_v4 = vpop.f32.mrf.mxu3 }
 0x36c   :  { %v9718_v45 = vpop.f32.mrf.mxu3 }
 0x371   :  { %v2208_v59 = vpop.f32.mrf.mxu0 }
 0x372   :  { %v2209_v15 = vadd.f32 %v2208_v59, %v12313_v33 }
 0x374   :  { %v2238_v0 = vadd.f32 %v2237_v1, %v2209_v15  ;;  %v9729_v2 = vpop.f32.mrf.mxu3 }
 0x376   :  { %v6183_v29 = vmul.f32 -1.442695, %v2238_v0 }
 0x377   :  { %v2150_v16 = vpop.f32.mrf.mxu2 }
 0x378   :  { %v2151_v20 = vadd.f32 %v2150_v16, %v12314_v44 }
 0x37a   :  { %v2180_v46 = vadd.f32 %v2179_v6, %v2151_v20 }
 0x37b   :  { %v2211_v7 = vpop.f32.mrf.mxu0 }
 0x37c   :  { %v6179_v5 = vmul.f32 -1.442695, %v2180_v46  ;;  %v2212_v23 = vadd.f32 %v2211_v7, %v12313_v33 }
 0x37e   :  { %6472 = vpow2.f32 %v6179_v5  ;;  %v2241_v52 = vadd.f32 %v2240_v48, %v2212_v23 }
 0x37f   :  { %6474 = vpow2.f32 %v6183_v29  ;;  %v9744_v29 = vpop.f32.mrf.mxu3 }
 0x380   :  { %v6184_v21 = vmul.f32 -1.442695, %v2241_v52 }
 0x381   :  { %v2153_v43 = vpop.f32.mrf.mxu2 }
 0x382   :  { %v2154_v36 = vadd.f32 %v2153_v43, %v12314_v44 }
 0x383   :  { %v2214_v14 = vpop.f32.mrf.mxu0 }
 0x384   :  { %v6473_v3 = vpop.eup %6472  ;;  %v2183_v25 = vadd.f32 %v2182_v35, %v2154_v36  ;;  %v2215_v30 = vadd.f32 %v2214_v14, %v12313_v33  ;;  %v2246_v35 = vpop.f32.mrf.mxu1 }
 0x385   :  { %v9716_v10 = vadd.f32 1.0, %v6473_v3  ;;  %v6475_v8 = vpop.eup %6474 }
 0x386   :  { %v6180_v22 = vmul.f32 -1.442695, %v2183_v25  ;;  %v2244_v58 = vadd.f32 %v2243_v42, %v2215_v30  ;;  %v9727_v12 = vadd.f32 1.0, %v6475_v8 }
 0x387   :  { %vm2386_vm5 = vweird.f32 %v9716_v10  ;;  %v2390_v42 = vand.u32 2147483647, %v9716_v10 }
 0x388   :  { %6476 = vpow2.f32 %v6180_v22  ;;  %v6185_v60 = vmul.f32 -1.442695, %v2244_v58  ;;  %vm2462_vm0 = vweird.f32 %v9727_v12 }
 0x389   :  { %v2156_v51 = vpop.f32.mrf.mxu2  ;;  %6478 = vrcp.f32 %v9716_v10  ;;  %vm2391_vm7 = vcmp.eq.f32.partialorder %v2390_v42, 8.507059e+37 }
 0x38a   :  { %v2157_v49 = vadd.f32 %v2156_v51, %v12314_v44  ;;  %6480 = vpow2.f32 %v6184_v21 }
 0x38b   :  { %v2217_v28 = vpop.f32.mrf.mxu0 }
 0x38c   :  { %v2186_v17 = vadd.f32 %v2185_v24, %v2157_v49  ;;  %v2218_v27 = vadd.f32 %v2217_v28, %v12313_v33  ;;  %v2353_v22 = vpop.f32.mrf.mxu1  ;;  %v2392_v49 = vand.u32 2147483648, %v9716_v10 }
 0x38e   :  { %v6477_v37 = vpop.eup %6476  ;;  %v6181_v40 = vmul.f32 -1.442695, %v2186_v17  ;;  %v2247_v59 = vadd.f32 %v2246_v35, %v2218_v27  ;;  %v2468_v27 = vand.u32 2147483648, %v9727_v12 }
 0x38f   :  { %v9723_v39 = vadd.f32 1.0, %v6477_v37  ;;  %v9725_v63 = vpop.eup %6478 }
 0x390   :  { %v2382_v6 = vmul.f32 %v9725_v63, %v9716_v10  ;;  %v6481_v38 = vpop.eup %6480  ;;  %v6186_v0 = vmul.f32 -1.442695, %v2247_v59  ;;  %vm2387_vm4 = vweird.f32 %v9725_v63 }
 0x391   :  { %v2159_v9 = vpop.f32.mrf.mxu2  ;;  %6482 = vrcp.f32 %v9723_v39  ;;  %v9737_v20 = vadd.f32 1.0, %v6481_v38  ;;  %vm9763_vm6 = vmor %vm2386_vm5, %vm2387_vm4  ;;  %v2591_v38 = vpop.f32.mrf.mxu3  ;;  %vm2401_vm10 = vweird.f32 %v9723_v39 }
 0x392   :  { %6484 = vrcp.f32 %v9727_v12  ;;  %v2160_v24 = vadd.f32 %v2159_v9, %v12314_v44  ;;  %v2383_v16 = vsub.f32 1.0, %v2382_v6 }
 0x393   :  { %6486 = vpow2.f32 %v6181_v40  ;;  %v2324_v5 = vpop.f32.mrf.mxu0  ;;  %v2393_v40 = vor.u32 1.1754944e-38, %v2392_v49  ;;  %vm2477_vm13 = vweird.f32 %v9737_v20 }
 0x394   :  { %6488 = vpow2.f32 %v6185_v60  ;;  %v2189_v15 = vadd.f32 %v2188_v31, %v2160_v24  ;;  %v2384_v48 = vmul.f32 %v9725_v63, %v2383_v16  ;;  %v2325_v58 = vadd.f32 %v2324_v5, %v8665_v53 }
 0x395   :  { %6490 = vrcp.f32 %v9737_v20  ;;  %v2466_v24 = vand.u32 2147483647, %v9727_v12 }
 0x396   :  { %v6182_v23 = vmul.f32 -1.442695, %v2189_v15  ;;  %6492 = vpow2.f32 %v6186_v0  ;;  %v2385_v52 = vadd.f32 %v9725_v63, %v2384_v48  ;;  %v2354_v15 = vadd.f32 %v2353_v22, %v2325_v58 }
 0x397   :  { %v9739_v46 = vpop.eup %6482  ;;  %v2407_v48 = vand.u32 2147483648, %v9723_v39  ;;  %v2469_v58 = vor.u32 1.1754944e-38, %v2468_v27  ;;  %vm9816_vm14 = vcmp.eq.f32.partialorder %v2466_v24, 8.507059e+37 }
 0x398   :  { %v9741_v7 = vpop.eup %6484  ;;  %v2397_v3 = vmul.f32 %v9739_v46, %v9723_v39  ;;  %6494 = vpow2.f32 %v6182_v23  ;;  %v2389_v28 = vsel %vm9763_vm6, %v9725_v63, %v2385_v52  ;;  %vm2402_vm8 = vweird.f32 %v9739_v46 }
 0x399   :  { %v2266_v1 = vpop.f32.mrf.mxu2  ;;  %v6487_v43 = vpop.eup %6486  ;;  %v2458_v25 = vmul.f32 %v9741_v7, %v9727_v12  ;;  %v2394_v35 = vsel %vm2391_vm7, %v2393_v40, %v2389_v28  ;;  %vm2463_vm9 = vweird.f32 %v9741_v7  ;;  %v2712_v52 = vadd.f32 %v2591_v38, %v8910_v19  ;;  %vm9797_vm11 = vmor %vm2401_vm10, %vm2402_vm8 }
 0x39a   :  { %v6489_v36 = vpop.eup %6488  ;;  %v9751_v31 = vadd.f32 1.0, %v6487_v43  ;;  %v2398_v51 = vsub.f32 1.0, %v2397_v3  ;;  %v2267_v60 = vadd.f32 %v2266_v1, %v8681_v13  ;;  %v2405_v43 = vand.u32 2147483647, %v9723_v39  ;;  %v2356_v3 = vpop.f32.mrf.mxu1  ;;  %vm9824_vm15 = vmor %vm2462_vm0, %vm2463_vm9 }
 0x39b   :  { %v9753_v14 = vadd.f32 1.0, %v6489_v36  ;;  %v9760_v21 = vpop.eup %6490  ;;  %v2459_v17 = vsub.f32 1.0, %v2458_v25  ;;  %v2327_v10 = vpop.f32.mrf.mxu0  ;;  %v2483_v25 = vand.u32 2147483648, %v9737_v20  ;;  %v6191_v27 = vmul.f32 -1.442695, %v2712_v52 }
 0x39c   :  { %6496 = vrcp.f32 %v9751_v31  ;;  %v2399_v37 = vmul.f32 %v9739_v46, %v2398_v51  ;;  %v6493_v9 = vpop.eup %6492  ;;  %v2473_v6 = vmul.f32 %v9760_v21, %v9737_v20  ;;  %v2296_v0 = vadd.f32 %v9712_v4, %v2267_v60 }
 0x39d   :  { %6498 = vrcp.f32 %v9753_v14  ;;  %v2460_v16 = vmul.f32 %v9741_v7, %v2459_v17  ;;  %v9783_v1 = vadd.f32 1.0, %v6493_v9  ;;  %v2517_v51 = vmul.f32 %v2394_v35, %v2354_v15 }
 0x39e   :  { %v2400_v59 = vadd.f32 %v9739_v46, %v2399_v37  ;;  %v6495_v63 = vpop.eup %6494  ;;  %v2474_v23 = vsub.f32 1.0, %v2473_v6  ;;  %v2328_v39 = vadd.f32 %v2327_v10, %v8665_v53  ;;  %v2408_v37 = vor.u32 1.1754944e-38, %v2407_v48 }
 0x39f   :  { %v9801_v49 = vadd.f32 1.0, %v6495_v63  ;;  %6500 = vrcp.f32 %v9783_v1  ;;  %v2461_v19 = vadd.f32 %v9741_v7, %v2460_v16  ;;  %v2521_v9 = vadd.f32 %v2517_v51, %v2296_v0  ;;  %v2594_v0 = vpop.f32.mrf.mxu3 }
 0x3a0   :  { %v2404_v42 = vsel %vm9797_vm11, %v9739_v46, %v2400_v59  ;;  %vm2406_vm12 = vcmp.eq.f32.partialorder %v2405_v43, 8.507059e+37  ;;  %v2475_v10 = vmul.f32 %v9760_v21, %v2474_v23  ;;  %v2357_v6 = vadd.f32 %v2356_v3, %v2328_v39 }
 0x3a1   :  { %v2269_v30 = vpop.f32.mrf.mxu2  ;;  %6502 = vrcp.f32 %v9801_v49  ;;  %v2484_v35 = vor.u32 1.1754944e-38, %v2483_v25  ;;  %v2465_v24 = vsel %vm9824_vm15, %v9741_v7, %v2461_v19  ;;  %v2481_v59 = vand.u32 2147483647, %v9737_v20 }
 0x3a2   :  { %v9785_v5 = vpop.eup %6496  ;;  %v2270_v8 = vadd.f32 %v2269_v30, %v8681_v13  ;;  %v2409_v30 = vsel %vm2406_vm12, %v2408_v37, %v2404_v42  ;;  %vm2478_vm1 = vweird.f32 %v9760_v21  ;;  %6504 = vtanh.f32 %v2521_v9  ;;  %v2359_v52 = vpop.f32.mrf.mxu1 }
 0x3a3   :  { %v9791_v36 = vpop.eup %6498  ;;  %v2412_v17 = vmul.f32 %v9785_v5, %v9751_v31  ;;  %v2330_v40 = vpop.f32.mrf.mxu0  ;;  %v2518_v16 = vmul.f32 %v2409_v30, %v2357_v6  ;;  %v2476_v43 = vadd.f32 %v9760_v21, %v2475_v10  ;;  %vm2417_vm2 = vweird.f32 %v9785_v5  ;;  %vm9848_vm3 = vmor %vm2477_vm13, %vm2478_vm1 }
 0x3a4   :  { %v2488_v28 = vmul.f32 %v9791_v36, %v9753_v14  ;;  %v2299_v38 = vadd.f32 %v9718_v45, %v2270_v8  ;;  %v2420_v48 = vand.u32 2147483647, %v9751_v31  ;;  %v2331_v3 = vadd.f32 %v2330_v40, %v8665_v53 }
 0x3a5   :  { %v2413_v63 = vsub.f32 1.0, %v2412_v17  ;;  %v9835_v15 = vpop.eup %6500  ;;  %v2422_v23 = vand.u32 2147483648, %v9751_v31  ;;  %6506 = vpow2.f32 %v6191_v27  ;;  %vm9852_vm4 = vcmp.eq.f32.partialorder %v2481_v59, 8.507059e+37 }
 0x3a6   :  { %v2489_v12 = vsub.f32 1.0, %v2488_v28  ;;  %v2522_v7 = vadd.f32 %v2518_v16, %v2299_v38  ;;  %vm2416_vm5 = vweird.f32 %v9751_v31  ;;  %v2713_v8 = vadd.f32 %v2594_v0, %v8920_v62 }
 0x3a7   :  { %v2414_v45 = vmul.f32 %v9785_v5, %v2413_v63  ;;  %v2503_v20 = vmul.f32 %v9835_v15, %v9783_v1  ;;  %v2470_v19 = vsel %vm9816_vm14, %v2469_v58, %v2465_v24  ;;  %vm2418_vm6 = vmor %vm2416_vm5, %vm2417_vm2  ;;  %v2423_v37 = vor.u32 1.1754944e-38, %v2422_v23 }
 0x3a8   :  { %v2490_v17 = vmul.f32 %v9791_v36, %v2489_v12  ;;  %v2480_v31 = vsel %vm9848_vm3, %v9760_v21, %v2476_v43  ;;  %vm2421_vm0 = vcmp.eq.f32.partialorder %v2420_v48, 8.507059e+37  ;;  %6508 = vtanh.f32 %v2522_v7 }
 0x3a9   :  { %v2272_v4 = vpop.f32.mrf.mxu2  ;;  %v2415_v39 = vadd.f32 %v9785_v5, %v2414_v45  ;;  %v2360_v9 = vadd.f32 %v2359_v52, %v2331_v3  ;;  %vm2492_vm7 = vweird.f32 %v9753_v14  ;;  %v2498_v58 = vand.u32 2147483648, %v9753_v14 }
 0x3aa   :  { %v2273_v25 = vadd.f32 %v2272_v4, %v8681_v13  ;;  %v9858_v4 = vpop.eup %6502  ;;  %v2529_v30 = vsub.f32 1.0, %v2470_v19  ;;  %vm2493_vm8 = vweird.f32 %v9791_v36  ;;  %v6192_v21 = vmul.f32 -1.442695, %v2713_v8 }
 0x3ab   :  { %v2419_v28 = vsel %vm2418_vm6, %v9785_v5, %v2415_v39  ;;  %v6505_v62 = vpop.eup %6504  ;;  %v2333_v40 = vpop.f32.mrf.mxu0  ;;  %v2427_v60 = vmul.f32 %v9858_v4, %v9801_v49  ;;  %v2504_v5 = vsub.f32 1.0, %v2503_v20  ;;  %v2485_v24 = vsel %vm9852_vm4, %v2484_v35, %v2480_v31  ;;  %vm9895_vm10 = vmor %vm2492_vm7, %vm2493_vm8 }
 0x3ac   :  { %v2424_v10 = vsel %vm2421_vm0, %v2423_v37, %v2419_v28  ;;  %v2302_v46 = vadd.f32 %v9729_v2, %v2273_v25  ;;  %v6507_v6 = vpop.eup %6506  ;;  %v2533_v38 = vmul.f32 %v6505_v62, %v2529_v30  ;;  %v2491_v2 = vadd.f32 %v9791_v36, %v2490_v17  ;;  %v2362_v25 = vpop.f32.mrf.mxu1  ;;  %v7264_v28 = vld [vmem:[#allocation2 + $0x208] sm:$0xff]  ;;  %v7265_v62 = vld [vmem:[#allocation2 + $0x400] sm:$0xff] }
 0x3ad   :  { %v2519_v27 = vmul.f32 %v2424_v10, %v2360_v9  ;;  %v2428_v59 = vsub.f32 1.0, %v2427_v60  ;;  %v2334_v12 = vadd.f32 %v2333_v40, %v8665_v53  ;;  %vm2432_vm9 = vweird.f32 %v9858_v4 }
 0x3ae   :  { %v2437_v16 = vand.u32 2147483648, %v9801_v49  ;;  %v2435_v43 = vand.u32 2147483647, %v9801_v49  ;;  %v2537_v45 = vmul.f32 %v2470_v19, %v9412_v61  ;;  %v6509_v7 = vpop.eup %6508  ;;  %v9888_v35 = vadd.f32 1.0, %v6507_v6 }
 0x3af   :  { %v2523_v63 = vadd.f32 %v2519_v27, %v2302_v46  ;;  %v2429_v0 = vmul.f32 %v9858_v4, %v2428_v59  ;;  %6510 = vpow2.f32 %v6192_v21  ;;  %v2505_v3 = vmul.f32 %v9835_v15, %v2504_v5  ;;  %v7269_v27 = vld [vmem:[#allocation2 + $0x3c0] sm:$0xff]  ;;  %v7270_v59 = vld [vmem:[#allocation2 + $0x1a8] sm:$0xff] }
 0x3b0   :  { %v2530_v23 = vsub.f32 1.0, %v2485_v24  ;;  %v2496_v61 = vand.u32 2147483647, %v9753_v14  ;;  %vm2431_vm11 = vweird.f32 %v9801_v49  ;;  %v9902_v22 = vadd.f32 %v2537_v45, %v2533_v38 }
 0x3b1   :  { %v2275_v42 = vpop.f32.mrf.mxu2  ;;  %v2430_v51 = vadd.f32 %v9858_v4, %v2429_v0  ;;  %v2495_v8 = vsel %vm9895_vm10, %v9791_v36, %v2491_v2  ;;  %6512 = vtanh.f32 %v2523_v63  ;;  %v2363_v20 = vadd.f32 %v2362_v25, %v2334_v12  ;;  %vm2433_vm12 = vmor %vm2431_vm11, %vm2432_vm9  ;;  %v7271_v63 = vld [vmem:[#allocation2 + $0x3a0] sm:$0xff] }
 0x3b2   :  { %v2276_v48 = vadd.f32 %v2275_v42, %v8681_v13  ;;  %v2597_v42 = vpop.f32.mrf.mxu3  ;;  %v2438_v19 = vor.u32 1.1754944e-38, %v2437_v16  ;;  %v2534_v37 = vmul.f32 %v6509_v7, %v2530_v23  ;;  %vm2436_vm13 = vcmp.eq.f32.partialorder %v2435_v43, 8.507059e+37  ;;  %2869 = vmatmul.f32.vlgmr.msra.gmra.mxu2 %v9902_v22  ;;  %2927 = vmatmul.f32.vlgmr.msrb.gmra.mxu0 %v9902_v22  ;;  %v7273_v7 = vld [vmem:[#allocation2 + $0x380] sm:$0xff] }
 0x3b3   :  { %v2434_v14 = vsel %vm2433_vm12, %v9858_v4, %v2430_v51  ;;  %v2499_v17 = vor.u32 1.1754944e-38, %v2498_v58  ;;  %3265 = vmatpush.msra.mxu2 %v7264_v28  ;;  %3515 = vmatpush.msrb.mxu0 %v7265_v62  ;;  %v2714_v9 = vadd.f32 %v2597_v42, %v8936_v57  ;;  %vm2497_vm14 = vcmp.eq.f32.partialorder %v2496_v61, 8.507059e+37  ;;  %v7267_v58 = vld [vmem:[#allocation2 + $0x3e0] sm:$0xff]  ;;  %v7274_v61 = vld [vmem:[#allocation2 + $0x168] sm:$0xff] }
 0x3b4   :  { %v2305_v49 = vadd.f32 %v9744_v29, %v2276_v48  ;;  %v2439_v31 = vsel %vm2436_vm13, %v2438_v19, %v2434_v14  ;;  %v2538_v4 = vmul.f32 %v2485_v24, %v9429_v56  ;;  %6514 = vrcp.f32 %v9888_v35  ;;  %v7266_v29 = vld [vmem:[#allocation2 + $0x1e8] sm:$0xff]  ;;  %v7275_v51 = vld [vmem:[#allocation2 + $0x360] sm:$0xff] }
 0x3b5   :  { %v2520_v10 = vmul.f32 %v2439_v31, %v2363_v20  ;;  %v6511_v46 = vpop.eup %6510  ;;  %v2500_v30 = vsel %vm2497_vm14, %v2499_v17, %v2495_v8  ;;  %3266 = vmatpush.msra.mxu2 %v7266_v29  ;;  %3516 = vmatpush.msrb.mxu0 %v7267_v58  ;;  %vm2508_vm15 = vweird.f32 %v9835_v15  ;;  %v2513_v5 = vand.u32 2147483648, %v9783_v1  ;;  %v7268_v56 = vld [vmem:[#allocation2 + $0x1c8] sm:$0xff]  ;;  %v7283_v29 = vld [vmem:[#allocation2 + $0x2e0] sm:$0xff] }
 0x3b6   :  { %v9919_v21 = vadd.f32 %v2538_v4, %v2534_v37  ;;  %vm2507_vm1 = vweird.f32 %v9783_v1  ;;  %v6193_v6 = vmul.f32 -1.442695, %v2714_v9  ;;  %v2531_v38 = vsub.f32 1.0, %v2500_v30  ;;  %v7272_v48 = vld [vmem:[#allocation2 + $0x188] sm:$0xff]  ;;  %v7281_v9 = vld [vmem:[#allocation2 + $0x300] sm:$0xff] }
 0x3b7   :  { %v2524_v60 = vadd.f32 %v2520_v10, %v2305_v49  ;;  %v6513_v57 = vpop.eup %6512  ;;  %3267 = vmatpush.msra.mxu2 %v7268_v56  ;;  %3517 = vmatpush.msrb.mxu0 %v7269_v27  ;;  %v2511_v24 = vand.u32 2147483647, %v9783_v1  ;;  %vm9926_vm2 = vmor %vm2507_vm1, %vm2508_vm15  ;;  %v9937_v0 = vadd.f32 1.0, %v6511_v46  ;;  %v2514_v43 = vor.u32 1.1754944e-38, %v2513_v5  ;;  %v7276_v37 = vld [vmem:[#allocation2 + $0x148] sm:$0xff]  ;;  %v7279_v49 = vld [vmem:[#allocation2 + $0x320] sm:$0xff]  ;;  %v2620_v56 = vpop.f32.mrf.mxu0 }
 0x3b8   :  { %v2535_v12 = vmul.f32 %v6513_v57, %v2531_v38  ;;  %v2539_v23 = vmul.f32 %v2500_v30, %v9454_v50  ;;  %v7277_v50 = vld [vmem:[#allocation2 + $0x340] sm:$0xff]  ;;  %v7278_v14 = vld [vmem:[#allocation2 + $0x128] sm:$0xff]  ;;  %vm2737_vm8 = vweird.f32 %v9888_v35 }
 0x3b9   :  { %v2562_v39 = vpop.f32.mrf.mxu2  ;;  %3268 = vmatpush.msra.mxu2 %v7270_v59  ;;  %3518 = vmatpush.msrb.mxu0 %v7271_v63  ;;  %vm2512_vm3 = vcmp.eq.f32.partialorder %v2511_v24, 8.507059e+37  ;;  %v7280_v62 = vld [vmem:[#allocation2 + $0x108] sm:$0xff]  ;;  %v7285_v27 = vld [vmem:[#allocation2 + $0x2c0] sm:$0xff]  ;;  %vm2752_vm12 = vweird.f32 %v9937_v0 }
 0x3ba   :  { %v2632_v36 = vadd.f32 %v2562_v39, %v8692_v34  ;;  %v2506_v34 = vadd.f32 %v9835_v15, %v2505_v3  ;;  %2872 = vmatmul.f32.gmra.mxu2 %v9919_v21  ;;  %2930 = vmatmul.f32.gmra.mxu0 %v9919_v21  ;;  %v9935_v1 = vpop.eup %6514  ;;  %v2600_v3 = vpop.f32.mrf.mxu3  ;;  %v9943_v42 = vadd.f32 %v2539_v23, %v2535_v12  ;;  %v7286_v24 = vld [vmem:[#allocation2 + $0xa8] sm:$0xff]  ;;  %v7287_v2 = vld [vmem:[#allocation2 + $0x2a0] sm:$0xff] }
 0x3bb   :  { %3269 = vmatpush.msra.mxu2 %v7272_v48  ;;  %3519 = vmatpush.msrb.mxu0 %v7273_v7  ;;  %v2715_v19 = vadd.f32 %v2600_v3, %v8959_v41  ;;  %v2733_v31 = vmul.f32 %v9935_v1, %v9888_v35  ;;  %v7288_v48 = vld [vmem:[#allocation2 + $0x88] sm:$0xff]  ;;  %v7289_v7 = vld [vmem:[#allocation2 + $0x280] sm:$0xff]  ;;  %vm2738_vm5 = vweird.f32 %v9935_v1 }
 0x3bc   :  { %v6187_v40 = vmul.f32 -1.442695, %v2632_v36  ;;  %v2510_v16 = vsel %vm9926_vm2, %v9835_v15, %v2506_v34  ;;  %v12366_v3 = vld [vmem:[#allocation25_spill] sm:$0xff]  ;;  %vm10010_vm9 = vmor %vm2737_vm8, %vm2738_vm5 }
 0x3bd   :  { %v2515_v52 = vsel %vm2512_vm3, %v2514_v43, %v2510_v16  ;;  %3270 = vmatpush.msra.mxu2 %v7274_v61  ;;  %3520 = vmatpush.msrb.mxu0 %v7275_v51  ;;  %v6194_v41 = vmul.f32 -1.442695, %v2715_v19  ;;  %v2734_v34 = vsub.f32 1.0, %v2733_v31  ;;  %v7290_v61 = vld [vmem:[#allocation2 + $0x68] sm:$0xff]  ;;  %v7291_v51 = vld [vmem:[#allocation2 + $0x260] sm:$0xff] }
 0x3be   :  { %6516 = vpow2.f32 %v6187_v40  ;;  %v2540_v10 = vmul.f32 %v2515_v52, %v9471_v11  ;;  %v7282_v40 = vld [vmem:[#allocation2 + $0xe8] sm:$0xff] }
 0x3bf   :  { %6518 = vtanh.f32 %v2524_v60  ;;  %3271 = vmatpush.msra.mxu2 %v7276_v37  ;;  %3521 = vmatpush.msrb.mxu0 %v7277_v50  ;;  %v7284_v11 = vld [vmem:[#allocation2 + $0xc8] sm:$0xff]  ;;  %v2735_v59 = vmul.f32 %v9935_v1, %v2734_v34  ;;  %v7296_v34 = vld [vmem:[#allocation2 + $0x220] sm:$0xff] }
 0x3c0   :  { %6520 = vpow2.f32 %v6193_v6 }
 0x3c1   :  { %v2565_v45 = vpop.f32.mrf.mxu2  ;;  %6522 = vrcp.f32 %v9937_v0  ;;  %3272 = vmatpush.msra.mxu2 %v7278_v14  ;;  %3522 = vmatpush.msrb.mxu0 %v7279_v49  ;;  %v9991_v49 = vld [vmem:[#allocation2 + $0x820] ss:$0 sm:$0xff] }
 0x3c2   :  { %v2633_v15 = vadd.f32 %v2565_v45, %v8759_v55  ;;  %v2532_v55 = vsub.f32 1.0, %v2515_v52  ;;  %2875 = vmatmul.f32.gmra.mxu2 %v9943_v42  ;;  %2933 = vmatmul.f32.gmra.mxu0 %v9943_v42 }
 0x3c3   :  { %3273 = vmatpush.msra.mxu2 %v7280_v62  ;;  %3523 = vmatpush.msrb.mxu0 %v7281_v9  ;;  %v2743_v62 = vand.u32 2147483648, %v9888_v35 }
 0x3c4   :  { %v6517_v25 = vpop.eup %6516  ;;  %v6188_v8 = vmul.f32 -1.442695, %v2633_v15 }
 0x3c5   :  { %v9941_v39 = vadd.f32 1.0, %v6517_v25  ;;  %v6519_v20 = vpop.eup %6518  ;;  %3274 = vmatpush.msra.mxu2 %v7282_v40  ;;  %3524 = vmatpush.msrb.mxu0 %v7283_v29  ;;  %v2741_v25 = vand.u32 2147483647, %v9888_v35  ;;  %v2623_v40 = vpop.f32.mrf.mxu0 }
 0x3c6   :  { %v6521_v17 = vpop.eup %6520  ;;  %v2536_v36 = vmul.f32 %v6519_v20, %v2532_v55  ;;  %v2736_v20 = vadd.f32 %v9935_v1, %v2735_v59  ;;  %v2744_v59 = vor.u32 1.1754944e-38, %v2743_v62 }
 0x3c7   :  { %6524 = vrcp.f32 %v9941_v39  ;;  %v9954_v46 = vpop.eup %6522  ;;  %v9956_v30 = vadd.f32 1.0, %v6521_v17  ;;  %3275 = vmatpush.msra.mxu2 %v7284_v11  ;;  %3525 = vmatpush.msrb.mxu0 %v7285_v27  ;;  %v2663_v12 = vand.u32 2147483648, %v9941_v39  ;;  %v2661_v43 = vand.u32 2147483647, %v9941_v39  ;;  %v12373_v11 = vld [vmem:[#allocation26_spill] sm:$0xff] }
 0x3c8   :  { %6526 = vpow2.f32 %v6188_v8  ;;  %v9960_v60 = vadd.f32 %v2540_v10, %v2536_v36  ;;  %v2748_v63 = vmul.f32 %v9954_v46, %v9937_v0  ;;  %vm2657_vm6 = vweird.f32 %v9941_v39  ;;  %v7293_v36 = vld [vmem:[#allocation2 + $0x48] sm:$0xff] }
 0x3c9   :  { %v2568_v28 = vpop.f32.mrf.mxu2  ;;  %6528 = vpow2.f32 %v6194_v41  ;;  %3276 = vmatpush.msra.mxu2 %v7286_v24  ;;  %3526 = vmatpush.msrb.mxu0 %v7287_v2  ;;  %v2664_v50 = vor.u32 1.1754944e-38, %v2663_v12  ;;  %vm2662_vm7 = vcmp.eq.f32.partialorder %v2661_v43, 8.507059e+37  ;;  %v7294_v41 = vld [vmem:[#allocation2 + $0x240] sm:$0xff]  ;;  %vm10014_vm10 = vcmp.eq.f32.partialorder %v2741_v25, 8.507059e+37  ;;  %v7297_v24 = vld [vmem:[#allocation2 + $0x408] sm:$0xff]  ;;  %v7298_v2 = vld [vmem:[#allocation2 + $0x410] sm:$0xff] }
 0x3ca   :  { %v2634_v4 = vadd.f32 %v2568_v28, %v8815_v32  ;;  %2878 = vmatmul.f32.gmra.mxu2 %v9960_v60  ;;  %2936 = vmatmul.f32.gmra.mxu0 %v9960_v60  ;;  %v2749_v19 = vsub.f32 1.0, %v2748_v63  ;;  %v2756_v63 = vand.u32 2147483647, %v9937_v0  ;;  %v7299_v43 = vld [vmem:[#allocation2 + $0x3e8] sm:$0xff]  ;;  %vm2753_vm13 = vweird.f32 %v9954_v46 }
 0x3cb   :  { %3277 = vmatpush.msra.mxu2 %v7288_v48  ;;  %3527 = vmatpush.msrb.mxu0 %v7289_v7  ;;  %vm10069_vm3 = vmor %vm2752_vm12, %vm2753_vm13  ;;  %vm2767_vm5 = vweird.f32 %v9956_v30 }
 0x3cc   :  { %v6189_v57 = vmul.f32 -1.442695, %v2634_v4  ;;  %v2750_v35 = vmul.f32 %v9954_v46, %v2749_v19  ;;  %vm10044_vm15 = vcmp.eq.f32.partialorder %v2756_v63, 8.507059e+37  ;;  %v7312_v19 = vld [vmem:[#allocation2 + $0x210] sm:$0xff] }
 0x3cd   :  { %v9958_v58 = vpop.eup %6524  ;;  %3278 = vmatpush.msra.mxu2 %v7290_v61  ;;  %3528 = vmatpush.msrb.mxu0 %v7291_v51  ;;  %v7301_v61 = vld [vmem:[#allocation2 + $0x3c8] sm:$0xff]  ;;  %v7302_v51 = vld [vmem:[#allocation2 + $0x3d0] sm:$0xff] }
 0x3ce   :  { %v6527_v5 = vpop.eup %6526  ;;  %v2653_v32 = vmul.f32 %v9958_v58, %v9941_v39  ;;  %6530 = vpow2.f32 %v6189_v57  ;;  %vm2658_vm4 = vweird.f32 %v9958_v58  ;;  %v2792_v39 = vadd.f32 %v9991_v49, %v2620_v56  ;;  %v7305_v57 = vld [vmem:[#allocation2 + $0x388] sm:$0xff] }
 0x3cf   :  { %v9964_v6 = vadd.f32 1.0, %v6527_v5  ;;  %6532 = vrcp.f32 %v9956_v30  ;;  %v6529_v15 = vpop.eup %6528  ;;  %vm9985_vm0 = vmor %vm2657_vm6, %vm2658_vm4  ;;  %3279 = vmatpush.msra.mxu2 %v7293_v36  ;;  %3529 = vmatpush.msrb.mxu0 %v7294_v41  ;;  %v2740_v56 = vsel %vm10010_vm9, %v9935_v1, %v2736_v20  ;;  %v2758_v20 = vand.u32 2147483648, %v9937_v0  ;;  %v7306_v5 = vld [vmem:[#allocation2 + $0x390] sm:$0xff] }
 0x3d0   :  { %v2654_v38 = vsub.f32 1.0, %v2653_v32  ;;  %v10002_v9 = vadd.f32 1.0, %v6529_v15  ;;  %v2745_v7 = vsel %vm10014_vm10, %v2744_v59, %v2740_v56 }
 0x3d1   :  { %6534 = vrcp.f32 %v9964_v6  ;;  %v2571_v45 = vpop.f32.mrf.mxu2  ;;  %3530 = vmatpush.msrb.mxu0 %v7296_v34  ;;  %v2678_v12 = vand.u32 2147483648, %v9964_v6  ;;  %vm2672_vm14 = vweird.f32 %v9964_v6  ;;  %v2808_v41 = vsub.f32 1.0, %v2745_v7  ;;  %v2626_v34 = vpop.f32.mrf.mxu0 }
 0x3d2   :  { %v2655_v16 = vmul.f32 %v9958_v58, %v2654_v38  ;;  %v2635_v23 = vadd.f32 %v2571_v45, %v12366_v3  ;;  %2985 = vmatmul.f32.vlgmr.msrb.gmra.mxu2 %v9902_v22  ;;  %3043 = vmatmul.f32.vlgmr.msra.gmra.mxu0 %v9902_v22  ;;  %v7300_v45 = vld [vmem:[#allocation2 + $0x3f0] sm:$0xff]  ;;  %v2751_v3 = vadd.f32 %v9954_v46, %v2750_v35 }
 0x3d3   :  { %3631 = vmatpush.msra.mxu0 %v7298_v2  ;;  %v2679_v37 = vor.u32 1.1754944e-38, %v2678_v12  ;;  %v2816_v62 = vmul.f32 %v2745_v7, %v9596_v18  ;;  %v7308_v2 = vld [vmem:[#allocation2 + $0x370] sm:$0xff]  ;;  %v2794_v7 = vadd.f32 %v9991_v49, %v2626_v34 }
 0x3d4   :  { %v2656_v52 = vadd.f32 %v9958_v58, %v2655_v16  ;;  %v6531_v8 = vpop.eup %6530  ;;  %v6190_v55 = vmul.f32 -1.442695, %v2635_v23  ;;  %v2676_v16 = vand.u32 2147483647, %v9964_v6 }
 0x3d5   :  { %v9989_v14 = vpop.eup %6532  ;;  %v9997_v31 = vadd.f32 1.0, %v6531_v8  ;;  %3632 = vmatpush.msra.mxu0 %v7300_v45 }
 0x3d6   :  { %v2660_v17 = vsel %vm9985_vm0, %v9958_v58, %v2656_v52  ;;  %6536 = vpow2.f32 %v6190_v55  ;;  %v7295_v58 = vld [vmem:[#allocation2 + $0x28] sm:$0xff]  ;;  %v2763_v32 = vmul.f32 %v9989_v14, %v9956_v30  ;;  %vm2677_vm2 = vcmp.eq.f32.partialorder %v2676_v16, 8.507059e+37 }
 0x3d7   :  { %v9999_v28 = vpop.eup %6534  ;;  %v2665_v10 = vsel %vm2662_vm7, %v2664_v50, %v2660_v17  ;;  %6538 = vrcp.f32 %v9997_v31  ;;  %3280 = vmatpush.msra.mxu2 %v7295_v58  ;;  %3633 = vmatpush.msra.mxu0 %v7302_v51  ;;  %v2793_v50 = vadd.f32 %v9991_v49, %v2623_v40  ;;  %v7304_v17 = vld [vmem:[#allocation2 + $0x3b0] sm:$0xff]  ;;  %v2693_v0 = vand.u32 2147483648, %v9997_v31 }
 0x3d8   :  { %v2796_v4 = vmul.f32 %v2792_v39, %v2665_v10  ;;  %v2668_v29 = vmul.f32 %v9999_v28, %v9964_v6  ;;  %6540 = vrcp.f32 %v10002_v9  ;;  %vm2673_vm11 = vweird.f32 %v9999_v28  ;;  %v7303_v39 = vld [vmem:[#allocation2 + $0x3a8] sm:$0xff] }
 0x3d9   :  { %3573 = vmatpush.msrb.mxu2 %v7297_v24  ;;  %v2764_v15 = vsub.f32 1.0, %v2763_v32  ;;  %vm10051_vm1 = vmor %vm2672_vm14, %vm2673_vm11  ;;  %3634 = vmatpush.msra.mxu0 %v7304_v17  ;;  %v2691_v32 = vand.u32 2147483647, %v9997_v31  ;;  %v7307_v24 = vld [vmem:[#allocation2 + $0x368] sm:$0xff]  ;;  %vm2768_vm6 = vweird.f32 %v9989_v14  ;;  %vm2687_vm0 = vweird.f32 %v9997_v31  ;;  %v7313_v17 = vld [vmem:[#allocation2 + $0x1e0] sm:$0xff] }
 0x3da   :  { %v2800_v27 = vadd.f32 %v2796_v4, %v12373_v11  ;;  %v2669_v38 = vsub.f32 1.0, %v2668_v29  ;;  %2988 = vmatmul.f32.gmra.mxu2 %v9919_v21  ;;  %3046 = vmatmul.f32.gmra.mxu0 %v9919_v21  ;;  %v2755_v29 = vsel %vm10069_vm3, %v9954_v46, %v2751_v3  ;;  %v2759_v11 = vor.u32 1.1754944e-38, %v2758_v20  ;;  %v7311_v20 = vld [vmem:[#allocation2 + $0x200] sm:$0xff]  ;;  %vm10117_vm9 = vmor %vm2767_vm5, %vm2768_vm6 }
 0x3db   :  { %3574 = vmatpush.msrb.mxu2 %v7299_v43  ;;  %v2765_v18 = vmul.f32 %v9989_v14, %v2764_v15  ;;  %3635 = vmatpush.msra.mxu0 %v7306_v5  ;;  %v2694_v45 = vor.u32 1.1754944e-38, %v2693_v0  ;;  %vm2692_vm8 = vcmp.eq.f32.partialorder %v2691_v32, 8.507059e+37  ;;  %v2629_v0 = vpop.f32.mrf.mxu0  ;;  %v7318_v5 = vld [vmem:[#allocation2 + $0x1d0] sm:$0xff]  ;;  %v7319_v32 = vld [vmem:[#allocation2 + $0x308] sm:$0xff] }
 0x3dc   :  { %6542 = vtanh.f32 %v2800_v27  ;;  %v2670_v1 = vmul.f32 %v9999_v28, %v2669_v38  ;;  %v6537_v48 = vpop.eup %6536  ;;  %v12380_v27 = vld [vmem:[#allocation28_spill] sm:$0xff] }
 0x3dd   :  { %v10038_v23 = vpop.eup %6538  ;;  %v10042_v52 = vadd.f32 1.0, %v6537_v48  ;;  %3575 = vmatpush.msrb.mxu2 %v7301_v61  ;;  %3636 = vmatpush.msra.mxu0 %v7308_v2  ;;  %v2766_v16 = vadd.f32 %v9989_v14, %v2765_v18  ;;  %v7309_v48 = vld [vmem:[#allocation2 + $0x348] sm:$0xff]  ;;  %v2773_v61 = vand.u32 2147483648, %v9956_v30  ;;  %v7341_v18 = vld [vmem:[#allocation2 + $0xe0] sm:$0xff] }
 0x3de   :  { %v2671_v25 = vadd.f32 %v9999_v28, %v2670_v1  ;;  %v2683_v6 = vmul.f32 %v10038_v23, %v9997_v31  ;;  %v10062_v36 = vpop.eup %6540  ;;  %vm2688_vm4 = vweird.f32 %v10038_v23  ;;  %v2760_v1 = vsel %vm10044_vm15, %v2759_v11, %v2755_v29  ;;  %v7310_v31 = vld [vmem:[#allocation2 + $0x350] sm:$0xff] }
 0x3df   :  { %6544 = vrcp.f32 %v10042_v52  ;;  %3576 = vmatpush.msrb.mxu2 %v7303_v39  ;;  %v2778_v46 = vmul.f32 %v10062_v36, %v10002_v9  ;;  %vm10099_vm7 = vmor %vm2687_vm0, %vm2688_vm4  ;;  %3637 = vmatpush.msra.mxu0 %v7310_v31  ;;  %v2708_v39 = vand.u32 2147483648, %v10042_v52  ;;  %vm2702_vm12 = vweird.f32 %v10042_v52  ;;  %v7326_v31 = vld [vmem:[#allocation2 + $0x190] sm:$0xff] }
 0x3e0   :  { %v2675_v55 = vsel %vm10051_vm1, %v9999_v28, %v2671_v25  ;;  %v2684_v4 = vsub.f32 1.0, %v2683_v6  ;;  %v2771_v25 = vand.u32 2147483647, %v9956_v30  ;;  %v7314_v30 = vld [vmem:[#allocation2 + $0x1f0] sm:$0xff]  ;;  %vm2783_vm15 = vweird.f32 %v10062_v36 }
 0x3e1   :  { %v2680_v28 = vsel %vm2677_vm2, %v2679_v37, %v2675_v55  ;;  %3577 = vmatpush.msrb.mxu2 %v7305_v57  ;;  %v2779_v51 = vsub.f32 1.0, %v2778_v46  ;;  %v2770_v55 = vsel %vm10117_vm9, %v9989_v14, %v2766_v16  ;;  %v2817_v14 = vmul.f32 %v2760_v1, %v9659_v26  ;;  %v7317_v57 = vld [vmem:[#allocation2 + $0x1c0] sm:$0xff]  ;;  %v7320_v26 = vld [vmem:[#allocation2 + $0x310] sm:$0xff] }
 0x3e2   :  { %v6543_v40 = vpop.eup %6542  ;;  %v2797_v58 = vmul.f32 %v2793_v50, %v2680_v28  ;;  %v2685_v56 = vmul.f32 %v10038_v23, %v2684_v4  ;;  %2991 = vmatmul.f32.gmra.mxu2 %v9943_v42  ;;  %3049 = vmatmul.f32.gmra.mxu0 %v9943_v42  ;;  %v2809_v50 = vsub.f32 1.0, %v2760_v1  ;;  %v2706_v28 = vand.u32 2147483647, %v10042_v52  ;;  %v7315_v4 = vld [vmem:[#allocation2 + $0x328] sm:$0xff]  ;;  %v7324_v16 = vld [vmem:[#allocation2 + $0x2f0] sm:$0xff]  ;;  %v7349_v46 = vld [vmem:[#allocation2 + $0xa0] sm:$0xff] }
 0x3e3   :  { %v2812_v35 = vmul.f32 %v6543_v40, %v2808_v41  ;;  %3578 = vmatpush.msrb.mxu2 %v7307_v24  ;;  %v12385_v41 = vld [vmem:[#allocation30_spill] sm:$0xff]  ;;  %v7316_v40 = vld [vmem:[#allocation2 + $0x330] sm:$0xff]  ;;  %vm10132_vm11 = vcmp.eq.f32.partialorder %v2771_v25, 8.507059e+37  ;;  %v2780_v34 = vmul.f32 %v10062_v36, %v2779_v51  ;;  %vm2782_vm1 = vweird.f32 %v10002_v9  ;;  %v7367_v25 = vld [vmem:[#allocation2 + $0x5e0] sm:$0xff] }
 0x3e4   :  { %v2801_v38 = vadd.f32 %v2797_v58, %v12380_v27  ;;  %v2686_v59 = vadd.f32 %v10038_v23, %v2685_v56  ;;  %3638 = vmatpush.msra.mxu0 %v7316_v40  ;;  %v2774_v58 = vor.u32 1.1754944e-38, %v2773_v61  ;;  %v2709_v27 = vor.u32 1.1754944e-38, %v2708_v39  ;;  %v7322_v24 = vld [vmem:[#allocation2 + $0x1b0] sm:$0xff]  ;;  %v7323_v1 = vld [vmem:[#allocation2 + $0x2e8] sm:$0xff]  ;;  %vm10164_vm2 = vmor %vm2782_vm1, %vm2783_vm15 }
 0x3e5   :  { %v10090_v63 = vadd.f32 %v2816_v62, %v2812_v35  ;;  %v10092_v12 = vpop.eup %6544  ;;  %3579 = vmatpush.msrb.mxu2 %v7309_v48  ;;  %vm2707_vm14 = vcmp.eq.f32.partialorder %v2706_v28, 8.507059e+37  ;;  %v2781_v43 = vadd.f32 %v10062_v36, %v2780_v34  ;;  %v7325_v48 = vld [vmem:[#allocation2 + $0x180] sm:$0xff]  ;;  %v12392_v61 = vld [vmem:[#allocation22_spill] sm:$0xff]  ;;  %v7332_v39 = vld [vmem:[#allocation2 + $0x150] sm:$0xff] }
 0x3e6   :  { %6546 = vtanh.f32 %v2801_v38  ;;  %v2690_v3 = vsel %vm10099_vm7, %v10038_v23, %v2686_v59  ;;  %v2698_v15 = vmul.f32 %v10092_v12, %v10042_v52  ;;  %vm2703_vm10 = vweird.f32 %v10092_v12  ;;  %3639 = vmatpush.msra.mxu0 %v7320_v26  ;;  %v7321_v38 = vld [vmem:[#allocation2 + $0x1a0] sm:$0xff]  ;;  %v7338_v28 = vld [vmem:[#allocation2 + $0x290] sm:$0xff] }
 0x3e7   :  { %2840 = vmatmul.f32.vlgmr.msra.gmra.mxu1 %v10090_v63  ;;  %2898 = vmatmul.f32.vlgmr.msrb.gmra.mxu3 %v10090_v63  ;;  %v2695_v8 = vsel %vm2692_vm8, %v2694_v45, %v2690_v3  ;;  %v2775_v11 = vsel %vm10132_vm11, %v2774_v58, %v2770_v55  ;;  %vm10143_vm13 = vmor %vm2702_vm12, %vm2703_vm10  ;;  %v2795_v52 = vadd.f32 %v9991_v49, %v2629_v0  ;;  %v2788_v49 = vand.u32 2147483648, %v10002_v9  ;;  %v7331_v55 = vld [vmem:[#allocation2 + $0x140] sm:$0xff]  ;;  %v7342_v0 = vld [vmem:[#allocation2 + $0x268] sm:$0xff] }
 0x3e8   :  { %3236 = vmatpush.msra.mxu1 %v7311_v20  ;;  %3294 = vmatpush.msrb.mxu3 %v7312_v19  ;;  %v2798_v37 = vmul.f32 %v2794_v7, %v2695_v8  ;;  %v2699_v6 = vsub.f32 1.0, %v2698_v15  ;;  %v2786_v3 = vand.u32 2147483647, %v10002_v9  ;;  %v7327_v8 = vld [vmem:[#allocation2 + $0x160] sm:$0xff]  ;;  %v7328_v20 = vld [vmem:[#allocation2 + $0x170] sm:$0xff]  ;;  %v2818_v19 = vmul.f32 %v2775_v11, %v9681_v47 }
 0x3e9   :  { %3580 = vmatpush.msrb.mxu2 %v7315_v4  ;;  %3640 = vmatpush.msra.mxu0 %v7324_v16  ;;  %v2785_v9 = vsel %vm10164_vm2, %v10062_v36, %v2781_v43  ;;  %v7334_v47 = vld [vmem:[#allocation2 + $0x2b0] sm:$0xff]  ;;  %v7335_v36 = vld [vmem:[#allocation2 + $0x120] sm:$0xff]  ;;  %v7358_v43 = vld [vmem:[#allocation2 + $0x3f8] sm:$0xff] }
 0x3ea   :  { %3237 = vmatpush.msra.mxu1 %v7313_v17  ;;  %3295 = vmatpush.msrb.mxu3 %v7314_v30  ;;  %v2802_v62 = vadd.f32 %v2798_v37, %v12385_v41  ;;  %v2700_v10 = vmul.f32 %v10092_v12, %v2699_v6  ;;  %v7329_v37 = vld [vmem:[#allocation2 + $0x2c8] sm:$0xff]  ;;  %v7330_v6 = vld [vmem:[#allocation2 + $0x2d0] sm:$0xff]  ;;  %vm2787_vm3 = vcmp.eq.f32.partialorder %v2786_v3, 8.507059e+37  ;;  %v7339_v4 = vld [vmem:[#allocation2 + $0x100] sm:$0xff] }
 0x3eb   :  { %3581 = vmatpush.msrb.mxu2 %v7319_v32  ;;  %3052 = vmatmul.f32.gmra.mxu0 %v9960_v60  ;;  %v7333_v30 = vld [vmem:[#allocation2 + $0x2a8] sm:$0xff]  ;;  %v7347_v26 = vld [vmem:[#allocation2 + $0x250] sm:$0xff] }
 0x3ec   :  { %v6547_v29 = vpop.eup %6546  ;;  %3238 = vmatpush.msra.mxu1 %v7317_v57  ;;  %3296 = vmatpush.msrb.mxu3 %v7318_v5  ;;  %6548 = vtanh.f32 %v2802_v62  ;;  %v2701_v56 = vadd.f32 %v10092_v12, %v2700_v10  ;;  %v7336_v62 = vld [vmem:[#allocation2 + $0x130] sm:$0xff]  ;;  %v7337_v10 = vld [vmem:[#allocation2 + $0x288] sm:$0xff] }
 0x3ed   :  { %v2813_v35 = vmul.f32 %v6547_v29, %v2809_v50  ;;  %3582 = vmatpush.msrb.mxu2 %v7323_v1  ;;  %3641 = vmatpush.msra.mxu0 %v7330_v6  ;;  %v2789_v50 = vor.u32 1.1754944e-38, %v2788_v49  ;;  %v7343_v57 = vld [vmem:[#allocation2 + $0x270] sm:$0xff]  ;;  %v7346_v32 = vld [vmem:[#allocation2 + $0x248] sm:$0xff]  ;;  %v7356_v1 = vld [vmem:[#allocation2 + $0x60] sm:$0xff] }
 0x3ee   :  { %3239 = vmatpush.msra.mxu1 %v7321_v38  ;;  %3297 = vmatpush.msrb.mxu3 %v7322_v24  ;;  %v2705_v2 = vsel %vm10143_vm13, %v10092_v12, %v2701_v56  ;;  %v2810_v12 = vsub.f32 1.0, %v2775_v11  ;;  %v7344_v5 = vld [vmem:[#allocation2 + $0xf0] sm:$0xff]  ;;  %v7353_v24 = vld [vmem:[#allocation2 + $0x80] sm:$0xff]  ;;  %v7365_v3 = vld [vmem:[#allocation2 + $0x608] sm:$0xff] }
 0x3ef   :  { %v10151_v59 = vadd.f32 %v2817_v14, %v2813_v35  ;;  %v2710_v45 = vsel %vm2707_vm14, %v2709_v27, %v2705_v2  ;;  %2994 = vmatmul.f32.gmra.mxu2 %v9960_v60  ;;  %3642 = vmatpush.msra.mxu0 %v7334_v47  ;;  %v2790_v41 = vsel %vm2787_vm3, %v2789_v50, %v2785_v9  ;;  %v7340_v14 = vld [vmem:[#allocation2 + $0x110] sm:$0xff]  ;;  %v7345_v35 = vld [vmem:[#allocation2 + $0xc0] sm:$0xff]  ;;  %v7355_v2 = vld [vmem:[#allocation2 + $0x418] sm:$0xff] }
 0x3f0   :  { %3240 = vmatpush.msra.mxu1 %v7325_v48  ;;  %3298 = vmatpush.msrb.mxu3 %v7326_v31  ;;  %v2799_v7 = vmul.f32 %v2795_v52, %v2710_v45  ;;  %v2811_v40 = vsub.f32 1.0, %v2790_v41  ;;  %v2819_v58 = vmul.f32 %v2790_v41, %v9687_v54  ;;  %v7348_v11 = vld [vmem:[#allocation2 + $0xd0] sm:$0xff]  ;;  %v7350_v54 = vld [vmem:[#allocation2 + $0x228] sm:$0xff]  ;;  %v7359_v45 = vld [vmem:[#allocation2 + $0x40] sm:$0xff] }
 0x3f1   :  { %2843 = vmatmul.f32.gmra.mxu1 %v10151_v59  ;;  %2901 = vmatmul.f32.gmra.mxu3 %v10151_v59  ;;  %v7351_v27 = vld [vmem:[#allocation2 + $0x230] sm:$0xff]  ;;  %v7361_v31 = vld [vmem:[#allocation2 + $0x3d8] sm:$0xff]  ;;  %v7362_v49 = vld [vmem:[#allocation2 + $0x20] sm:$0xff] }
 0x3f2   :  { %v6549_v15 = vpop.eup %6548  ;;  %v2803_v51 = vadd.f32 %v2799_v7, %v12392_v61  ;;  %3241 = vmatpush.msra.mxu1 %v7327_v8  ;;  %3299 = vmatpush.msrb.mxu3 %v7328_v20  ;;  %v7352_v38 = vld [vmem:[#allocation2 + $0xb0] sm:$0xff]  ;;  %v7368_v61 = vld [vmem:[#allocation2 + $0x5e8] sm:$0xff]  ;;  %v7370_v8 = vld [vmem:[#allocation2 + $0x5c0] sm:$0xff] }
 0x3f3   :  { %v2814_v23 = vmul.f32 %v6549_v15, %v2810_v12  ;;  %3583 = vmatpush.msrb.mxu2 %v7329_v37  ;;  %3643 = vmatpush.msra.mxu0 %v7338_v28  ;;  %v7354_v52 = vld [vmem:[#allocation2 + $0x90] sm:$0xff]  ;;  %v7364_v12 = vld [vmem:[#allocation2 + $0x600] sm:$0xff]  ;;  %v7366_v15 = vld [vmem:[#allocation2 + $0x3b8] sm:$0xff] }
 0x3f4   :  { %6550 = vtanh.f32 %v2803_v51  ;;  %3242 = vmatpush.msra.mxu1 %v7331_v55  ;;  %3300 = vmatpush.msrb.mxu3 %v7332_v39  ;;  %v7357_v16 = vld [vmem:[#allocation2 + $0x70] sm:$0xff]  ;;  %v7369_v51 = vld [vmem:[#allocation2 + $0x398] sm:$0xff]  ;;  %v7371_v20 = vld [vmem:[#allocation2 + $0x5c8] sm:$0xff] }
 0x3f5   :  { %v10173_v17 = vadd.f32 %v2818_v19, %v2814_v23  ;;  %3584 = vmatpush.msrb.mxu2 %v7333_v30  ;;  %3644 = vmatpush.msra.mxu0 %v7343_v57  ;;  %v7360_v48 = vld [vmem:[#allocation2 + $0x50] sm:$0xff]  ;;  %v7372_v19 = vld [vmem:[#allocation2 + $0x378] sm:$0xff]  ;;  %v7373_v9 = vld [vmem:[#allocation2 + $0x5a0] sm:$0xff] }
 0x3f6   :  { %3243 = vmatpush.msra.mxu1 %v7335_v36  ;;  %3301 = vmatpush.msrb.mxu3 %v7336_v62  ;;  %v7363_v7 = vld [vmem:[#allocation2 + $0x30] sm:$0xff]  ;;  %v7374_v23 = vld [vmem:[#allocation2 + $0x5a8] sm:$0xff]  ;;  %v7375_v37 = vld [vmem:[#allocation2 + $0x580] sm:$0xff] }
 0x3f7   :  { %3585 = vmatpush.msrb.mxu2 %v7337_v10  ;;  %3645 = vmatpush.msra.mxu0 %v7347_v26  ;;  %v7376_v6 = vld [vmem:[#allocation2 + $0x358] sm:$0xff]  ;;  %v7377_v50 = vld [vmem:[#allocation2 + $0x588] sm:$0xff]  ;;  %v7378_v55 = vld [vmem:[#allocation2 + $0x560] sm:$0xff] }
 0x3f8   :  { %3281 = vmatmul.f32.vlgmr.msra.gmra.mxu2 %v10090_v63  ;;  %3244 = vmatpush.msra.mxu1 %v7339_v4  ;;  %v7379_v39 = vld [vmem:[#allocation2 + $0x338] sm:$0xff]  ;;  %v7380_v30 = vld [vmem:[#allocation2 + $0x568] sm:$0xff]  ;;  %v7381_v47 = vld [vmem:[#allocation2 + $0x540] sm:$0xff] }
 0x3f9   :  { %2846 = vmatmul.f32.gmra.mxu1 %v10173_v17  ;;  %2904 = vmatmul.f32.gmra.mxu3 %v10173_v17  ;;  %v7382_v41 = vld [vmem:[#allocation2 + $0x318] sm:$0xff]  ;;  %v7383_v36 = vld [vmem:[#allocation2 + $0x548] sm:$0xff]  ;;  %v7384_v62 = vld [vmem:[#allocation2 + $0x520] sm:$0xff] }
 0x3fa   :  { %v6551_v29 = vpop.eup %6550  ;;  %3302 = vmatpush.msrb.mxu3 %v7340_v14  ;;  %3245 = vmatpush.msra.mxu1 %v7341_v18  ;;  %v7385_v10 = vld [vmem:[#allocation2 + $0x528] sm:$0xff]  ;;  %v7386_v28 = vld [vmem:[#allocation2 + $0x500] sm:$0xff]  ;;  %v7387_v4 = vld [vmem:[#allocation2 + $0x2f8] sm:$0xff] }
 0x3fb   :  { %v2815_v34 = vmul.f32 %v6551_v29, %v2811_v40  ;;  %3586 = vmatpush.msrb.mxu2 %v7342_v0  ;;  %3646 = vmatpush.msra.mxu0 %v7351_v27  ;;  %v7388_v40 = vld [vmem:[#allocation2 + $0x508] sm:$0xff]  ;;  %v7389_v29 = vld [vmem:[#allocation2 + $0x4e0] sm:$0xff]  ;;  %v7390_v14 = vld [vmem:[#allocation2 + $0x2d8] sm:$0xff] }
 0x3fc   :  { %3303 = vmatpush.msrb.mxu3 %v7344_v5  ;;  %3246 = vmatpush.msra.mxu1 %v7345_v35  ;;  %v7391_v18 = vld [vmem:[#allocation2 + $0x4e8] sm:$0xff]  ;;  %v7395_v57 = vld [vmem:[#allocation2 + $0x4a0] sm:$0xff] }
 0x3fd   :  { %v10179_v56 = vadd.f32 %v2819_v58, %v2815_v34  ;;  %3587 = vmatpush.msrb.mxu2 %v7346_v32  ;;  %v7392_v58 = vld [vmem:[#allocation2 + $0x4c0] sm:$0xff]  ;;  %v7393_v34 = vld [vmem:[#allocation2 + $0x2b8] sm:$0xff]  ;;  %v7394_v0 = vld [vmem:[#allocation2 + $0x4c8] sm:$0xff] }
 0x3fe   :  { %3304 = vmatpush.msrb.mxu3 %v7348_v11  ;;  %3247 = vmatpush.msra.mxu1 %v7349_v46  ;;  %v7396_v5 = vld [vmem:[#allocation2 + $0x4a8] sm:$0xff]  ;;  %v7397_v35 = vld [vmem:[#allocation2 + $0x480] sm:$0xff]  ;;  %v7398_v32 = vld [vmem:[#allocation2 + $0x298] sm:$0xff] }
 0x3ff   :  { %3588 = vmatpush.msrb.mxu2 %v7350_v54  ;;  %v7399_v26 = vld [vmem:[#allocation2 + $0x488] sm:$0xff]  ;;  %v7400_v11 = vld [vmem:[#allocation2 + $0x460] sm:$0xff]  ;;  %v7401_v46 = vld [vmem:[#allocation2 + $0x278] sm:$0xff] }
 0x400   :  { %3284 = vmatmul.f32.gmra.mxu2 %v10151_v59  ;;  %3305 = vmatpush.msrb.mxu3 %v7352_v38  ;;  %v7402_v54 = vld [vmem:[#allocation2 + $0x468] sm:$0xff]  ;;  %v7403_v27 = vld [vmem:[#allocation2 + $0x440] sm:$0xff]  ;;  %v7404_v38 = vld [vmem:[#allocation2 + $0x258] sm:$0xff] }
 0x401   :  { %2849 = vmatmul.f32.gmra.mxu1 %v10179_v56  ;;  %2907 = vmatmul.f32.gmra.mxu3 %v10179_v56 }
 0x402   :  { %3248 = vmatpush.msra.mxu1 %v7353_v24  ;;  %3306 = vmatpush.msrb.mxu3 %v7354_v52  ;;  %v7405_v24 = vld [vmem:[#allocation2 + $0x448] sm:$0xff]  ;;  %v7406_v52 = vld [vmem:[#allocation2 + $0x420] sm:$0xff] }
 0x403   :  { %3689 = vmatpush.msra.mxu2 %v7355_v2  ;;  %v7407_v2 = vld [vmem:[#allocation2 + $0x428] sm:$0xff] }
 0x404   :  { %3249 = vmatpush.msra.mxu1 %v7356_v1  ;;  %3307 = vmatpush.msrb.mxu3 %v7357_v16  ;;  %v7408_v1 = vld [vmem:[#allocation2 + $0x610] sm:$0xff]  ;;  %v7409_v16 = vld [vmem:[#allocation2 + $0x618] sm:$0xff] }
 0x405   :  { %3690 = vmatpush.msra.mxu2 %v7358_v43  ;;  %v7410_v43 = vld [vmem:[#allocation2 + $0x238] sm:$0xff] }
 0x406   :  { %3250 = vmatpush.msra.mxu1 %v7359_v45  ;;  %3308 = vmatpush.msrb.mxu3 %v7360_v48  ;;  %v7411_v45 = vld [vmem:[#allocation2 + $0x5f0] sm:$0xff]  ;;  %v7412_v48 = vld [vmem:[#allocation2 + $0x5f8] sm:$0xff] }
 0x407   :  { %3691 = vmatpush.msra.mxu2 %v7361_v31  ;;  %v7413_v31 = vld [vmem:[#allocation2 + $0x5d0] sm:$0xff] }
 0x408   :  { %3287 = vmatmul.f32.gmra.mxu2 %v10173_v17  ;;  %3251 = vmatpush.msra.mxu1 %v7362_v49  ;;  %v7414_v49 = vld [vmem:[#allocation2 + $0x5d8] sm:$0xff] }
 0x409   :  { %2956 = vmatmul.f32.vlgmr.msrb.gmra.mxu1 %v10090_v63  ;;  %3014 = vmatmul.f32.vlgmr.msra.gmra.mxu3 %v10090_v63 }
 0x40a   :  { %3309 = vmatpush.msrb.mxu3 %v7363_v7  ;;  %3544 = vmatpush.msrb.mxu1 %v7364_v12  ;;  %v7415_v7 = vld [vmem:[#allocation2 + $0x5b0] sm:$0xff]  ;;  %v7416_v12 = vld [vmem:[#allocation2 + $0x5b8] sm:$0xff] }
 0x40b   :  { %3692 = vmatpush.msra.mxu2 %v7366_v15  ;;  %v7418_v15 = vld [vmem:[#allocation2 + $0x598] sm:$0xff] }
 0x40c   :  { %3602 = vmatpush.msra.mxu3 %v7365_v3  ;;  %3545 = vmatpush.msrb.mxu1 %v7367_v25  ;;  %v7417_v3 = vld [vmem:[#allocation2 + $0x590] sm:$0xff] }
 0x40d   :  { %3693 = vmatpush.msra.mxu2 %v7369_v51  ;;  %v7419_v25 = vld [vmem:[#allocation2 + $0x570] sm:$0xff] }
 0x40e   :  { %3603 = vmatpush.msra.mxu3 %v7368_v61  ;;  %3546 = vmatpush.msrb.mxu1 %v7370_v8  ;;  %v7420_v61 = vld [vmem:[#allocation2 + $0x578] sm:$0xff]  ;;  %v7421_v51 = vld [vmem:[#allocation2 + $0x550] sm:$0xff] }
 0x40f   :  { %3694 = vmatpush.msra.mxu2 %v7372_v19  ;;  %v7422_v8 = vld [vmem:[#allocation2 + $0x558] sm:$0xff] }
 0x410   :  { %3604 = vmatpush.msra.mxu3 %v7371_v20  ;;  %3290 = vmatmul.f32.gmra.mxu2 %v10179_v56  ;;  %v7423_v20 = vld [vmem:[#allocation2 + $0x530] sm:$0xff]  ;;  %v7424_v19 = vld [vmem:[#allocation2 + $0x538] sm:$0xff] }
 0x411   :  { %3547 = vmatpush.msrb.mxu1 %v7373_v9  ;;  %3017 = vmatmul.f32.gmra.mxu3 %v10151_v59  ;;  %v7425_v9 = vld [vmem:[#allocation2 + $0x510] sm:$0xff] }
 0x412   :  { %2959 = vmatmul.f32.gmra.mxu1 %v10151_v59  ;;  %3605 = vmatpush.msra.mxu3 %v7374_v23 }
 0x413   :  { %3548 = vmatpush.msrb.mxu1 %v7375_v37  ;;  %3695 = vmatpush.msra.mxu2 %v7376_v6  ;;  %v7426_v37 = vld [vmem:[#allocation2 + $0x518] sm:$0xff]  ;;  %v7427_v6 = vld [vmem:[#allocation2 + $0x4f0] sm:$0xff] }
 0x414   :  { %3606 = vmatpush.msra.mxu3 %v7377_v50  ;;  %v7428_v50 = vld [vmem:[#allocation2 + $0x4f8] sm:$0xff] }
 0x415   :  { %3549 = vmatpush.msrb.mxu1 %v7378_v55  ;;  %3696 = vmatpush.msra.mxu2 %v7379_v39  ;;  %v7429_v55 = vld [vmem:[#allocation2 + $0x4d0] sm:$0xff]  ;;  %v7430_v39 = vld [vmem:[#allocation2 + $0x4d8] sm:$0xff] }
 0x416   :  { %3607 = vmatpush.msra.mxu3 %v7380_v30  ;;  %v7431_v30 = vld [vmem:[#allocation2 + $0x4b0] sm:$0xff] }
 0x417   :  { %3550 = vmatpush.msrb.mxu1 %v7381_v47  ;;  %3697 = vmatpush.msra.mxu2 %v7382_v41  ;;  %v7432_v47 = vld [vmem:[#allocation2 + $0x4b8] sm:$0xff]  ;;  %v7433_v41 = vld [vmem:[#allocation2 + $0x490] sm:$0xff] }
 0x418   :  { %3608 = vmatpush.msra.mxu3 %v7383_v36  ;;  %v7434_v36 = vld [vmem:[#allocation2 + $0x498] sm:$0xff] }
 0x419   :  { %3551 = vmatpush.msrb.mxu1 %v7384_v62  ;;  %3020 = vmatmul.f32.gmra.mxu3 %v10173_v17  ;;  %v7435_v62 = vld [vmem:[#allocation2 + $0x470] sm:$0xff] }
 0x41a   :  { %2962 = vmatmul.f32.gmra.mxu1 %v10173_v17  ;;  %3609 = vmatpush.msra.mxu3 %v7385_v10 }
 0x41b   :  { %3552 = vmatpush.msrb.mxu1 %v7386_v28  ;;  %3698 = vmatpush.msra.mxu2 %v7387_v4  ;;  %v7436_v28 = vld [vmem:[#allocation2 + $0x478] sm:$0xff]  ;;  %v7437_v4 = vld [vmem:[#allocation2 + $0x450] sm:$0xff] }
 0x41c   :  { %3610 = vmatpush.msra.mxu3 %v7388_v40  ;;  %v7438_v40 = vld [vmem:[#allocation2 + $0x458] sm:$0xff] }
 0x41d   :  { %3553 = vmatpush.msrb.mxu1 %v7389_v29  ;;  %3699 = vmatpush.msra.mxu2 %v7390_v14  ;;  %v7439_v29 = vld [vmem:[#allocation2 + $0x430] sm:$0xff]  ;;  %v7440_v14 = vld [vmem:[#allocation2 + $0x438] sm:$0xff] }
 0x41e   :  { %3611 = vmatpush.msra.mxu3 %v7391_v18 }
 0x41f   :  { %3554 = vmatpush.msrb.mxu1 %v7392_v58  ;;  %3700 = vmatpush.msra.mxu2 %v7393_v34 }
 0x420   :  { %3612 = vmatpush.msra.mxu3 %v7394_v0 }
 0x421   :  { %3555 = vmatpush.msrb.mxu1 %v7395_v57  ;;  %3023 = vmatmul.f32.gmra.mxu3 %v10179_v56 }
 0x422   :  { %2965 = vmatmul.f32.gmra.mxu1 %v10179_v56  ;;  %3613 = vmatpush.msra.mxu3 %v7396_v5 }
 0x423   :  { %3556 = vmatpush.msrb.mxu1 %v7397_v35  ;;  %3701 = vmatpush.msra.mxu2 %v7398_v32 }
 0x424   :  { %3614 = vmatpush.msra.mxu3 %v7399_v26 }
 0x425   :  { %3557 = vmatpush.msrb.mxu1 %v7400_v11  ;;  %3702 = vmatpush.msra.mxu2 %v7401_v46 }
 0x426   :  { %3615 = vmatpush.msra.mxu3 %v7402_v54 }
 0x427   :  { %3558 = vmatpush.msrb.mxu1 %v7403_v27  ;;  %3703 = vmatpush.msra.mxu2 %v7404_v38 }
 0x428   :  { %3616 = vmatpush.msra.mxu3 %v7405_v24 }
 0x429   :  { %3559 = vmatpush.msrb.mxu1 %v7406_v52  ;;  %3310 = vmatmul.f32.vlgmr.msrb.gmra.mxu3 %v10090_v63 }
 0x42a   :  { %3252 = vmatmul.f32.vlgmr.msra.gmra.mxu1 %v10090_v63  ;;  %3617 = vmatpush.msra.mxu3 %v7407_v2 }
 0x42b   :  { %3660 = vmatpush.msra.mxu1 %v7408_v1  ;;  %3704 = vmatpush.msra.mxu2 %v7410_v43 }
 0x42c   :  { %3718 = vmatpush.msrb.mxu3 %v7409_v16 }
 0x42d   :  { %3661 = vmatpush.msra.mxu1 %v7411_v45 }
 0x42e   :  { %3719 = vmatpush.msrb.mxu3 %v7412_v48 }
 0x42f   :  { %3662 = vmatpush.msra.mxu1 %v7413_v31  ;;  %v2928_v34 = vpop.f32.mrf.mxu0 }
 0x430   :  { %3720 = vmatpush.msrb.mxu3 %v7414_v49 }
 0x431   :  { %3663 = vmatpush.msra.mxu1 %v7415_v7  ;;  %3313 = vmatmul.f32.gmra.mxu3 %v10151_v59 }
 0x432   :  { %3255 = vmatmul.f32.gmra.mxu1 %v10151_v59  ;;  %3721 = vmatpush.msrb.mxu3 %v7416_v12 }
 0x433   :  { %3664 = vmatpush.msra.mxu1 %v7417_v3 }
 0x434   :  { %3722 = vmatpush.msrb.mxu3 %v7418_v15 }
 0x435   :  { %3665 = vmatpush.msra.mxu1 %v7419_v25  ;;  %v2870_v23 = vpop.f32.mrf.mxu2 }
 0x436   :  { %3723 = vmatpush.msrb.mxu3 %v7420_v61 }
 0x437   :  { %3666 = vmatpush.msra.mxu1 %v7421_v51  ;;  %v2931_v46 = vpop.f32.mrf.mxu0 }
 0x438   :  { %3724 = vmatpush.msrb.mxu3 %v7422_v8 }
 0x439   :  { %3667 = vmatpush.msra.mxu1 %v7423_v20  ;;  %3316 = vmatmul.f32.gmra.mxu3 %v10173_v17 }
 0x43a   :  { %3258 = vmatmul.f32.gmra.mxu1 %v10173_v17  ;;  %3725 = vmatpush.msrb.mxu3 %v7424_v19 }
 0x43b   :  { %3668 = vmatpush.msra.mxu1 %v7425_v9 }
 0x43c   :  { %3726 = vmatpush.msrb.mxu3 %v7426_v37 }
 0x43d   :  { %3669 = vmatpush.msra.mxu1 %v7427_v6  ;;  %v2873_v10 = vpop.f32.mrf.mxu2 }
 0x43e   :  { %3727 = vmatpush.msrb.mxu3 %v7428_v50 }
 0x43f   :  { %3670 = vmatpush.msra.mxu1 %v7429_v55  ;;  %v2934_v48 = vpop.f32.mrf.mxu0 }
 0x440   :  { %3728 = vmatpush.msrb.mxu3 %v7430_v39 }
 0x441   :  { %3671 = vmatpush.msra.mxu1 %v7431_v30  ;;  %3319 = vmatmul.f32.gmra.mxu3 %v10179_v56 }
 0x442   :  { %3261 = vmatmul.f32.gmra.mxu1 %v10179_v56  ;;  %3729 = vmatpush.msrb.mxu3 %v7432_v47 }
 0x443   :  { %3672 = vmatpush.msra.mxu1 %v7433_v41 }
 0x444   :  { %3730 = vmatpush.msrb.mxu3 %v7434_v36 }
 0x445   :  { %3673 = vmatpush.msra.mxu1 %v7435_v62  ;;  %v2876_v18 = vpop.f32.mrf.mxu2 }
 0x446   :  { %3731 = vmatpush.msrb.mxu3 %v7436_v28 }
 0x447   :  { %3674 = vmatpush.msra.mxu1 %v7437_v4  ;;  %v2937_v6 = vpop.f32.mrf.mxu0 }
 0x448   :  { %3732 = vmatpush.msrb.mxu3 %v7438_v40 }
 0x449   :  { %3675 = vmatpush.msra.mxu1 %v7439_v29 }
 0x44a   :  { %3733 = vmatpush.msrb.mxu3 %v7440_v14 }
 0x44d   :  { %v2879_v58 = vpop.f32.mrf.mxu2 }
 0x455   :  { %v10202_v57 = vpop.f32.mrf.mxu2 }
 0x45d   :  { %v10206_v54 = vpop.f32.mrf.mxu2 }
 0x464   :  { %v2841_v0 = vpop.f32.mrf.mxu1 }
 0x465   :  { %v2842_v5 = vadd.f32 %v2841_v0, %v12314_v44  ;;  %v10213_v7 = vpop.f32.mrf.mxu2 }
 0x467   :  { %v2871_v35 = vadd.f32 %v2870_v23, %v2842_v5  ;;  %v3044_v5 = vpop.f32.mrf.mxu0 }
 0x469   :  { %v6195_v32 = vmul.f32 -1.442695, %v2871_v35 }
 0x46a   :  { %v2899_v26 = vpop.f32.mrf.mxu3 }
 0x46b   :  { %6552 = vpow2.f32 %v6195_v32  ;;  %v2900_v11 = vadd.f32 %v2899_v26, %v12313_v33 }
 0x46d   :  { %v2929_v27 = vadd.f32 %v2928_v34, %v2900_v11 }
 0x46e   :  { %v2844_v38 = vpop.f32.mrf.mxu1 }
 0x46f   :  { %v2845_v24 = vadd.f32 %v2844_v38, %v12314_v44  ;;  %v6199_v16 = vmul.f32 -1.442695, %v2929_v27 }
 0x471   :  { %v6553_v52 = vpop.eup %6552  ;;  %v2874_v1 = vadd.f32 %v2873_v10, %v2845_v24 }
 0x472   :  { %v10209_v2 = vadd.f32 1.0, %v6553_v52  ;;  %v10227_v47 = vpop.f32.mrf.mxu2 }
 0x473   :  { %v6196_v43 = vmul.f32 -1.442695, %v2874_v1 }
 0x474   :  { %6554 = vrcp.f32 %v10209_v2  ;;  %v2902_v45 = vpop.f32.mrf.mxu3  ;;  %vm3077_vm5 = vweird.f32 %v10209_v2  ;;  %v3081_v24 = vand.u32 2147483647, %v10209_v2 }
 0x475   :  { %6556 = vpow2.f32 %v6196_v43  ;;  %v2903_v12 = vadd.f32 %v2902_v45, %v12313_v33 }
 0x476   :  { %6558 = vpow2.f32 %v6199_v16  ;;  %v2847_v31 = vpop.f32.mrf.mxu1  ;;  %vm3082_vm0 = vcmp.eq.f32.partialorder %v3081_v24, 8.507059e+37 }
 0x477   :  { %v2848_v49 = vadd.f32 %v2847_v31, %v12314_v44  ;;  %v2932_v8 = vadd.f32 %v2931_v46, %v2903_v12  ;;  %v3083_v46 = vand.u32 2147483648, %v10209_v2 }
 0x479   :  { %v2877_v15 = vadd.f32 %v2876_v18, %v2848_v49  ;;  %v6200_v39 = vmul.f32 -1.442695, %v2932_v8 }
 0x47a   :  { %v10216_v3 = vpop.eup %6554 }
 0x47b   :  { %v6557_v25 = vpop.eup %6556  ;;  %v6197_v20 = vmul.f32 -1.442695, %v2877_v15  ;;  %v3073_v37 = vmul.f32 %v10216_v3, %v10209_v2  ;;  %vm3078_vm4 = vweird.f32 %v10216_v3  ;;  %v3282_v27 = vpop.f32.mrf.mxu2  ;;  %v3084_v15 = vor.u32 1.1754944e-38, %v3083_v46 }
 0x47c   :  { %v6559_v61 = vpop.eup %6558  ;;  %v10218_v51 = vadd.f32 1.0, %v6557_v25  ;;  %v2905_v19 = vpop.f32.mrf.mxu3  ;;  %vm10251_vm6 = vmor %vm3077_vm5, %vm3078_vm4 }
 0x47d   :  { %v2906_v9 = vadd.f32 %v2905_v19, %v12313_v33  ;;  %v10223_v50 = vadd.f32 1.0, %v6559_v61  ;;  %6560 = vpow2.f32 %v6197_v20  ;;  %v3074_v36 = vsub.f32 1.0, %v3073_v37  ;;  %v12395_v61 = vld [vmem:[#allocation35_spill] sm:$0xff] }
 0x47e   :  { %v2850_v23 = vpop.f32.mrf.mxu1  ;;  %6562 = vrcp.f32 %v10218_v51  ;;  %v3403_v8 = vadd.f32 %v3282_v27, %v12395_v61  ;;  %vm3092_vm8 = vweird.f32 %v10218_v51 }
 0x47f   :  { %v2851_v55 = vadd.f32 %v2850_v23, %v12314_v44  ;;  %v2935_v41 = vadd.f32 %v2934_v48, %v2906_v9  ;;  %6564 = vrcp.f32 %v10223_v50  ;;  %vm3153_vm9 = vweird.f32 %v10223_v50 }
 0x480   :  { %6566 = vpow2.f32 %v6200_v39 }
 0x481   :  { %v2880_v30 = vadd.f32 %v2879_v58, %v2851_v55  ;;  %v6201_v14 = vmul.f32 -1.442695, %v2935_v41  ;;  %v3075_v58 = vmul.f32 %v10216_v3, %v3074_v36  ;;  %v3047_v55 = vpop.f32.mrf.mxu0  ;;  %v3159_v41 = vand.u32 2147483648, %v10223_v50 }
 0x482   :  { %v6207_v36 = vmul.f32 -1.442695, %v3403_v8 }
 0x483   :  { %v6561_v10 = vpop.eup %6560  ;;  %v6198_v28 = vmul.f32 -1.442695, %v2880_v30  ;;  %v3076_v11 = vadd.f32 %v10216_v3, %v3075_v58  ;;  %v3285_v58 = vpop.f32.mrf.mxu2 }
 0x484   :  { %v2908_v62 = vpop.f32.mrf.mxu3  ;;  %v10231_v40 = vpop.eup %6562  ;;  %v10233_v29 = vadd.f32 1.0, %v6561_v10 }
 0x485   :  { %v2909_v4 = vadd.f32 %v2908_v62, %v12313_v33  ;;  %v10237_v0 = vpop.eup %6564  ;;  %v3088_v35 = vmul.f32 %v10231_v40, %v10218_v51  ;;  %v3080_v31 = vsel %vm10251_vm6, %v10216_v3, %v3076_v11  ;;  %vm3093_vm7 = vweird.f32 %v10231_v40 }
 0x486   :  { %v2957_v18 = vpop.f32.mrf.mxu1  ;;  %6568 = vrcp.f32 %v10233_v29  ;;  %v6567_v32 = vpop.eup %6566  ;;  %v3149_v52 = vmul.f32 %v10237_v0, %v10223_v50  ;;  %v3085_v23 = vsel %vm3082_vm0, %v3084_v15, %v3080_v31  ;;  %v3096_v11 = vand.u32 2147483647, %v10218_v51  ;;  %vm10287_vm10 = vmor %vm3092_vm8, %vm3093_vm7 }
 0x487   :  { %v2938_v34 = vadd.f32 %v2937_v6, %v2909_v4  ;;  %6570 = vpow2.f32 %v6198_v28  ;;  %v10248_v1 = vadd.f32 1.0, %v6567_v32  ;;  %v3089_v45 = vsub.f32 1.0, %v3088_v35 }
 0x488   :  { %6572 = vpow2.f32 %v6201_v14  ;;  %v2958_v20 = vadd.f32 %v2957_v18, %v8681_v13  ;;  %v3150_v9 = vsub.f32 1.0, %v3149_v52  ;;  %v3157_v32 = vand.u32 2147483647, %v10223_v50 }
 0x489   :  { %v6202_v26 = vmul.f32 -1.442695, %v2938_v34  ;;  %v3090_v37 = vmul.f32 %v10231_v40, %v3089_v45  ;;  %vm3154_vm11 = vweird.f32 %v10237_v0  ;;  %vm3097_vm13 = vcmp.eq.f32.partialorder %v3096_v11, 8.507059e+37  ;;  %v3050_v50 = vpop.f32.mrf.mxu0 }
 0x48a   :  { %v2987_v62 = vadd.f32 %v10202_v57, %v2958_v20  ;;  %v3151_v4 = vmul.f32 %v10237_v0, %v3150_v9  ;;  %vm10300_vm12 = vcmp.eq.f32.partialorder %v3157_v32, 8.507059e+37  ;;  %vm10308_vm14 = vmor %vm3153_vm9, %vm3154_vm11  ;;  %vm3107_vm1 = vweird.f32 %v10233_v29 }
 0x48b   :  { %6574 = vpow2.f32 %v6202_v26  ;;  %v3091_v18 = vadd.f32 %v10231_v40, %v3090_v37  ;;  %vm3168_vm3 = vweird.f32 %v10248_v1  ;;  %v3172_v11 = vand.u32 2147483647, %v10248_v1 }
 0x48c   :  { %v3015_v38 = vpop.f32.mrf.mxu3  ;;  %v10255_v48 = vpop.eup %6568  ;;  %6576 = vrcp.f32 %v10248_v1 }
 0x48d   :  { %v3016_v16 = vadd.f32 %v3015_v38, %v8665_v53  ;;  %v6571_v49 = vpop.eup %6570  ;;  %v3103_v19 = vmul.f32 %v10255_v48, %v10233_v29  ;;  %v12398_v38 = vld [vmem:[#allocation13_spill] sm:$0xff]  ;;  %vm3108_vm15 = vweird.f32 %v10255_v48 }
 0x48e   :  { %v6573_v25 = vpop.eup %6572  ;;  %v10266_v3 = vadd.f32 1.0, %v6571_v49  ;;  %v3404_v24 = vadd.f32 %v3285_v58, %v12398_v38  ;;  %vm10331_vm2 = vmor %vm3107_vm1, %vm3108_vm15  ;;  %v3288_v38 = vpop.f32.mrf.mxu2 }
 0x48f   :  { %v2960_v2 = vpop.f32.mrf.mxu1  ;;  %v3045_v12 = vadd.f32 %v3044_v5, %v3016_v16  ;;  %v10268_v39 = vadd.f32 1.0, %v6573_v25  ;;  %v3104_v28 = vsub.f32 1.0, %v3103_v19  ;;  %v3098_v5 = vand.u32 2147483648, %v10218_v51 }
 0x490   :  { %6578 = vrcp.f32 %v10266_v3  ;;  %v3095_v16 = vsel %vm10287_vm10, %v10231_v40, %v3091_v18  ;;  %v3152_v51 = vadd.f32 %v10237_v0, %v3151_v4  ;;  %v2961_v49 = vadd.f32 %v2960_v2, %v8681_v13 }
 0x491   :  { %v3208_v6 = vmul.f32 %v3085_v23, %v3045_v12  ;;  %v6575_v30 = vpop.eup %6574  ;;  %6580 = vrcp.f32 %v10268_v39  ;;  %v3105_v27 = vmul.f32 %v10255_v48, %v3104_v28  ;;  %v3099_v45 = vor.u32 1.1754944e-38, %v3098_v5 }
 0x492   :  { %v10279_v57 = vpop.eup %6576  ;;  %v10282_v26 = vadd.f32 1.0, %v6575_v30  ;;  %6582 = vpow2.f32 %v6207_v36  ;;  %v3160_v12 = vor.u32 1.1754944e-38, %v3159_v41  ;;  %v3156_v2 = vsel %vm10308_vm14, %v10237_v0, %v3152_v51 }
 0x493   :  { %v3212_v34 = vadd.f32 %v3208_v6, %v2987_v62  ;;  %v3164_v43 = vmul.f32 %v10279_v57, %v10248_v1  ;;  %v3100_v25 = vsel %vm3097_vm13, %v3099_v45, %v3095_v16  ;;  %v3106_v8 = vadd.f32 %v10255_v48, %v3105_v27 }
 0x494   :  { %v3018_v10 = vpop.f32.mrf.mxu3  ;;  %v6208_v19 = vmul.f32 -1.442695, %v3404_v24  ;;  %v3113_v23 = vand.u32 2147483648, %v10233_v29  ;;  %v3111_v30 = vand.u32 2147483647, %v10233_v29  ;;  %v3161_v36 = vsel %vm10300_vm12, %v3160_v12, %v3156_v2  ;;  %v3053_v2 = vpop.f32.mrf.mxu0 }
 0x495   :  { %v3019_v14 = vadd.f32 %v3018_v10, %v8665_v53  ;;  %6584 = vtanh.f32 %v3212_v34  ;;  %v3165_v6 = vsub.f32 1.0, %v3164_v43  ;;  %v3174_v0 = vand.u32 2147483648, %v10248_v1 }
 0x496   :  { %6586 = vrcp.f32 %v10282_v26  ;;  %v10312_v15 = vpop.eup %6578  ;;  %v2990_v62 = vadd.f32 %v10206_v54, %v2961_v49  ;;  %v3110_v54 = vsel %vm10331_vm2, %v10255_v48, %v3106_v8  ;;  %v3114_v5 = vor.u32 1.1754944e-38, %v3113_v23 }
 0x497   :  { %v2963_v35 = vpop.f32.mrf.mxu1  ;;  %v3048_v52 = vadd.f32 %v3047_v55, %v3019_v14  ;;  %v10319_v20 = vpop.eup %6580  ;;  %v3118_v28 = vmul.f32 %v10312_v15, %v10266_v3  ;;  %v3220_v32 = vsub.f32 1.0, %v3161_v36  ;;  %v3166_v27 = vmul.f32 %v10279_v57, %v3165_v6 }
 0x498   :  { %v6583_v37 = vpop.eup %6582  ;;  %v3179_v29 = vmul.f32 %v10319_v20, %v10268_v39  ;;  %v2964_v14 = vadd.f32 %v2963_v35, %v8681_v13  ;;  %6588 = vpow2.f32 %v6208_v19  ;;  %vm3112_vm4 = vcmp.eq.f32.partialorder %v3111_v30, 8.507059e+37 }
 0x499   :  { %v3209_v9 = vmul.f32 %v3100_v25, %v3048_v52  ;;  %v10347_v46 = vadd.f32 1.0, %v6583_v37  ;;  %v3115_v35 = vsel %vm3112_vm4, %v3114_v5, %v3110_v54  ;;  %v3228_v52 = vmul.f32 %v3161_v36, %v9902_v22  ;;  %v7444_v5 = vld [vmem:[#allocation2 + $0x3e0] sm:$0xff] }
 0x49a   :  { %v3119_v16 = vsub.f32 1.0, %v3118_v28  ;;  %v3180_v48 = vsub.f32 1.0, %v3179_v29  ;;  %v2993_v43 = vadd.f32 %v10213_v7, %v2964_v14  ;;  %vm3123_vm5 = vweird.f32 %v10312_v15  ;;  %v12405_v7 = vld [vmem:[#allocation7_spill] sm:$0xff]  ;;  %v7453_v29 = vld [vmem:[#allocation2 + $0x148] sm:$0xff] }
 0x49b   :  { %v6585_v4 = vpop.eup %6584  ;;  %v3213_v34 = vadd.f32 %v3209_v9, %v2990_v62  ;;  %v3126_v22 = vand.u32 2147483647, %v10266_v3  ;;  %v3128_v25 = vand.u32 2147483648, %v10266_v3  ;;  %v3167_v8 = vadd.f32 %v10279_v57, %v3166_v27  ;;  %v12406_v9 = vld [vmem:[#allocation27_spill] sm:$0xff]  ;;  %v7442_v62 = vld [vmem:[#allocation2 + $0x400] sm:$0xff] }
 0x49c   :  { %v3021_v61 = vpop.f32.mrf.mxu3  ;;  %v10344_v58 = vpop.eup %6586  ;;  %v3224_v24 = vmul.f32 %v6585_v4, %v3220_v32  ;;  %v3120_v12 = vmul.f32 %v10312_v15, %v3119_v16  ;;  %vm3122_vm6 = vweird.f32 %v10266_v3  ;;  %vm3169_vm7 = vweird.f32 %v10279_v57 }
 0x49d   :  { %v3022_v55 = vadd.f32 %v3021_v61, %v8665_v53  ;;  %v3194_v51 = vmul.f32 %v10344_v58, %v10282_v26  ;;  %6590 = vtanh.f32 %v3213_v34  ;;  %vm10373_vm0 = vmor %vm3122_vm6, %vm3123_vm5  ;;  %v3181_v3 = vmul.f32 %v10319_v20, %v3180_v48  ;;  %v7443_v34 = vld [vmem:[#allocation2 + $0x1e8] sm:$0xff]  ;;  %v3291_v16 = vpop.f32.mrf.mxu2 }
 0x49e   :  { %v10354_v49 = vadd.f32 %v3228_v52, %v3224_v24  ;;  %v10368_v37 = vpop.eup %6588  ;;  %v3121_v30 = vadd.f32 %v10312_v15, %v3120_v12  ;;  %v3129_v28 = vor.u32 1.1754944e-38, %v3128_v25  ;;  %vm10381_vm8 = vmor %vm3168_vm3, %vm3169_vm7  ;;  %vm3127_vm9 = vcmp.eq.f32.partialorder %v3126_v22, 8.507059e+37  ;;  %v7445_v52 = vld [vmem:[#allocation2 + $0x1c8] sm:$0xff] }
 0x49f   :  { %v2966_v41 = vpop.f32.mrf.mxu1  ;;  %v3051_v18 = vadd.f32 %v3050_v50, %v3022_v55  ;;  %v3405_v50 = vadd.f32 %v3288_v38, %v12405_v7  ;;  %v3195_v10 = vsub.f32 1.0, %v3194_v51  ;;  %v3175_v54 = vor.u32 1.1754944e-38, %v3174_v0  ;;  %v12411_v22 = vld [vmem:[#allocation18_spill] sm:$0xff] }
 0x4a0   :  { %v2967_v19 = vadd.f32 %v2966_v41, %v8681_v13  ;;  %3560 = vmatmul.f32.vlgmr.msrb.gmra.mxu1 %v10354_v49  ;;  %3618 = vmatmul.f32.vlgmr.msra.gmra.mxu3 %v10354_v49  ;;  %v7441_v41 = vld [vmem:[#allocation2 + $0x208] sm:$0xff]  ;;  %v3125_v14 = vsel %vm10373_vm0, %v10312_v15, %v3121_v30  ;;  %v3189_v27 = vand.u32 2147483648, %v10268_v39  ;;  %vm3173_vm10 = vcmp.eq.f32.partialorder %v3172_v11, 8.507059e+37  ;;  %v12412_v30 = vld [vmem:[#allocation29_spill] sm:$0xff] }
 0x4a1   :  { %v3210_v45 = vmul.f32 %v3115_v35, %v3051_v18  ;;  %3956 = vmatpush.msrb.mxu1 %v7441_v41  ;;  %4206 = vmatpush.msra.mxu3 %v7442_v62  ;;  %v3171_v18 = vsel %vm10381_vm8, %v10279_v57, %v3167_v8  ;;  %v3130_v38 = vsel %vm3127_vm9, %v3129_v28, %v3125_v14  ;;  %v7446_v57 = vld [vmem:[#allocation2 + $0x3c0] sm:$0xff]  ;;  %vm3183_vm11 = vweird.f32 %v10268_v39  ;;  %v7447_v11 = vld [vmem:[#allocation2 + $0x1a8] sm:$0xff] }
 0x4a2   :  { %v2996_v15 = vadd.f32 %v10227_v47, %v2967_v19  ;;  %v3176_v24 = vsel %vm3173_vm10, %v3175_v54, %v3171_v18  ;;  %v6209_v1 = vmul.f32 -1.442695, %v3405_v50  ;;  %v3196_v0 = vmul.f32 %v10344_v58, %v3195_v10  ;;  %v7449_v8 = vld [vmem:[#allocation2 + $0x188] sm:$0xff]  ;;  %v7454_v14 = vld [vmem:[#allocation2 + $0x340] sm:$0xff] }
 0x4a3   :  { %v3214_v6 = vadd.f32 %v3210_v45, %v2993_v43  ;;  %3957 = vmatpush.msrb.mxu1 %v7443_v34  ;;  %4207 = vmatpush.msra.mxu3 %v7444_v5  ;;  %v6591_v32 = vpop.eup %6590  ;;  %v3221_v48 = vsub.f32 1.0, %v3176_v24  ;;  %v3182_v43 = vadd.f32 %v10319_v20, %v3181_v3  ;;  %vm3184_vm12 = vweird.f32 %v10319_v20  ;;  %v7448_v45 = vld [vmem:[#allocation2 + $0x3a0] sm:$0xff] }
 0x4a4   :  { %v3024_v31 = vpop.f32.mrf.mxu3  ;;  %v3187_v47 = vand.u32 2147483647, %v10268_v39  ;;  %vm3185_vm13 = vmor %vm3183_vm11, %vm3184_vm12  ;;  %v3190_v12 = vor.u32 1.1754944e-38, %v3189_v27  ;;  %v3406_v25 = vadd.f32 %v3291_v16, %v12411_v22  ;;  %v3204_v50 = vand.u32 2147483648, %v10282_v26  ;;  %v7460_v16 = vld [vmem:[#allocation2 + $0x2e0] sm:$0xff] }
 0x4a5   :  { %v3025_v40 = vadd.f32 %v3024_v31, %v8665_v53  ;;  %3958 = vmatpush.msrb.mxu1 %v7445_v52  ;;  %4208 = vmatpush.msra.mxu3 %v7446_v57  ;;  %v3225_v31 = vmul.f32 %v6591_v32, %v3221_v48  ;;  %vm3198_vm15 = vweird.f32 %v10282_v26  ;;  %vm3199_vm1 = vweird.f32 %v10344_v58 }
 0x4a6   :  { %vm3188_vm14 = vcmp.eq.f32.partialorder %v3187_v47, 8.507059e+37  ;;  %v3202_v62 = vand.u32 2147483647, %v10282_v26  ;;  %v10419_v3 = vadd.f32 1.0, %v10368_v37  ;;  %v6210_v10 = vmul.f32 -1.442695, %v3406_v25  ;;  %vm10425_vm2 = vmor %vm3198_vm15, %vm3199_vm1 }
 0x4a7   :  { %v3253_v61 = vpop.f32.mrf.mxu1  ;;  %v3054_v55 = vadd.f32 %v3053_v2, %v3025_v40  ;;  %3959 = vmatpush.msrb.mxu1 %v7447_v11  ;;  %4209 = vmatpush.msra.mxu3 %v7448_v45  ;;  %v3229_v40 = vmul.f32 %v3176_v24, %v9919_v21  ;;  %v7450_v2 = vld [vmem:[#allocation2 + $0x380] sm:$0xff]  ;;  %v3205_v5 = vor.u32 1.1754944e-38, %v3204_v50  ;;  %v7457_v24 = vld [vmem:[#allocation2 + $0x108] sm:$0xff]  ;;  %vm3428_vm8 = vweird.f32 %v10347_v46 }
 0x4a8   :  { %v3323_v23 = vadd.f32 %v3253_v61, %v12406_v9  ;;  %v3186_v61 = vsel %vm3185_vm13, %v10319_v20, %v3182_v43  ;;  %v3197_v20 = vadd.f32 %v10344_v58, %v3196_v0  ;;  %vm3203_vm3 = vcmp.eq.f32.partialorder %v3202_v62, 8.507059e+37  ;;  %v7456_v26 = vld [vmem:[#allocation2 + $0x320] sm:$0xff]  ;;  %v7459_v0 = vld [vmem:[#allocation2 + $0xe8] sm:$0xff] }
 0x4a9   :  { %v3211_v35 = vmul.f32 %v3130_v38, %v3054_v55  ;;  %3960 = vmatpush.msrb.mxu1 %v7449_v8  ;;  %4210 = vmatpush.msra.mxu3 %v7450_v2  ;;  %v10407_v19 = vadd.f32 %v3229_v40, %v3225_v31  ;;  %v3191_v21 = vsel %vm3188_vm14, %v3190_v12, %v3186_v61  ;;  %v7452_v55 = vld [vmem:[#allocation2 + $0x360] sm:$0xff]  ;;  %v7461_v45 = vld [vmem:[#allocation2 + $0xc8] sm:$0xff]  ;;  %vm3443_vm12 = vweird.f32 %v10419_v3 }
 0x4aa   :  { %v6203_v4 = vmul.f32 -1.442695, %v3323_v23  ;;  %v3222_v41 = vsub.f32 1.0, %v3191_v21  ;;  %v3230_v28 = vmul.f32 %v3191_v21, %v9943_v42  ;;  %v3201_v34 = vsel %vm10425_vm2, %v10344_v58, %v3197_v20  ;;  %v7455_v42 = vld [vmem:[#allocation2 + $0x128] sm:$0xff]  ;;  %v7458_v58 = vld [vmem:[#allocation2 + $0x300] sm:$0xff] }
 0x4ab   :  { %v3215_v51 = vadd.f32 %v3211_v35, %v2996_v15  ;;  %4211 = vmatpush.msra.mxu3 %v7452_v55  ;;  %3563 = vmatmul.f32.gmra.mxu1 %v10407_v19  ;;  %v3206_v38 = vsel %vm3203_vm3, %v3205_v5, %v3201_v34  ;;  %v7462_v31 = vld [vmem:[#allocation2 + $0x2c0] sm:$0xff]  ;;  %v12418_v5 = vld [vmem:[#allocation32_spill] sm:$0xff] }
 0x4ac   :  { %6592 = vpow2.f32 %v6203_v4  ;;  %3621 = vmatmul.f32.gmra.mxu3 %v10407_v19  ;;  %v3223_v52 = vsub.f32 1.0, %v3206_v38  ;;  %v3231_v61 = vmul.f32 %v3206_v38, %v9960_v60  ;;  %v3311_v2 = vpop.f32.mrf.mxu3  ;;  %v10475_v34 = vld [vmem:[#allocation2 + $0x820] ss:$0 sm:$0xff]  ;;  %v7470_v38 = vld [vmem:[#allocation2 + $0x48] sm:$0xff] }
 0x4ad   :  { %6594 = vtanh.f32 %v3214_v6  ;;  %v7451_v6 = vld [vmem:[#allocation2 + $0x168] sm:$0xff]  ;;  %4212 = vmatpush.msra.mxu3 %v7454_v14 }
 0x4ae   :  { %6596 = vrcp.f32 %v10347_v46  ;;  %3961 = vmatpush.msrb.mxu1 %v7451_v6  ;;  %v7467_v14 = vld [vmem:[#allocation2 + $0x68] sm:$0xff] }
 0x4af   :  { %6598 = vpow2.f32 %v6209_v1  ;;  %v3256_v23 = vpop.f32.mrf.mxu1  ;;  %4213 = vmatpush.msra.mxu3 %v7456_v26 }
 0x4b0   :  { %6600 = vtanh.f32 %v3215_v51  ;;  %v3324_v36 = vadd.f32 %v3256_v23, %v12412_v30  ;;  %3962 = vmatpush.msrb.mxu1 %v7453_v29  ;;  %v12415_v51 = vld [vmem:[#allocation31_spill] sm:$0xff]  ;;  %v7464_v23 = vld [vmem:[#allocation2 + $0x2a0] sm:$0xff]  ;;  %v7465_v30 = vld [vmem:[#allocation2 + $0x88] sm:$0xff] }
 0x4b1   :  { %4214 = vmatpush.msra.mxu3 %v7458_v58 }
 0x4b2   :  { %v6593_v7 = vpop.eup %6592  ;;  %v6204_v54 = vmul.f32 -1.442695, %v3324_v36  ;;  %3963 = vmatpush.msrb.mxu1 %v7455_v42  ;;  %v7466_v36 = vld [vmem:[#allocation2 + $0x280] sm:$0xff] }
 0x4b3   :  { %v6595_v9 = vpop.eup %6594  ;;  %v10410_v39 = vadd.f32 1.0, %v6593_v7  ;;  %4215 = vmatpush.msra.mxu3 %v7460_v16 }
 0x4b4   :  { %v10429_v18 = vpop.eup %6596  ;;  %v3226_v37 = vmul.f32 %v6595_v9, %v3222_v41  ;;  %3964 = vmatpush.msrb.mxu1 %v7457_v24  ;;  %v7463_v9 = vld [vmem:[#allocation2 + $0xa8] sm:$0xff]  ;;  %v3434_v24 = vand.u32 2147483648, %v10347_v46 }
 0x4b5   :  { %6602 = vrcp.f32 %v10410_v39  ;;  %v6599_v32 = vpop.eup %6598  ;;  %v3424_v35 = vmul.f32 %v10429_v18, %v10347_v46  ;;  %4216 = vmatpush.msra.mxu3 %v7462_v31  ;;  %v3352_v7 = vand.u32 2147483647, %v10410_v39  ;;  %v3354_v50 = vand.u32 2147483648, %v10410_v39  ;;  %v3314_v31 = vpop.f32.mrf.mxu3 }
 0x4b6   :  { %6604 = vpow2.f32 %v6204_v54  ;;  %v10434_v27 = vadd.f32 %v3230_v28, %v3226_v37  ;;  %v6601_v15 = vpop.eup %6600  ;;  %3965 = vmatpush.msrb.mxu1 %v7459_v0  ;;  %v10446_v12 = vadd.f32 1.0, %v6599_v32  ;;  %vm3348_vm5 = vweird.f32 %v10410_v39  ;;  %v7468_v54 = vld [vmem:[#allocation2 + $0x260] sm:$0xff] }
 0x4b7   :  { %6606 = vrcp.f32 %v10419_v3  ;;  %v3259_v1 = vpop.f32.mrf.mxu1  ;;  %v3227_v47 = vmul.f32 %v6601_v15, %v3223_v52  ;;  %v3425_v11 = vsub.f32 1.0, %v3424_v35  ;;  %4217 = vmatpush.msra.mxu3 %v7464_v23  ;;  %v3355_v4 = vor.u32 1.1754944e-38, %v3354_v50  ;;  %v7471_v15 = vld [vmem:[#allocation2 + $0x240] sm:$0xff] }
 0x4b8   :  { %6608 = vpow2.f32 %v6210_v10  ;;  %3566 = vmatmul.f32.gmra.mxu1 %v10434_v27  ;;  %3624 = vmatmul.f32.gmra.mxu3 %v10434_v27  ;;  %v3325_v43 = vadd.f32 %v3259_v1, %v12415_v51  ;;  %vm3353_vm0 = vcmp.eq.f32.partialorder %v3352_v7, 8.507059e+37  ;;  %vm3429_vm7 = vweird.f32 %v10429_v18  ;;  %v7473_v51 = vld [vmem:[#allocation2 + $0x220] sm:$0xff] }
 0x4b9   :  { %3966 = vmatpush.msrb.mxu1 %v7461_v45  ;;  %v10457_v60 = vadd.f32 %v3231_v61, %v3227_v47  ;;  %v3426_v55 = vmul.f32 %v10429_v18, %v3425_v11  ;;  %4218 = vmatpush.msra.mxu3 %v7466_v36  ;;  %v3432_v0 = vand.u32 2147483647, %v10347_v46  ;;  %vm3430_vm9 = vmor %vm3428_vm8, %vm3429_vm7  ;;  %v12419_v47 = vld [vmem:[#allocation12_spill] sm:$0xff]  ;;  %v3449_v23 = vand.u32 2147483648, %v10419_v3 }
 0x4ba   :  { %v6205_v25 = vmul.f32 -1.442695, %v3325_v43  ;;  %vm3458_vm8 = vweird.f32 %v10446_v12 }
 0x4bb   :  { %v10439_v57 = vpop.eup %6602  ;;  %3967 = vmatpush.msrb.mxu1 %v7463_v9  ;;  %4219 = vmatpush.msra.mxu3 %v7468_v54  ;;  %v3427_v26 = vadd.f32 %v10429_v18, %v3426_v55  ;;  %vm3433_vm10 = vcmp.eq.f32.partialorder %v3432_v0, 8.507059e+37  ;;  %v7477_v54 = vld [vmem:[#allocation2 + $0x3f0] sm:$0xff] }
 0x4bc   :  { %v3344_v48 = vmul.f32 %v10439_v57, %v10410_v39  ;;  %v6605_v40 = vpop.eup %6604  ;;  %vm3349_vm4 = vweird.f32 %v10439_v57  ;;  %6610 = vpow2.f32 %v6205_v25  ;;  %v3483_v39 = vadd.f32 %v10475_v34, %v3311_v2 }
 0x4bd   :  { %v10449_v8 = vpop.eup %6606  ;;  %v10453_v21 = vadd.f32 1.0, %v6605_v40  ;;  %3968 = vmatpush.msrb.mxu1 %v7465_v30  ;;  %vm10468_vm6 = vmor %vm3348_vm5, %vm3349_vm4  ;;  %4220 = vmatpush.msra.mxu3 %v7471_v15  ;;  %v3431_v46 = vsel %vm3430_vm9, %v10429_v18, %v3427_v26  ;;  %v3435_v40 = vor.u32 1.1754944e-38, %v3434_v24  ;;  %v7479_v15 = vld [vmem:[#allocation2 + $0x3d0] sm:$0xff]  ;;  %v3447_v24 = vand.u32 2147483647, %v10419_v3  ;;  %v3317_v0 = vpop.f32.mrf.mxu3 }
 0x4be   :  { %v3345_v22 = vsub.f32 1.0, %v3344_v48  ;;  %v6609_v20 = vpop.eup %6608  ;;  %v3439_v41 = vmul.f32 %v10449_v8, %v10419_v3  ;;  %v7472_v48 = vld [vmem:[#allocation2 + $0x28] sm:$0xff]  ;;  %vm3444_vm13 = vweird.f32 %v10449_v8 }
 0x4bf   :  { %6612 = vrcp.f32 %v10453_v21  ;;  %v10466_v10 = vadd.f32 1.0, %v6609_v20  ;;  %v3262_v29 = vpop.f32.mrf.mxu1  ;;  %3969 = vmatpush.msrb.mxu1 %v7467_v14  ;;  %4221 = vmatpush.msra.mxu3 %v7473_v51  ;;  %v3369_v2 = vand.u32 2147483648, %v10453_v21  ;;  %v3436_v7 = vsel %vm3433_vm10, %v3435_v40, %v3431_v46  ;;  %v7474_v20 = vld [vmem:[#allocation2 + $0x408] sm:$0xff]  ;;  %vm10528_vm2 = vmor %vm3443_vm12, %vm3444_vm13 }
 0x4c0   :  { %v3346_v6 = vmul.f32 %v10439_v57, %v3345_v22  ;;  %6614 = vrcp.f32 %v10446_v12  ;;  %3569 = vmatmul.f32.gmra.mxu1 %v10457_v60  ;;  %3627 = vmatmul.f32.gmra.mxu3 %v10457_v60  ;;  %v3326_v42 = vadd.f32 %v3262_v29, %v12418_v5  ;;  %v3440_v58 = vsub.f32 1.0, %v3439_v41  ;;  %v7476_v14 = vld [vmem:[#allocation2 + $0x3e8] sm:$0xff] }
 0x4c1   :  { %3970 = vmatpush.msrb.mxu1 %v7470_v38  ;;  %6616 = vrcp.f32 %v10466_v10  ;;  %v3367_v18 = vand.u32 2147483647, %v10453_v21  ;;  %vm3363_vm14 = vweird.f32 %v10453_v21  ;;  %v3499_v28 = vsub.f32 1.0, %v3436_v7  ;;  %v7478_v38 = vld [vmem:[#allocation2 + $0x3c8] sm:$0xff] }
 0x4c2   :  { %v3347_v62 = vadd.f32 %v10439_v57, %v3346_v6  ;;  %v6611_v35 = vpop.eup %6610  ;;  %v3441_v22 = vmul.f32 %v10449_v8, %v3440_v58  ;;  %v7475_v6 = vld [vmem:[#allocation2 + $0x410] sm:$0xff]  ;;  %v3484_v5 = vadd.f32 %v10475_v34, %v3314_v31  ;;  %v3507_v26 = vmul.f32 %v3436_v7, %v10090_v63  ;;  %v7480_v51 = vld [vmem:[#allocation2 + $0x3a8] sm:$0xff] }
 0x4c3   :  { %v10487_v16 = vadd.f32 1.0, %v6611_v35  ;;  %3971 = vmatpush.msrb.mxu1 %v7472_v48  ;;  %vm3368_vm1 = vcmp.eq.f32.partialorder %v3367_v18, 8.507059e+37  ;;  %vm3448_vm4 = vcmp.eq.f32.partialorder %v3447_v24, 8.507059e+37  ;;  %v7515_v24 = vld [vmem:[#allocation2 + $0x110] sm:$0xff] }
 0x4c4   :  { %v3351_v37 = vsel %vm10468_vm6, %v10439_v57, %v3347_v62  ;;  %v6206_v57 = vmul.f32 -1.442695, %v3326_v42  ;;  %v3442_v30 = vadd.f32 %v10449_v8, %v3441_v22  ;;  %v7482_v22 = vld [vmem:[#allocation2 + $0x200] sm:$0xff] }
 0x4c5   :  { %v3356_v32 = vsel %vm3353_vm0, %v3355_v4, %v3351_v37  ;;  %v6613_v1 = vpop.eup %6612  ;;  %v3370_v4 = vor.u32 1.1754944e-38, %v3369_v2  ;;  %v3384_v48 = vand.u32 2147483648, %v10487_v16  ;;  %v3382_v46 = vand.u32 2147483647, %v10487_v16 }
 0x4c6   :  { %v3487_v52 = vmul.f32 %v3483_v39, %v3356_v32  ;;  %v10489_v43 = vpop.eup %6614  ;;  %v3359_v45 = vmul.f32 %v6613_v1, %v10453_v21  ;;  %6618 = vpow2.f32 %v6206_v57  ;;  %vm3364_vm11 = vweird.f32 %v6613_v1 }
 0x4c7   :  { %6620 = vrcp.f32 %v10487_v16  ;;  %v10500_v61 = vmul.f32 %v10489_v43, %v10446_v12  ;;  %v10506_v9 = vpop.eup %6616  ;;  %vm3365_vm15 = vmor %vm3363_vm14, %vm3364_vm11  ;;  %vm3378_vm5 = vweird.f32 %v10487_v16  ;;  %v3385_v18 = vor.u32 1.1754944e-38, %v3384_v48 }
 0x4c8   :  { %v3491_v11 = vadd.f32 %v3487_v52, %v12419_v47  ;;  %v3360_v25 = vsub.f32 1.0, %v3359_v45  ;;  %3676 = vmatmul.f32.vlgmr.msra.gmra.mxu1 %v10354_v49  ;;  %3734 = vmatmul.f32.vlgmr.msrb.gmra.mxu3 %v10354_v49  ;;  %v3469_v63 = vmul.f32 %v10506_v9, %v10466_v10  ;;  %v7481_v47 = vld [vmem:[#allocation2 + $0x3b0] sm:$0xff]  ;;  %vm3383_vm0 = vcmp.eq.f32.partialorder %v3382_v46, 8.507059e+37  ;;  %v7496_v46 = vld [vmem:[#allocation2 + $0x328] sm:$0xff] }
 0x4c9   :  { %4264 = vmatpush.msra.mxu1 %v7474_v20  ;;  %4322 = vmatpush.msrb.mxu3 %v7475_v6  ;;  %v3455_v62 = vsub.f32 1.0, %v10500_v61  ;;  %v7485_v20 = vld [vmem:[#allocation2 + $0x390] sm:$0xff]  ;;  %v3485_v6 = vadd.f32 %v10475_v34, %v3317_v0  ;;  %vm3459_vm7 = vweird.f32 %v10489_v43 }
 0x4ca   :  { %6622 = vtanh.f32 %v3491_v11  ;;  %v3361_v50 = vmul.f32 %v6613_v1, %v3360_v25  ;;  %v12422_v11 = vld [vmem:[#allocation33_spill] sm:$0xff]  ;;  %v7483_v25 = vld [vmem:[#allocation2 + $0x210] sm:$0xff]  ;;  %v3470_v2 = vsub.f32 1.0, %v3469_v63  ;;  %vm10577_vm9 = vmor %vm3458_vm8, %vm3459_vm7 }
 0x4cb   :  { %4265 = vmatpush.msra.mxu1 %v7476_v14  ;;  %4323 = vmatpush.msrb.mxu3 %v7477_v54  ;;  %v3456_v31 = vmul.f32 %v10489_v43, %v3455_v62  ;;  %v7489_v14 = vld [vmem:[#allocation2 + $0x370] sm:$0xff] }
 0x4cc   :  { %v6619_v55 = vpop.eup %6618  ;;  %v3362_v36 = vadd.f32 %v6613_v1, %v3361_v50  ;;  %v7501_v50 = vld [vmem:[#allocation2 + $0x310] sm:$0xff] }
 0x4cd   :  { %v10513_v41 = vpop.eup %6620  ;;  %v10517_v29 = vadd.f32 1.0, %v6619_v55  ;;  %4266 = vmatpush.msra.mxu1 %v7478_v38  ;;  %4324 = vmatpush.msrb.mxu3 %v7479_v15  ;;  %v3457_v62 = vadd.f32 %v10489_v43, %v3456_v31  ;;  %v7492_v38 = vld [vmem:[#allocation2 + $0x348] sm:$0xff]  ;;  %v7493_v15 = vld [vmem:[#allocation2 + $0x350] sm:$0xff] }
 0x4ce   :  { %v3366_v39 = vsel %vm3365_vm15, %v6613_v1, %v3362_v36  ;;  %v3374_v21 = vmul.f32 %v10513_v41, %v10487_v16  ;;  %v3446_v1 = vsel %vm10528_vm2, %v10449_v8, %v3442_v30  ;;  %vm3379_vm3 = vweird.f32 %v10513_v41  ;;  %v7486_v30 = vld [vmem:[#allocation2 + $0x1e0] sm:$0xff]  ;;  %v7487_v36 = vld [vmem:[#allocation2 + $0x1f0] sm:$0xff] }
 0x4cf   :  { %v3371_v32 = vsel %vm3368_vm1, %v3370_v4, %v3366_v39  ;;  %6624 = vrcp.f32 %v10517_v29  ;;  %4267 = vmatpush.msra.mxu1 %v7480_v51  ;;  %4325 = vmatpush.msrb.mxu3 %v7481_v47  ;;  %v3450_v8 = vor.u32 1.1754944e-38, %v3449_v23  ;;  %vm10556_vm6 = vmor %vm3378_vm5, %vm3379_vm3  ;;  %v7484_v23 = vld [vmem:[#allocation2 + $0x388] sm:$0xff]  ;;  %v7490_v39 = vld [vmem:[#allocation2 + $0x1c0] sm:$0xff]  ;;  %v3320_v51 = vpop.f32.mrf.mxu3  ;;  %vm3393_vm11 = vweird.f32 %v10517_v29 }
 0x4d0   :  { %v6623_v37 = vpop.eup %6622  ;;  %v3488_v58 = vmul.f32 %v3484_v5, %v3371_v32  ;;  %v3375_v52 = vsub.f32 1.0, %v3374_v21  ;;  %3679 = vmatmul.f32.gmra.mxu1 %v10407_v19  ;;  %3737 = vmatmul.f32.gmra.mxu3 %v10407_v19  ;;  %v7488_v4 = vld [vmem:[#allocation2 + $0x368] sm:$0xff]  ;;  %v7491_v5 = vld [vmem:[#allocation2 + $0x1d0] sm:$0xff]  ;;  %v3462_v21 = vand.u32 2147483647, %v10446_v12  ;;  %v3399_v32 = vand.u32 2147483648, %v10517_v29 }
 0x4d1   :  { %v3503_v42 = vmul.f32 %v6623_v37, %v3499_v28  ;;  %v3451_v7 = vsel %vm3448_vm4, %v3450_v8, %v3446_v1  ;;  %4268 = vmatpush.msra.mxu1 %v7484_v23  ;;  %4326 = vmatpush.msrb.mxu3 %v7485_v20  ;;  %v3397_v1 = vand.u32 2147483647, %v10517_v29  ;;  %v7494_v47 = vld [vmem:[#allocation2 + $0x1a0] sm:$0xff]  ;;  %v7497_v8 = vld [vmem:[#allocation2 + $0x330] sm:$0xff]  ;;  %vm3474_vm15 = vweird.f32 %v10506_v9 }
 0x4d2   :  { %v3492_v3 = vadd.f32 %v3488_v58, %v12422_v11  ;;  %v3376_v45 = vmul.f32 %v10513_v41, %v3375_v52  ;;  %v12427_v58 = vld [vmem:[#allocation36_spill] sm:$0xff]  ;;  %v3508_v48 = vmul.f32 %v3451_v7, %v10151_v59  ;;  %v7495_v11 = vld [vmem:[#allocation2 + $0x1b0] sm:$0xff]  ;;  %vm3463_vm12 = vcmp.eq.f32.partialorder %v3462_v21, 8.507059e+37  ;;  %v7508_v21 = vld [vmem:[#allocation2 + $0x2c8] sm:$0xff] }
 0x4d3   :  { %v10535_v57 = vadd.f32 %v3507_v26, %v3503_v42  ;;  %4269 = vmatpush.msra.mxu1 %v7488_v4  ;;  %4327 = vmatpush.msrb.mxu3 %v7489_v14  ;;  %v3471_v42 = vmul.f32 %v10506_v9, %v3470_v2  ;;  %v3500_v26 = vsub.f32 1.0, %v3451_v7  ;;  %v3400_v31 = vor.u32 1.1754944e-38, %v3399_v32  ;;  %v7500_v7 = vld [vmem:[#allocation2 + $0x308] sm:$0xff]  ;;  %v7510_v32 = vld [vmem:[#allocation2 + $0x120] sm:$0xff] }
 0x4d4   :  { %6626 = vtanh.f32 %v3492_v3  ;;  %v3377_v40 = vadd.f32 %v10513_v41, %v3376_v45  ;;  %vm3398_vm14 = vcmp.eq.f32.partialorder %v3397_v1, 8.507059e+37  ;;  %v3486_v2 = vadd.f32 %v10475_v34, %v3320_v51  ;;  %v12432_v4 = vld [vmem:[#allocation38_spill] sm:$0xff]  ;;  %v7519_v51 = vld [vmem:[#allocation2 + $0xf0] sm:$0xff] }
 0x4d5   :  { %3531 = vmatmul.f32.vlgmr.msrb.gmra.mxu0 %v10535_v57  ;;  %3589 = vmatmul.f32.vlgmr.msrb.gmra.mxu2 %v10535_v57  ;;  %v10552_v61 = vpop.eup %6624  ;;  %v3479_v20 = vand.u32 2147483648, %v10466_v10  ;;  %vm3473_vm1 = vweird.f32 %v10466_v10  ;;  %v3477_v34 = vand.u32 2147483647, %v10466_v10 }
 0x4d6   :  { %3927 = vmatpush.msrb.mxu0 %v7482_v22  ;;  %3985 = vmatpush.msrb.mxu2 %v7483_v25  ;;  %v3381_v16 = vsel %vm10556_vm6, %v10513_v41, %v3377_v40  ;;  %v3389_v55 = vmul.f32 %v10552_v61, %v10517_v29  ;;  %v3464_v41 = vand.u32 2147483648, %v10446_v12  ;;  %vm3394_vm10 = vweird.f32 %v10552_v61  ;;  %v7498_v40 = vld [vmem:[#allocation2 + $0x180] sm:$0xff]  ;;  %v7499_v22 = vld [vmem:[#allocation2 + $0x190] sm:$0xff]  ;;  %vm10614_vm2 = vmor %vm3473_vm1, %vm3474_vm15 }
 0x4d7   :  { %v3386_v28 = vsel %vm3383_vm0, %v3385_v18, %v3381_v16  ;;  %4270 = vmatpush.msra.mxu1 %v7492_v38  ;;  %4328 = vmatpush.msrb.mxu3 %v7493_v15  ;;  %v3461_v12 = vsel %vm10577_vm9, %v10489_v43, %v3457_v62  ;;  %vm10597_vm13 = vmor %vm3393_vm11, %vm3394_vm10  ;;  %v3472_v18 = vadd.f32 %v10506_v9, %v3471_v42  ;;  %v7509_v42 = vld [vmem:[#allocation2 + $0x2d0] sm:$0xff]  ;;  %vm3478_vm3 = vcmp.eq.f32.partialorder %v3477_v34, 8.507059e+37  ;;  %v7512_v15 = vld [vmem:[#allocation2 + $0x2a8] sm:$0xff] }
 0x4d8   :  { %3928 = vmatpush.msrb.mxu0 %v7486_v30  ;;  %3986 = vmatpush.msrb.mxu2 %v7487_v36  ;;  %v3489_v54 = vmul.f32 %v3485_v6, %v3386_v28  ;;  %v3390_v37 = vsub.f32 1.0, %v3389_v55  ;;  %v3465_v3 = vor.u32 1.1754944e-38, %v3464_v41  ;;  %v7503_v6 = vld [vmem:[#allocation2 + $0x170] sm:$0xff]  ;;  %v7504_v30 = vld [vmem:[#allocation2 + $0x2e8] sm:$0xff]  ;;  %v7525_v43 = vld [vmem:[#allocation2 + $0xa0] sm:$0xff] }
 0x4d9   :  { %3682 = vmatmul.f32.gmra.mxu1 %v10434_v27  ;;  %3740 = vmatmul.f32.gmra.mxu3 %v10434_v27  ;;  %v7505_v36 = vld [vmem:[#allocation2 + $0x2f0] sm:$0xff]  ;;  %v7541_v34 = vld [vmem:[#allocation2 + $0x608] sm:$0xff] }
 0x4da   :  { %3929 = vmatpush.msrb.mxu0 %v7490_v39  ;;  %3987 = vmatpush.msrb.mxu2 %v7491_v5  ;;  %v6627_v35 = vpop.eup %6626  ;;  %v3493_v52 = vadd.f32 %v3489_v54, %v12427_v58  ;;  %v3391_v63 = vmul.f32 %v10552_v61, %v3390_v37  ;;  %v3466_v25 = vsel %vm3463_vm12, %v3465_v3, %v3461_v12  ;;  %v7506_v37 = vld [vmem:[#allocation2 + $0x140] sm:$0xff]  ;;  %v7507_v39 = vld [vmem:[#allocation2 + $0x150] sm:$0xff]  ;;  %v3480_v5 = vor.u32 1.1754944e-38, %v3479_v20  ;;  %v7546_v28 = vld [vmem:[#allocation2 + $0x5c8] sm:$0xff] }
 0x4db   :  { %v3504_v0 = vmul.f32 %v6627_v35, %v3500_v26  ;;  %4271 = vmatpush.msra.mxu1 %v7496_v46  ;;  %4329 = vmatpush.msrb.mxu3 %v7497_v8  ;;  %v3501_v55 = vsub.f32 1.0, %v3466_v25  ;;  %v3509_v10 = vmul.f32 %v3466_v25, %v10173_v17  ;;  %v3476_v54 = vsel %vm10614_vm2, %v10506_v9, %v3472_v18  ;;  %v7511_v17 = vld [vmem:[#allocation2 + $0x130] sm:$0xff]  ;;  %v7514_v35 = vld [vmem:[#allocation2 + $0x100] sm:$0xff]  ;;  %v7524_v8 = vld [vmem:[#allocation2 + $0x248] sm:$0xff] }
 0x4dc   :  { %3930 = vmatpush.msrb.mxu0 %v7494_v47  ;;  %3988 = vmatpush.msrb.mxu2 %v7495_v11  ;;  %6628 = vtanh.f32 %v3493_v52  ;;  %v3392_v45 = vadd.f32 %v10552_v61, %v3391_v63  ;;  %v3481_v38 = vsel %vm3478_vm3, %v3480_v5, %v3476_v54  ;;  %v7513_v9 = vld [vmem:[#allocation2 + $0x2b0] sm:$0xff]  ;;  %v7516_v52 = vld [vmem:[#allocation2 + $0x288] sm:$0xff]  ;;  %v7521_v11 = vld [vmem:[#allocation2 + $0xc0] sm:$0xff] }
 0x4dd   :  { %v10593_v59 = vadd.f32 %v3508_v48, %v3504_v0  ;;  %4272 = vmatpush.msra.mxu1 %v7500_v7  ;;  %4330 = vmatpush.msrb.mxu3 %v7501_v50  ;;  %v3502_v58 = vsub.f32 1.0, %v3481_v38  ;;  %v7517_v63 = vld [vmem:[#allocation2 + $0x290] sm:$0xff]  ;;  %v7518_v0 = vld [vmem:[#allocation2 + $0xe0] sm:$0xff]  ;;  %v3510_v12 = vmul.f32 %v3481_v38, %v10179_v56  ;;  %v7520_v47 = vld [vmem:[#allocation2 + $0x268] sm:$0xff] }
 0x4de   :  { %3931 = vmatpush.msrb.mxu0 %v7498_v40  ;;  %3989 = vmatpush.msrb.mxu2 %v7499_v22  ;;  %v3396_v29 = vsel %vm10597_vm13, %v10552_v61, %v3392_v45  ;;  %v7502_v61 = vld [vmem:[#allocation2 + $0x160] sm:$0xff]  ;;  %v7522_v3 = vld [vmem:[#allocation2 + $0x270] sm:$0xff]  ;;  %v7529_v22 = vld [vmem:[#allocation2 + $0x228] sm:$0xff] }
 0x4df   :  { %v3401_v23 = vsel %vm3398_vm14, %v3400_v31, %v3396_v29  ;;  %3534 = vmatmul.f32.gmra.mxu0 %v10593_v59  ;;  %3592 = vmatmul.f32.gmra.mxu2 %v10593_v59  ;;  %v7523_v46 = vld [vmem:[#allocation2 + $0xd0] sm:$0xff]  ;;  %v7528_v40 = vld [vmem:[#allocation2 + $0x80] sm:$0xff]  ;;  %v7533_v7 = vld [vmem:[#allocation2 + $0x418] sm:$0xff] }
 0x4e0   :  { %v3490_v16 = vmul.f32 %v3486_v2, %v3401_v23  ;;  %3932 = vmatpush.msrb.mxu0 %v7502_v61  ;;  %3990 = vmatpush.msrb.mxu2 %v7503_v6  ;;  %v7526_v31 = vld [vmem:[#allocation2 + $0x250] sm:$0xff]  ;;  %v7532_v2 = vld [vmem:[#allocation2 + $0x60] sm:$0xff]  ;;  %v7536_v23 = vld [vmem:[#allocation2 + $0x3f8] sm:$0xff] }
 0x4e1   :  { %4273 = vmatpush.msra.mxu1 %v7504_v30  ;;  %4331 = vmatpush.msrb.mxu3 %v7505_v36  ;;  %v7527_v56 = vld [vmem:[#allocation2 + $0xb0] sm:$0xff]  ;;  %v7535_v18 = vld [vmem:[#allocation2 + $0x40] sm:$0xff]  ;;  %v7543_v30 = vld [vmem:[#allocation2 + $0x5e8] sm:$0xff] }
 0x4e2   :  { %v6629_v62 = vpop.eup %6628  ;;  %v3494_v14 = vadd.f32 %v3490_v16, %v12432_v4  ;;  %3685 = vmatmul.f32.gmra.mxu1 %v10457_v60  ;;  %3743 = vmatmul.f32.gmra.mxu3 %v10457_v60  ;;  %v7530_v25 = vld [vmem:[#allocation2 + $0x230] sm:$0xff]  ;;  %v7538_v16 = vld [vmem:[#allocation2 + $0x20] sm:$0xff]  ;;  %v7544_v36 = vld [vmem:[#allocation2 + $0x3d8] sm:$0xff] }
 0x4e3   :  { %v3505_v41 = vmul.f32 %v6629_v62, %v3501_v55  ;;  %3933 = vmatpush.msrb.mxu0 %v7506_v37  ;;  %3991 = vmatpush.msrb.mxu2 %v7507_v39  ;;  %v7531_v29 = vld [vmem:[#allocation2 + $0x90] sm:$0xff]  ;;  %v7540_v6 = vld [vmem:[#allocation2 + $0x600] sm:$0xff]  ;;  %v7547_v4 = vld [vmem:[#allocation2 + $0x3b8] sm:$0xff] }
 0x4e4   :  { %6630 = vtanh.f32 %v3494_v14  ;;  %4274 = vmatpush.msra.mxu1 %v7508_v21  ;;  %4332 = vmatpush.msrb.mxu3 %v7509_v42  ;;  %v7534_v50 = vld [vmem:[#allocation2 + $0x70] sm:$0xff]  ;;  %v7542_v55 = vld [vmem:[#allocation2 + $0x5e0] sm:$0xff]  ;;  %v7552_v37 = vld [vmem:[#allocation2 + $0x588] sm:$0xff] }
 0x4e5   :  { %v10625_v26 = vadd.f32 %v3509_v10, %v3505_v41  ;;  %3934 = vmatpush.msrb.mxu0 %v7510_v32  ;;  %3992 = vmatpush.msrb.mxu2 %v7511_v17  ;;  %v7537_v20 = vld [vmem:[#allocation2 + $0x50] sm:$0xff]  ;;  %v7545_v62 = vld [vmem:[#allocation2 + $0x5c0] sm:$0xff]  ;;  %v7549_v41 = vld [vmem:[#allocation2 + $0x5a8] sm:$0xff] }
 0x4e6   :  { %4275 = vmatpush.msra.mxu1 %v7512_v15  ;;  %4333 = vmatpush.msrb.mxu3 %v7513_v9  ;;  %v7539_v61 = vld [vmem:[#allocation2 + $0x30] sm:$0xff]  ;;  %v7548_v14 = vld [vmem:[#allocation2 + $0x5a0] sm:$0xff]  ;;  %v7550_v10 = vld [vmem:[#allocation2 + $0x398] sm:$0xff] }
 0x4e7   :  { %3537 = vmatmul.f32.gmra.mxu0 %v10625_v26  ;;  %3595 = vmatmul.f32.gmra.mxu2 %v10625_v26  ;;  %v7551_v54 = vld [vmem:[#allocation2 + $0x580] sm:$0xff]  ;;  %v7553_v39 = vld [vmem:[#allocation2 + $0x378] sm:$0xff]  ;;  %v7555_v21 = vld [vmem:[#allocation2 + $0x568] sm:$0xff] }
 0x4e8   :  { %3935 = vmatpush.msrb.mxu0 %v7514_v35  ;;  %3993 = vmatpush.msrb.mxu2 %v7515_v24  ;;  %v7554_v5 = vld [vmem:[#allocation2 + $0x560] sm:$0xff]  ;;  %v7556_v42 = vld [vmem:[#allocation2 + $0x358] sm:$0xff]  ;;  %v7558_v17 = vld [vmem:[#allocation2 + $0x548] sm:$0xff] }
 0x4e9   :  { %4276 = vmatpush.msra.mxu1 %v7516_v52  ;;  %4334 = vmatpush.msrb.mxu3 %v7517_v63  ;;  %v7557_v32 = vld [vmem:[#allocation2 + $0x540] sm:$0xff]  ;;  %v7560_v15 = vld [vmem:[#allocation2 + $0x338] sm:$0xff]  ;;  %v7561_v9 = vld [vmem:[#allocation2 + $0x528] sm:$0xff] }
 0x4ea   :  { %v6631_v1 = vpop.eup %6630  ;;  %3972 = vmatmul.f32.vlgmr.msrb.gmra.mxu1 %v10535_v57  ;;  %3936 = vmatpush.msrb.mxu0 %v7518_v0  ;;  %v7559_v38 = vld [vmem:[#allocation2 + $0x520] sm:$0xff]  ;;  %v7563_v24 = vld [vmem:[#allocation2 + $0x318] sm:$0xff] }
 0x4eb   :  { %v3506_v48 = vmul.f32 %v6631_v1, %v3502_v58  ;;  %3994 = vmatpush.msrb.mxu2 %v7519_v51  ;;  %4277 = vmatpush.msra.mxu1 %v7520_v47  ;;  %v7562_v35 = vld [vmem:[#allocation2 + $0x500] sm:$0xff]  ;;  %v7564_v58 = vld [vmem:[#allocation2 + $0x508] sm:$0xff]  ;;  %v7566_v63 = vld [vmem:[#allocation2 + $0x2f8] sm:$0xff] }
 0x4ec   :  { %3937 = vmatpush.msrb.mxu0 %v7521_v11  ;;  %4335 = vmatpush.msrb.mxu3 %v7522_v3  ;;  %v7565_v52 = vld [vmem:[#allocation2 + $0x4e0] sm:$0xff]  ;;  %v7567_v1 = vld [vmem:[#allocation2 + $0x4e8] sm:$0xff]  ;;  %v7571_v51 = vld [vmem:[#allocation2 + $0x2d8] sm:$0xff] }
 0x4ed   :  { %v10631_v45 = vadd.f32 %v3510_v12, %v3506_v48  ;;  %3995 = vmatpush.msrb.mxu2 %v7523_v46  ;;  %4278 = vmatpush.msra.mxu1 %v7524_v8  ;;  %v7568_v0 = vld [vmem:[#allocation2 + $0x4c0] sm:$0xff]  ;;  %v7569_v48 = vld [vmem:[#allocation2 + $0x4c8] sm:$0xff]  ;;  %v7574_v3 = vld [vmem:[#allocation2 + $0x2b8] sm:$0xff] }
 0x4ee   :  { %3938 = vmatpush.msrb.mxu0 %v7525_v43  ;;  %4336 = vmatpush.msrb.mxu3 %v7526_v31  ;;  %v7570_v12 = vld [vmem:[#allocation2 + $0x4a0] sm:$0xff]  ;;  %v7572_v47 = vld [vmem:[#allocation2 + $0x4a8] sm:$0xff]  ;;  %v7577_v43 = vld [vmem:[#allocation2 + $0x298] sm:$0xff] }
 0x4ef   :  { %3540 = vmatmul.f32.gmra.mxu0 %v10631_v45  ;;  %3598 = vmatmul.f32.gmra.mxu2 %v10631_v45  ;;  %v7573_v11 = vld [vmem:[#allocation2 + $0x480] sm:$0xff]  ;;  %v7575_v46 = vld [vmem:[#allocation2 + $0x488] sm:$0xff] }
 0x4f0   :  { %3996 = vmatpush.msrb.mxu2 %v7527_v56  ;;  %3939 = vmatpush.msrb.mxu0 %v7528_v40  ;;  %v7576_v8 = vld [vmem:[#allocation2 + $0x460] sm:$0xff]  ;;  %v7578_v31 = vld [vmem:[#allocation2 + $0x468] sm:$0xff] }
 0x4f1   :  { %4279 = vmatpush.msra.mxu1 %v7529_v22  ;;  %4337 = vmatpush.msrb.mxu3 %v7530_v25  ;;  %v7579_v56 = vld [vmem:[#allocation2 + $0x440] sm:$0xff]  ;;  %v7580_v40 = vld [vmem:[#allocation2 + $0x448] sm:$0xff]  ;;  %v7582_v25 = vld [vmem:[#allocation2 + $0x610] sm:$0xff] }
 0x4f2   :  { %3975 = vmatmul.f32.gmra.mxu1 %v10593_v59  ;;  %3997 = vmatpush.msrb.mxu2 %v7531_v29  ;;  %v7581_v22 = vld [vmem:[#allocation2 + $0x420] sm:$0xff]  ;;  %v7583_v29 = vld [vmem:[#allocation2 + $0x278] sm:$0xff] }
 0x4f3   :  { %3940 = vmatpush.msrb.mxu0 %v7532_v2  ;;  %4380 = vmatpush.msrb.mxu1 %v7533_v7  ;;  %v7584_v2 = vld [vmem:[#allocation2 + $0x428] sm:$0xff]  ;;  %v7585_v7 = vld [vmem:[#allocation2 + $0x618] sm:$0xff] }
 0x4f4   :  { %3998 = vmatpush.msrb.mxu2 %v7534_v50  ;;  %v7586_v50 = vld [vmem:[#allocation2 + $0x5f0] sm:$0xff] }
 0x4f5   :  { %3941 = vmatpush.msrb.mxu0 %v7535_v18  ;;  %4381 = vmatpush.msrb.mxu1 %v7536_v23  ;;  %v7587_v18 = vld [vmem:[#allocation2 + $0x258] sm:$0xff] }
 0x4f6   :  { %3999 = vmatpush.msrb.mxu2 %v7537_v20  ;;  %v7588_v23 = vld [vmem:[#allocation2 + $0x5f8] sm:$0xff]  ;;  %v7589_v20 = vld [vmem:[#allocation2 + $0x5d0] sm:$0xff] }
 0x4f7   :  { %3647 = vmatmul.f32.vlgmr.msra.gmra.mxu0 %v10535_v57  ;;  %3705 = vmatmul.f32.vlgmr.msra.gmra.mxu2 %v10535_v57 }
 0x4f8   :  { %3942 = vmatpush.msrb.mxu0 %v7538_v16  ;;  %4000 = vmatpush.msrb.mxu2 %v7539_v61  ;;  %v7590_v16 = vld [vmem:[#allocation2 + $0x238] sm:$0xff] }
 0x4f9   :  { %4382 = vmatpush.msrb.mxu1 %v7544_v36  ;;  %v7591_v61 = vld [vmem:[#allocation2 + $0x5d8] sm:$0xff]  ;;  %v7596_v36 = vld [vmem:[#allocation2 + $0x570] sm:$0xff] }
 0x4fa   :  { %4235 = vmatpush.msra.mxu0 %v7540_v6  ;;  %4293 = vmatpush.msra.mxu2 %v7541_v34  ;;  %v7592_v6 = vld [vmem:[#allocation2 + $0x5b0] sm:$0xff]  ;;  %v7593_v34 = vld [vmem:[#allocation2 + $0x5b8] sm:$0xff] }
 0x4fb   :  { %3978 = vmatmul.f32.gmra.mxu1 %v10625_v26 }
 0x4fc   :  { %4236 = vmatpush.msra.mxu0 %v7542_v55  ;;  %4294 = vmatpush.msra.mxu2 %v7543_v30  ;;  %v7594_v55 = vld [vmem:[#allocation2 + $0x590] sm:$0xff]  ;;  %v7595_v30 = vld [vmem:[#allocation2 + $0x598] sm:$0xff] }
 0x4fd   :  { %4383 = vmatpush.msrb.mxu1 %v7547_v4  ;;  %v7598_v4 = vld [vmem:[#allocation2 + $0x550] sm:$0xff] }
 0x4fe   :  { %4237 = vmatpush.msra.mxu0 %v7545_v62  ;;  %4295 = vmatpush.msra.mxu2 %v7546_v28  ;;  %v7597_v28 = vld [vmem:[#allocation2 + $0x578] sm:$0xff] }
 0x4ff   :  { %3650 = vmatmul.f32.gmra.mxu0 %v10593_v59  ;;  %3708 = vmatmul.f32.gmra.mxu2 %v10593_v59 }
 0x500   :  { %4238 = vmatpush.msra.mxu0 %v7548_v14  ;;  %4296 = vmatpush.msra.mxu2 %v7549_v41  ;;  %v7599_v14 = vld [vmem:[#allocation2 + $0x558] sm:$0xff]  ;;  %v7600_v41 = vld [vmem:[#allocation2 + $0x530] sm:$0xff] }
 0x501   :  { %4384 = vmatpush.msrb.mxu1 %v7550_v10  ;;  %v7601_v10 = vld [vmem:[#allocation2 + $0x538] sm:$0xff] }
 0x502   :  { %4239 = vmatpush.msra.mxu0 %v7551_v54  ;;  %4297 = vmatpush.msra.mxu2 %v7552_v37  ;;  %v7602_v54 = vld [vmem:[#allocation2 + $0x510] sm:$0xff]  ;;  %v7603_v37 = vld [vmem:[#allocation2 + $0x518] sm:$0xff] }
 0x503   :  { %3981 = vmatmul.f32.gmra.mxu1 %v10631_v45 }
 0x504   :  { %4385 = vmatpush.msrb.mxu1 %v7553_v39  ;;  %4240 = vmatpush.msra.mxu0 %v7554_v5  ;;  %v7604_v39 = vld [vmem:[#allocation2 + $0x4f0] sm:$0xff]  ;;  %v7605_v5 = vld [vmem:[#allocation2 + $0x4f8] sm:$0xff] }
 0x505   :  { %4298 = vmatpush.msra.mxu2 %v7555_v21  ;;  %v7606_v21 = vld [vmem:[#allocation2 + $0x4d0] sm:$0xff] }
 0x506   :  { %4386 = vmatpush.msrb.mxu1 %v7556_v42  ;;  %4241 = vmatpush.msra.mxu0 %v7557_v32  ;;  %v7607_v32 = vld [vmem:[#allocation2 + $0x4d8] sm:$0xff] }
 0x507   :  { %3653 = vmatmul.f32.gmra.mxu0 %v10625_v26  ;;  %3711 = vmatmul.f32.gmra.mxu2 %v10625_v26 }
 0x508   :  { %4299 = vmatpush.msra.mxu2 %v7558_v17  ;;  %4242 = vmatpush.msra.mxu0 %v7559_v38  ;;  %v7608_v17 = vld [vmem:[#allocation2 + $0x4b0] sm:$0xff]  ;;  %v7609_v38 = vld [vmem:[#allocation2 + $0x4b8] sm:$0xff] }
 0x509   :  { %4387 = vmatpush.msrb.mxu1 %v7560_v15  ;;  %v7610_v15 = vld [vmem:[#allocation2 + $0x490] sm:$0xff] }
 0x50a   :  { %4300 = vmatpush.msra.mxu2 %v7561_v9  ;;  %4243 = vmatpush.msra.mxu0 %v7562_v35  ;;  %v7611_v9 = vld [vmem:[#allocation2 + $0x498] sm:$0xff]  ;;  %v7612_v35 = vld [vmem:[#allocation2 + $0x470] sm:$0xff] }
 0x50b   :  { %4388 = vmatpush.msrb.mxu1 %v7563_v24  ;;  %v7613_v24 = vld [vmem:[#allocation2 + $0x478] sm:$0xff] }
 0x50c   :  { %4301 = vmatpush.msra.mxu2 %v7564_v58  ;;  %4244 = vmatpush.msra.mxu0 %v7565_v52  ;;  %v7614_v58 = vld [vmem:[#allocation2 + $0x450] sm:$0xff] }
 0x50d   :  { %4389 = vmatpush.msrb.mxu1 %v7566_v63  ;;  %v7615_v63 = vld [vmem:[#allocation2 + $0x458] sm:$0xff] }
 0x50e   :  { %4302 = vmatpush.msra.mxu2 %v7567_v1  ;;  %4245 = vmatpush.msra.mxu0 %v7568_v0  ;;  %v7616_v1 = vld [vmem:[#allocation2 + $0x430] sm:$0xff]  ;;  %v7617_v0 = vld [vmem:[#allocation2 + $0x438] sm:$0xff] }
 0x50f   :  { %3656 = vmatmul.f32.gmra.mxu0 %v10631_v45  ;;  %3714 = vmatmul.f32.gmra.mxu2 %v10631_v45 }
 0x510   :  { %4303 = vmatpush.msra.mxu2 %v7569_v48  ;;  %4246 = vmatpush.msra.mxu0 %v7570_v12 }
 0x511   :  { %4390 = vmatpush.msrb.mxu1 %v7571_v51 }
 0x512   :  { %4304 = vmatpush.msra.mxu2 %v7572_v47  ;;  %4247 = vmatpush.msra.mxu0 %v7573_v11 }
 0x513   :  { %4391 = vmatpush.msrb.mxu1 %v7574_v3 }
 0x514   :  { %4305 = vmatpush.msra.mxu2 %v7575_v46  ;;  %4248 = vmatpush.msra.mxu0 %v7576_v8 }
 0x515   :  { %4392 = vmatpush.msrb.mxu1 %v7577_v43 }
 0x516   :  { %4306 = vmatpush.msra.mxu2 %v7578_v31  ;;  %4249 = vmatpush.msra.mxu0 %v7579_v56 }
 0x517   :  { %3943 = vmatmul.f32.vlgmr.msrb.gmra.mxu0 %v10535_v57  ;;  %4001 = vmatmul.f32.vlgmr.msrb.gmra.mxu2 %v10535_v57 }
 0x518   :  { %4307 = vmatpush.msra.mxu2 %v7580_v40  ;;  %4250 = vmatpush.msra.mxu0 %v7581_v22 }
 0x519   :  { %4393 = vmatpush.msrb.mxu1 %v7583_v29 }
 0x51a   :  { %4351 = vmatpush.msrb.mxu0 %v7582_v25  ;;  %4308 = vmatpush.msra.mxu2 %v7584_v2 }
 0x51b   :  { %4394 = vmatpush.msrb.mxu1 %v7587_v18 }
 0x51c   :  { %4409 = vmatpush.msrb.mxu2 %v7585_v7  ;;  %4352 = vmatpush.msrb.mxu0 %v7586_v50 }
 0x51d   :  { %4395 = vmatpush.msrb.mxu1 %v7590_v16  ;;  %v3561_v62 = vpop.f32.mrf.mxu1 }
 0x51e   :  { %4410 = vmatpush.msrb.mxu2 %v7588_v23  ;;  %4353 = vmatpush.msrb.mxu0 %v7589_v20 }
 0x51f   :  { %3946 = vmatmul.f32.gmra.mxu0 %v10593_v59  ;;  %4004 = vmatmul.f32.gmra.mxu2 %v10593_v59 }
 0x520   :  { %4411 = vmatpush.msrb.mxu2 %v7591_v61  ;;  %4354 = vmatpush.msrb.mxu0 %v7592_v6 }
 0x522   :  { %4412 = vmatpush.msrb.mxu2 %v7593_v34  ;;  %4355 = vmatpush.msrb.mxu0 %v7594_v55 }
 0x523   :  { %v3619_v51 = vpop.f32.mrf.mxu3 }
 0x524   :  { %4413 = vmatpush.msrb.mxu2 %v7595_v30  ;;  %4356 = vmatpush.msrb.mxu0 %v7596_v36 }
 0x526   :  { %4414 = vmatpush.msrb.mxu2 %v7597_v28  ;;  %4357 = vmatpush.msrb.mxu0 %v7598_v4 }
 0x527   :  { %3949 = vmatmul.f32.gmra.mxu0 %v10625_v26  ;;  %4007 = vmatmul.f32.gmra.mxu2 %v10625_v26 }
 0x528   :  { %4415 = vmatpush.msrb.mxu2 %v7599_v14  ;;  %4358 = vmatpush.msrb.mxu0 %v7600_v41  ;;  %v3564_v42 = vpop.f32.mrf.mxu1 }
 0x52a   :  { %4416 = vmatpush.msrb.mxu2 %v7601_v10  ;;  %4359 = vmatpush.msrb.mxu0 %v7602_v54 }
 0x52c   :  { %4417 = vmatpush.msrb.mxu2 %v7603_v37  ;;  %4360 = vmatpush.msrb.mxu0 %v7604_v39 }
 0x52e   :  { %4418 = vmatpush.msrb.mxu2 %v7605_v5  ;;  %4361 = vmatpush.msrb.mxu0 %v7606_v21 }
 0x52f   :  { %3952 = vmatmul.f32.gmra.mxu0 %v10631_v45  ;;  %4010 = vmatmul.f32.gmra.mxu2 %v10631_v45  ;;  %v3622_v31 = vpop.f32.mrf.mxu3 }
 0x530   :  { %4419 = vmatpush.msrb.mxu2 %v7607_v32  ;;  %4362 = vmatpush.msrb.mxu0 %v7608_v17 }
 0x532   :  { %4420 = vmatpush.msrb.mxu2 %v7609_v38  ;;  %4363 = vmatpush.msrb.mxu0 %v7610_v15 }
 0x534   :  { %4421 = vmatpush.msrb.mxu2 %v7611_v9  ;;  %4364 = vmatpush.msrb.mxu0 %v7612_v35 }
 0x535   :  { %v3567_v52 = vpop.f32.mrf.mxu1 }
 0x536   :  { %4422 = vmatpush.msrb.mxu2 %v7613_v24  ;;  %4365 = vmatpush.msrb.mxu0 %v7614_v58 }
 0x538   :  { %4423 = vmatpush.msrb.mxu2 %v7615_v63  ;;  %4366 = vmatpush.msrb.mxu0 %v7616_v1 }
 0x53a   :  { %4424 = vmatpush.msrb.mxu2 %v7617_v0 }
 0x53b   :  { %v3625_v20 = vpop.f32.mrf.mxu3 }
 0x53d   :  { %v3570_v48 = vpop.f32.mrf.mxu1 }
 0x543   :  { %v3628_v37 = vpop.f32.mrf.mxu3 }
 0x545   :  { %v10654_v12 = vpop.f32.mrf.mxu1 }
 0x54d   :  { %v10657_v8 = vpop.f32.mrf.mxu1 }
 0x552   :  { %v3532_v47 = vpop.f32.mrf.mxu0 }
 0x553   :  { %v3533_v11 = vadd.f32 %v3532_v47, %v12314_v44 }
 0x555   :  { %v3562_v3 = vadd.f32 %v3561_v62, %v3533_v11  ;;  %v3735_v11 = vpop.f32.mrf.mxu3 }
 0x556   :  { %v10661_v2 = vpop.f32.mrf.mxu1 }
 0x557   :  { %v6211_v46 = vmul.f32 -1.442695, %v3562_v3  ;;  %v12433_v3 = vld [vmem:[#allocation9_spill] sm:$0xff] }
 0x558   :  { %v3590_v43 = vpop.f32.mrf.mxu2 }
 0x559   :  { %6632 = vpow2.f32 %v6211_v46  ;;  %v3591_v56 = vadd.f32 %v3590_v43, %v12313_v33 }
 0x55b   :  { %v3620_v7 = vadd.f32 %v3619_v51, %v3591_v56 }
 0x55c   :  { %v3535_v40 = vpop.f32.mrf.mxu0 }
 0x55d   :  { %v3536_v22 = vadd.f32 %v3535_v40, %v12314_v44  ;;  %v6215_v16 = vmul.f32 -1.442695, %v3620_v7 }
 0x55f   :  { %v6633_v25 = vpop.eup %6632  ;;  %v3565_v29 = vadd.f32 %v3564_v42, %v3536_v22  ;;  %v10668_v62 = vpop.f32.mrf.mxu1 }
 0x560   :  { %v10663_v50 = vadd.f32 1.0, %v6633_v25 }
 0x561   :  { %v6212_v18 = vmul.f32 -1.442695, %v3565_v29 }
 0x562   :  { %v3593_v23 = vpop.f32.mrf.mxu2  ;;  %v3774_v25 = vand.u32 2147483648, %v10663_v50  ;;  %vm3768_vm5 = vweird.f32 %v10663_v50 }
 0x563   :  { %6634 = vpow2.f32 %v6212_v18  ;;  %v3594_v34 = vadd.f32 %v3593_v23, %v12313_v33 }
 0x564   :  { %v3538_v61 = vpop.f32.mrf.mxu0  ;;  %6636 = vrcp.f32 %v10663_v50 }
 0x565   :  { %v3539_v6 = vadd.f32 %v3538_v61, %v12314_v44  ;;  %6638 = vpow2.f32 %v6215_v16  ;;  %v3623_v41 = vadd.f32 %v3622_v31, %v3594_v34  ;;  %v3772_v16 = vand.u32 2147483647, %v10663_v50 }
 0x567   :  { %v3568_v55 = vadd.f32 %v3567_v52, %v3539_v6  ;;  %v6216_v42 = vmul.f32 -1.442695, %v3623_v41  ;;  %v3973_v63 = vpop.f32.mrf.mxu1  ;;  %v3775_v41 = vor.u32 1.1754944e-38, %v3774_v25  ;;  %vm3773_vm0 = vcmp.eq.f32.partialorder %v3772_v16, 8.507059e+37 }
 0x568   :  { %v4094_v46 = vadd.f32 %v3973_v63, %v12433_v3 }
 0x569   :  { %v6635_v30 = vpop.eup %6634  ;;  %v6213_v36 = vmul.f32 -1.442695, %v3568_v55 }
 0x56a   :  { %v3596_v28 = vpop.f32.mrf.mxu2  ;;  %v10670_v4 = vpop.eup %6636  ;;  %v10672_v14 = vadd.f32 1.0, %v6635_v30  ;;  %v6223_v7 = vmul.f32 -1.442695, %v4094_v46 }
 0x56b   :  { %6640 = vpow2.f32 %v6213_v36  ;;  %v3597_v10 = vadd.f32 %v3596_v28, %v12313_v33  ;;  %v6639_v5 = vpop.eup %6638  ;;  %v3764_v21 = vmul.f32 %v10670_v4, %v10663_v50  ;;  %vm3769_vm4 = vweird.f32 %v10670_v4 }
 0x56c   :  { %v3541_v54 = vpop.f32.mrf.mxu0  ;;  %6642 = vrcp.f32 %v10672_v14  ;;  %v10679_v15 = vadd.f32 1.0, %v6639_v5  ;;  %vm10704_vm6 = vmor %vm3768_vm5, %vm3769_vm4  ;;  %v3789_v63 = vand.u32 2147483648, %v10672_v14  ;;  %vm3783_vm9 = vweird.f32 %v10672_v14 }
 0x56d   :  { %v3542_v39 = vadd.f32 %v3541_v54, %v12314_v44  ;;  %v3626_v17 = vadd.f32 %v3625_v20, %v3597_v10  ;;  %v3765_v24 = vsub.f32 1.0, %v3764_v21  ;;  %6644 = vpow2.f32 %v6216_v42  ;;  %v3738_v42 = vpop.f32.mrf.mxu3 }
 0x56e   :  { %6646 = vrcp.f32 %v10679_v15  ;;  %vm3844_vm8 = vweird.f32 %v10679_v15 }
 0x56f   :  { %v3571_v32 = vadd.f32 %v3570_v48, %v3542_v39  ;;  %v6217_v1 = vmul.f32 -1.442695, %v3626_v17  ;;  %v3766_v47 = vmul.f32 %v10670_v4, %v3765_v24 }
 0x571   :  { %v6641_v38 = vpop.eup %6640  ;;  %v6214_v9 = vmul.f32 -1.442695, %v3571_v32  ;;  %v3767_v22 = vadd.f32 %v10670_v4, %v3766_v47 }
 0x572   :  { %v3599_v35 = vpop.f32.mrf.mxu2  ;;  %v10681_v58 = vadd.f32 1.0, %v6641_v38  ;;  %v10684_v51 = vpop.eup %6642  ;;  %v3848_v38 = vand.u32 2147483647, %v10679_v15 }
 0x573   :  { %v3600_v52 = vadd.f32 %v3599_v35, %v12313_v33  ;;  %6648 = vpow2.f32 %v6214_v9  ;;  %v3779_v31 = vmul.f32 %v10684_v51, %v10672_v14  ;;  %v6645_v56 = vpop.eup %6644  ;;  %v3771_v28 = vsel %vm10704_vm6, %v10670_v4, %v3767_v22 }
 0x574   :  { %v3648_v0 = vpop.f32.mrf.mxu0  ;;  %6650 = vrcp.f32 %v10681_v58  ;;  %v10695_v29 = vpop.eup %6646  ;;  %v10698_v20 = vadd.f32 1.0, %v6645_v56  ;;  %v3850_v4 = vand.u32 2147483648, %v10679_v15  ;;  %v3776_v17 = vsel %vm3773_vm0, %v3775_v41, %v3771_v28 }
 0x575   :  { %v3629_v48 = vadd.f32 %v3628_v37, %v3600_v52  ;;  %6652 = vpow2.f32 %v6217_v1  ;;  %v3780_v6 = vsub.f32 1.0, %v3779_v31  ;;  %v3840_v36 = vmul.f32 %v10695_v29, %v10679_v15  ;;  %v3976_v37 = vpop.f32.mrf.mxu1  ;;  %v12436_v1 = vld [vmem:[#allocation41_spill] sm:$0xff] }
 0x576   :  { %v3649_v50 = vadd.f32 %v3648_v0, %v8681_v13  ;;  %v3787_v52 = vand.u32 2147483647, %v10672_v14  ;;  %v4095_v0 = vadd.f32 %v3976_v37, %v12436_v1  ;;  %vm3784_vm7 = vweird.f32 %v10684_v51 }
 0x577   :  { %v6218_v43 = vmul.f32 -1.442695, %v3629_v48  ;;  %v3781_v39 = vmul.f32 %v10684_v51, %v3780_v6  ;;  %v3841_v9 = vsub.f32 1.0, %v3840_v36  ;;  %vm10746_vm11 = vmor %vm3783_vm9, %vm3784_vm7  ;;  %vm10751_vm12 = vcmp.eq.f32.partialorder %v3848_v38, 8.507059e+37 }
 0x578   :  { %v3678_v48 = vadd.f32 %v10654_v12, %v3649_v50  ;;  %vm10740_vm10 = vcmp.eq.f32.partialorder %v3787_v52, 8.507059e+37  ;;  %v6224_v25 = vmul.f32 -1.442695, %v4095_v0  ;;  %v3851_v55 = vor.u32 1.1754944e-38, %v3850_v4  ;;  %v12447_v0 = vld [vmem:[#allocation44_spill] sm:$0xff] }
 0x579   :  { %6654 = vpow2.f32 %v6218_v43  ;;  %v6649_v23 = vpop.eup %6648  ;;  %v3782_v3 = vadd.f32 %v10684_v51, %v3781_v39  ;;  %vm3845_vm14 = vweird.f32 %v10695_v29  ;;  %v3741_v39 = vpop.f32.mrf.mxu3  ;;  %vm3798_vm15 = vweird.f32 %v10681_v58 }
 0x57a   :  { %v3706_v40 = vpop.f32.mrf.mxu2  ;;  %v10702_v34 = vpop.eup %6650  ;;  %6656 = vpow2.f32 %v6223_v7  ;;  %v10713_v10 = vadd.f32 1.0, %v6649_v23  ;;  %vm10782_vm1 = vmor %vm3844_vm8, %vm3845_vm14  ;;  %v3865_v52 = vand.u32 2147483648, %v10698_v20  ;;  %vm3859_vm3 = vweird.f32 %v10698_v20 }
 0x57b   :  { %v3707_v18 = vadd.f32 %v3706_v40, %v8665_v53  ;;  %v6653_v30 = vpop.eup %6652  ;;  %6658 = vrcp.f32 %v10698_v20  ;;  %v3794_v5 = vmul.f32 %v10702_v34, %v10681_v58  ;;  %v3842_v40 = vmul.f32 %v10695_v29, %v3841_v9 }
 0x57c   :  { %v3651_v61 = vpop.f32.mrf.mxu0  ;;  %v10721_v32 = vadd.f32 1.0, %v6653_v30  ;;  %6660 = vrcp.f32 %v10713_v10  ;;  %v3786_v6 = vsel %vm10746_vm11, %v10684_v51, %v3782_v3  ;;  %vm3799_vm13 = vweird.f32 %v10702_v34 }
 0x57d   :  { %v3736_v54 = vadd.f32 %v3735_v11, %v3707_v18  ;;  %v3795_v43 = vsub.f32 1.0, %v3794_v5  ;;  %v3790_v18 = vor.u32 1.1754944e-38, %v3789_v63  ;;  %v3652_v41 = vadd.f32 %v3651_v61, %v8681_v13  ;;  %v3979_v5 = vpop.f32.mrf.mxu1  ;;  %vm10792_vm2 = vmor %vm3798_vm15, %vm3799_vm13 }
 0x57e   :  { %6662 = vrcp.f32 %v10721_v32  ;;  %v3843_v51 = vadd.f32 %v10695_v29, %v3842_v40  ;;  %vm3813_vm6 = vweird.f32 %v10713_v10  ;;  %vm3874_vm11 = vweird.f32 %v10721_v32 }
 0x57f   :  { %v6655_v21 = vpop.eup %6654  ;;  %v3899_v35 = vmul.f32 %v3776_v17, %v3736_v54  ;;  %v3796_v23 = vmul.f32 %v10702_v34, %v3795_v43  ;;  %v3802_v17 = vand.u32 2147483647, %v10681_v58  ;;  %v3880_v43 = vand.u32 2147483648, %v10721_v32 }
 0x580   :  { %v10730_v47 = vadd.f32 1.0, %v6655_v21  ;;  %v6657_v31 = vpop.eup %6656  ;;  %v3791_v21 = vsel %vm10740_vm10, %v3790_v18, %v3786_v6  ;;  %v3847_v15 = vsel %vm10782_vm1, %v10695_v29, %v3843_v51 }
 0x581   :  { %v10736_v56 = vpop.eup %6658  ;;  %v3903_v12 = vadd.f32 %v3899_v35, %v3678_v48  ;;  %v10761_v36 = vadd.f32 1.0, %v6657_v31  ;;  %v3797_v54 = vadd.f32 %v10702_v34, %v3796_v23  ;;  %v10804_v48 = vadd.f32 %v3979_v5, %v12447_v0 }
 0x582   :  { %v3709_v24 = vpop.f32.mrf.mxu2  ;;  %6664 = vrcp.f32 %v10730_v47  ;;  %v10759_v30 = vpop.eup %6660  ;;  %v3855_v28 = vmul.f32 %v10736_v56, %v10698_v20  ;;  %vm3803_vm4 = vcmp.eq.f32.partialorder %v3802_v17, 8.507059e+37  ;;  %v3817_v5 = vand.u32 2147483647, %v10713_v10 }
 0x583   :  { %v3710_v11 = vadd.f32 %v3709_v24, %v8665_v53  ;;  %6666 = vtanh.f32 %v3903_v12  ;;  %v3809_v35 = vmul.f32 %v10759_v30, %v10713_v10  ;;  %v3801_v3 = vsel %vm10792_vm2, %v10702_v34, %v3797_v54 }
 0x584   :  { %v3654_v46 = vpop.f32.mrf.mxu0  ;;  %v10770_v37 = vpop.eup %6662  ;;  %6668 = vpow2.f32 %v6224_v25  ;;  %v3856_v24 = vsub.f32 1.0, %v3855_v28  ;;  %v3852_v25 = vsel %vm10751_vm12, %v3851_v55, %v3847_v15  ;;  %vm3814_vm5 = vweird.f32 %v10759_v30 }
 0x585   :  { %v3739_v14 = vadd.f32 %v3738_v42, %v3710_v11  ;;  %v3804_v42 = vand.u32 2147483648, %v10681_v58  ;;  %6670 = vrcp.f32 %v10761_v36  ;;  %v3870_v1 = vmul.f32 %v10770_v37, %v10721_v32  ;;  %vm10835_vm0 = vmor %vm3813_vm6, %vm3814_vm5  ;;  %v12450_v58 = vld [vmem:[#allocation24_spill] sm:$0xff] }
 0x586   :  { %v3681_v11 = vadd.f32 %v10657_v8, %v3652_v41  ;;  %v3655_v29 = vadd.f32 %v3654_v46, %v8681_v13  ;;  %v3810_v7 = vsub.f32 1.0, %v3809_v35  ;;  %v3857_v18 = vmul.f32 %v10736_v56, %v3856_v24 }
 0x587   :  { %v3900_v4 = vmul.f32 %v3791_v21, %v3739_v14  ;;  %v3805_v40 = vor.u32 1.1754944e-38, %v3804_v42  ;;  %v3911_v14 = vsub.f32 1.0, %v3852_v25  ;;  %v3871_v6 = vsub.f32 1.0, %v3870_v1  ;;  %v3744_v42 = vpop.f32.mrf.mxu3 }
 0x588   :  { %v10799_v63 = vpop.eup %6664  ;;  %v3811_v41 = vmul.f32 %v10759_v30, %v3810_v7  ;;  %v3684_v16 = vadd.f32 %v10661_v2, %v3655_v29  ;;  %v3919_v54 = vmul.f32 %v3852_v25, %v10354_v49  ;;  %v3819_v2 = vand.u32 2147483648, %v10713_v10  ;;  %v7619_v29 = vld [vmem:[#allocation2 + $0x400] sm:$0xff] }
 0x589   :  { %v6667_v12 = vpop.eup %6666  ;;  %v3904_v22 = vadd.f32 %v3900_v4, %v3681_v11  ;;  %v3885_v34 = vmul.f32 %v10799_v63, %v10730_v47  ;;  %v3806_v23 = vsel %vm3803_vm4, %v3805_v40, %v3801_v3  ;;  %v3858_v1 = vadd.f32 %v10736_v56, %v3857_v18  ;;  %v7618_v3 = vld [vmem:[#allocation2 + $0x208] sm:$0xff] }
 0x58a   :  { %v3712_v50 = vpop.f32.mrf.mxu2  ;;  %v10815_v8 = vpop.eup %6668  ;;  %v3915_v55 = vmul.f32 %v6667_v12, %v3911_v14  ;;  %vm3860_vm7 = vweird.f32 %v10736_v56  ;;  %v3863_v0 = vand.u32 2147483647, %v10698_v20  ;;  %v3872_v10 = vmul.f32 %v10770_v37, %v3871_v6  ;;  %v7621_v20 = vld [vmem:[#allocation2 + $0x3e0] sm:$0xff] }
 0x58b   :  { %v3713_v61 = vadd.f32 %v3712_v50, %v8665_v53  ;;  %v10822_v50 = vpop.eup %6670  ;;  %6672 = vtanh.f32 %v3904_v22  ;;  %v3886_v4 = vsub.f32 1.0, %v3885_v34  ;;  %vm3818_vm8 = vcmp.eq.f32.partialorder %v3817_v5, 8.507059e+37  ;;  %vm3861_vm9 = vmor %vm3859_vm3, %vm3860_vm7  ;;  %v7620_v34 = vld [vmem:[#allocation2 + $0x1e8] sm:$0xff] }
 0x58c   :  { %v3657_v38 = vpop.f32.mrf.mxu0  ;;  %v10831_v17 = vadd.f32 %v3919_v54, %v3915_v55  ;;  %v3862_v12 = vsel %vm3861_vm9, %v10736_v56, %v3858_v1  ;;  %vm3864_vm10 = vcmp.eq.f32.partialorder %v3863_v0, 8.507059e+37  ;;  %v3873_v6 = vadd.f32 %v10770_v37, %v3872_v10  ;;  %v7622_v56 = vld [vmem:[#allocation2 + $0x1c8] sm:$0xff] }
 0x58d   :  { %v3742_v31 = vadd.f32 %v3741_v39, %v3713_v61  ;;  %v3812_v39 = vadd.f32 %v10759_v30, %v3811_v41  ;;  %v3658_v61 = vadd.f32 %v3657_v38, %v8681_v13  ;;  %v3820_v38 = vor.u32 1.1754944e-38, %v3819_v2  ;;  %v7624_v5 = vld [vmem:[#allocation2 + $0x1a8] sm:$0xff] }
 0x58e   :  { %4251 = vmatmul.f32.vlgmr.msra.gmra.mxu0 %v10831_v17  ;;  %4309 = vmatmul.f32.vlgmr.msra.gmra.mxu2 %v10831_v17  ;;  %vm3875_vm12 = vweird.f32 %v10770_v37  ;;  %v3878_v55 = vand.u32 2147483647, %v10721_v32  ;;  %v3895_v54 = vand.u32 2147483648, %v10730_v47  ;;  %vm3889_vm14 = vweird.f32 %v10730_v47  ;;  %v7628_v10 = vld [vmem:[#allocation2 + $0x168] sm:$0xff] }
 0x58f   :  { %v3901_v46 = vmul.f32 %v3806_v23, %v3742_v31  ;;  %v3816_v24 = vsel %vm10835_vm0, %v10759_v30, %v3812_v39  ;;  %v3866_v30 = vor.u32 1.1754944e-38, %v3865_v52  ;;  %4647 = vmatpush.msra.mxu0 %v7618_v3  ;;  %4897 = vmatpush.msra.mxu2 %v7619_v29  ;;  %v3887_v31 = vmul.f32 %v10799_v63, %v3886_v4  ;;  %v3982_v23 = vpop.f32.mrf.mxu1  ;;  %vm10860_vm13 = vmor %vm3874_vm11, %vm3875_vm12 }
 0x590   :  { %v3821_v40 = vsel %vm3818_vm8, %v3820_v38, %v3816_v24  ;;  %v3687_v25 = vadd.f32 %v10668_v62, %v3658_v61  ;;  %v7623_v62 = vld [vmem:[#allocation2 + $0x3c0] sm:$0xff]  ;;  %v3881_v39 = vor.u32 1.1754944e-38, %v3880_v43  ;;  %vm3879_vm15 = vcmp.eq.f32.partialorder %v3878_v55, 8.507059e+37 }
 0x591   :  { %v3905_v9 = vadd.f32 %v3901_v46, %v3684_v16  ;;  %v6673_v22 = vpop.eup %6672  ;;  %v3867_v18 = vsel %vm3864_vm10, %v3866_v30, %v3862_v12  ;;  %4648 = vmatpush.msra.mxu0 %v7620_v34  ;;  %4898 = vmatpush.msra.mxu2 %v7621_v20  ;;  %v6225_v46 = vmul.f32 -1.442695, %v10804_v48  ;;  %v3888_v48 = vadd.f32 %v10799_v63, %v3887_v31  ;;  %v7627_v43 = vld [vmem:[#allocation2 + $0x380] sm:$0xff]  ;;  %v7630_v12 = vld [vmem:[#allocation2 + $0x148] sm:$0xff] }
 0x592   :  { %v3715_v28 = vpop.f32.mrf.mxu2  ;;  %v3912_v52 = vsub.f32 1.0, %v3867_v18  ;;  %v3920_v41 = vmul.f32 %v3867_v18, %v10407_v19  ;;  %v7625_v19 = vld [vmem:[#allocation2 + $0x3a0] sm:$0xff]  ;;  %vm3890_vm1 = vweird.f32 %v10799_v63  ;;  %v3893_v32 = vand.u32 2147483647, %v10730_v47  ;;  %v7634_v20 = vld [vmem:[#allocation2 + $0x108] sm:$0xff] }
 0x593   :  { %v3716_v51 = vadd.f32 %v3715_v28, %v8665_v53  ;;  %4649 = vmatpush.msra.mxu0 %v7622_v56  ;;  %4899 = vmatpush.msra.mxu2 %v7623_v62  ;;  %vm10884_vm2 = vmor %vm3889_vm14, %vm3890_vm1  ;;  %v3896_v0 = vor.u32 1.1754944e-38, %v3895_v54  ;;  %v10893_v30 = vadd.f32 1.0, %v10815_v8  ;;  %v7633_v8 = vld [vmem:[#allocation2 + $0x320] sm:$0xff]  ;;  %v4115_v34 = vmul.f32 %v10822_v50, %v10761_v36 }
 0x594   :  { %v3944_v21 = vpop.f32.mrf.mxu0  ;;  %v3916_v28 = vmul.f32 %v6673_v22, %v3912_v52  ;;  %v3892_v1 = vsel %vm10884_vm2, %v10799_v63, %v3888_v48  ;;  %vm3894_vm3 = vcmp.eq.f32.partialorder %v3893_v32, 8.507059e+37  ;;  %v7631_v63 = vld [vmem:[#allocation2 + $0x340] sm:$0xff]  ;;  %vm4120_vm7 = vweird.f32 %v10822_v50 }
 0x595   :  { %v3745_v35 = vadd.f32 %v3744_v42, %v3716_v51  ;;  %v4014_v15 = vadd.f32 %v3944_v21, %v12450_v58  ;;  %v3877_v51 = vsel %vm10860_vm13, %v10770_v37, %v3873_v6  ;;  %4650 = vmatpush.msra.mxu0 %v7624_v5  ;;  %4900 = vmatpush.msra.mxu2 %v7625_v19  ;;  %v12453_v21 = vld [vmem:[#allocation47_spill] sm:$0xff]  ;;  %v7626_v37 = vld [vmem:[#allocation2 + $0x188] sm:$0xff]  ;;  %v7635_v52 = vld [vmem:[#allocation2 + $0x300] sm:$0xff]  ;;  %v4116_v16 = vsub.f32 1.0, %v4115_v34 }
 0x596   :  { %v4097_v42 = vadd.f32 %v3982_v23, %v12453_v21  ;;  %v10874_v4 = vadd.f32 %v3920_v41, %v3916_v28  ;;  %v3882_v49 = vsel %vm3879_vm15, %v3881_v39, %v3877_v51  ;;  %v12456_v58 = vld [vmem:[#allocation34_spill] sm:$0xff]  ;;  %v12457_v62 = vld [vmem:[#allocation37_spill] sm:$0xff]  ;;  %vm4119_vm8 = vweird.f32 %v10761_v36 }
 0x597   :  { %v6219_v11 = vmul.f32 -1.442695, %v4014_v15  ;;  %v3902_v7 = vmul.f32 %v3821_v40, %v3745_v35  ;;  %4651 = vmatpush.msra.mxu0 %v7626_v37  ;;  %4901 = vmatpush.msra.mxu2 %v7627_v43  ;;  %v3913_v38 = vsub.f32 1.0, %v3882_v49  ;;  %v3921_v31 = vmul.f32 %v3882_v49, %v10434_v27  ;;  %v7636_v28 = vld [vmem:[#allocation2 + $0xe8] sm:$0xff]  ;;  %v7637_v41 = vld [vmem:[#allocation2 + $0x2e0] sm:$0xff]  ;;  %vm10960_vm9 = vmor %vm4119_vm8, %vm4120_vm7 }
 0x598   :  { %4254 = vmatmul.f32.gmra.mxu0 %v10874_v4  ;;  %4312 = vmatmul.f32.gmra.mxu2 %v10874_v4  ;;  %v6226_v47 = vmul.f32 -1.442695, %v4097_v42  ;;  %v3897_v40 = vsel %vm3894_vm3, %v3896_v0, %v3892_v1  ;;  %v7638_v5 = vld [vmem:[#allocation2 + $0xc8] sm:$0xff]  ;;  %v7639_v19 = vld [vmem:[#allocation2 + $0x2c0] sm:$0xff]  ;;  %v4117_v24 = vmul.f32 %v10822_v50, %v4116_v16  ;;  %vm4134_vm12 = vweird.f32 %v10893_v30 }
 0x599   :  { %6674 = vpow2.f32 %v6219_v11  ;;  %v3906_v14 = vadd.f32 %v3902_v7, %v3687_v25  ;;  %4652 = vmatpush.msra.mxu0 %v7628_v10  ;;  %v7629_v11 = vld [vmem:[#allocation2 + $0x360] sm:$0xff]  ;;  %v7632_v7 = vld [vmem:[#allocation2 + $0x128] sm:$0xff]  ;;  %v3914_v27 = vsub.f32 1.0, %v3897_v40  ;;  %v3922_v55 = vmul.f32 %v3897_v40, %v10457_v60  ;;  %v7654_v10 = vld [vmem:[#allocation2 + $0x3f0] sm:$0xff] }
 0x59a   :  { %6676 = vtanh.f32 %v3905_v9  ;;  %4902 = vmatpush.msra.mxu2 %v7629_v11  ;;  %v4002_v42 = vpop.f32.mrf.mxu2  ;;  %v7643_v1 = vld [vmem:[#allocation2 + $0x280] sm:$0xff] }
 0x59b   :  { %6678 = vtanh.f32 %v3906_v14  ;;  %4653 = vmatpush.msra.mxu0 %v7630_v12  ;;  %v7645_v12 = vld [vmem:[#allocation2 + $0x68] sm:$0xff] }
 0x59c   :  { %6680 = vpow2.f32 %v6225_v46  ;;  %v3947_v35 = vpop.f32.mrf.mxu0  ;;  %4903 = vmatpush.msra.mxu2 %v7631_v63  ;;  %v7646_v63 = vld [vmem:[#allocation2 + $0x260] sm:$0xff] }
 0x59d   :  { %v4015_v15 = vadd.f32 %v3947_v35, %v12456_v58  ;;  %4654 = vmatpush.msra.mxu0 %v7632_v7  ;;  %v7641_v35 = vld [vmem:[#allocation2 + $0x2a0] sm:$0xff] }
 0x59e   :  { %4904 = vmatpush.msra.mxu2 %v7633_v8 }
 0x59f   :  { %v6675_v61 = vpop.eup %6674  ;;  %v6220_v3 = vmul.f32 -1.442695, %v4015_v15  ;;  %4655 = vmatpush.msra.mxu0 %v7634_v20 }
 0x5a0   :  { %v6677_v2 = vpop.eup %6676  ;;  %v10878_v9 = vadd.f32 1.0, %v6675_v61  ;;  %4905 = vmatpush.msra.mxu2 %v7635_v52  ;;  %v7647_v52 = vld [vmem:[#allocation2 + $0x48] sm:$0xff] }
 0x5a1   :  { %v3917_v29 = vmul.f32 %v6677_v2, %v3913_v38  ;;  %v6679_v22 = vpop.eup %6678  ;;  %4656 = vmatpush.msra.mxu0 %v7636_v28  ;;  %v7640_v2 = vld [vmem:[#allocation2 + $0xa8] sm:$0xff]  ;;  %v12463_v28 = vld [vmem:[#allocation8_spill] sm:$0xff] }
 0x5a2   :  { %6682 = vrcp.f32 %v10878_v9  ;;  %v6681_v18 = vpop.eup %6680  ;;  %v3918_v6 = vmul.f32 %v6679_v22, %v3914_v27  ;;  %4906 = vmatpush.msra.mxu2 %v7637_v41  ;;  %v4045_v61 = vand.u32 2147483648, %v10878_v9  ;;  %v4043_v43 = vand.u32 2147483647, %v10878_v9  ;;  %v7642_v38 = vld [vmem:[#allocation2 + $0x88] sm:$0xff] }
 0x5a3   :  { %6684 = vpow2.f32 %v6220_v3  ;;  %v10897_v25 = vadd.f32 %v3921_v31, %v3917_v29  ;;  %v10910_v51 = vadd.f32 1.0, %v6681_v18  ;;  %4657 = vmatpush.msra.mxu0 %v7638_v5  ;;  %vm4039_vm5 = vweird.f32 %v10878_v9  ;;  %v10942_v3 = vld [vmem:[#allocation2 + $0x820] ss:$0 sm:$0xff]  ;;  %v12460_v31 = vld [vmem:[#allocation16_spill] sm:$0xff] }
 0x5a4   :  { %6686 = vrcp.f32 %v10893_v30  ;;  %v3950_v14 = vpop.f32.mrf.mxu0  ;;  %4907 = vmatpush.msra.mxu2 %v7639_v19  ;;  %v10917_v32 = vadd.f32 %v3922_v55, %v3918_v6  ;;  %v4046_v11 = vor.u32 1.1754944e-38, %v4045_v61  ;;  %vm4044_vm0 = vcmp.eq.f32.partialorder %v4043_v43, 8.507059e+37  ;;  %v7649_v55 = vld [vmem:[#allocation2 + $0x28] sm:$0xff] }
 0x5a5   :  { %6688 = vpow2.f32 %v6226_v47  ;;  %4257 = vmatmul.f32.gmra.mxu0 %v10897_v25  ;;  %4315 = vmatmul.f32.gmra.mxu2 %v10897_v25  ;;  %v4016_v46 = vadd.f32 %v3950_v14, %v12457_v62  ;;  %v4174_v29 = vadd.f32 %v10942_v3, %v4002_v42  ;;  %v4118_v22 = vadd.f32 %v10822_v50, %v4117_v24  ;;  %v7651_v43 = vld [vmem:[#allocation2 + $0x408] sm:$0xff] }
 0x5a6   :  { %4658 = vmatpush.msra.mxu0 %v7640_v2  ;;  %4908 = vmatpush.msra.mxu2 %v7641_v35  ;;  %v4125_v18 = vand.u32 2147483648, %v10761_v36  ;;  %v4123_v6 = vand.u32 2147483647, %v10761_v36  ;;  %v7650_v36 = vld [vmem:[#allocation2 + $0x220] sm:$0xff]  ;;  %v7652_v2 = vld [vmem:[#allocation2 + $0x410] sm:$0xff]  ;;  %v4140_v24 = vand.u32 2147483648, %v10893_v30  ;;  %vm4149_vm8 = vweird.f32 %v10910_v51 }
 0x5a7   :  { %v6221_v48 = vmul.f32 -1.442695, %v4016_v46 }
 0x5a8   :  { %v10902_v23 = vpop.eup %6682  ;;  %4659 = vmatpush.msra.mxu0 %v7642_v38  ;;  %4909 = vmatpush.msra.mxu2 %v7643_v1  ;;  %vm4124_vm10 = vcmp.eq.f32.partialorder %v4123_v6, 8.507059e+37  ;;  %v7653_v1 = vld [vmem:[#allocation2 + $0x3e8] sm:$0xff]  ;;  %v7658_v6 = vld [vmem:[#allocation2 + $0x3b0] sm:$0xff] }
 0x5a9   :  { %v4035_v56 = vmul.f32 %v10902_v23, %v10878_v9  ;;  %v6685_v54 = vpop.eup %6684  ;;  %vm4040_vm4 = vweird.f32 %v10902_v23  ;;  %6690 = vpow2.f32 %v6221_v48  ;;  %v4126_v48 = vor.u32 1.1754944e-38, %v4125_v18 }
 0x5aa   :  { %v10912_v21 = vpop.eup %6686  ;;  %v10915_v49 = vadd.f32 1.0, %v6685_v54  ;;  %vm10933_vm6 = vmor %vm4039_vm5, %vm4040_vm4  ;;  %4660 = vmatpush.msra.mxu0 %v7645_v12  ;;  %4910 = vmatpush.msra.mxu2 %v7646_v63  ;;  %v4122_v54 = vsel %vm10960_vm9, %v10822_v50, %v4118_v22  ;;  %v7655_v22 = vld [vmem:[#allocation2 + $0x3c8] sm:$0xff] }
 0x5ab   :  { %v4036_v39 = vsub.f32 1.0, %v4035_v56  ;;  %v6689_v37 = vpop.eup %6688  ;;  %v4130_v58 = vmul.f32 %v10912_v21, %v10893_v30  ;;  %v4127_v50 = vsel %vm4124_vm10, %v4126_v48, %v4122_v54  ;;  %vm4135_vm13 = vweird.f32 %v10912_v21  ;;  %v7660_v48 = vld [vmem:[#allocation2 + $0x390] sm:$0xff] }
 0x5ac   :  { %6692 = vrcp.f32 %v10915_v49  ;;  %v10929_v0 = vadd.f32 1.0, %v6689_v37  ;;  %v3953_v47 = vpop.f32.mrf.mxu0  ;;  %4661 = vmatpush.msra.mxu0 %v7647_v52  ;;  %v4060_v61 = vand.u32 2147483648, %v10915_v49  ;;  %vm4054_vm14 = vweird.f32 %v10915_v49  ;;  %vm11009_vm2 = vmor %vm4134_vm12, %vm4135_vm13 }
 0x5ad   :  { %v4037_v60 = vmul.f32 %v10902_v23, %v4036_v39  ;;  %6694 = vrcp.f32 %v10910_v51  ;;  %4260 = vmatmul.f32.gmra.mxu0 %v10917_v32  ;;  %4318 = vmatmul.f32.gmra.mxu2 %v10917_v32  ;;  %v4017_v40 = vadd.f32 %v3953_v47, %v12460_v31  ;;  %v4131_v34 = vsub.f32 1.0, %v4130_v58  ;;  %v4005_v39 = vpop.f32.mrf.mxu2 }
 0x5ae   :  { %6696 = vrcp.f32 %v10929_v0  ;;  %4662 = vmatpush.msra.mxu0 %v7649_v55  ;;  %v4198_v18 = vmul.f32 %v4127_v50, %v10535_v57 }
 0x5af   :  { %v4038_v15 = vadd.f32 %v10902_v23, %v4037_v60  ;;  %v6691_v8 = vpop.eup %6690  ;;  %v6222_v20 = vmul.f32 -1.442695, %v4017_v40  ;;  %v4132_v5 = vmul.f32 %v10912_v21, %v4131_v34  ;;  %v4058_v60 = vand.u32 2147483647, %v10915_v49 }
 0x5b0   :  { %v10954_v56 = vadd.f32 1.0, %v6691_v8 }
 0x5b1   :  { %v4042_v9 = vsel %vm10933_vm6, %v10902_v23, %v4038_v15  ;;  %v7648_v23 = vld [vmem:[#allocation2 + $0x240] sm:$0xff]  ;;  %6698 = vpow2.f32 %v6222_v20  ;;  %v10987_v15 = vadd.f32 %v10912_v21, %v4132_v5  ;;  %vm4059_vm1 = vcmp.eq.f32.partialorder %v4058_v60, 8.507059e+37 }
 0x5b2   :  { %v4047_v7 = vsel %vm4044_vm0, %v4046_v11, %v4042_v9  ;;  %4911 = vmatpush.msra.mxu2 %v7648_v23  ;;  %v10949_v14 = vpop.eup %6692  ;;  %6700 = vrcp.f32 %v10954_v56  ;;  %v4190_v9 = vsub.f32 1.0, %v4127_v50  ;;  %v4138_v20 = vand.u32 2147483647, %v10893_v30  ;;  %v12466_v30 = vld [vmem:[#allocation20_spill] sm:$0xff] }
 0x5b3   :  { %v4178_v27 = vmul.f32 %v4174_v29, %v4047_v7  ;;  %v10956_v62 = vpop.eup %6694  ;;  %v4050_v16 = vmul.f32 %v10949_v14, %v10915_v49  ;;  %vm4055_vm11 = vweird.f32 %v10949_v14  ;;  %v4061_v29 = vor.u32 1.1754944e-38, %v4060_v61  ;;  %v7656_v7 = vld [vmem:[#allocation2 + $0x3d0] sm:$0xff] }
 0x5b4   :  { %4912 = vmatpush.msra.mxu2 %v7650_v36  ;;  %v10974_v42 = vmul.f32 %v10956_v62, %v10910_v51  ;;  %v10982_v35 = vpop.eup %6696  ;;  %vm4056_vm15 = vmor %vm4054_vm14, %vm4055_vm11  ;;  %v4175_v49 = vadd.f32 %v10942_v3, %v4005_v39  ;;  %v4073_v54 = vand.u32 2147483647, %v10954_v56  ;;  %v7659_v39 = vld [vmem:[#allocation2 + $0x388] sm:$0xff]  ;;  %vm4139_vm4 = vcmp.eq.f32.partialorder %v4138_v20, 8.507059e+37  ;;  %v7662_v61 = vld [vmem:[#allocation2 + $0x210] sm:$0xff] }
 0x5b5   :  { %v4182_v41 = vadd.f32 %v4178_v27, %v12463_v28  ;;  %v4051_v19 = vsub.f32 1.0, %v4050_v16  ;;  %4367 = vmatmul.f32.vlgmr.msrb.gmra.mxu0 %v10831_v17  ;;  %4425 = vmatmul.f32.vlgmr.msrb.gmra.mxu2 %v10831_v17  ;;  %v4160_v57 = vmul.f32 %v10982_v35, %v10929_v0  ;;  %v4137_v28 = vsel %vm11009_vm2, %v10912_v21, %v10987_v15  ;;  %v7691_v20 = vld [vmem:[#allocation2 + $0xe0] sm:$0xff] }
 0x5b6   :  { %4955 = vmatpush.msrb.mxu0 %v7651_v43  ;;  %5013 = vmatpush.msrb.mxu2 %v7652_v2  ;;  %v4146_v47 = vsub.f32 1.0, %v10974_v42  ;;  %v4075_v16 = vand.u32 2147483648, %v10954_v56  ;;  %v4141_v21 = vor.u32 1.1754944e-38, %v4140_v24  ;;  %vm4069_vm5 = vweird.f32 %v10954_v56  ;;  %v7661_v42 = vld [vmem:[#allocation2 + $0x200] sm:$0xff]  ;;  %v7663_v24 = vld [vmem:[#allocation2 + $0x368] sm:$0xff]  ;;  %v7680_v43 = vld [vmem:[#allocation2 + $0x170] sm:$0xff] }
 0x5b7   :  { %6702 = vtanh.f32 %v4182_v41  ;;  %v4052_v37 = vmul.f32 %v10949_v14, %v4051_v19  ;;  %v6699_v58 = vpop.eup %6698  ;;  %v4008_v41 = vpop.f32.mrf.mxu2  ;;  %vm4074_vm0 = vcmp.eq.f32.partialorder %v4073_v54, 8.507059e+37  ;;  %vm4150_vm7 = vweird.f32 %v10956_v62 }
 0x5b8   :  { %4956 = vmatpush.msrb.mxu0 %v7653_v1  ;;  %5014 = vmatpush.msrb.mxu2 %v7654_v10  ;;  %v10992_v11 = vpop.eup %6700  ;;  %v10997_v31 = vadd.f32 1.0, %v6699_v58  ;;  %v4147_v5 = vmul.f32 %v10956_v62, %v4146_v47  ;;  %v4142_v60 = vsel %vm4139_vm4, %v4141_v21, %v4137_v28  ;;  %v4076_v2 = vor.u32 1.1754944e-38, %v4075_v16  ;;  %v7664_v58 = vld [vmem:[#allocation2 + $0x370] sm:$0xff]  ;;  %v7665_v1 = vld [vmem:[#allocation2 + $0x1e0] sm:$0xff]  ;;  %vm11061_vm9 = vmor %vm4149_vm8, %vm4150_vm7 }
 0x5b9   :  { %v4053_v38 = vadd.f32 %v10949_v14, %v4052_v37  ;;  %v4065_v63 = vmul.f32 %v10992_v11, %v10954_v56  ;;  %vm4070_vm3 = vweird.f32 %v10992_v11  ;;  %v4161_v37 = vsub.f32 1.0, %v4160_v57  ;;  %v7666_v10 = vld [vmem:[#allocation2 + $0x1f0] sm:$0xff]  ;;  %v7671_v57 = vld [vmem:[#allocation2 + $0x1a0] sm:$0xff] }
 0x5ba   :  { %4957 = vmatpush.msrb.mxu0 %v7655_v22  ;;  %5015 = vmatpush.msrb.mxu2 %v7656_v7  ;;  %6704 = vrcp.f32 %v10997_v31  ;;  %vm11038_vm6 = vmor %vm4069_vm5, %vm4070_vm3  ;;  %v4176_v15 = vadd.f32 %v10942_v3, %v4008_v41  ;;  %v4148_v47 = vadd.f32 %v10956_v62, %v4147_v5  ;;  %v7670_v22 = vld [vmem:[#allocation2 + $0x1d0] sm:$0xff]  ;;  %v4153_v7 = vand.u32 2147483647, %v10910_v51 }
 0x5bb   :  { %v4057_v12 = vsel %vm4056_vm15, %v10949_v14, %v4053_v38  ;;  %v4066_v23 = vsub.f32 1.0, %v4065_v63  ;;  %v7657_v14 = vld [vmem:[#allocation2 + $0x3a8] sm:$0xff]  ;;  %v7669_v63 = vld [vmem:[#allocation2 + $0x1c0] sm:$0xff]  ;;  %v7672_v28 = vld [vmem:[#allocation2 + $0x1b0] sm:$0xff]  ;;  %v4199_v16 = vmul.f32 %v4142_v60, %v10593_v59  ;;  %vm4084_vm11 = vweird.f32 %v10997_v31 }
 0x5bc   :  { %v4062_v34 = vsel %vm4059_vm1, %v4061_v29, %v4057_v12  ;;  %4958 = vmatpush.msrb.mxu0 %v7657_v14  ;;  %5016 = vmatpush.msrb.mxu2 %v7658_v6  ;;  %v7667_v29 = vld [vmem:[#allocation2 + $0x348] sm:$0xff]  ;;  %v4088_v6 = vand.u32 2147483647, %v10997_v31  ;;  %v7676_v21 = vld [vmem:[#allocation2 + $0x190] sm:$0xff]  ;;  %vm4154_vm12 = vcmp.eq.f32.partialorder %v4153_v7, 8.507059e+37  ;;  %vm4165_vm15 = vweird.f32 %v10982_v35  ;;  %v7687_v7 = vld [vmem:[#allocation2 + $0x100] sm:$0xff] }
 0x5bd   :  { %v6703_v40 = vpop.eup %6702  ;;  %v4179_v52 = vmul.f32 %v4175_v49, %v4062_v34  ;;  %4370 = vmatmul.f32.gmra.mxu0 %v10874_v4  ;;  %4428 = vmatmul.f32.gmra.mxu2 %v10874_v4  ;;  %v4067_v36 = vmul.f32 %v10992_v11, %v4066_v23  ;;  %v4090_v34 = vand.u32 2147483648, %v10997_v31  ;;  %vm4164_vm1 = vweird.f32 %v10929_v0 }
 0x5be   :  { %v4194_v8 = vmul.f32 %v6703_v40, %v4190_v9  ;;  %4959 = vmatpush.msrb.mxu0 %v7659_v39  ;;  %5017 = vmatpush.msrb.mxu2 %v7660_v48  ;;  %v7668_v40 = vld [vmem:[#allocation2 + $0x350] sm:$0xff]  ;;  %v7675_v48 = vld [vmem:[#allocation2 + $0x180] sm:$0xff]  ;;  %vm4089_vm14 = vcmp.eq.f32.partialorder %v4088_v6, 8.507059e+37  ;;  %vm11098_vm2 = vmor %vm4164_vm1, %vm4165_vm15 }
 0x5bf   :  { %v4183_v55 = vadd.f32 %v4179_v52, %v12466_v30  ;;  %v4068_v19 = vadd.f32 %v10992_v11, %v4067_v36  ;;  %v12471_v52 = vld [vmem:[#allocation10_spill] sm:$0xff]  ;;  %v4011_v30 = vpop.f32.mrf.mxu2  ;;  %v7674_v36 = vld [vmem:[#allocation2 + $0x330] sm:$0xff]  ;;  %v4091_v5 = vor.u32 1.1754944e-38, %v4090_v34 }
 0x5c0   :  { %v11016_v46 = vadd.f32 %v4198_v18, %v4194_v8  ;;  %v11034_v50 = vpop.eup %6704  ;;  %4960 = vmatpush.msrb.mxu0 %v7663_v24  ;;  %5018 = vmatpush.msrb.mxu2 %v7664_v58  ;;  %v4162_v8 = vmul.f32 %v10982_v35, %v4161_v37  ;;  %v4191_v18 = vsub.f32 1.0, %v4142_v60  ;;  %v4177_v37 = vadd.f32 %v10942_v3, %v4011_v30  ;;  %v7679_v60 = vld [vmem:[#allocation2 + $0x160] sm:$0xff]  ;;  %v7689_v34 = vld [vmem:[#allocation2 + $0x2c8] sm:$0xff]  ;;  %v7695_v6 = vld [vmem:[#allocation2 + $0x2b0] sm:$0xff] }
 0x5c1   :  { %6706 = vtanh.f32 %v4183_v55  ;;  %v4072_v56 = vsel %vm11038_vm6, %v10992_v11, %v4068_v19  ;;  %v4080_v38 = vmul.f32 %v11034_v50, %v10997_v31  ;;  %v4155_v11 = vand.u32 2147483648, %v10910_v51  ;;  %v7673_v55 = vld [vmem:[#allocation2 + $0x328] sm:$0xff] }
 0x5c2   :  { %4222 = vmatmul.f32.vlgmr.msra.gmra.mxu3 %v11016_v46  ;;  %4280 = vmatmul.f32.vlgmr.msra.gmra.mxu1 %v11016_v46  ;;  %v4077_v9 = vsel %vm4074_vm0, %v4076_v2, %v4072_v56  ;;  %vm4085_vm10 = vweird.f32 %v11034_v50  ;;  %v4152_v51 = vsel %vm11061_vm9, %v10956_v62, %v4148_v47  ;;  %v7677_v19 = vld [vmem:[#allocation2 + $0x308] sm:$0xff]  ;;  %v4163_v2 = vadd.f32 %v10982_v35, %v4162_v8  ;;  %v12476_v47 = vld [vmem:[#allocation43_spill] sm:$0xff]  ;;  %v7704_v62 = vld [vmem:[#allocation2 + $0x60] sm:$0xff] }
 0x5c3   :  { %4618 = vmatpush.msra.mxu3 %v7661_v42  ;;  %4676 = vmatpush.msra.mxu1 %v7662_v61  ;;  %v4180_v12 = vmul.f32 %v4176_v15, %v4077_v9  ;;  %v4081_v49 = vsub.f32 1.0, %v4080_v38  ;;  %v4156_v54 = vor.u32 1.1754944e-38, %v4155_v11  ;;  %vm11079_vm13 = vmor %vm4084_vm11, %vm4085_vm10  ;;  %v7678_v42 = vld [vmem:[#allocation2 + $0x310] sm:$0xff]  ;;  %v4170_v58 = vand.u32 2147483648, %v10929_v0  ;;  %v7698_v30 = vld [vmem:[#allocation2 + $0x2a8] sm:$0xff] }
 0x5c4   :  { %4961 = vmatpush.msrb.mxu0 %v7667_v29  ;;  %5019 = vmatpush.msrb.mxu2 %v7668_v40  ;;  %v7682_v15 = vld [vmem:[#allocation2 + $0x150] sm:$0xff]  ;;  %v4168_v3 = vand.u32 2147483647, %v10929_v0  ;;  %v7683_v29 = vld [vmem:[#allocation2 + $0x120] sm:$0xff] }
 0x5c5   :  { %4619 = vmatpush.msra.mxu3 %v7665_v1  ;;  %4677 = vmatpush.msra.mxu1 %v7666_v10  ;;  %v4184_v23 = vadd.f32 %v4180_v12, %v12471_v52  ;;  %v4082_v14 = vmul.f32 %v11034_v50, %v4081_v49  ;;  %v4157_v61 = vsel %vm4154_vm12, %v4156_v54, %v4152_v51  ;;  %v7684_v40 = vld [vmem:[#allocation2 + $0x130] sm:$0xff]  ;;  %v7685_v49 = vld [vmem:[#allocation2 + $0x2e8] sm:$0xff]  ;;  %v7693_v52 = vld [vmem:[#allocation2 + $0xc0] sm:$0xff] }
 0x5c6   :  { %4373 = vmatmul.f32.gmra.mxu0 %v10897_v25  ;;  %4431 = vmatmul.f32.gmra.mxu2 %v10897_v25  ;;  %v4192_v38 = vsub.f32 1.0, %v4157_v61  ;;  %v4200_v0 = vmul.f32 %v4157_v61, %v10625_v26  ;;  %v4167_v12 = vsel %vm11098_vm2, %v10982_v35, %v4163_v2  ;;  %v7688_v8 = vld [vmem:[#allocation2 + $0x110] sm:$0xff]  ;;  %vm4169_vm3 = vcmp.eq.f32.partialorder %v4168_v3, 8.507059e+37  ;;  %v7709_v61 = vld [vmem:[#allocation2 + $0x20] sm:$0xff]  ;;  %v7720_v3 = vld [vmem:[#allocation2 + $0x5c8] sm:$0xff] }
 0x5c7   :  { %4620 = vmatpush.msra.mxu3 %v7669_v63  ;;  %4678 = vmatpush.msra.mxu1 %v7670_v22  ;;  %v6707_v27 = vpop.eup %6706  ;;  %6708 = vtanh.f32 %v4184_v23  ;;  %v4083_v39 = vadd.f32 %v11034_v50, %v4082_v14  ;;  %v7686_v63 = vld [vmem:[#allocation2 + $0x2f0] sm:$0xff]  ;;  %v4171_v22 = vor.u32 1.1754944e-38, %v4170_v58  ;;  %v7714_v2 = vld [vmem:[#allocation2 + $0x600] sm:$0xff]  ;;  %v7723_v10 = vld [vmem:[#allocation2 + $0x5a8] sm:$0xff] }
 0x5c8   :  { %v4195_v41 = vmul.f32 %v6707_v27, %v4191_v18  ;;  %4962 = vmatpush.msrb.mxu0 %v7673_v55  ;;  %5020 = vmatpush.msrb.mxu2 %v7674_v36  ;;  %v7690_v26 = vld [vmem:[#allocation2 + $0x2d0] sm:$0xff]  ;;  %v7700_v36 = vld [vmem:[#allocation2 + $0x80] sm:$0xff] }
 0x5c9   :  { %4621 = vmatpush.msra.mxu3 %v7671_v57  ;;  %4679 = vmatpush.msra.mxu1 %v7672_v28  ;;  %v4087_v31 = vsel %vm11079_vm13, %v11034_v50, %v4083_v39  ;;  %v7681_v50 = vld [vmem:[#allocation2 + $0x140] sm:$0xff]  ;;  %v4172_v27 = vsel %vm4169_vm3, %v4171_v22, %v4167_v12  ;;  %v7692_v35 = vld [vmem:[#allocation2 + $0xf0] sm:$0xff]  ;;  %v7730_v12 = vld [vmem:[#allocation2 + $0x548] sm:$0xff] }
 0x5ca   :  { %v11075_v59 = vadd.f32 %v4199_v16, %v4195_v41  ;;  %4963 = vmatpush.msrb.mxu0 %v7677_v19  ;;  %5021 = vmatpush.msrb.mxu2 %v7678_v42  ;;  %v4092_v24 = vsel %vm4089_vm14, %v4091_v5, %v4087_v31  ;;  %v7694_v23 = vld [vmem:[#allocation2 + $0xd0] sm:$0xff]  ;;  %v4193_v14 = vsub.f32 1.0, %v4172_v27  ;;  %v7696_v28 = vld [vmem:[#allocation2 + $0xa0] sm:$0xff]  ;;  %v4201_v51 = vmul.f32 %v4172_v27, %v10631_v45  ;;  %v7733_v22 = vld [vmem:[#allocation2 + $0x528] sm:$0xff] }
 0x5cb   :  { %4622 = vmatpush.msra.mxu3 %v7675_v48  ;;  %4680 = vmatpush.msra.mxu1 %v7676_v21  ;;  %v4181_v56 = vmul.f32 %v4177_v37, %v4092_v24  ;;  %v7697_v41 = vld [vmem:[#allocation2 + $0xb0] sm:$0xff]  ;;  %v7702_v48 = vld [vmem:[#allocation2 + $0x288] sm:$0xff]  ;;  %v7706_v45 = vld [vmem:[#allocation2 + $0x40] sm:$0xff] }
 0x5cc   :  { %4225 = vmatmul.f32.gmra.mxu3 %v11075_v59  ;;  %4283 = vmatmul.f32.gmra.mxu1 %v11075_v59  ;;  %v7699_v55 = vld [vmem:[#allocation2 + $0x290] sm:$0xff]  ;;  %v7711_v37 = vld [vmem:[#allocation2 + $0x268] sm:$0xff]  ;;  %v7716_v58 = vld [vmem:[#allocation2 + $0x5e0] sm:$0xff] }
 0x5cd   :  { %4623 = vmatpush.msra.mxu3 %v7679_v60  ;;  %4681 = vmatpush.msra.mxu1 %v7680_v43  ;;  %v6709_v1 = vpop.eup %6708  ;;  %v4185_v9 = vadd.f32 %v4181_v56, %v12476_v47  ;;  %v7701_v54 = vld [vmem:[#allocation2 + $0x90] sm:$0xff]  ;;  %v7713_v43 = vld [vmem:[#allocation2 + $0x248] sm:$0xff]  ;;  %v7724_v47 = vld [vmem:[#allocation2 + $0x580] sm:$0xff] }
 0x5ce   :  { %4376 = vmatmul.f32.gmra.mxu0 %v10917_v32  ;;  %4434 = vmatmul.f32.gmra.mxu2 %v10917_v32  ;;  %v4196_v11 = vmul.f32 %v6709_v1, %v4192_v38  ;;  %v7703_v21 = vld [vmem:[#allocation2 + $0x270] sm:$0xff]  ;;  %v7715_v24 = vld [vmem:[#allocation2 + $0x608] sm:$0xff]  ;;  %v7721_v38 = vld [vmem:[#allocation2 + $0x418] sm:$0xff] }
 0x5cf   :  { %4624 = vmatpush.msra.mxu3 %v7681_v50  ;;  %4682 = vmatpush.msra.mxu1 %v7682_v15  ;;  %6710 = vtanh.f32 %v4185_v9  ;;  %v7705_v5 = vld [vmem:[#allocation2 + $0x70] sm:$0xff]  ;;  %v7717_v56 = vld [vmem:[#allocation2 + $0x5e8] sm:$0xff]  ;;  %v7719_v15 = vld [vmem:[#allocation2 + $0x5c0] sm:$0xff] }
 0x5d0   :  { %4964 = vmatpush.msrb.mxu0 %v7685_v49  ;;  %5022 = vmatpush.msrb.mxu2 %v7686_v63  ;;  %v11107_v18 = vadd.f32 %v4200_v0, %v4196_v11  ;;  %v7707_v19 = vld [vmem:[#allocation2 + $0x50] sm:$0xff]  ;;  %v7718_v50 = vld [vmem:[#allocation2 + $0x228] sm:$0xff]  ;;  %v7722_v1 = vld [vmem:[#allocation2 + $0x5a0] sm:$0xff] }
 0x5d1   :  { %4625 = vmatpush.msra.mxu3 %v7683_v29  ;;  %4683 = vmatpush.msra.mxu1 %v7684_v40  ;;  %v7708_v42 = vld [vmem:[#allocation2 + $0x250] sm:$0xff]  ;;  %v7725_v9 = vld [vmem:[#allocation2 + $0x588] sm:$0xff]  ;;  %v7726_v29 = vld [vmem:[#allocation2 + $0x560] sm:$0xff] }
 0x5d2   :  { %4965 = vmatpush.msrb.mxu0 %v7689_v34  ;;  %5023 = vmatpush.msrb.mxu2 %v7690_v26  ;;  %v7710_v31 = vld [vmem:[#allocation2 + $0x30] sm:$0xff]  ;;  %v7727_v40 = vld [vmem:[#allocation2 + $0x568] sm:$0xff]  ;;  %v7728_v11 = vld [vmem:[#allocation2 + $0x3f8] sm:$0xff] }
 0x5d3   :  { %4626 = vmatpush.msra.mxu3 %v7687_v7  ;;  %4684 = vmatpush.msra.mxu1 %v7688_v8  ;;  %v7712_v60 = vld [vmem:[#allocation2 + $0x230] sm:$0xff]  ;;  %v7729_v0 = vld [vmem:[#allocation2 + $0x540] sm:$0xff]  ;;  %v7731_v49 = vld [vmem:[#allocation2 + $0x3d8] sm:$0xff] }
 0x5d4   :  { %4228 = vmatmul.f32.gmra.mxu3 %v11107_v18  ;;  %4286 = vmatmul.f32.gmra.mxu1 %v11107_v18  ;;  %v7732_v63 = vld [vmem:[#allocation2 + $0x520] sm:$0xff]  ;;  %v7735_v8 = vld [vmem:[#allocation2 + $0x508] sm:$0xff]  ;;  %v7736_v34 = vld [vmem:[#allocation2 + $0x3b8] sm:$0xff] }
 0x5d5   :  { %4627 = vmatpush.msra.mxu3 %v7691_v20  ;;  %4685 = vmatpush.msra.mxu1 %v7692_v35  ;;  %v6711_v57 = vpop.eup %6710  ;;  %v7734_v7 = vld [vmem:[#allocation2 + $0x500] sm:$0xff]  ;;  %v7738_v27 = vld [vmem:[#allocation2 + $0x4e8] sm:$0xff]  ;;  %v7739_v20 = vld [vmem:[#allocation2 + $0x398] sm:$0xff] }
 0x5d6   :  { %4663 = vmatmul.f32.vlgmr.msra.gmra.mxu0 %v11016_v46  ;;  %5024 = vmatpush.msrb.mxu2 %v7695_v6  ;;  %v4197_v16 = vmul.f32 %v6711_v57, %v4193_v14  ;;  %v7737_v26 = vld [vmem:[#allocation2 + $0x4e0] sm:$0xff]  ;;  %v7744_v6 = vld [vmem:[#allocation2 + $0x4a8] sm:$0xff] }
 0x5d7   :  { %4628 = vmatpush.msra.mxu3 %v7693_v52  ;;  %4686 = vmatpush.msra.mxu1 %v7694_v23  ;;  %v7740_v35 = vld [vmem:[#allocation2 + $0x4c0] sm:$0xff]  ;;  %v7741_v52 = vld [vmem:[#allocation2 + $0x4c8] sm:$0xff]  ;;  %v7742_v23 = vld [vmem:[#allocation2 + $0x378] sm:$0xff] }
 0x5d8   :  { %4966 = vmatpush.msrb.mxu0 %v7698_v30  ;;  %5025 = vmatpush.msrb.mxu2 %v7699_v55  ;;  %v11113_v39 = vadd.f32 %v4201_v51, %v4197_v16  ;;  %v7743_v14 = vld [vmem:[#allocation2 + $0x4a0] sm:$0xff]  ;;  %v7749_v51 = vld [vmem:[#allocation2 + $0x468] sm:$0xff]  ;;  %v7750_v30 = vld [vmem:[#allocation2 + $0x338] sm:$0xff] }
 0x5d9   :  { %4629 = vmatpush.msra.mxu3 %v7696_v28  ;;  %4687 = vmatpush.msra.mxu1 %v7697_v41  ;;  %v7745_v57 = vld [vmem:[#allocation2 + $0x480] sm:$0xff]  ;;  %v7746_v28 = vld [vmem:[#allocation2 + $0x488] sm:$0xff]  ;;  %v7747_v41 = vld [vmem:[#allocation2 + $0x358] sm:$0xff] }
 0x5da   :  { %4967 = vmatpush.msrb.mxu0 %v7702_v48  ;;  %5026 = vmatpush.msrb.mxu2 %v7703_v21  ;;  %v7748_v16 = vld [vmem:[#allocation2 + $0x460] sm:$0xff]  ;;  %v7755_v21 = vld [vmem:[#allocation2 + $0x428] sm:$0xff] }
 0x5db   :  { %4630 = vmatpush.msra.mxu3 %v7700_v36  ;;  %4688 = vmatpush.msra.mxu1 %v7701_v54  ;;  %v7751_v55 = vld [vmem:[#allocation2 + $0x440] sm:$0xff]  ;;  %v7752_v36 = vld [vmem:[#allocation2 + $0x448] sm:$0xff]  ;;  %v7753_v54 = vld [vmem:[#allocation2 + $0x318] sm:$0xff] }
 0x5dc   :  { %4231 = vmatmul.f32.gmra.mxu3 %v11113_v39  ;;  %4289 = vmatmul.f32.gmra.mxu1 %v11113_v39  ;;  %v7754_v48 = vld [vmem:[#allocation2 + $0x420] sm:$0xff] }
 0x5dd   :  { %4631 = vmatpush.msra.mxu3 %v7704_v62  ;;  %4689 = vmatpush.msra.mxu1 %v7705_v5  ;;  %v7756_v62 = vld [vmem:[#allocation2 + $0x610] sm:$0xff]  ;;  %v7757_v5 = vld [vmem:[#allocation2 + $0x618] sm:$0xff] }
 0x5de   :  { %4666 = vmatmul.f32.gmra.mxu0 %v11075_v59  ;;  %5027 = vmatpush.msrb.mxu2 %v7708_v42  ;;  %v7760_v42 = vld [vmem:[#allocation2 + $0x5f8] sm:$0xff] }
 0x5df   :  { %4632 = vmatpush.msra.mxu3 %v7706_v45  ;;  %4690 = vmatpush.msra.mxu1 %v7707_v19  ;;  %v7758_v45 = vld [vmem:[#allocation2 + $0x2f8] sm:$0xff]  ;;  %v7759_v19 = vld [vmem:[#allocation2 + $0x5f0] sm:$0xff] }
 0x5e0   :  { %4968 = vmatpush.msrb.mxu0 %v7711_v37  ;;  %5028 = vmatpush.msrb.mxu2 %v7712_v60  ;;  %v7763_v37 = vld [vmem:[#allocation2 + $0x5d8] sm:$0xff] }
 0x5e1   :  { %4633 = vmatpush.msra.mxu3 %v7709_v61  ;;  %4691 = vmatpush.msra.mxu1 %v7710_v31  ;;  %v7761_v61 = vld [vmem:[#allocation2 + $0x2d8] sm:$0xff]  ;;  %v7762_v31 = vld [vmem:[#allocation2 + $0x5d0] sm:$0xff] }
 0x5e2   :  { %4969 = vmatpush.msrb.mxu0 %v7713_v43  ;;  %v7764_v60 = vld [vmem:[#allocation2 + $0x2b8] sm:$0xff]  ;;  %v7765_v43 = vld [vmem:[#allocation2 + $0x5b0] sm:$0xff] }
 0x5e4   :  { %4338 = vmatmul.f32.vlgmr.msrb.gmra.mxu3 %v11016_v46  ;;  %4396 = vmatmul.f32.vlgmr.msrb.gmra.mxu1 %v11016_v46 }
 0x5e5   :  { %4926 = vmatpush.msrb.mxu3 %v7714_v2  ;;  %4984 = vmatpush.msrb.mxu1 %v7715_v24  ;;  %v7766_v2 = vld [vmem:[#allocation2 + $0x5b8] sm:$0xff]  ;;  %v7767_v24 = vld [vmem:[#allocation2 + $0x590] sm:$0xff] }
 0x5e6   :  { %4669 = vmatmul.f32.gmra.mxu0 %v11107_v18 }
 0x5e7   :  { %4927 = vmatpush.msrb.mxu3 %v7716_v58  ;;  %4985 = vmatpush.msrb.mxu1 %v7717_v56  ;;  %v7768_v58 = vld [vmem:[#allocation2 + $0x598] sm:$0xff] }
 0x5e8   :  { %4970 = vmatpush.msrb.mxu0 %v7718_v50  ;;  %v7769_v56 = vld [vmem:[#allocation2 + $0x298] sm:$0xff]  ;;  %v7770_v50 = vld [vmem:[#allocation2 + $0x570] sm:$0xff] }
 0x5e9   :  { %4928 = vmatpush.msrb.mxu3 %v7719_v15  ;;  %4986 = vmatpush.msrb.mxu1 %v7720_v3  ;;  %v7771_v15 = vld [vmem:[#allocation2 + $0x578] sm:$0xff] }
 0x5ea   :  { %5071 = vmatpush.msra.mxu0 %v7721_v38  ;;  %v7772_v3 = vld [vmem:[#allocation2 + $0x278] sm:$0xff]  ;;  %v7773_v38 = vld [vmem:[#allocation2 + $0x550] sm:$0xff] }
 0x5eb   :  { %4929 = vmatpush.msrb.mxu3 %v7722_v1  ;;  %4987 = vmatpush.msrb.mxu1 %v7723_v10  ;;  %v7774_v1 = vld [vmem:[#allocation2 + $0x558] sm:$0xff] }
 0x5ec   :  { %4341 = vmatmul.f32.gmra.mxu3 %v11075_v59  ;;  %4399 = vmatmul.f32.gmra.mxu1 %v11075_v59  ;;  %v7775_v10 = vld [vmem:[#allocation2 + $0x258] sm:$0xff] }
 0x5ed   :  { %4930 = vmatpush.msrb.mxu3 %v7724_v47  ;;  %4988 = vmatpush.msrb.mxu1 %v7725_v9  ;;  %v7776_v47 = vld [vmem:[#allocation2 + $0x530] sm:$0xff]  ;;  %v7777_v9 = vld [vmem:[#allocation2 + $0x538] sm:$0xff] }
 0x5ee   :  { %4672 = vmatmul.f32.gmra.mxu0 %v11113_v39 }
 0x5ef   :  { %4931 = vmatpush.msrb.mxu3 %v7726_v29  ;;  %4989 = vmatpush.msrb.mxu1 %v7727_v40  ;;  %v7778_v29 = vld [vmem:[#allocation2 + $0x510] sm:$0xff]  ;;  %v7779_v40 = vld [vmem:[#allocation2 + $0x518] sm:$0xff] }
 0x5f0   :  { %5072 = vmatpush.msra.mxu0 %v7728_v11  ;;  %v7780_v11 = vld [vmem:[#allocation2 + $0x238] sm:$0xff] }
 0x5f1   :  { %4932 = vmatpush.msrb.mxu3 %v7729_v0  ;;  %4990 = vmatpush.msrb.mxu1 %v7730_v12  ;;  %v7781_v0 = vld [vmem:[#allocation2 + $0x4f0] sm:$0xff]  ;;  %v7782_v12 = vld [vmem:[#allocation2 + $0x4f8] sm:$0xff] }
 0x5f2   :  { %5073 = vmatpush.msra.mxu0 %v7731_v49 }
 0x5f3   :  { %4933 = vmatpush.msrb.mxu3 %v7732_v63  ;;  %4991 = vmatpush.msrb.mxu1 %v7733_v22  ;;  %v7783_v63 = vld [vmem:[#allocation2 + $0x4d0] sm:$0xff]  ;;  %v7784_v22 = vld [vmem:[#allocation2 + $0x4d8] sm:$0xff] }
 0x5f4   :  { %4344 = vmatmul.f32.gmra.mxu3 %v11107_v18  ;;  %4402 = vmatmul.f32.gmra.mxu1 %v11107_v18 }
 0x5f5   :  { %4934 = vmatpush.msrb.mxu3 %v7734_v7  ;;  %4992 = vmatpush.msrb.mxu1 %v7735_v8  ;;  %v7785_v7 = vld [vmem:[#allocation2 + $0x4b0] sm:$0xff]  ;;  %v7786_v8 = vld [vmem:[#allocation2 + $0x4b8] sm:$0xff] }
 0x5f6   :  { %5074 = vmatpush.msra.mxu0 %v7736_v34  ;;  %v7787_v34 = vld [vmem:[#allocation2 + $0x490] sm:$0xff] }
 0x5f7   :  { %4935 = vmatpush.msrb.mxu3 %v7737_v26  ;;  %4993 = vmatpush.msrb.mxu1 %v7738_v27  ;;  %v7788_v26 = vld [vmem:[#allocation2 + $0x498] sm:$0xff]  ;;  %v7789_v27 = vld [vmem:[#allocation2 + $0x470] sm:$0xff] }
 0x5f8   :  { %5075 = vmatpush.msra.mxu0 %v7739_v20  ;;  %v7790_v20 = vld [vmem:[#allocation2 + $0x478] sm:$0xff] }
 0x5f9   :  { %4936 = vmatpush.msrb.mxu3 %v7740_v35  ;;  %4994 = vmatpush.msrb.mxu1 %v7741_v52  ;;  %v7791_v35 = vld [vmem:[#allocation2 + $0x450] sm:$0xff]  ;;  %v7792_v52 = vld [vmem:[#allocation2 + $0x458] sm:$0xff] }
 0x5fa   :  { %5076 = vmatpush.msra.mxu0 %v7742_v23 }
 0x5fb   :  { %4937 = vmatpush.msrb.mxu3 %v7743_v14  ;;  %4995 = vmatpush.msrb.mxu1 %v7744_v6  ;;  %v7793_v14 = vld [vmem:[#allocation2 + $0x430] sm:$0xff]  ;;  %v7794_v6 = vld [vmem:[#allocation2 + $0x438] sm:$0xff] }
 0x5fc   :  { %4347 = vmatmul.f32.gmra.mxu3 %v11113_v39  ;;  %4405 = vmatmul.f32.gmra.mxu1 %v11113_v39 }
 0x5fd   :  { %4938 = vmatpush.msrb.mxu3 %v7745_v57  ;;  %4996 = vmatpush.msrb.mxu1 %v7746_v28 }
 0x5fe   :  { %5077 = vmatpush.msra.mxu0 %v7747_v41 }
 0x5ff   :  { %4939 = vmatpush.msrb.mxu3 %v7748_v16  ;;  %4997 = vmatpush.msrb.mxu1 %v7749_v51 }
 0x600   :  { %5078 = vmatpush.msra.mxu0 %v7750_v30 }
 0x601   :  { %4940 = vmatpush.msrb.mxu3 %v7751_v55  ;;  %4998 = vmatpush.msrb.mxu1 %v7752_v36 }
 0x602   :  { %5079 = vmatpush.msra.mxu0 %v7753_v54 }
 0x603   :  { %4941 = vmatpush.msrb.mxu3 %v7754_v48  ;;  %4999 = vmatpush.msrb.mxu1 %v7755_v21 }
 0x604   :  { %4634 = vmatmul.f32.vlgmr.msra.gmra.mxu3 %v11016_v46  ;;  %4692 = vmatmul.f32.vlgmr.msra.gmra.mxu1 %v11016_v46 }
 0x605   :  { %5042 = vmatpush.msra.mxu3 %v7756_v62  ;;  %5100 = vmatpush.msra.mxu1 %v7757_v5 }
 0x606   :  { %5080 = vmatpush.msra.mxu0 %v7758_v45 }
 0x607   :  { %5043 = vmatpush.msra.mxu3 %v7759_v19  ;;  %5101 = vmatpush.msra.mxu1 %v7760_v42 }
 0x608   :  { %5081 = vmatpush.msra.mxu0 %v7761_v61 }
 0x609   :  { %5044 = vmatpush.msra.mxu3 %v7762_v31  ;;  %5102 = vmatpush.msra.mxu1 %v7763_v37 }
 0x60a   :  { %5082 = vmatpush.msra.mxu0 %v7764_v60 }
 0x60b   :  { %5045 = vmatpush.msra.mxu3 %v7765_v43  ;;  %5103 = vmatpush.msra.mxu1 %v7766_v2  ;;  %v4252_v49 = vpop.f32.mrf.mxu0 }
 0x60c   :  { %4637 = vmatmul.f32.gmra.mxu3 %v11075_v59  ;;  %4695 = vmatmul.f32.gmra.mxu1 %v11075_v59 }
 0x60d   :  { %5046 = vmatpush.msra.mxu3 %v7767_v24  ;;  %5104 = vmatpush.msra.mxu1 %v7768_v58 }
 0x60e   :  { %5083 = vmatpush.msra.mxu0 %v7769_v56 }
 0x60f   :  { %5047 = vmatpush.msra.mxu3 %v7770_v50  ;;  %5105 = vmatpush.msra.mxu1 %v7771_v15 }
 0x610   :  { %5084 = vmatpush.msra.mxu0 %v7772_v3 }
 0x611   :  { %5048 = vmatpush.msra.mxu3 %v7773_v38  ;;  %5106 = vmatpush.msra.mxu1 %v7774_v1  ;;  %v4310_v51 = vpop.f32.mrf.mxu2 }
 0x612   :  { %5085 = vmatpush.msra.mxu0 %v7775_v10 }
 0x613   :  { %5049 = vmatpush.msra.mxu3 %v7776_v47  ;;  %5107 = vmatpush.msra.mxu1 %v7777_v9 }
 0x614   :  { %4640 = vmatmul.f32.gmra.mxu3 %v11107_v18  ;;  %4698 = vmatmul.f32.gmra.mxu1 %v11107_v18 }
 0x615   :  { %5050 = vmatpush.msra.mxu3 %v7778_v29  ;;  %5108 = vmatpush.msra.mxu1 %v7779_v40  ;;  %v4255_v23 = vpop.f32.mrf.mxu0 }
 0x616   :  { %5086 = vmatpush.msra.mxu0 %v7780_v11 }
 0x617   :  { %5051 = vmatpush.msra.mxu3 %v7781_v0  ;;  %5109 = vmatpush.msra.mxu1 %v7782_v12 }
 0x619   :  { %5052 = vmatpush.msra.mxu3 %v7783_v63  ;;  %5110 = vmatpush.msra.mxu1 %v7784_v22 }
 0x61b   :  { %5053 = vmatpush.msra.mxu3 %v7785_v7  ;;  %5111 = vmatpush.msra.mxu1 %v7786_v8  ;;  %v4313_v5 = vpop.f32.mrf.mxu2 }
 0x61c   :  { %4643 = vmatmul.f32.gmra.mxu3 %v11113_v39  ;;  %4701 = vmatmul.f32.gmra.mxu1 %v11113_v39 }
 0x61d   :  { %5054 = vmatpush.msra.mxu3 %v7787_v34  ;;  %5112 = vmatpush.msra.mxu1 %v7788_v26 }
 0x61f   :  { %5055 = vmatpush.msra.mxu3 %v7789_v27  ;;  %5113 = vmatpush.msra.mxu1 %v7790_v20 }
 0x621   :  { %5056 = vmatpush.msra.mxu3 %v7791_v35  ;;  %5114 = vmatpush.msra.mxu1 %v7792_v52 }
 0x622   :  { %v4258_v57 = vpop.f32.mrf.mxu0 }
 0x623   :  { %5057 = vmatpush.msra.mxu3 %v7793_v14  ;;  %5115 = vmatpush.msra.mxu1 %v7794_v6 }
 0x628   :  { %v4316_v50 = vpop.f32.mrf.mxu2 }
 0x62a   :  { %v4261_v28 = vpop.f32.mrf.mxu0 }
 0x630   :  { %v4319_v22 = vpop.f32.mrf.mxu2 }
 0x632   :  { %v11136_v16 = vpop.f32.mrf.mxu0 }
 0x63a   :  { %v11139_v21 = vpop.f32.mrf.mxu0 }
 0x63f   :  { %v4281_v41 = vpop.f32.mrf.mxu1 }
 0x640   :  { %v4282_v62 = vadd.f32 %v4281_v41, %v12313_v33 }
 0x642   :  { %v4311_v19 = vadd.f32 %v4310_v51, %v4282_v62 }
 0x643   :  { %v11144_v24 = vpop.f32.mrf.mxu0 }
 0x644   :  { %v6231_v43 = vmul.f32 -1.442695, %v4311_v19  ;;  %v4426_v19 = vpop.f32.mrf.mxu2 }
 0x645   :  { %v4223_v30 = vpop.f32.mrf.mxu3 }
 0x646   :  { %v4224_v55 = vadd.f32 %v4223_v30, %v12314_v44 }
 0x648   :  { %v4253_v36 = vadd.f32 %v4252_v49, %v4224_v55 }
 0x649   :  { %v4284_v48 = vpop.f32.mrf.mxu1 }
 0x64a   :  { %v6227_v54 = vmul.f32 -1.442695, %v4253_v36  ;;  %v4285_v45 = vadd.f32 %v4284_v48, %v12313_v33 }
 0x64b   :  { %v11154_v11 = vpop.f32.mrf.mxu0 }
 0x64c   :  { %6712 = vpow2.f32 %v6227_v54  ;;  %v4314_v60 = vadd.f32 %v4313_v5, %v4285_v45  ;;  %v12477_v5 = vld [vmem:[#allocation50_spill] sm:$0xff] }
 0x64d   :  { %6714 = vpow2.f32 %v6231_v43 }
 0x64e   :  { %v6232_v56 = vmul.f32 -1.442695, %v4314_v60 }
 0x64f   :  { %v4226_v42 = vpop.f32.mrf.mxu3 }
 0x650   :  { %v4227_v61 = vadd.f32 %v4226_v42, %v12314_v44 }
 0x651   :  { %v4287_v31 = vpop.f32.mrf.mxu1 }
 0x652   :  { %v6713_v37 = vpop.eup %6712  ;;  %v4256_v2 = vadd.f32 %v4255_v23, %v4227_v61  ;;  %v4288_v38 = vadd.f32 %v4287_v31, %v12313_v33 }
 0x653   :  { %v11146_v58 = vadd.f32 1.0, %v6713_v37  ;;  %v6715_v10 = vpop.eup %6714  ;;  %v4664_v51 = vpop.f32.mrf.mxu0 }
 0x654   :  { %v6228_v15 = vmul.f32 -1.442695, %v4256_v2  ;;  %v4317_v9 = vadd.f32 %v4316_v50, %v4288_v38  ;;  %v11156_v49 = vadd.f32 1.0, %v6715_v10 }
 0x655   :  { %6716 = vrcp.f32 %v11146_v58  ;;  %v4465_v61 = vand.u32 2147483648, %v11146_v58  ;;  %vm4459_vm5 = vweird.f32 %v11146_v58  ;;  %v4463_v2 = vand.u32 2147483647, %v11146_v58 }
 0x656   :  { %6718 = vpow2.f32 %v6232_v56  ;;  %v6233_v8 = vmul.f32 -1.442695, %v4317_v9  ;;  %v4541_v50 = vand.u32 2147483648, %v11156_v49  ;;  %vm4535_vm7 = vweird.f32 %v11156_v49 }
 0x657   :  { %v4229_v3 = vpop.f32.mrf.mxu3  ;;  %6720 = vpow2.f32 %v6228_v15  ;;  %vm4464_vm0 = vcmp.eq.f32.partialorder %v4463_v2, 8.507059e+37 }
 0x658   :  { %v4230_v47 = vadd.f32 %v4229_v3, %v12314_v44  ;;  %6722 = vrcp.f32 %v11156_v49 }
 0x659   :  { %v4290_v1 = vpop.f32.mrf.mxu1  ;;  %6724 = vpow2.f32 %v6233_v8 }
 0x65a   :  { %v4291_v29 = vadd.f32 %v4290_v1, %v12313_v33  ;;  %v4259_v7 = vadd.f32 %v4258_v57, %v4230_v47 }
 0x65b   :  { %v11152_v40 = vpop.eup %6716 }
 0x65c   :  { %v6719_v12 = vpop.eup %6718  ;;  %v4320_v34 = vadd.f32 %v4319_v22, %v4291_v29  ;;  %v4455_v26 = vmul.f32 %v11152_v40, %v11146_v58  ;;  %v6229_v52 = vmul.f32 -1.442695, %v4259_v7  ;;  %vm4460_vm4 = vweird.f32 %v11152_v40 }
 0x65d   :  { %v6721_v63 = vpop.eup %6720  ;;  %v11160_v27 = vadd.f32 1.0, %v6719_v12  ;;  %vm11186_vm6 = vmor %vm4459_vm5, %vm4460_vm4  ;;  %v4466_v58 = vor.u32 1.1754944e-38, %v4465_v61  ;;  %v11205_v7 = vor.u32 1.1754944e-38, %v4541_v50 }
 0x65e   :  { %v11164_v35 = vadd.f32 1.0, %v6721_v63  ;;  %v6234_v23 = vmul.f32 -1.442695, %v4320_v34  ;;  %v4456_v14 = vsub.f32 1.0, %v4455_v26  ;;  %v11168_v30 = vpop.eup %6722  ;;  %v12480_v26 = vld [vmem:[#allocation53_spill] sm:$0xff] }
 0x65f   :  { %v4232_v0 = vpop.f32.mrf.mxu3  ;;  %6726 = vrcp.f32 %v11160_v27  ;;  %v6725_v54 = vpop.eup %6724  ;;  %v4531_v62 = vmul.f32 %v11168_v30, %v11156_v49  ;;  %vm4536_vm9 = vweird.f32 %v11168_v30  ;;  %vm4550_vm14 = vweird.f32 %v11160_v27 }
 0x660   :  { %v4233_v20 = vadd.f32 %v4232_v0, %v12314_v44  ;;  %6728 = vrcp.f32 %v11164_v35  ;;  %v4457_v55 = vmul.f32 %v11152_v40, %v4456_v14  ;;  %v11181_v37 = vadd.f32 1.0, %v6725_v54  ;;  %v4667_v0 = vpop.f32.mrf.mxu0  ;;  %vm11251_vm13 = vmor %vm4535_vm7, %vm4536_vm9 }
 0x661   :  { %v4397_v41 = vpop.f32.mrf.mxu1  ;;  %6730 = vpow2.f32 %v6229_v52  ;;  %v4532_v56 = vsub.f32 1.0, %v4531_v62  ;;  %vm4474_vm10 = vweird.f32 %v11164_v35 }
 0x662   :  { %v4262_v6 = vadd.f32 %v4261_v28, %v4233_v20  ;;  %6732 = vpow2.f32 %v6234_v23  ;;  %v4785_v28 = vadd.f32 %v4664_v51, %v12477_v5  ;;  %v4458_v42 = vadd.f32 %v11152_v40, %v4457_v55 }
 0x663   :  { %v4398_v10 = vadd.f32 %v4397_v41, %v8665_v53  ;;  %v4533_v34 = vmul.f32 %v11168_v30, %v4532_v56  ;;  %v4786_v20 = vadd.f32 %v4667_v0, %v12480_v26  ;;  %v4480_v55 = vand.u32 2147483648, %v11164_v35 }
 0x664   :  { %v6230_v36 = vmul.f32 -1.442695, %v4262_v6  ;;  %v6239_v15 = vmul.f32 -1.442695, %v4785_v28  ;;  %v4462_v47 = vsel %vm11186_vm6, %v11152_v40, %v4458_v42  ;;  %v4478_v28 = vand.u32 2147483647, %v11164_v35 }
 0x665   :  { %v11171_v48 = vpop.eup %6726  ;;  %v4467_v40 = vsel %vm4464_vm0, %v4466_v58, %v4462_v47  ;;  %v4427_v52 = vadd.f32 %v4426_v19, %v4398_v10  ;;  %v4556_v19 = vand.u32 2147483648, %v11160_v27  ;;  %v4539_v42 = vand.u32 2147483647, %v11156_v49 }
 0x666   :  { %v11176_v45 = vpop.eup %6728  ;;  %6734 = vpow2.f32 %v6230_v36  ;;  %v4546_v29 = vmul.f32 %v11171_v48, %v11160_v27  ;;  %vm4479_vm12 = vcmp.eq.f32.partialorder %v4478_v28, 8.507059e+37  ;;  %vm4551_vm1 = vweird.f32 %v11171_v48 }
 0x667   :  { %v4339_v57 = vpop.f32.mrf.mxu3  ;;  %v6731_v31 = vpop.eup %6730  ;;  %v4470_v38 = vmul.f32 %v11176_v45, %v11164_v35  ;;  %6736 = vrcp.f32 %v11181_v37  ;;  %v4590_v51 = vmul.f32 %v4467_v40, %v4427_v52  ;;  %vm4475_vm8 = vweird.f32 %v11176_v45  ;;  %vm11290_vm4 = vmor %vm4550_vm14, %vm4551_vm1 }
 0x668   :  { %v6733_v43 = vpop.eup %6732  ;;  %v11192_v1 = vadd.f32 1.0, %v6731_v31  ;;  %v4340_v63 = vadd.f32 %v4339_v57, %v8681_v13  ;;  %6738 = vpow2.f32 %v6239_v15  ;;  %v4547_v23 = vsub.f32 1.0, %v4546_v29  ;;  %v4429_v57 = vpop.f32.mrf.mxu2  ;;  %vm11230_vm11 = vmor %vm4474_vm10, %vm4475_vm8 }
 0x669   :  { %v4400_v9 = vpop.f32.mrf.mxu1  ;;  %v11201_v12 = vadd.f32 1.0, %v6733_v43  ;;  %v4471_v8 = vsub.f32 1.0, %v4470_v38  ;;  %v6240_v31 = vmul.f32 -1.442695, %v4786_v20  ;;  %v4534_v43 = vadd.f32 %v11168_v30, %v4533_v34 }
 0x66a   :  { %6740 = vrcp.f32 %v11192_v1  ;;  %v4369_v14 = vadd.f32 %v11136_v16, %v4340_v63  ;;  %v4401_v62 = vadd.f32 %v4400_v9, %v8665_v53  ;;  %v4548_v15 = vmul.f32 %v11171_v48, %v4547_v23 }
 0x66b   :  { %6742 = vrcp.f32 %v11201_v12  ;;  %v4472_v6 = vmul.f32 %v11176_v45, %v4471_v8  ;;  %v4481_v38 = vor.u32 1.1754944e-38, %v4480_v55  ;;  %vm11256_vm15 = vcmp.eq.f32.partialorder %v4539_v42, 8.507059e+37 }
 0x66c   :  { %v6735_v22 = vpop.eup %6734  ;;  %v4594_v2 = vadd.f32 %v4590_v51, %v4369_v14  ;;  %v4430_v58 = vadd.f32 %v4429_v57, %v4401_v62  ;;  %v4549_v26 = vadd.f32 %v11171_v48, %v4548_v15  ;;  %v4495_v57 = vand.u32 2147483648, %v11192_v1 }
 0x66d   :  { %v11213_v41 = vadd.f32 1.0, %v6735_v22  ;;  %v11217_v54 = vpop.eup %6736  ;;  %v4473_v5 = vadd.f32 %v11176_v45, %v4472_v6  ;;  %vm4565_vm5 = vweird.f32 %v11181_v37  ;;  %vm4489_vm0 = vweird.f32 %v11192_v1 }
 0x66e   :  { %v6739_v61 = vpop.eup %6738  ;;  %v4561_v35 = vmul.f32 %v11217_v54, %v11181_v37  ;;  %vm4566_vm6 = vweird.f32 %v11217_v54  ;;  %vm4580_vm1 = vweird.f32 %v11201_v12 }
 0x66f   :  { %v4342_v60 = vpop.f32.mrf.mxu3  ;;  %v4477_v3 = vsel %vm11230_vm11, %v11176_v45, %v4473_v5  ;;  %6744 = vrcp.f32 %v11213_v41  ;;  %v4557_v45 = vor.u32 1.1754944e-38, %v4556_v19  ;;  %v11266_v40 = vadd.f32 1.0, %v6739_v61  ;;  %vm11326_vm10 = vmor %vm4565_vm5, %vm4566_vm6 }
 0x670   :  { %v4343_v16 = vadd.f32 %v4342_v60, %v8681_v13  ;;  %v4554_v60 = vand.u32 2147483647, %v11160_v27  ;;  %v11235_v50 = vpop.eup %6740  ;;  %v4482_v63 = vsel %vm4479_vm12, %v4481_v38, %v4477_v3  ;;  %6746 = vtanh.f32 %v4594_v2 }
 0x671   :  { %v4403_v10 = vpop.f32.mrf.mxu1  ;;  %v11243_v47 = vpop.eup %6742  ;;  %v4591_v22 = vmul.f32 %v4482_v63, %v4430_v58  ;;  %v4485_v49 = vmul.f32 %v11235_v50, %v11192_v1  ;;  %v4562_v8 = vsub.f32 1.0, %v4561_v35  ;;  %6748 = vpow2.f32 %v6240_v31 }
 0x672   :  { %v4372_v9 = vadd.f32 %v11139_v21, %v4343_v16  ;;  %v4538_v21 = vsel %vm11251_vm13, %v11168_v30, %v4534_v43  ;;  %vm11268_vm2 = vcmp.eq.f32.partialorder %v4554_v60, 8.507059e+37  ;;  %v4432_v30 = vpop.f32.mrf.mxu2  ;;  %v4576_v23 = vmul.f32 %v11243_v47, %v11201_v12 }
 0x673   :  { %v4486_v52 = vsub.f32 1.0, %v4485_v49  ;;  %v4543_v14 = vsel %vm11256_vm15, %v11205_v7, %v4538_v21  ;;  %v4404_v6 = vadd.f32 %v4403_v10, %v8665_v53  ;;  %vm4490_vm3 = vweird.f32 %v11235_v50  ;;  %v7795_v7 = vld [vmem:[#allocation2 + $0x208] sm:$0xff] }
 0x674   :  { %v4595_v20 = vadd.f32 %v4591_v22, %v4372_v9  ;;  %v4493_v5 = vand.u32 2147483647, %v11192_v1  ;;  %v4563_v16 = vmul.f32 %v11217_v54, %v4562_v8  ;;  %v4571_v19 = vand.u32 2147483648, %v11181_v37  ;;  %vm4491_vm7 = vmor %vm4489_vm0, %vm4490_vm3 }
 0x675   :  { %v11280_v55 = vpop.eup %6744  ;;  %v4487_v62 = vmul.f32 %v11235_v50, %v4486_v52  ;;  %v4577_v61 = vsub.f32 1.0, %v4576_v23  ;;  %v4602_v31 = vsub.f32 1.0, %v4543_v14  ;;  %v4496_v43 = vor.u32 1.1754944e-38, %v4495_v57  ;;  %v4670_v23 = vpop.f32.mrf.mxu0 }
 0x676   :  { %v6747_v42 = vpop.eup %6746  ;;  %6750 = vtanh.f32 %v4595_v20  ;;  %v4500_v56 = vmul.f32 %v11280_v55, %v11213_v41  ;;  %v4433_v15 = vadd.f32 %v4432_v30, %v4404_v6  ;;  %vm4494_vm8 = vcmp.eq.f32.partialorder %v4493_v5, 8.507059e+37 }
 0x677   :  { %v4345_v36 = vpop.f32.mrf.mxu3  ;;  %v4488_v27 = vadd.f32 %v11235_v50, %v4487_v62  ;;  %v11307_v60 = vpop.eup %6748  ;;  %v4606_v3 = vmul.f32 %v6747_v42, %v4602_v31  ;;  %v4564_v9 = vadd.f32 %v11217_v54, %v4563_v16  ;;  %v4510_v0 = vand.u32 2147483648, %v11213_v41  ;;  %v7796_v16 = vld [vmem:[#allocation2 + $0x400] sm:$0xff]  ;;  %v12494_v42 = vld [vmem:[#allocation56_spill] sm:$0xff] }
 0x678   :  { %v4346_v28 = vadd.f32 %v4345_v36, %v8681_v13  ;;  %v4553_v36 = vsel %vm11290_vm4, %v11171_v48, %v4549_v26  ;;  %v4501_v10 = vsub.f32 1.0, %v4500_v56  ;;  %vm4505_vm9 = vweird.f32 %v11280_v55 }
 0x679   :  { %v4406_v2 = vpop.f32.mrf.mxu1  ;;  %v4492_v48 = vsel %vm4491_vm7, %v11235_v50, %v4488_v27  ;;  %v4558_v1 = vsel %vm11268_vm2, %v4557_v45, %v4553_v36  ;;  %v4508_v50 = vand.u32 2147483647, %v11213_v41  ;;  %v4578_v45 = vmul.f32 %v11243_v47, %v4577_v61 }
 0x67a   :  { %v4375_v35 = vadd.f32 %v11144_v24, %v4346_v28  ;;  %v4497_v38 = vsel %vm4494_vm8, %v4496_v43, %v4492_v48  ;;  %v4407_v29 = vadd.f32 %v4406_v2, %v8665_v53  ;;  %v4502_v63 = vmul.f32 %v11280_v55, %v4501_v10  ;;  %v4435_v34 = vpop.f32.mrf.mxu2  ;;  %v12493_v28 = vld [vmem:[#allocation39_spill] sm:$0xff]  ;;  %v7797_v43 = vld [vmem:[#allocation2 + $0x1e8] sm:$0xff] }
 0x67b   :  { %v4592_v58 = vmul.f32 %v4497_v38, %v4433_v15  ;;  %v4610_v24 = vmul.f32 %v4543_v14, %v10831_v17  ;;  %v4603_v22 = vsub.f32 1.0, %v4558_v1  ;;  %v4569_v20 = vand.u32 2147483647, %v11181_v37 }
 0x67c   :  { %v6751_v21 = vpop.eup %6750  ;;  %v4503_v17 = vadd.f32 %v11280_v55, %v4502_v63  ;;  %vm4504_vm11 = vweird.f32 %v11213_v41  ;;  %v4568_v14 = vsel %vm11326_vm10, %v11217_v54, %v4564_v9  ;;  %v4436_v6 = vadd.f32 %v4435_v34, %v4407_v29  ;;  %v7802_v9 = vld [vmem:[#allocation2 + $0x3a0] sm:$0xff] }
 0x67d   :  { %v4596_v49 = vadd.f32 %v4592_v58, %v4375_v35  ;;  %v11333_v52 = vadd.f32 %v4610_v24, %v4606_v3  ;;  %vm4506_vm12 = vmor %vm4504_vm11, %vm4505_vm9  ;;  %v4511_v57 = vor.u32 1.1754944e-38, %v4510_v0  ;;  %vm4509_vm13 = vcmp.eq.f32.partialorder %v4508_v50, 8.507059e+37  ;;  %v7800_v35 = vld [vmem:[#allocation2 + $0x3c0] sm:$0xff]  ;;  %v7801_v58 = vld [vmem:[#allocation2 + $0x1a8] sm:$0xff] }
 0x67e   :  { %v4507_v37 = vsel %vm4506_vm12, %v11280_v55, %v4503_v17  ;;  %v4572_v62 = vor.u32 1.1754944e-38, %v4571_v19  ;;  %v4787_v36 = vadd.f32 %v4670_v23, %v12494_v42  ;;  %vm4570_vm14 = vcmp.eq.f32.partialorder %v4569_v20, 8.507059e+37  ;;  %v7805_v20 = vld [vmem:[#allocation2 + $0x168] sm:$0xff]  ;;  %v7806_v17 = vld [vmem:[#allocation2 + $0x360] sm:$0xff] }
 0x67f   :  { %v4348_v51 = vpop.f32.mrf.mxu3  ;;  %6752 = vtanh.f32 %v4596_v49  ;;  %4942 = vmatmul.f32.vlgmr.msrb.gmra.mxu3 %v11333_v52  ;;  %5000 = vmatmul.f32.vlgmr.msrb.gmra.mxu1 %v11333_v52  ;;  %v4512_v5 = vsel %vm4509_vm13, %v4511_v57, %v4507_v37  ;;  %v4611_v55 = vmul.f32 %v4558_v1, %v10874_v4  ;;  %vm4581_vm15 = vweird.f32 %v11243_v47  ;;  %v7799_v4 = vld [vmem:[#allocation2 + $0x1c8] sm:$0xff]  ;;  %v12497_v49 = vld [vmem:[#allocation40_spill] sm:$0xff] }
 0x680   :  { %v4349_v8 = vadd.f32 %v4348_v51, %v8681_v13  ;;  %v4607_v51 = vmul.f32 %v6751_v21, %v4603_v22  ;;  %5338 = vmatpush.msrb.mxu3 %v7795_v7  ;;  %5588 = vmatpush.msrb.mxu1 %v7796_v16  ;;  %v4593_v27 = vmul.f32 %v4512_v5, %v4436_v6  ;;  %6754 = vrcp.f32 %v11266_v40  ;;  %vm11357_vm2 = vmor %vm4580_vm1, %vm4581_vm15  ;;  %v7803_v21 = vld [vmem:[#allocation2 + $0x188] sm:$0xff]  ;;  %v4673_v22 = vpop.f32.mrf.mxu0 }
 0x681   :  { %v4573_v61 = vsel %vm4570_vm14, %v4572_v62, %v4568_v14  ;;  %v4579_v19 = vadd.f32 %v11243_v47, %v4578_v45  ;;  %v4586_v48 = vand.u32 2147483648, %v11201_v12  ;;  %v6241_v3 = vmul.f32 -1.442695, %v4787_v36  ;;  %v7804_v45 = vld [vmem:[#allocation2 + $0x380] sm:$0xff]  ;;  %v12498_v6 = vld [vmem:[#allocation58_spill] sm:$0xff] }
 0x682   :  { %v4378_v41 = vadd.f32 %v11154_v11, %v4349_v8  ;;  %5339 = vmatpush.msrb.mxu3 %v7797_v43  ;;  %v7798_v11 = vld [vmem:[#allocation2 + $0x3e0] sm:$0xff]  ;;  %v11350_v56 = vadd.f32 %v4611_v55, %v4607_v51  ;;  %v4604_v1 = vsub.f32 1.0, %v4573_v61  ;;  %v4584_v38 = vand.u32 2147483647, %v11201_v12  ;;  %v7807_v51 = vld [vmem:[#allocation2 + $0x148] sm:$0xff] }
 0x683   :  { %5589 = vmatpush.msrb.mxu1 %v7798_v11  ;;  %v4583_v0 = vsel %vm11357_vm2, %v11243_v47, %v4579_v19  ;;  %v11369_v63 = vadd.f32 1.0, %v11307_v60  ;;  %v4587_v50 = vor.u32 1.1754944e-38, %v4586_v48  ;;  %v4612_v47 = vmul.f32 %v4573_v61, %v10897_v25  ;;  %v7808_v25 = vld [vmem:[#allocation2 + $0x340] sm:$0xff]  ;;  %v7811_v42 = vld [vmem:[#allocation2 + $0x108] sm:$0xff] }
 0x684   :  { %v4597_v2 = vadd.f32 %v4593_v27, %v4378_v41  ;;  %5340 = vmatpush.msrb.mxu3 %v7799_v4  ;;  %vm4585_vm3 = vcmp.eq.f32.partialorder %v4584_v38, 8.507059e+37  ;;  %v4788_v57 = vadd.f32 %v4673_v22, %v12498_v6  ;;  %v7809_v41 = vld [vmem:[#allocation2 + $0x128] sm:$0xff]  ;;  %v7810_v62 = vld [vmem:[#allocation2 + $0x320] sm:$0xff]  ;;  %vm4810_vm8 = vweird.f32 %v11266_v40 }
 0x685   :  { %v6753_v15 = vpop.eup %6752  ;;  %5590 = vmatpush.msrb.mxu1 %v7800_v35  ;;  %v4588_v26 = vsel %vm4585_vm3, %v4587_v50, %v4583_v0  ;;  %v7812_v36 = vld [vmem:[#allocation2 + $0x300] sm:$0xff]  ;;  %v12499_v55 = vld [vmem:[#allocation42_spill] sm:$0xff]  ;;  %vm4825_vm12 = vweird.f32 %v11369_v63 }
 0x686   :  { %5341 = vmatpush.msrb.mxu3 %v7801_v58  ;;  %v4608_v29 = vmul.f32 %v6753_v15, %v4604_v1  ;;  %v11366_v12 = vpop.eup %6754  ;;  %v4605_v37 = vsub.f32 1.0, %v4588_v26  ;;  %v6242_v7 = vmul.f32 -1.442695, %v4788_v57  ;;  %v4613_v27 = vmul.f32 %v4588_v26, %v10917_v32  ;;  %v7813_v11 = vld [vmem:[#allocation2 + $0xe8] sm:$0xff]  ;;  %v7814_v19 = vld [vmem:[#allocation2 + $0x2e0] sm:$0xff] }
 0x687   :  { %v4635_v30 = vpop.f32.mrf.mxu3  ;;  %5591 = vmatpush.msrb.mxu1 %v7802_v9  ;;  %4945 = vmatmul.f32.gmra.mxu3 %v11350_v56  ;;  %v7815_v1 = vld [vmem:[#allocation2 + $0xc8] sm:$0xff]  ;;  %v7816_v38 = vld [vmem:[#allocation2 + $0x2c0] sm:$0xff]  ;;  %vm4811_vm5 = vweird.f32 %v11366_v12 }
 0x688   :  { %v4705_v54 = vadd.f32 %v4635_v30, %v12493_v28  ;;  %5003 = vmatmul.f32.gmra.mxu1 %v11350_v56  ;;  %5342 = vmatpush.msrb.mxu3 %v7803_v21  ;;  %v11375_v30 = vadd.f32 %v4612_v47, %v4608_v29  ;;  %v4806_v28 = vmul.f32 %v11366_v12, %v11266_v40  ;;  %v7817_v9 = vld [vmem:[#allocation2 + $0xa8] sm:$0xff]  ;;  %v7818_v29 = vld [vmem:[#allocation2 + $0x2a0] sm:$0xff]  ;;  %vm11442_vm9 = vmor %vm4810_vm8, %vm4811_vm5 }
 0x689   :  { %5592 = vmatpush.msrb.mxu1 %v7804_v45  ;;  %v7819_v47 = vld [vmem:[#allocation2 + $0x88] sm:$0xff] }
 0x68a   :  { %v6235_v31 = vmul.f32 -1.442695, %v4705_v54  ;;  %5343 = vmatpush.msrb.mxu3 %v7805_v20  ;;  %v4807_v15 = vsub.f32 1.0, %v4806_v28  ;;  %v4814_v20 = vand.u32 2147483647, %v11266_v40 }
 0x68b   :  { %5593 = vmatpush.msrb.mxu1 %v7806_v17 }
 0x68c   :  { %6756 = vpow2.f32 %v6235_v31  ;;  %5344 = vmatpush.msrb.mxu3 %v7807_v51  ;;  %v4808_v0 = vmul.f32 %v11366_v12, %v4807_v15  ;;  %v7827_v15 = vld [vmem:[#allocation2 + $0x220] sm:$0xff]  ;;  %vm11446_vm10 = vcmp.eq.f32.partialorder %v4814_v20, 8.507059e+37 }
 0x68d   :  { %6758 = vtanh.f32 %v4597_v2  ;;  %5594 = vmatpush.msrb.mxu1 %v7808_v25 }
 0x68e   :  { %6760 = vpow2.f32 %v6241_v3  ;;  %5345 = vmatpush.msrb.mxu3 %v7809_v41  ;;  %v4693_v3 = vpop.f32.mrf.mxu1  ;;  %v4809_v57 = vadd.f32 %v11366_v12, %v4808_v0 }
 0x68f   :  { %v4638_v24 = vpop.f32.mrf.mxu3  ;;  %6762 = vrcp.f32 %v11369_v63  ;;  %5595 = vmatpush.msrb.mxu1 %v7810_v62  ;;  %4948 = vmatmul.f32.gmra.mxu3 %v11375_v30 }
 0x690   :  { %v4706_v8 = vadd.f32 %v4638_v24, %v12497_v49  ;;  %5006 = vmatmul.f32.gmra.mxu1 %v11375_v30  ;;  %5346 = vmatpush.msrb.mxu3 %v7811_v42  ;;  %v7820_v49 = vld [vmem:[#allocation2 + $0x280] sm:$0xff] }
 0x691   :  { %5596 = vmatpush.msrb.mxu1 %v7812_v36  ;;  %v4816_v36 = vand.u32 2147483648, %v11266_v40 }
 0x692   :  { %v6757_v34 = vpop.eup %6756  ;;  %v6236_v23 = vmul.f32 -1.442695, %v4706_v8  ;;  %5347 = vmatpush.msrb.mxu3 %v7813_v11  ;;  %v12500_v8 = vld [vmem:[#allocation45_spill] sm:$0xff] }
 0x693   :  { %v11373_v60 = vadd.f32 1.0, %v6757_v34  ;;  %v6759_v14 = vpop.eup %6758  ;;  %5597 = vmatpush.msrb.mxu1 %v7814_v19  ;;  %v4817_v0 = vor.u32 1.1754944e-38, %v4816_v36 }
 0x694   :  { %v6761_v5 = vpop.eup %6760  ;;  %v4609_v54 = vmul.f32 %v6759_v14, %v4605_v37  ;;  %5348 = vmatpush.msrb.mxu3 %v7815_v1  ;;  %v7822_v14 = vld [vmem:[#allocation2 + $0x260] sm:$0xff]  ;;  %v12507_v1 = vld [vmem:[#allocation46_spill] sm:$0xff] }
 0x695   :  { %6764 = vrcp.f32 %v11373_v60  ;;  %v11386_v31 = vpop.eup %6762  ;;  %v11388_v43 = vadd.f32 1.0, %v6761_v5  ;;  %5598 = vmatpush.msrb.mxu1 %v7816_v38  ;;  %v4736_v24 = vand.u32 2147483648, %v11373_v60  ;;  %v4734_v45 = vand.u32 2147483647, %v11373_v60  ;;  %v11423_v5 = vld [vmem:[#allocation2 + $0x820] ss:$0 sm:$0xff] }
 0x696   :  { %6766 = vpow2.f32 %v6236_v23  ;;  %v11392_v48 = vadd.f32 %v4613_v27, %v4609_v54  ;;  %5349 = vmatpush.msrb.mxu3 %v7817_v9  ;;  %v4821_v50 = vmul.f32 %v11386_v31, %v11369_v63  ;;  %vm4730_vm6 = vweird.f32 %v11373_v60  ;;  %v7821_v23 = vld [vmem:[#allocation2 + $0x68] sm:$0xff]  ;;  %v4696_v11 = vpop.f32.mrf.mxu1 }
 0x697   :  { %v4641_v16 = vpop.f32.mrf.mxu3  ;;  %6768 = vpow2.f32 %v6242_v7  ;;  %5599 = vmatpush.msrb.mxu1 %v7818_v29  ;;  %v4737_v37 = vor.u32 1.1754944e-38, %v4736_v24  ;;  %vm4735_vm7 = vcmp.eq.f32.partialorder %v4734_v45, 8.507059e+37  ;;  %v7824_v7 = vld [vmem:[#allocation2 + $0x48] sm:$0xff]  ;;  %v7829_v29 = vld [vmem:[#allocation2 + $0x410] sm:$0xff]  ;;  %vm4826_vm13 = vweird.f32 %v11386_v31 }
 0x698   :  { %v4707_v61 = vadd.f32 %v4641_v16, %v12499_v55  ;;  %4951 = vmatmul.f32.gmra.mxu3 %v11392_v48  ;;  %5009 = vmatmul.f32.gmra.mxu1 %v11392_v48  ;;  %v4822_v51 = vsub.f32 1.0, %v4821_v50  ;;  %v7825_v16 = vld [vmem:[#allocation2 + $0x240] sm:$0xff]  ;;  %v7828_v9 = vld [vmem:[#allocation2 + $0x408] sm:$0xff]  ;;  %v4831_v50 = vand.u32 2147483648, %v11369_v63  ;;  %vm11497_vm2 = vmor %vm4825_vm12, %vm4826_vm13  ;;  %vm4840_vm5 = vweird.f32 %v11388_v43 }
 0x699   :  { %5350 = vmatpush.msrb.mxu3 %v7819_v47  ;;  %5600 = vmatpush.msrb.mxu1 %v7820_v49  ;;  %v7830_v45 = vld [vmem:[#allocation2 + $0x3e8] sm:$0xff] }
 0x69a   :  { %v6237_v4 = vmul.f32 -1.442695, %v4707_v61  ;;  %v4823_v40 = vmul.f32 %v11386_v31, %v4822_v51 }
 0x69b   :  { %v11390_v2 = vpop.eup %6764  ;;  %5351 = vmatpush.msrb.mxu3 %v7821_v23  ;;  %5601 = vmatpush.msrb.mxu1 %v7822_v14  ;;  %v7832_v23 = vld [vmem:[#allocation2 + $0x3c8] sm:$0xff]  ;;  %v7833_v14 = vld [vmem:[#allocation2 + $0x3d0] sm:$0xff] }
 0x69c   :  { %v6767_v35 = vpop.eup %6766  ;;  %v4726_v32 = vmul.f32 %v11390_v2, %v11373_v60  ;;  %6770 = vpow2.f32 %v6237_v4  ;;  %vm4731_vm4 = vweird.f32 %v11390_v2  ;;  %v4865_v60 = vadd.f32 %v11423_v5, %v4693_v3  ;;  %v7836_v4 = vld [vmem:[#allocation2 + $0x388] sm:$0xff] }
 0x69d   :  { %v11396_v10 = vadd.f32 1.0, %v6767_v35  ;;  %6772 = vrcp.f32 %v11388_v43  ;;  %v6769_v26 = vpop.eup %6768  ;;  %vm11417_vm0 = vmor %vm4730_vm6, %vm4731_vm4  ;;  %5352 = vmatpush.msrb.mxu3 %v7824_v7  ;;  %5602 = vmatpush.msrb.mxu1 %v7825_v16  ;;  %v4813_v3 = vsel %vm11442_vm9, %v11366_v12, %v4809_v57  ;;  %v4832_v57 = vor.u32 1.1754944e-38, %v4831_v50  ;;  %v7837_v35 = vld [vmem:[#allocation2 + $0x390] sm:$0xff] }
 0x69e   :  { %v4727_v58 = vsub.f32 1.0, %v4726_v32  ;;  %v11434_v27 = vadd.f32 1.0, %v6769_v26  ;;  %v4818_v49 = vsel %vm11446_vm10, %v4817_v0, %v4813_v3 }
 0x69f   :  { %6774 = vrcp.f32 %v11396_v10  ;;  %v4644_v22 = vpop.f32.mrf.mxu3  ;;  %5603 = vmatpush.msrb.mxu1 %v7827_v15  ;;  %v4751_v24 = vand.u32 2147483648, %v11396_v10  ;;  %vm4745_vm14 = vweird.f32 %v11396_v10  ;;  %v4881_v16 = vsub.f32 1.0, %v4818_v49  ;;  %v4699_v15 = vpop.f32.mrf.mxu1 }
 0x6a0   :  { %v4728_v21 = vmul.f32 %v11390_v2, %v4727_v58  ;;  %v4708_v34 = vadd.f32 %v4644_v22, %v12500_v8  ;;  %5058 = vmatmul.f32.vlgmr.msra.gmra.mxu3 %v11333_v52  ;;  %5116 = vmatmul.f32.vlgmr.msra.gmra.mxu1 %v11333_v52  ;;  %v7831_v22 = vld [vmem:[#allocation2 + $0x3f0] sm:$0xff]  ;;  %v4824_v8 = vadd.f32 %v11386_v31, %v4823_v40 }
 0x6a1   :  { %5704 = vmatpush.msra.mxu1 %v7829_v29  ;;  %v4752_v25 = vor.u32 1.1754944e-38, %v4751_v24  ;;  %v4889_v36 = vmul.f32 %v4818_v49, %v11016_v46 }
 0x6a2   :  { %v4729_v17 = vadd.f32 %v11390_v2, %v4728_v21  ;;  %v6771_v6 = vpop.eup %6770  ;;  %v6238_v41 = vmul.f32 -1.442695, %v4708_v34  ;;  %v4749_v21 = vand.u32 2147483647, %v11396_v10 }
 0x6a3   :  { %v11421_v62 = vpop.eup %6772  ;;  %v11429_v54 = vadd.f32 1.0, %v6771_v6  ;;  %5705 = vmatpush.msra.mxu1 %v7831_v22  ;;  %v4829_v6 = vand.u32 2147483647, %v11369_v63  ;;  %v7840_v22 = vld [vmem:[#allocation2 + $0x348] sm:$0xff] }
 0x6a4   :  { %v4733_v28 = vsel %vm11417_vm0, %v11390_v2, %v4729_v17  ;;  %6776 = vpow2.f32 %v6238_v41  ;;  %v7826_v2 = vld [vmem:[#allocation2 + $0x28] sm:$0xff]  ;;  %v4836_v32 = vmul.f32 %v11421_v62, %v11388_v43  ;;  %vm4750_vm1 = vcmp.eq.f32.partialorder %v4749_v21, 8.507059e+37 }
 0x6a5   :  { %v11431_v42 = vpop.eup %6774  ;;  %v4738_v55 = vsel %vm4735_vm7, %v4737_v37, %v4733_v28  ;;  %6778 = vrcp.f32 %v11429_v54  ;;  %5353 = vmatpush.msrb.mxu3 %v7826_v2  ;;  %5706 = vmatpush.msra.mxu1 %v7833_v14  ;;  %v7835_v28 = vld [vmem:[#allocation2 + $0x3b0] sm:$0xff]  ;;  %v4766_v63 = vand.u32 2147483648, %v11429_v54  ;;  %vm4830_vm4 = vcmp.eq.f32.partialorder %v4829_v6, 8.507059e+37  ;;  %v7842_v6 = vld [vmem:[#allocation2 + $0x200] sm:$0xff] }
 0x6a6   :  { %v4869_v61 = vmul.f32 %v4865_v60, %v4738_v55  ;;  %v4741_v19 = vmul.f32 %v11431_v42, %v11396_v10  ;;  %6780 = vrcp.f32 %v11434_v27  ;;  %vm4746_vm11 = vweird.f32 %v11431_v42  ;;  %v7834_v60 = vld [vmem:[#allocation2 + $0x3a8] sm:$0xff] }
 0x6a7   :  { %5646 = vmatpush.msra.mxu3 %v7828_v9  ;;  %v4837_v26 = vsub.f32 1.0, %v4836_v32  ;;  %vm11479_vm15 = vmor %vm4745_vm14, %vm4746_vm11  ;;  %v4866_v10 = vadd.f32 %v11423_v5, %v4696_v11  ;;  %5707 = vmatpush.msra.mxu1 %v7835_v28  ;;  %v4764_v32 = vand.u32 2147483647, %v11429_v54  ;;  %v7839_v9 = vld [vmem:[#allocation2 + $0x370] sm:$0xff]  ;;  %vm4760_vm6 = vweird.f32 %v11429_v54  ;;  %v12517_v28 = vld [vmem:[#allocation52_spill] sm:$0xff] }
 0x6a8   :  { %v4873_v38 = vadd.f32 %v4869_v61, %v12507_v1  ;;  %v4742_v58 = vsub.f32 1.0, %v4741_v19  ;;  %5061 = vmatmul.f32.gmra.mxu3 %v11350_v56  ;;  %5119 = vmatmul.f32.gmra.mxu1 %v11350_v56  ;;  %v4828_v19 = vsel %vm11497_vm2, %v11386_v31, %v4824_v8  ;;  %v12512_v1 = vld [vmem:[#allocation49_spill] sm:$0xff]  ;;  %vm4841_vm0 = vweird.f32 %v11421_v62 }
 0x6a9   :  { %5647 = vmatpush.msra.mxu3 %v7830_v45  ;;  %v4838_v46 = vmul.f32 %v11421_v62, %v4837_v26  ;;  %5708 = vmatpush.msra.mxu1 %v7837_v35  ;;  %v4833_v29 = vsel %vm4830_vm4, %v4832_v57, %v4828_v19  ;;  %v4767_v45 = vor.u32 1.1754944e-38, %v4766_v63  ;;  %vm4765_vm8 = vcmp.eq.f32.partialorder %v4764_v32, 8.507059e+37  ;;  %v7843_v57 = vld [vmem:[#allocation2 + $0x210] sm:$0xff]  ;;  %vm11545_vm9 = vmor %vm4840_vm5, %vm4841_vm0  ;;  %v7848_v63 = vld [vmem:[#allocation2 + $0x1c0] sm:$0xff] }
 0x6aa   :  { %6782 = vtanh.f32 %v4873_v38  ;;  %v4743_v12 = vmul.f32 %v11431_v42, %v4742_v58  ;;  %v6777_v47 = vpop.eup %6776  ;;  %v7838_v58 = vld [vmem:[#allocation2 + $0x368] sm:$0xff]  ;;  %v4844_v26 = vand.u32 2147483647, %v11388_v43  ;;  %v7872_v19 = vld [vmem:[#allocation2 + $0xe0] sm:$0xff] }
 0x6ab   :  { %v11470_v34 = vpop.eup %6778  ;;  %v11474_v17 = vadd.f32 1.0, %v6777_v47  ;;  %5648 = vmatpush.msra.mxu3 %v7832_v23  ;;  %5709 = vmatpush.msra.mxu1 %v7839_v9  ;;  %v7841_v47 = vld [vmem:[#allocation2 + $0x350] sm:$0xff] }
 0x6ac   :  { %v4744_v20 = vadd.f32 %v11431_v42, %v4743_v12  ;;  %v4756_v37 = vmul.f32 %v11470_v34, %v11429_v54  ;;  %v11490_v7 = vpop.eup %6780  ;;  %vm4761_vm3 = vweird.f32 %v11470_v34  ;;  %v11522_v12 = vadd.f32 %v11421_v62, %v4838_v46 }
 0x6ad   :  { %6784 = vrcp.f32 %v11474_v17  ;;  %5649 = vmatpush.msra.mxu3 %v7834_v60  ;;  %v4851_v31 = vmul.f32 %v11490_v7, %v11434_v27  ;;  %vm11527_vm7 = vmor %vm4760_vm6, %vm4761_vm3  ;;  %5710 = vmatpush.msra.mxu1 %v7841_v47  ;;  %v4867_v54 = vadd.f32 %v11423_v5, %v4699_v15  ;;  %v7844_v60 = vld [vmem:[#allocation2 + $0x1e0] sm:$0xff]  ;;  %v4779_v55 = vand.u32 2147483647, %v11474_v17  ;;  %v4702_v15 = vpop.f32.mrf.mxu1  ;;  %v7857_v47 = vld [vmem:[#allocation2 + $0x190] sm:$0xff] }
 0x6ae   :  { %v4748_v41 = vsel %vm11479_vm15, %v11431_v42, %v4744_v20  ;;  %v4757_v61 = vsub.f32 1.0, %v4756_v37  ;;  %v4846_v20 = vand.u32 2147483648, %v11388_v43  ;;  %v4882_v37 = vsub.f32 1.0, %v4833_v29  ;;  %v7845_v43 = vld [vmem:[#allocation2 + $0x1f0] sm:$0xff] }
 0x6af   :  { %v4753_v42 = vsel %vm4750_vm1, %v4752_v25, %v4748_v41  ;;  %5650 = vmatpush.msra.mxu3 %v7836_v4  ;;  %v4852_v23 = vsub.f32 1.0, %v4851_v31  ;;  %v4781_v41 = vand.u32 2147483648, %v11474_v17  ;;  %vm11561_vm11 = vcmp.eq.f32.partialorder %v4844_v26, 8.507059e+37  ;;  %v7849_v4 = vld [vmem:[#allocation2 + $0x1d0] sm:$0xff]  ;;  %v7880_v31 = vld [vmem:[#allocation2 + $0xa0] sm:$0xff] }
 0x6b0   :  { %v6783_v11 = vpop.eup %6782  ;;  %v4870_v2 = vmul.f32 %v4866_v10, %v4753_v42  ;;  %v4758_v3 = vmul.f32 %v11470_v34, %v4757_v61  ;;  %5064 = vmatmul.f32.gmra.mxu3 %v11375_v30  ;;  %5122 = vmatmul.f32.gmra.mxu1 %v11375_v30  ;;  %v4843_v10 = vsel %vm11545_vm9, %v11421_v62, %v11522_v12  ;;  %v7846_v42 = vld [vmem:[#allocation2 + $0x328] sm:$0xff]  ;;  %v7847_v61 = vld [vmem:[#allocation2 + $0x330] sm:$0xff]  ;;  %v4847_v46 = vor.u32 1.1754944e-38, %v4846_v20  ;;  %v7898_v26 = vld [vmem:[#allocation2 + $0x5e0] sm:$0xff] }
 0x6b1   :  { %v4885_v40 = vmul.f32 %v6783_v11, %v4881_v16  ;;  %5651 = vmatpush.msra.mxu3 %v7838_v58  ;;  %5711 = vmatpush.msra.mxu1 %v7847_v61  ;;  %v4890_v62 = vmul.f32 %v4833_v29, %v11075_v59  ;;  %vm4775_vm12 = vweird.f32 %v11474_v17  ;;  %v7851_v59 = vld [vmem:[#allocation2 + $0x310] sm:$0xff]  ;;  %vm4780_vm14 = vcmp.eq.f32.partialorder %v4779_v55, 8.507059e+37 }
 0x6b2   :  { %v4874_v38 = vadd.f32 %v4870_v2, %v12512_v1  ;;  %v4759_v50 = vadd.f32 %v11470_v34, %v4758_v3  ;;  %v4853_v2 = vmul.f32 %v11490_v7, %v4852_v23  ;;  %v7850_v3 = vld [vmem:[#allocation2 + $0x308] sm:$0xff]  ;;  %v4848_v32 = vsel %vm11561_vm11, %v4847_v46, %v4843_v10  ;;  %v7853_v58 = vld [vmem:[#allocation2 + $0x1b0] sm:$0xff]  ;;  %v7862_v10 = vld [vmem:[#allocation2 + $0x140] sm:$0xff] }
 0x6b3   :  { %v11515_v0 = vadd.f32 %v4889_v36, %v4885_v40  ;;  %v11519_v24 = vpop.eup %6784  ;;  %5652 = vmatpush.msra.mxu3 %v7840_v22  ;;  %5712 = vmatpush.msra.mxu1 %v7851_v59  ;;  %v4782_v1 = vor.u32 1.1754944e-38, %v4781_v41  ;;  %v7855_v12 = vld [vmem:[#allocation2 + $0x2f0] sm:$0xff]  ;;  %vm4856_vm15 = vweird.f32 %v11490_v7  ;;  %v7856_v22 = vld [vmem:[#allocation2 + $0x180] sm:$0xff]  ;;  %vm4855_vm1 = vweird.f32 %v11434_v27 }
 0x6b4   :  { %6786 = vtanh.f32 %v4874_v38  ;;  %v4763_v49 = vsel %vm11527_vm7, %v11470_v34, %v4759_v50  ;;  %v4771_v8 = vmul.f32 %v11519_v24, %v11474_v17  ;;  %vm4776_vm10 = vweird.f32 %v11519_v24  ;;  %v7852_v38 = vld [vmem:[#allocation2 + $0x1a0] sm:$0xff]  ;;  %v7854_v50 = vld [vmem:[#allocation2 + $0x2e8] sm:$0xff]  ;;  %vm11593_vm2 = vmor %vm4855_vm1, %vm4856_vm15 }
 0x6b5   :  { %4913 = vmatmul.f32.vlgmr.msra.gmra.mxu2 %v11515_v0  ;;  %4971 = vmatmul.f32.vlgmr.msrb.gmra.mxu0 %v11515_v0  ;;  %v4768_v14 = vsel %vm4765_vm8, %v4767_v45, %v4763_v49  ;;  %vm11572_vm13 = vmor %vm4775_vm12, %vm4776_vm10  ;;  %v4868_v17 = vadd.f32 %v11423_v5, %v4702_v15  ;;  %v4854_v21 = vadd.f32 %v11490_v7, %v4853_v2  ;;  %v4861_v5 = vand.u32 2147483648, %v11434_v27  ;;  %v12524_v20 = vld [vmem:[#allocation55_spill] sm:$0xff]  ;;  %v7873_v15 = vld [vmem:[#allocation2 + $0x268] sm:$0xff] }
 0x6b6   :  { %5309 = vmatpush.msra.mxu2 %v7842_v6  ;;  %5367 = vmatpush.msrb.mxu0 %v7843_v57  ;;  %v4871_v51 = vmul.f32 %v4867_v54, %v4768_v14  ;;  %v4772_v25 = vsub.f32 1.0, %v4771_v8  ;;  %v4859_v49 = vand.u32 2147483647, %v11434_v27  ;;  %v7858_v14 = vld [vmem:[#allocation2 + $0x160] sm:$0xff]  ;;  %v7859_v6 = vld [vmem:[#allocation2 + $0x170] sm:$0xff]  ;;  %v4891_v57 = vmul.f32 %v4848_v32, %v11107_v18 }
 0x6b7   :  { %5653 = vmatpush.msra.mxu3 %v7846_v42  ;;  %5713 = vmatpush.msra.mxu1 %v7855_v12  ;;  %v4858_v27 = vsel %vm11593_vm2, %v11490_v7, %v4854_v21  ;;  %v7863_v41 = vld [vmem:[#allocation2 + $0x150] sm:$0xff]  ;;  %v7866_v7 = vld [vmem:[#allocation2 + $0x120] sm:$0xff]  ;;  %v7889_v21 = vld [vmem:[#allocation2 + $0x3f8] sm:$0xff] }
 0x6b8   :  { %5310 = vmatpush.msra.mxu2 %v7844_v60  ;;  %5368 = vmatpush.msrb.mxu0 %v7845_v43  ;;  %v4875_v16 = vadd.f32 %v4871_v51, %v12517_v28  ;;  %v4773_v36 = vmul.f32 %v11519_v24, %v4772_v25  ;;  %v7860_v51 = vld [vmem:[#allocation2 + $0x2c8] sm:$0xff]  ;;  %v7861_v25 = vld [vmem:[#allocation2 + $0x2d0] sm:$0xff]  ;;  %vm4860_vm3 = vcmp.eq.f32.partialorder %v4859_v49, 8.507059e+37  ;;  %v7870_v42 = vld [vmem:[#allocation2 + $0x100] sm:$0xff] }
 0x6b9   :  { %5654 = vmatpush.msra.mxu3 %v7850_v3  ;;  %5125 = vmatmul.f32.gmra.mxu1 %v11392_v48  ;;  %v7864_v43 = vld [vmem:[#allocation2 + $0x2a8] sm:$0xff]  ;;  %v7865_v18 = vld [vmem:[#allocation2 + $0x2b0] sm:$0xff] }
 0x6ba   :  { %v6787_v11 = vpop.eup %6786  ;;  %5311 = vmatpush.msra.mxu2 %v7848_v63  ;;  %5369 = vmatpush.msrb.mxu0 %v7849_v4  ;;  %6788 = vtanh.f32 %v4875_v16  ;;  %v4774_v40 = vadd.f32 %v11519_v24, %v4773_v36  ;;  %v7867_v16 = vld [vmem:[#allocation2 + $0x130] sm:$0xff]  ;;  %v7868_v36 = vld [vmem:[#allocation2 + $0x288] sm:$0xff] }
 0x6bb   :  { %v4886_v35 = vmul.f32 %v6787_v11, %v4882_v37  ;;  %5655 = vmatpush.msra.mxu3 %v7854_v50  ;;  %5714 = vmatpush.msra.mxu1 %v7861_v25  ;;  %v4862_v37 = vor.u32 1.1754944e-38, %v4861_v5  ;;  %v7869_v55 = vld [vmem:[#allocation2 + $0x290] sm:$0xff]  ;;  %v7877_v3 = vld [vmem:[#allocation2 + $0x248] sm:$0xff]  ;;  %v7887_v50 = vld [vmem:[#allocation2 + $0x60] sm:$0xff] }
 0x6bc   :  { %5312 = vmatpush.msra.mxu2 %v7852_v38  ;;  %5370 = vmatpush.msrb.mxu0 %v7853_v58  ;;  %v4778_v29 = vsel %vm11572_vm13, %v11519_v24, %v4774_v40  ;;  %v4883_v24 = vsub.f32 1.0, %v4848_v32  ;;  %v7874_v63 = vld [vmem:[#allocation2 + $0x270] sm:$0xff]  ;;  %v7884_v58 = vld [vmem:[#allocation2 + $0x80] sm:$0xff]  ;;  %v7896_v49 = vld [vmem:[#allocation2 + $0x608] sm:$0xff] }
 0x6bd   :  { %v11576_v9 = vadd.f32 %v4890_v62, %v4886_v35  ;;  %v4783_v45 = vsel %vm4780_vm14, %v4782_v1, %v4778_v29  ;;  %5067 = vmatmul.f32.gmra.mxu3 %v11392_v48  ;;  %5715 = vmatpush.msra.mxu1 %v7865_v18  ;;  %v4863_v28 = vsel %vm4860_vm3, %v4862_v37, %v4858_v27  ;;  %v7871_v62 = vld [vmem:[#allocation2 + $0x110] sm:$0xff]  ;;  %v7876_v35 = vld [vmem:[#allocation2 + $0xc0] sm:$0xff]  ;;  %v7886_v29 = vld [vmem:[#allocation2 + $0x418] sm:$0xff] }
 0x6be   :  { %5313 = vmatpush.msra.mxu2 %v7856_v22  ;;  %5371 = vmatpush.msrb.mxu0 %v7857_v47  ;;  %v4872_v54 = vmul.f32 %v4868_v17, %v4783_v45  ;;  %v4884_v61 = vsub.f32 1.0, %v4863_v28  ;;  %v4892_v46 = vmul.f32 %v4863_v28, %v11113_v39  ;;  %v7875_v4 = vld [vmem:[#allocation2 + $0xf0] sm:$0xff]  ;;  %v7881_v39 = vld [vmem:[#allocation2 + $0x228] sm:$0xff]  ;;  %v7890_v45 = vld [vmem:[#allocation2 + $0x40] sm:$0xff] }
 0x6bf   :  { %4916 = vmatmul.f32.gmra.mxu2 %v11576_v9  ;;  %4974 = vmatmul.f32.gmra.mxu0 %v11576_v9  ;;  %v7878_v59 = vld [vmem:[#allocation2 + $0x250] sm:$0xff]  ;;  %v7892_v47 = vld [vmem:[#allocation2 + $0x3d8] sm:$0xff]  ;;  %v7893_v5 = vld [vmem:[#allocation2 + $0x20] sm:$0xff] }
 0x6c0   :  { %v6789_v8 = vpop.eup %6788  ;;  %v4876_v23 = vadd.f32 %v4872_v54, %v12524_v20  ;;  %5314 = vmatpush.msra.mxu2 %v7858_v14  ;;  %5372 = vmatpush.msrb.mxu0 %v7859_v6  ;;  %v7879_v32 = vld [vmem:[#allocation2 + $0xd0] sm:$0xff]  ;;  %v7899_v20 = vld [vmem:[#allocation2 + $0x5e8] sm:$0xff]  ;;  %v7901_v14 = vld [vmem:[#allocation2 + $0x5c0] sm:$0xff] }
 0x6c1   :  { %v4887_v34 = vmul.f32 %v6789_v8, %v4883_v24  ;;  %5656 = vmatpush.msra.mxu3 %v7860_v51  ;;  %5716 = vmatpush.msra.mxu1 %v7869_v55  ;;  %v7882_v1 = vld [vmem:[#allocation2 + $0x230] sm:$0xff]  ;;  %v7895_v24 = vld [vmem:[#allocation2 + $0x600] sm:$0xff]  ;;  %v7897_v8 = vld [vmem:[#allocation2 + $0x3b8] sm:$0xff] }
 0x6c2   :  { %6790 = vtanh.f32 %v4876_v23  ;;  %5315 = vmatpush.msra.mxu2 %v7862_v10  ;;  %5373 = vmatpush.msrb.mxu0 %v7863_v41  ;;  %v7883_v38 = vld [vmem:[#allocation2 + $0xb0] sm:$0xff]  ;;  %v7900_v23 = vld [vmem:[#allocation2 + $0x398] sm:$0xff]  ;;  %v7902_v6 = vld [vmem:[#allocation2 + $0x5c8] sm:$0xff] }
 0x6c3   :  { %v11602_v60 = vadd.f32 %v4891_v57, %v4887_v34  ;;  %5657 = vmatpush.msra.mxu3 %v7864_v43  ;;  %5717 = vmatpush.msra.mxu1 %v7874_v63  ;;  %v7885_v17 = vld [vmem:[#allocation2 + $0x90] sm:$0xff]  ;;  %v7903_v57 = vld [vmem:[#allocation2 + $0x378] sm:$0xff]  ;;  %v7904_v27 = vld [vmem:[#allocation2 + $0x5a0] sm:$0xff] }
 0x6c4   :  { %5316 = vmatpush.msra.mxu2 %v7866_v7  ;;  %5374 = vmatpush.msrb.mxu0 %v7867_v16  ;;  %v7888_v12 = vld [vmem:[#allocation2 + $0x70] sm:$0xff]  ;;  %v7905_v34 = vld [vmem:[#allocation2 + $0x5a8] sm:$0xff]  ;;  %v7906_v51 = vld [vmem:[#allocation2 + $0x580] sm:$0xff] }
 0x6c5   :  { %5658 = vmatpush.msra.mxu3 %v7868_v36  ;;  %5718 = vmatpush.msra.mxu1 %v7878_v59  ;;  %v7891_v22 = vld [vmem:[#allocation2 + $0x50] sm:$0xff]  ;;  %v7907_v25 = vld [vmem:[#allocation2 + $0x358] sm:$0xff]  ;;  %v7908_v37 = vld [vmem:[#allocation2 + $0x588] sm:$0xff] }
 0x6c6   :  { %5354 = vmatmul.f32.vlgmr.msrb.gmra.mxu3 %v11515_v0  ;;  %5317 = vmatpush.msra.mxu2 %v7870_v42  ;;  %v7894_v54 = vld [vmem:[#allocation2 + $0x30] sm:$0xff]  ;;  %v7909_v10 = vld [vmem:[#allocation2 + $0x560] sm:$0xff]  ;;  %v7910_v41 = vld [vmem:[#allocation2 + $0x338] sm:$0xff] }
 0x6c7   :  { %4919 = vmatmul.f32.gmra.mxu2 %v11602_v60  ;;  %4977 = vmatmul.f32.gmra.mxu0 %v11602_v60  ;;  %v7911_v43 = vld [vmem:[#allocation2 + $0x568] sm:$0xff]  ;;  %v7912_v18 = vld [vmem:[#allocation2 + $0x540] sm:$0xff]  ;;  %v7913_v28 = vld [vmem:[#allocation2 + $0x318] sm:$0xff] }
 0x6c8   :  { %v6791_v11 = vpop.eup %6790  ;;  %5375 = vmatpush.msrb.mxu0 %v7871_v62  ;;  %5318 = vmatpush.msra.mxu2 %v7872_v19  ;;  %v7914_v7 = vld [vmem:[#allocation2 + $0x548] sm:$0xff]  ;;  %v7915_v16 = vld [vmem:[#allocation2 + $0x520] sm:$0xff]  ;;  %v7918_v42 = vld [vmem:[#allocation2 + $0x2f8] sm:$0xff] }
 0x6c9   :  { %v4888_v2 = vmul.f32 %v6791_v11, %v4884_v61  ;;  %5659 = vmatpush.msra.mxu3 %v7873_v15  ;;  %5719 = vmatpush.msra.mxu1 %v7882_v1  ;;  %v7916_v36 = vld [vmem:[#allocation2 + $0x528] sm:$0xff]  ;;  %v7917_v55 = vld [vmem:[#allocation2 + $0x500] sm:$0xff]  ;;  %v7921_v62 = vld [vmem:[#allocation2 + $0x2d8] sm:$0xff] }
 0x6ca   :  { %5376 = vmatpush.msrb.mxu0 %v7875_v4  ;;  %5319 = vmatpush.msra.mxu2 %v7876_v35  ;;  %v7919_v61 = vld [vmem:[#allocation2 + $0x508] sm:$0xff]  ;;  %v7920_v11 = vld [vmem:[#allocation2 + $0x4e0] sm:$0xff] }
 0x6cb   :  { %v11608_v40 = vadd.f32 %v4892_v46, %v4888_v2  ;;  %5660 = vmatpush.msra.mxu3 %v7877_v3  ;;  %v7922_v19 = vld [vmem:[#allocation2 + $0x4e8] sm:$0xff]  ;;  %v7923_v46 = vld [vmem:[#allocation2 + $0x4c0] sm:$0xff]  ;;  %v7924_v2 = vld [vmem:[#allocation2 + $0x2b8] sm:$0xff] }
 0x6cc   :  { %5377 = vmatpush.msrb.mxu0 %v7879_v32  ;;  %5320 = vmatpush.msra.mxu2 %v7880_v31  ;;  %v7925_v15 = vld [vmem:[#allocation2 + $0x4c8] sm:$0xff]  ;;  %v7926_v63 = vld [vmem:[#allocation2 + $0x4a0] sm:$0xff]  ;;  %v7929_v3 = vld [vmem:[#allocation2 + $0x298] sm:$0xff] }
 0x6cd   :  { %5661 = vmatpush.msra.mxu3 %v7881_v39  ;;  %v7927_v4 = vld [vmem:[#allocation2 + $0x4a8] sm:$0xff]  ;;  %v7928_v35 = vld [vmem:[#allocation2 + $0x480] sm:$0xff]  ;;  %v7932_v31 = vld [vmem:[#allocation2 + $0x278] sm:$0xff] }
 0x6ce   :  { %5357 = vmatmul.f32.gmra.mxu3 %v11576_v9  ;;  %5378 = vmatpush.msrb.mxu0 %v7883_v38  ;;  %v7930_v59 = vld [vmem:[#allocation2 + $0x488] sm:$0xff]  ;;  %v7931_v32 = vld [vmem:[#allocation2 + $0x460] sm:$0xff]  ;;  %v7935_v38 = vld [vmem:[#allocation2 + $0x258] sm:$0xff] }
 0x6cf   :  { %4922 = vmatmul.f32.gmra.mxu2 %v11608_v40  ;;  %4980 = vmatmul.f32.gmra.mxu0 %v11608_v40  ;;  %v7933_v39 = vld [vmem:[#allocation2 + $0x468] sm:$0xff]  ;;  %v7934_v1 = vld [vmem:[#allocation2 + $0x440] sm:$0xff] }
 0x6d0   :  { %5321 = vmatpush.msra.mxu2 %v7884_v58  ;;  %5379 = vmatpush.msrb.mxu0 %v7885_v17  ;;  %v7936_v58 = vld [vmem:[#allocation2 + $0x448] sm:$0xff]  ;;  %v7937_v17 = vld [vmem:[#allocation2 + $0x420] sm:$0xff] }
 0x6d1   :  { %5762 = vmatpush.msrb.mxu3 %v7886_v29  ;;  %v7938_v29 = vld [vmem:[#allocation2 + $0x428] sm:$0xff] }
 0x6d2   :  { %5322 = vmatpush.msra.mxu2 %v7887_v50  ;;  %5380 = vmatpush.msrb.mxu0 %v7888_v12  ;;  %v7939_v50 = vld [vmem:[#allocation2 + $0x610] sm:$0xff]  ;;  %v7940_v12 = vld [vmem:[#allocation2 + $0x618] sm:$0xff] }
 0x6d3   :  { %5763 = vmatpush.msrb.mxu3 %v7889_v21  ;;  %v7941_v21 = vld [vmem:[#allocation2 + $0x238] sm:$0xff] }
 0x6d4   :  { %5323 = vmatpush.msra.mxu2 %v7890_v45  ;;  %5381 = vmatpush.msrb.mxu0 %v7891_v22  ;;  %v7942_v45 = vld [vmem:[#allocation2 + $0x5f0] sm:$0xff]  ;;  %v7943_v22 = vld [vmem:[#allocation2 + $0x5f8] sm:$0xff] }
 0x6d5   :  { %5764 = vmatpush.msrb.mxu3 %v7892_v47  ;;  %v7944_v47 = vld [vmem:[#allocation2 + $0x5d0] sm:$0xff] }
 0x6d6   :  { %5360 = vmatmul.f32.gmra.mxu3 %v11602_v60  ;;  %5324 = vmatpush.msra.mxu2 %v7893_v5  ;;  %v7945_v5 = vld [vmem:[#allocation2 + $0x5d8] sm:$0xff] }
 0x6d7   :  { %5029 = vmatmul.f32.vlgmr.msrb.gmra.mxu2 %v11515_v0  ;;  %5087 = vmatmul.f32.vlgmr.msra.gmra.mxu0 %v11515_v0 }
 0x6d8   :  { %5382 = vmatpush.msrb.mxu0 %v7894_v54  ;;  %5617 = vmatpush.msrb.mxu2 %v7895_v24  ;;  %v7946_v54 = vld [vmem:[#allocation2 + $0x5b0] sm:$0xff]  ;;  %v7947_v24 = vld [vmem:[#allocation2 + $0x5b8] sm:$0xff] }
 0x6d9   :  { %5765 = vmatpush.msrb.mxu3 %v7897_v8  ;;  %v7949_v8 = vld [vmem:[#allocation2 + $0x598] sm:$0xff] }
 0x6da   :  { %5675 = vmatpush.msra.mxu0 %v7896_v49  ;;  %5618 = vmatpush.msrb.mxu2 %v7898_v26  ;;  %v7948_v49 = vld [vmem:[#allocation2 + $0x590] sm:$0xff] }
 0x6db   :  { %5766 = vmatpush.msrb.mxu3 %v7900_v23  ;;  %v7950_v26 = vld [vmem:[#allocation2 + $0x570] sm:$0xff] }
 0x6dc   :  { %5676 = vmatpush.msra.mxu0 %v7899_v20  ;;  %5619 = vmatpush.msrb.mxu2 %v7901_v14  ;;  %v7951_v20 = vld [vmem:[#allocation2 + $0x578] sm:$0xff]  ;;  %v7952_v23 = vld [vmem:[#allocation2 + $0x550] sm:$0xff] }
 0x6dd   :  { %5767 = vmatpush.msrb.mxu3 %v7903_v57  ;;  %v7953_v14 = vld [vmem:[#allocation2 + $0x558] sm:$0xff] }
 0x6de   :  { %5677 = vmatpush.msra.mxu0 %v7902_v6  ;;  %5363 = vmatmul.f32.gmra.mxu3 %v11608_v40  ;;  %v7954_v6 = vld [vmem:[#allocation2 + $0x530] sm:$0xff]  ;;  %v7955_v57 = vld [vmem:[#allocation2 + $0x538] sm:$0xff] }
 0x6df   :  { %5620 = vmatpush.msrb.mxu2 %v7904_v27  ;;  %5090 = vmatmul.f32.gmra.mxu0 %v11576_v9  ;;  %v7956_v27 = vld [vmem:[#allocation2 + $0x510] sm:$0xff] }
 0x6e0   :  { %5032 = vmatmul.f32.gmra.mxu2 %v11576_v9  ;;  %5678 = vmatpush.msra.mxu0 %v7905_v34  ;;  %v7957_v34 = vld [vmem:[#allocation2 + $0x518] sm:$0xff] }
 0x6e1   :  { %5621 = vmatpush.msrb.mxu2 %v7906_v51  ;;  %5768 = vmatpush.msrb.mxu3 %v7907_v25  ;;  %v7958_v51 = vld [vmem:[#allocation2 + $0x4f0] sm:$0xff] }
 0x6e2   :  { %5679 = vmatpush.msra.mxu0 %v7908_v37  ;;  %v7959_v37 = vld [vmem:[#allocation2 + $0x4f8] sm:$0xff] }
 0x6e3   :  { %5622 = vmatpush.msrb.mxu2 %v7909_v10  ;;  %5769 = vmatpush.msrb.mxu3 %v7910_v41  ;;  %v7960_v10 = vld [vmem:[#allocation2 + $0x4d0] sm:$0xff]  ;;  %v7961_v41 = vld [vmem:[#allocation2 + $0x4d8] sm:$0xff] }
 0x6e4   :  { %5680 = vmatpush.msra.mxu0 %v7911_v43  ;;  %v7962_v43 = vld [vmem:[#allocation2 + $0x4b0] sm:$0xff] }
 0x6e5   :  { %5623 = vmatpush.msrb.mxu2 %v7912_v18  ;;  %5770 = vmatpush.msrb.mxu3 %v7913_v28  ;;  %v7963_v18 = vld [vmem:[#allocation2 + $0x4b8] sm:$0xff]  ;;  %v7964_v28 = vld [vmem:[#allocation2 + $0x490] sm:$0xff] }
 0x6e6   :  { %5681 = vmatpush.msra.mxu0 %v7914_v7  ;;  %v7965_v7 = vld [vmem:[#allocation2 + $0x498] sm:$0xff] }
 0x6e7   :  { %5624 = vmatpush.msrb.mxu2 %v7915_v16  ;;  %5093 = vmatmul.f32.gmra.mxu0 %v11602_v60  ;;  %v7966_v16 = vld [vmem:[#allocation2 + $0x470] sm:$0xff] }
 0x6e8   :  { %5035 = vmatmul.f32.gmra.mxu2 %v11602_v60  ;;  %5682 = vmatpush.msra.mxu0 %v7916_v36  ;;  %v7967_v36 = vld [vmem:[#allocation2 + $0x478] sm:$0xff] }
 0x6e9   :  { %5625 = vmatpush.msrb.mxu2 %v7917_v55  ;;  %5771 = vmatpush.msrb.mxu3 %v7918_v42  ;;  %v7968_v55 = vld [vmem:[#allocation2 + $0x450] sm:$0xff] }
 0x6ea   :  { %5683 = vmatpush.msra.mxu0 %v7919_v61  ;;  %v7969_v61 = vld [vmem:[#allocation2 + $0x458] sm:$0xff] }
 0x6eb   :  { %5626 = vmatpush.msrb.mxu2 %v7920_v11  ;;  %5772 = vmatpush.msrb.mxu3 %v7921_v62  ;;  %v7970_v11 = vld [vmem:[#allocation2 + $0x430] sm:$0xff]  ;;  %v7971_v62 = vld [vmem:[#allocation2 + $0x438] sm:$0xff] }
 0x6ec   :  { %5684 = vmatpush.msra.mxu0 %v7922_v19 }
 0x6ed   :  { %5627 = vmatpush.msrb.mxu2 %v7923_v46  ;;  %5773 = vmatpush.msrb.mxu3 %v7924_v2 }
 0x6ee   :  { %5685 = vmatpush.msra.mxu0 %v7925_v15 }
 0x6ef   :  { %5628 = vmatpush.msrb.mxu2 %v7926_v63  ;;  %5096 = vmatmul.f32.gmra.mxu0 %v11608_v40 }
 0x6f0   :  { %5038 = vmatmul.f32.gmra.mxu2 %v11608_v40  ;;  %5686 = vmatpush.msra.mxu0 %v7927_v4 }
 0x6f1   :  { %5629 = vmatpush.msrb.mxu2 %v7928_v35  ;;  %5774 = vmatpush.msrb.mxu3 %v7929_v3 }
 0x6f2   :  { %5687 = vmatpush.msra.mxu0 %v7930_v59 }
 0x6f3   :  { %5630 = vmatpush.msrb.mxu2 %v7931_v32  ;;  %5775 = vmatpush.msrb.mxu3 %v7932_v31 }
 0x6f4   :  { %5688 = vmatpush.msra.mxu0 %v7933_v39 }
 0x6f5   :  { %5631 = vmatpush.msrb.mxu2 %v7934_v1  ;;  %5776 = vmatpush.msrb.mxu3 %v7935_v38 }
 0x6f6   :  { %5689 = vmatpush.msra.mxu0 %v7936_v58 }
 0x6f7   :  { %5632 = vmatpush.msrb.mxu2 %v7937_v17  ;;  %5383 = vmatmul.f32.vlgmr.msrb.gmra.mxu0 %v11515_v0 }
 0x6f8   :  { %5325 = vmatmul.f32.vlgmr.msra.gmra.mxu2 %v11515_v0  ;;  %5690 = vmatpush.msra.mxu0 %v7938_v29 }
 0x6f9   :  { %5733 = vmatpush.msra.mxu2 %v7939_v50  ;;  %5777 = vmatpush.msrb.mxu3 %v7941_v21 }
 0x6fa   :  { %5791 = vmatpush.msrb.mxu0 %v7940_v12 }
 0x6fb   :  { %5734 = vmatpush.msra.mxu2 %v7942_v45 }
 0x6fc   :  { %5792 = vmatpush.msrb.mxu0 %v7943_v22  ;;  %v5001_v2 = vpop.f32.mrf.mxu1 }
 0x6fd   :  { %5735 = vmatpush.msra.mxu2 %v7944_v47 }
 0x6fe   :  { %5793 = vmatpush.msrb.mxu0 %v7945_v5 }
 0x6ff   :  { %5736 = vmatpush.msra.mxu2 %v7946_v54  ;;  %5386 = vmatmul.f32.gmra.mxu0 %v11576_v9 }
 0x700   :  { %5328 = vmatmul.f32.gmra.mxu2 %v11576_v9  ;;  %5794 = vmatpush.msrb.mxu0 %v7947_v24 }
 0x701   :  { %5737 = vmatpush.msra.mxu2 %v7948_v49 }
 0x702   :  { %5795 = vmatpush.msrb.mxu0 %v7949_v8  ;;  %v4943_v25 = vpop.f32.mrf.mxu3 }
 0x703   :  { %5738 = vmatpush.msra.mxu2 %v7950_v26 }
 0x704   :  { %5796 = vmatpush.msrb.mxu0 %v7951_v20 }
 0x705   :  { %5739 = vmatpush.msra.mxu2 %v7952_v23  ;;  %v5004_v59 = vpop.f32.mrf.mxu1 }
 0x706   :  { %5797 = vmatpush.msrb.mxu0 %v7953_v14 }
 0x707   :  { %5740 = vmatpush.msra.mxu2 %v7954_v6  ;;  %5389 = vmatmul.f32.gmra.mxu0 %v11602_v60 }
 0x708   :  { %5331 = vmatmul.f32.gmra.mxu2 %v11602_v60  ;;  %5798 = vmatpush.msrb.mxu0 %v7955_v57 }
 0x709   :  { %5741 = vmatpush.msra.mxu2 %v7956_v27 }
 0x70a   :  { %5799 = vmatpush.msrb.mxu0 %v7957_v34  ;;  %v4946_v42 = vpop.f32.mrf.mxu3 }
 0x70b   :  { %5742 = vmatpush.msra.mxu2 %v7958_v51 }
 0x70c   :  { %5800 = vmatpush.msrb.mxu0 %v7959_v37 }
 0x70d   :  { %5743 = vmatpush.msra.mxu2 %v7960_v10  ;;  %v5007_v45 = vpop.f32.mrf.mxu1 }
 0x70e   :  { %5801 = vmatpush.msrb.mxu0 %v7961_v41 }
 0x70f   :  { %5744 = vmatpush.msra.mxu2 %v7962_v43  ;;  %5392 = vmatmul.f32.gmra.mxu0 %v11608_v40 }
 0x710   :  { %5334 = vmatmul.f32.gmra.mxu2 %v11608_v40  ;;  %5802 = vmatpush.msrb.mxu0 %v7963_v18 }
 0x711   :  { %5745 = vmatpush.msra.mxu2 %v7964_v28 }
 0x712   :  { %5803 = vmatpush.msrb.mxu0 %v7965_v7  ;;  %v4949_v19 = vpop.f32.mrf.mxu3 }
 0x713   :  { %5746 = vmatpush.msra.mxu2 %v7966_v16 }
 0x714   :  { %5804 = vmatpush.msrb.mxu0 %v7967_v36 }
 0x715   :  { %5747 = vmatpush.msra.mxu2 %v7968_v55  ;;  %v5010_v10 = vpop.f32.mrf.mxu1 }
 0x716   :  { %5805 = vmatpush.msrb.mxu0 %v7969_v61 }
 0x717   :  { %5748 = vmatpush.msra.mxu2 %v7970_v11 }
 0x718   :  { %5806 = vmatpush.msrb.mxu0 %v7971_v62 }
 0x71b   :  { %v4952_v46 = vpop.f32.mrf.mxu3 }
 0x723   :  { %v11631_v63 = vpop.f32.mrf.mxu3 }
 0x72b   :  { %v11636_v58 = vpop.f32.mrf.mxu3 }
 0x732   :  { %v4972_v15 = vpop.f32.mrf.mxu0 }
 0x733   :  { %v4973_v4 = vadd.f32 %v4972_v15, %v12313_v33  ;;  %v11643_v26 = vpop.f32.mrf.mxu3 }
 0x735   :  { %v5002_v32 = vadd.f32 %v5001_v2, %v4973_v4 }
 0x737   :  { %v6247_v17 = vmul.f32 -1.442695, %v5002_v32 }
 0x738   :  { %v4914_v35 = vpop.f32.mrf.mxu2 }
 0x739   :  { %v4915_v3 = vadd.f32 %v4914_v35, %v12314_v44 }
 0x73b   :  { %v4944_v31 = vadd.f32 %v4943_v25, %v4915_v3 }
 0x73c   :  { %v4975_v1 = vpop.f32.mrf.mxu0 }
 0x73d   :  { %v6243_v39 = vmul.f32 -1.442695, %v4944_v31  ;;  %v4976_v38 = vadd.f32 %v4975_v1, %v12313_v33  ;;  %v5117_v1 = vpop.f32.mrf.mxu1 }
 0x73f   :  { %6792 = vpow2.f32 %v6243_v39  ;;  %v5005_v29 = vadd.f32 %v5004_v59, %v4976_v38 }
 0x740   :  { %6794 = vpow2.f32 %v6247_v17  ;;  %v11653_v36 = vpop.f32.mrf.mxu3 }
 0x741   :  { %v6248_v22 = vmul.f32 -1.442695, %v5005_v29 }
 0x742   :  { %v4917_v50 = vpop.f32.mrf.mxu2 }
 0x743   :  { %v4918_v12 = vadd.f32 %v4917_v50, %v12314_v44 }
 0x744   :  { %v4978_v47 = vpop.f32.mrf.mxu0 }
 0x745   :  { %v6793_v21 = vpop.eup %6792  ;;  %v4947_v54 = vadd.f32 %v4946_v42, %v4918_v12  ;;  %v4979_v24 = vadd.f32 %v4978_v47, %v12313_v33 }
 0x746   :  { %v11639_v5 = vadd.f32 1.0, %v6793_v21  ;;  %v6795_v8 = vpop.eup %6794 }
 0x747   :  { %v6244_v49 = vmul.f32 -1.442695, %v4947_v54  ;;  %v5008_v20 = vadd.f32 %v5007_v45, %v4979_v24  ;;  %v11645_v14 = vadd.f32 1.0, %v6795_v8 }
 0x748   :  { %6796 = vrcp.f32 %v11639_v5  ;;  %v5156_v39 = vand.u32 2147483648, %v11639_v5  ;;  %vm5150_vm5 = vweird.f32 %v11639_v5 }
 0x749   :  { %6798 = vpow2.f32 %v6248_v22  ;;  %v6249_v57 = vmul.f32 -1.442695, %v5008_v20  ;;  %v5232_v12 = vand.u32 2147483648, %v11645_v14  ;;  %v5355_v21 = vpop.f32.mrf.mxu3  ;;  %vm5226_vm7 = vweird.f32 %v11645_v14 }
 0x74a   :  { %6800 = vpow2.f32 %v6244_v49  ;;  %v4920_v23 = vpop.f32.mrf.mxu2  ;;  %v5157_v24 = vor.u32 1.1754944e-38, %v5156_v39 }
 0x74b   :  { %v4921_v6 = vadd.f32 %v4920_v23, %v12314_v44  ;;  %6802 = vrcp.f32 %v11645_v14 }
 0x74c   :  { %v4981_v27 = vpop.f32.mrf.mxu0  ;;  %6804 = vpow2.f32 %v6249_v57  ;;  %v5230_v57 = vand.u32 2147483647, %v11645_v14 }
 0x74d   :  { %v4950_v51 = vadd.f32 %v4949_v19, %v4921_v6  ;;  %v4982_v25 = vadd.f32 %v4981_v27, %v12313_v33 }
 0x74e   :  { %v6797_v34 = vpop.eup %6796  ;;  %vm5231_vm15 = vcmp.eq.f32.partialorder %v5230_v57, 8.507059e+37 }
 0x74f   :  { %v6799_v37 = vpop.eup %6798  ;;  %v6245_v43 = vmul.f32 -1.442695, %v4950_v51  ;;  %v5011_v18 = vadd.f32 %v5010_v10, %v4982_v25  ;;  %v5146_v28 = vmul.f32 %v6797_v34, %v11639_v5  ;;  %vm5151_vm4 = vweird.f32 %v6797_v34 }
 0x750   :  { %v6801_v41 = vpop.eup %6800  ;;  %v11655_v55 = vadd.f32 1.0, %v6799_v37  ;;  %vm11671_vm6 = vmor %vm5150_vm5, %vm5151_vm4  ;;  %v5233_v10 = vor.u32 1.1754944e-38, %v5232_v12 }
 0x751   :  { %v11651_v7 = vadd.f32 1.0, %v6801_v41  ;;  %v5147_v16 = vsub.f32 1.0, %v5146_v28  ;;  %6806 = vpow2.f32 %v6245_v43  ;;  %v6250_v61 = vmul.f32 -1.442695, %v5011_v18  ;;  %v11658_v19 = vpop.eup %6802  ;;  %v12527_v41 = vld [vmem:[#allocation60_spill] sm:$0xff] }
 0x752   :  { %v4923_v42 = vpop.f32.mrf.mxu2  ;;  %v6805_v4 = vpop.eup %6804  ;;  %v5222_v32 = vmul.f32 %v11658_v19, %v11645_v14  ;;  %v5476_v43 = vadd.f32 %v5355_v21, %v12527_v41  ;;  %vm5227_vm8 = vweird.f32 %v11658_v19  ;;  %v5247_v28 = vand.u32 2147483648, %v11655_v55 }
 0x753   :  { %v4924_v11 = vadd.f32 %v4923_v42, %v12314_v44  ;;  %6808 = vrcp.f32 %v11651_v7  ;;  %v5148_v15 = vmul.f32 %v6797_v34, %v5147_v16  ;;  %v11664_v31 = vadd.f32 1.0, %v6805_v4  ;;  %vm11724_vm13 = vmor %vm5226_vm7, %vm5227_vm8 }
 0x754   :  { %v5088_v62 = vpop.f32.mrf.mxu0  ;;  %6810 = vrcp.f32 %v11655_v55  ;;  %v5223_v54 = vsub.f32 1.0, %v5222_v32  ;;  %vm5165_vm10 = vweird.f32 %v11651_v7  ;;  %v5245_v21 = vand.u32 2147483647, %v11655_v55 }
 0x755   :  { %v4953_v2 = vadd.f32 %v4952_v46, %v4924_v11  ;;  %6812 = vpow2.f32 %v6250_v61  ;;  %v5149_v3 = vadd.f32 %v6797_v34, %v5148_v15  ;;  %v5154_v46 = vand.u32 2147483647, %v11639_v5  ;;  %v5120_v15 = vpop.f32.mrf.mxu1 }
 0x756   :  { %v5089_v22 = vadd.f32 %v5088_v62, %v8665_v53  ;;  %v5224_v37 = vmul.f32 %v11658_v19, %v5223_v54  ;;  %vm5241_vm14 = vweird.f32 %v11655_v55  ;;  %vm11740_vm1 = vcmp.eq.f32.partialorder %v5245_v21, 8.507059e+37 }
 0x757   :  { %v6246_v35 = vmul.f32 -1.442695, %v4953_v2  ;;  %v6807_v59 = vpop.eup %6806  ;;  %v5153_v47 = vsel %vm11671_vm6, %v6797_v34, %v5149_v3  ;;  %vm5155_vm0 = vcmp.eq.f32.partialorder %v5154_v46, 8.507059e+37  ;;  %v5169_v2 = vand.u32 2147483647, %v11651_v7 }
 0x758   :  { %v11678_v45 = vadd.f32 1.0, %v6807_v59  ;;  %v5158_v6 = vsel %vm5155_vm0, %v5157_v24, %v5153_v47  ;;  %v5118_v51 = vadd.f32 %v5117_v1, %v5089_v22  ;;  %v5171_v3 = vand.u32 2147483648, %v11651_v7 }
 0x759   :  { %6814 = vpow2.f32 %v6246_v35  ;;  %v11669_v17 = vpop.eup %6808  ;;  %v6255_v59 = vmul.f32 -1.442695, %v5476_v43  ;;  %v5225_v32 = vadd.f32 %v11658_v19, %v5224_v37  ;;  %vm5170_vm12 = vcmp.eq.f32.partialorder %v5169_v2, 8.507059e+37 }
 0x75a   :  { %v5030_v38 = vpop.f32.mrf.mxu2  ;;  %v11675_v50 = vpop.eup %6810  ;;  %6816 = vrcp.f32 %v11664_v31  ;;  %v5161_v20 = vmul.f32 %v11669_v17, %v11651_v7  ;;  %v5281_v16 = vmul.f32 %v5158_v6, %v5118_v51  ;;  %vm5166_vm9 = vweird.f32 %v11669_v17 }
 0x75b   :  { %v6813_v5 = vpop.eup %6812  ;;  %v5031_v49 = vadd.f32 %v5030_v38, %v8681_v13  ;;  %v5237_v23 = vmul.f32 %v11675_v50, %v11655_v55  ;;  %6818 = vrcp.f32 %v11678_v45  ;;  %v5358_v38 = vpop.f32.mrf.mxu3  ;;  %vm5167_vm11 = vmor %vm5165_vm10, %vm5166_vm9  ;;  %v5172_v29 = vor.u32 1.1754944e-38, %v5171_v3 }
 0x75c   :  { %v5091_v8 = vpop.f32.mrf.mxu0  ;;  %v11692_v34 = vadd.f32 1.0, %v6813_v5  ;;  %v5162_v18 = vsub.f32 1.0, %v5161_v20  ;;  %vm5242_vm2 = vweird.f32 %v11675_v50  ;;  %vm5256_vm3 = vweird.f32 %v11664_v31 }
 0x75d   :  { %v5060_v25 = vadd.f32 %v11631_v63, %v5031_v49  ;;  %v5092_v42 = vadd.f32 %v5091_v8, %v8665_v53  ;;  %v5238_v4 = vsub.f32 1.0, %v5237_v23  ;;  %v12530_v8 = vld [vmem:[#allocation62_spill] sm:$0xff]  ;;  %v5123_v2 = vpop.f32.mrf.mxu1  ;;  %vm11763_vm5 = vmor %vm5241_vm14, %vm5242_vm2  ;;  %vm5180_vm0 = vweird.f32 %v11678_v45 }
 0x75e   :  { %v5163_v63 = vmul.f32 %v11669_v17, %v5162_v18  ;;  %6820 = vrcp.f32 %v11692_v34  ;;  %v5477_v20 = vadd.f32 %v5358_v38, %v12530_v8 }
 0x75f   :  { %v6815_v27 = vpop.eup %6814  ;;  %v5285_v35 = vadd.f32 %v5281_v16, %v5060_v25  ;;  %v5121_v22 = vadd.f32 %v5120_v15, %v5092_v42  ;;  %v5239_v54 = vmul.f32 %v11675_v50, %v5238_v4  ;;  %v5184_v15 = vand.u32 2147483647, %v11678_v45 }
 0x760   :  { %v11700_v11 = vpop.eup %6816  ;;  %v11702_v62 = vadd.f32 1.0, %v6815_v27  ;;  %v5164_v39 = vadd.f32 %v11669_v17, %v5163_v63  ;;  %v5248_v27 = vor.u32 1.1754944e-38, %v5247_v28  ;;  %v11748_v28 = vmul.f32 -1.442695, %v5477_v20 }
 0x761   :  { %v11712_v1 = vpop.eup %6818  ;;  %v5252_v46 = vmul.f32 %v11700_v11, %v11664_v31  ;;  %v5240_v43 = vadd.f32 %v11675_v50, %v5239_v54  ;;  %vm5257_vm6 = vweird.f32 %v11700_v11  ;;  %vm5185_vm8 = vcmp.eq.f32.partialorder %v5184_v15, 8.507059e+37 }
 0x762   :  { %6822 = vrcp.f32 %v11702_v62  ;;  %v5168_v47 = vsel %vm5167_vm11, %v11669_v17, %v5164_v39  ;;  %v5229_v17 = vsel %vm11724_vm13, %v11658_v19, %v5225_v32  ;;  %v5176_v14 = vmul.f32 %v11712_v1, %v11678_v45  ;;  %vm11797_vm10 = vmor %vm5256_vm3, %vm5257_vm6 }
 0x763   :  { %v5033_v61 = vpop.f32.mrf.mxu2  ;;  %6824 = vtanh.f32 %v5285_v35  ;;  %v5173_v24 = vsel %vm5170_vm12, %v5172_v29, %v5168_v47  ;;  %v5253_v25 = vsub.f32 1.0, %v5252_v46  ;;  %v5234_v41 = vsel %vm5231_vm15, %v5233_v10, %v5229_v17  ;;  %v5361_v8 = vpop.f32.mrf.mxu3 }
 0x764   :  { %v5034_v12 = vadd.f32 %v5033_v61, %v8681_v13  ;;  %v5094_v5 = vpop.f32.mrf.mxu0  ;;  %v5282_v23 = vmul.f32 %v5173_v24, %v5121_v22  ;;  %v11736_v6 = vpop.eup %6820  ;;  %6826 = vpow2.f32 %v6255_v59  ;;  %v5177_v18 = vsub.f32 1.0, %v5176_v14 }
 0x765   :  { %v5267_v57 = vmul.f32 %v11736_v6, %v11692_v34  ;;  %v5095_v42 = vadd.f32 %v5094_v5, %v8665_v53  ;;  %v5186_v61 = vand.u32 2147483648, %v11678_v45  ;;  %vm5181_vm4 = vweird.f32 %v11712_v1 }
 0x766   :  { %v5063_v49 = vadd.f32 %v11636_v58, %v5034_v12  ;;  %v5262_v58 = vand.u32 2147483648, %v11664_v31  ;;  %v5178_v10 = vmul.f32 %v11712_v1, %v5177_v18  ;;  %v5254_v3 = vmul.f32 %v11700_v11, %v5253_v25  ;;  %vm5182_vm7 = vmor %vm5180_vm0, %vm5181_vm4 }
 0x767   :  { %v5293_v32 = vsub.f32 1.0, %v5234_v41  ;;  %v5244_v46 = vsel %vm11763_vm5, %v11675_v50, %v5240_v43  ;;  %v5268_v55 = vsub.f32 1.0, %v5267_v57  ;;  %v5187_v12 = vor.u32 1.1754944e-38, %v5186_v61  ;;  %v12537_v43 = vld [vmem:[#allocation64_spill] sm:$0xff] }
 0x768   :  { %v5286_v19 = vadd.f32 %v5282_v23, %v5063_v49  ;;  %v11746_v16 = vpop.eup %6822  ;;  %v5263_v59 = vor.u32 1.1754944e-38, %v5262_v58  ;;  %v5179_v38 = vadd.f32 %v11712_v1, %v5178_v10  ;;  %v5124_v47 = vadd.f32 %v5123_v2, %v5095_v42  ;;  %v5126_v42 = vpop.f32.mrf.mxu1 }
 0x769   :  { %v6825_v63 = vpop.eup %6824  ;;  %v5191_v22 = vmul.f32 %v11746_v16, %v11702_v62  ;;  %v5249_v45 = vsel %vm11740_vm1, %v5248_v27, %v5244_v46  ;;  %v5255_v24 = vadd.f32 %v11700_v11, %v5254_v3  ;;  %v5201_v23 = vand.u32 2147483648, %v11702_v62  ;;  %v12538_v46 = vld [vmem:[#allocation48_spill] sm:$0xff] }
 0x76a   :  { %6828 = vtanh.f32 %v5286_v19  ;;  %v6827_v39 = vpop.eup %6826  ;;  %v5297_v29 = vmul.f32 %v6825_v63, %v5293_v32  ;;  %v5183_v5 = vsel %vm5182_vm7, %v11712_v1, %v5179_v38  ;;  %v5301_v14 = vmul.f32 %v5234_v41, %v11333_v52 }
 0x76b   :  { %v5036_v51 = vpop.f32.mrf.mxu2  ;;  %v5188_v54 = vsel %vm5185_vm8, %v5187_v12, %v5183_v5  ;;  %v5192_v49 = vsub.f32 1.0, %v5191_v22  ;;  %vm5196_vm9 = vweird.f32 %v11746_v16  ;;  %v5294_v25 = vsub.f32 1.0, %v5249_v45 }
 0x76c   :  { %v5037_v4 = vadd.f32 %v5036_v51, %v8681_v13  ;;  %v5097_v21 = vpop.f32.mrf.mxu0  ;;  %v5283_v20 = vmul.f32 %v5188_v54, %v5124_v47  ;;  %v5260_v58 = vand.u32 2147483647, %v11664_v31  ;;  %v11791_v19 = vadd.f32 %v5301_v14, %v5297_v29 }
 0x76d   :  { %v5098_v17 = vadd.f32 %v5097_v21, %v8665_v53  ;;  %v5193_v51 = vmul.f32 %v11746_v16, %v5192_v49  ;;  %v5269_v41 = vmul.f32 %v11736_v6, %v5268_v55  ;;  %v5478_v18 = vadd.f32 %v5361_v8, %v12537_v43  ;;  %v12541_v43 = vld [vmem:[#allocation54_spill] sm:$0xff] }
 0x76e   :  { %v5066_v50 = vadd.f32 %v11643_v26, %v5037_v4  ;;  %v5199_v26 = vand.u32 2147483647, %v11702_v62  ;;  %vm5195_vm11 = vweird.f32 %v11702_v62  ;;  %v5259_v63 = vsel %vm11797_vm10, %v11700_v11, %v5255_v24  ;;  %5633 = vmatmul.f32.vlgmr.msrb.gmra.mxu2 %v11791_v19  ;;  %5691 = vmatmul.f32.vlgmr.msra.gmra.mxu0 %v11791_v19 }
 0x76f   :  { %v5194_v57 = vadd.f32 %v11746_v16, %v5193_v51  ;;  %vm5197_vm12 = vmor %vm5195_vm11, %vm5196_vm9  ;;  %v5202_v31 = vor.u32 1.1754944e-38, %v5201_v23  ;;  %v5127_v2 = vadd.f32 %v5126_v42, %v5098_v17  ;;  %v11814_v15 = vadd.f32 1.0, %v6827_v39  ;;  %v12540_v17 = vld [vmem:[#allocation6_spill] sm:$0xff] }
 0x770   :  { %v6829_v1 = vpop.eup %6828  ;;  %v5287_v37 = vadd.f32 %v5283_v20, %v5066_v50  ;;  %vm5200_vm13 = vcmp.eq.f32.partialorder %v5199_v26, 8.507059e+37  ;;  %vm5261_vm14 = vcmp.eq.f32.partialorder %v5260_v58, 8.507059e+37  ;;  %v5302_v11 = vmul.f32 %v5249_v45, %v11350_v56  ;;  %v5364_v50 = vpop.f32.mrf.mxu3 }
 0x771   :  { %v5298_v61 = vmul.f32 %v6829_v1, %v5294_v25  ;;  %v5198_v10 = vsel %vm5197_vm12, %v11746_v16, %v5194_v57  ;;  %v5264_v3 = vsel %vm5261_vm14, %v5263_v59, %v5259_v63  ;;  %vm5272_vm15 = vweird.f32 %v11736_v6 }
 0x772   :  { %6830 = vtanh.f32 %v5287_v37  ;;  %v5203_v4 = vsel %vm5200_vm13, %v5202_v31, %v5198_v10  ;;  %v5270_v16 = vadd.f32 %v11736_v6, %v5269_v41  ;;  %v6257_v39 = vmul.f32 -1.442695, %v5478_v18 }
 0x773   :  { %v5039_v7 = vpop.f32.mrf.mxu2  ;;  %6832 = vpow2.f32 %v11748_v28  ;;  %v5284_v32 = vmul.f32 %v5203_v4, %v5127_v2  ;;  %v11821_v55 = vadd.f32 %v5302_v11, %v5298_v61  ;;  %vm5271_vm1 = vweird.f32 %v11692_v34 }
 0x774   :  { %v5040_v27 = vadd.f32 %v5039_v7, %v8681_v13  ;;  %6834 = vrcp.f32 %v11814_v15  ;;  %v5295_v56 = vsub.f32 1.0, %v5264_v3  ;;  %v5275_v28 = vand.u32 2147483647, %v11692_v34  ;;  %vm5273_vm2 = vmor %vm5271_vm1, %vm5272_vm15  ;;  %v5384_v2 = vpop.f32.mrf.mxu0 }
 0x775   :  { %v5274_v22 = vsel %vm5273_vm2, %v11736_v6, %v5270_v16  ;;  %v5303_v7 = vmul.f32 %v5264_v3, %v11375_v30  ;;  %v5479_v23 = vadd.f32 %v5364_v50, %v12540_v17  ;;  %vm5501_vm4 = vweird.f32 %v11814_v15  ;;  %v12542_v16 = vld [vmem:[#allocation5_spill] sm:$0xff] }
 0x776   :  { %v5069_v62 = vadd.f32 %v11653_v36, %v5040_v27  ;;  %v5277_v36 = vand.u32 2147483648, %v11692_v34  ;;  %5636 = vmatmul.f32.gmra.mxu2 %v11821_v55  ;;  %5694 = vmatmul.f32.gmra.mxu0 %v11821_v55  ;;  %vm5276_vm3 = vcmp.eq.f32.partialorder %v5275_v28, 8.507059e+37  ;;  %v12539_v34 = vld [vmem:[#allocation51_spill] sm:$0xff] }
 0x777   :  { %v6258_v58 = vmul.f32 -1.442695, %v5479_v23 }
 0x778   :  { %v5288_v29 = vadd.f32 %v5284_v32, %v5069_v62  ;;  %v6831_v21 = vpop.eup %6830  ;;  %v5278_v5 = vor.u32 1.1754944e-38, %v5277_v36 }
 0x779   :  { %v5299_v59 = vmul.f32 %v6831_v21, %v5295_v56  ;;  %v6833_v47 = vpop.eup %6832 }
 0x77a   :  { %6836 = vtanh.f32 %v5288_v29  ;;  %v5279_v54 = vsel %vm5276_vm3, %v5278_v5, %v5274_v22  ;;  %v11832_v49 = vpop.eup %6834  ;;  %v11834_v8 = vadd.f32 1.0, %v6833_v47  ;;  %v5507_v29 = vand.u32 2147483648, %v11814_v15 }
 0x77b   :  { %v5326_v35 = vpop.f32.mrf.mxu2  ;;  %v11836_v6 = vadd.f32 %v5303_v7, %v5299_v59  ;;  %v5296_v51 = vsub.f32 1.0, %v5279_v54  ;;  %v5497_v25 = vmul.f32 %v11832_v49, %v11814_v15  ;;  %v5304_v52 = vmul.f32 %v5279_v54, %v11392_v48 }
 0x77c   :  { %v5396_v38 = vadd.f32 %v5326_v35, %v12538_v46  ;;  %v5505_v46 = vand.u32 2147483647, %v11814_v15  ;;  %vm5502_vm6 = vweird.f32 %v11832_v49  ;;  %v5387_v23 = vpop.f32.mrf.mxu0  ;;  %vm5516_vm12 = vweird.f32 %v11834_v8 }
 0x77d   :  { %v5498_v61 = vsub.f32 1.0, %v5497_v25  ;;  %vm11886_vm9 = vmor %vm5501_vm4, %vm5502_vm6 }
 0x77e   :  { %v6251_v12 = vmul.f32 -1.442695, %v5396_v38  ;;  %5639 = vmatmul.f32.gmra.mxu2 %v11836_v6  ;;  %5697 = vmatmul.f32.gmra.mxu0 %v11836_v6  ;;  %vm5506_vm11 = vcmp.eq.f32.partialorder %v5505_v46, 8.507059e+37 }
 0x77f   :  { %v5499_v48 = vmul.f32 %v11832_v49, %v5498_v61 }
 0x780   :  { %6838 = vpow2.f32 %v6251_v12  ;;  %v6837_v20 = vpop.eup %6836 }
 0x781   :  { %6840 = vpow2.f32 %v6257_v39  ;;  %v5300_v30 = vmul.f32 %v6837_v20, %v5296_v51  ;;  %v5500_v28 = vadd.f32 %v11832_v49, %v5499_v48 }
 0x783   :  { %v5329_v45 = vpop.f32.mrf.mxu2  ;;  %v11848_v57 = vadd.f32 %v5304_v52, %v5300_v30 }
 0x784   :  { %v5397_v24 = vadd.f32 %v5329_v45, %v12539_v34 }
 0x786   :  { %v6252_v14 = vmul.f32 -1.442695, %v5397_v24  ;;  %v6839_v1 = vpop.eup %6838  ;;  %5642 = vmatmul.f32.gmra.mxu2 %v11848_v57  ;;  %5700 = vmatmul.f32.gmra.mxu0 %v11848_v57  ;;  %v11876_v24 = vld [vmem:[#allocation2 + $0x820] ss:$0 sm:$0xff] }
 0x787   :  { %v6841_v26 = vpop.eup %6840  ;;  %v5412_v27 = vadd.f32 1.0, %v6839_v1  ;;  %v5556_v20 = vadd.f32 %v11876_v24, %v5384_v2  ;;  %v5557_v48 = vadd.f32 %v11876_v24, %v5387_v23 }
 0x788   :  { %6842 = vpow2.f32 %v6252_v14  ;;  %v11844_v37 = vadd.f32 1.0, %v6841_v26 }
 0x789   :  { %6844 = vrcp.f32 %v11834_v8  ;;  %v5427_v38 = vand.u32 2147483648, %v5412_v27  ;;  %v5425_v21 = vand.u32 2147483647, %v5412_v27  ;;  %vm5421_vm0 = vweird.f32 %v5412_v27 }
 0x78a   :  { %6846 = vrcp.f32 %v5412_v27 }
 0x78b   :  { %v5332_v41 = vpop.f32.mrf.mxu2  ;;  %6848 = vpow2.f32 %v6258_v58  ;;  %v5428_v54 = vor.u32 1.1754944e-38, %v5427_v38  ;;  %vm5426_vm8 = vcmp.eq.f32.partialorder %v5425_v21, 8.507059e+37  ;;  %v5504_v58 = vsel %vm11886_vm9, %v11832_v49, %v5500_v28 }
 0x78c   :  { %v5398_v18 = vadd.f32 %v5332_v41, %v12541_v43  ;;  %6850 = vrcp.f32 %v11844_v37  ;;  %v12545_v43 = vld [vmem:[#allocation57_spill] sm:$0xff] }
 0x78e   :  { %v6843_v42 = vpop.eup %6842  ;;  %v6253_v63 = vmul.f32 -1.442695, %v5398_v18  ;;  %5749 = vmatmul.f32.vlgmr.msra.gmra.mxu2 %v11791_v19  ;;  %5807 = vmatmul.f32.vlgmr.msrb.gmra.mxu0 %v11791_v19 }
 0x78f   :  { %v11850_v31 = vpop.eup %6844  ;;  %v11853_v10 = vadd.f32 1.0, %v6843_v42 }
 0x790   :  { %v6847_v62 = vpop.eup %6846  ;;  %6852 = vpow2.f32 %v6253_v63  ;;  %v5512_v11 = vmul.f32 %v11850_v31, %v11834_v8  ;;  %vm5517_vm15 = vweird.f32 %v11850_v31 }
 0x791   :  { %v5417_v4 = vmul.f32 %v6847_v62, %v5412_v27  ;;  %6854 = vrcp.f32 %v11853_v10  ;;  %v6849_v32 = vpop.eup %6848  ;;  %vm5422_vm5 = vweird.f32 %v6847_v62  ;;  %v5508_v27 = vor.u32 1.1754944e-38, %v5507_v29  ;;  %vm11915_vm2 = vmor %vm5516_vm12, %vm5517_vm15 }
 0x792   :  { %v11864_v39 = vpop.eup %6850  ;;  %v5513_v59 = vsub.f32 1.0, %v5512_v11  ;;  %v11869_v5 = vadd.f32 1.0, %v6849_v32  ;;  %vm5423_vm7 = vmor %vm5421_vm0, %vm5422_vm5  ;;  %v5442_v25 = vand.u32 2147483648, %v11853_v10  ;;  %v5440_v15 = vand.u32 2147483647, %v11853_v10 }
 0x793   :  { %v5418_v35 = vsub.f32 1.0, %v5417_v4  ;;  %v5335_v3 = vpop.f32.mrf.mxu2  ;;  %v5527_v45 = vmul.f32 %v11864_v39, %v11844_v37  ;;  %vm5436_vm13 = vweird.f32 %v11853_v10  ;;  %v5509_v63 = vsel %vm5506_vm11, %v5508_v27, %v5504_v58 }
 0x794   :  { %v5399_v36 = vadd.f32 %v5335_v3, %v12542_v16  ;;  %v5514_v1 = vmul.f32 %v11850_v31, %v5513_v59  ;;  %vm5441_vm1 = vcmp.eq.f32.partialorder %v5440_v15, 8.507059e+37  ;;  %v5522_v32 = vand.u32 2147483648, %v11834_v8 }
 0x795   :  { %v5419_v12 = vmul.f32 %v6847_v62, %v5418_v35  ;;  %v5528_v41 = vsub.f32 1.0, %v5527_v45  ;;  %v5537_v58 = vand.u32 2147483648, %v11844_v37 }
 0x796   :  { %v6853_v56 = vpop.eup %6852  ;;  %v6254_v22 = vmul.f32 -1.442695, %v5399_v36  ;;  %v5515_v2 = vadd.f32 %v11850_v31, %v5514_v1  ;;  %5752 = vmatmul.f32.gmra.mxu2 %v11821_v55  ;;  %5810 = vmatmul.f32.gmra.mxu0 %v11821_v55 }
 0x797   :  { %v6855_v47 = vpop.eup %6854  ;;  %v5420_v50 = vadd.f32 %v6847_v62, %v5419_v12  ;;  %v11871_v7 = vadd.f32 1.0, %v6853_v56  ;;  %v5529_v29 = vmul.f32 %v11864_v39, %v5528_v41  ;;  %v5390_v12 = vpop.f32.mrf.mxu0  ;;  %v5572_v56 = vsub.f32 1.0, %v5509_v63 }
 0x798   :  { %v5432_v34 = vmul.f32 %v6855_v47, %v11853_v10  ;;  %6856 = vpow2.f32 %v6254_v22  ;;  %vm5437_vm10 = vweird.f32 %v6855_v47  ;;  %v5520_v10 = vand.u32 2147483647, %v11834_v8  ;;  %v12548_v8 = vld [vmem:[#allocation59_spill] sm:$0xff] }
 0x799   :  { %v5424_v17 = vsel %vm5423_vm7, %v6847_v62, %v5420_v50  ;;  %6858 = vrcp.f32 %v11871_v7  ;;  %vm5438_vm14 = vmor %vm5436_vm13, %vm5437_vm10  ;;  %v5443_v62 = vor.u32 1.1754944e-38, %v5442_v25  ;;  %v5457_v21 = vand.u32 2147483648, %v11871_v7 }
 0x79a   :  { %v5429_v51 = vsel %vm5426_vm8, %v5428_v54, %v5424_v17  ;;  %v5433_v26 = vsub.f32 1.0, %v5432_v34  ;;  %6860 = vrcp.f32 %v11869_v5  ;;  %v5519_v28 = vsel %vm11915_vm2, %v11850_v31, %v5515_v2  ;;  %v12551_v2 = vld [vmem:[#allocation61_spill] sm:$0xff] }
 0x79b   :  { %v5560_v30 = vmul.f32 %v5556_v20, %v5429_v51  ;;  %v5455_v22 = vand.u32 2147483647, %v11871_v7  ;;  %v5580_v54 = vmul.f32 %v5509_v63, %v11515_v0  ;;  %vm5521_vm4 = vcmp.eq.f32.partialorder %v5520_v10, 8.507059e+37 }
 0x79c   :  { %v5434_v52 = vmul.f32 %v6855_v47, %v5433_v26  ;;  %v5523_v34 = vor.u32 1.1754944e-38, %v5522_v32  ;;  %vm5451_vm5 = vweird.f32 %v11871_v7  ;;  %v5558_v23 = vadd.f32 %v11876_v24, %v5390_v12 }
 0x79d   :  { %v5564_v18 = vadd.f32 %v5560_v30, %v12545_v43  ;;  %v5458_v14 = vor.u32 1.1754944e-38, %v5457_v21  ;;  %vm5456_vm0 = vcmp.eq.f32.partialorder %v5455_v22, 8.507059e+37  ;;  %vm5532_vm7 = vweird.f32 %v11864_v39 }
 0x79e   :  { %v6857_v42 = vpop.eup %6856  ;;  %v5435_v61 = vadd.f32 %v6855_v47, %v5434_v52  ;;  %v5524_v1 = vsel %vm5521_vm4, %v5523_v34, %v5519_v28  ;;  %5755 = vmatmul.f32.gmra.mxu2 %v11836_v6  ;;  %5813 = vmatmul.f32.gmra.mxu0 %v11836_v6  ;;  %vm5531_vm8 = vweird.f32 %v11844_v37  ;;  %v5535_v43 = vand.u32 2147483647, %v11844_v37  ;;  %v12552_v28 = vld [vmem:[#allocation63_spill] sm:$0xff] }
 0x79f   :  { %v6859_v49 = vpop.eup %6858  ;;  %v11901_v4 = vadd.f32 1.0, %v6857_v42  ;;  %6862 = vtanh.f32 %v5564_v18  ;;  %v5573_v41 = vsub.f32 1.0, %v5524_v1  ;;  %vm11945_vm10 = vmor %vm5531_vm8, %vm5532_vm7  ;;  %v5538_v10 = vor.u32 1.1754944e-38, %v5537_v58 }
 0x7a0   :  { %v5439_v11 = vsel %vm5438_vm14, %v6855_v47, %v5435_v61  ;;  %v5447_v35 = vmul.f32 %v6859_v49, %v11871_v7  ;;  %v11911_v46 = vpop.eup %6860  ;;  %vm5452_vm3 = vweird.f32 %v6859_v49  ;;  %v5530_v7 = vadd.f32 %v11864_v39, %v5529_v29 }
 0x7a1   :  { %v5444_v3 = vsel %vm5441_vm1, %v5443_v62, %v5439_v11  ;;  %6864 = vrcp.f32 %v11901_v4  ;;  %v5542_v45 = vmul.f32 %v11911_v46, %v11869_v5  ;;  %vm5453_vm6 = vmor %vm5451_vm5, %vm5452_vm3  ;;  %v5472_v15 = vand.u32 2147483648, %v11901_v4 }
 0x7a2   :  { %v5448_v38 = vsub.f32 1.0, %v5447_v35  ;;  %v5561_v36 = vmul.f32 %v5557_v48, %v5444_v3  ;;  %v5470_v61 = vand.u32 2147483647, %v11901_v4  ;;  %v5393_v48 = vpop.f32.mrf.mxu0  ;;  %v5581_v35 = vmul.f32 %v5524_v1, %v11576_v9 }
 0x7a3   :  { %v5543_v0 = vsub.f32 1.0, %v5542_v45  ;;  %v5534_v37 = vsel %vm11945_vm10, %v11864_v39, %v5530_v7  ;;  %vm5466_vm11 = vweird.f32 %v11901_v4  ;;  %v5473_v32 = vor.u32 1.1754944e-38, %v5472_v15 }
 0x7a4   :  { %v5449_v59 = vmul.f32 %v6859_v49, %v5448_v38  ;;  %v5565_v47 = vadd.f32 %v5561_v36, %v12548_v8  ;;  %vm5536_vm13 = vcmp.eq.f32.partialorder %v5535_v43, 8.507059e+37  ;;  %v5559_v16 = vadd.f32 %v11876_v24, %v5393_v48  ;;  %v221_v43 = vld [vmem:[#allocation2 + $0x800] sm:$0xff] }
 0x7a5   :  { %v6863_v50 = vpop.eup %6862  ;;  %v5544_v62 = vmul.f32 %v11911_v46, %v5543_v0  ;;  %vm5471_vm14 = vcmp.eq.f32.partialorder %v5470_v61, 8.507059e+37  ;;  %v5539_v29 = vsel %vm5536_vm13, %v5538_v10, %v5534_v37  ;;  %vm5547_vm15 = vweird.f32 %v11911_v46 }
 0x7a6   :  { %v5450_v20 = vadd.f32 %v6859_v49, %v5449_v59  ;;  %v5576_v17 = vmul.f32 %v6863_v50, %v5572_v56  ;;  %6866 = vtanh.f32 %v5565_v47  ;;  %5758 = vmatmul.f32.gmra.mxu2 %v11848_v57  ;;  %5816 = vmatmul.f32.gmra.mxu0 %v11848_v57  ;;  %v5552_v39 = vand.u32 2147483648, %v11869_v5 }
 0x7a7   :  { %v6865_v31 = vpop.eup %6864  ;;  %v5545_v9 = vadd.f32 %v11911_v46, %v5544_v62  ;;  %vm5546_vm1 = vweird.f32 %v11869_v5  ;;  %v5574_v24 = vsub.f32 1.0, %v5539_v29  ;;  %v5550_v21 = vand.u32 2147483647, %v11869_v5 }
 0x7a8   :  { %v5454_v51 = vsel %vm5453_vm6, %v6859_v49, %v5450_v20  ;;  %v5462_v26 = vmul.f32 %v6865_v31, %v11901_v4  ;;  %v11932_v27 = vadd.f32 %v5580_v54, %v5576_v17  ;;  %vm5467_vm9 = vweird.f32 %v6865_v31  ;;  %vm5548_vm2 = vmor %vm5546_vm1, %vm5547_vm15 }
 0x7a9   :  { %v5459_v30 = vsel %vm5456_vm0, %v5458_v14, %v5454_v51  ;;  %vm5468_vm12 = vmor %vm5466_vm11, %vm5467_vm9  ;;  %v5582_v8 = vmul.f32 %v5539_v29, %v11602_v60  ;;  %v5549_v47 = vsel %vm5548_vm2, %v11911_v46, %v5545_v9  ;;  %v5553_v50 = vor.u32 1.1754944e-38, %v5552_v39 }
 0x7aa   :  { %v5463_v25 = vsub.f32 1.0, %v5462_v26  ;;  %5604 = vmatmul.f32.vlgmr.msrb.gmra.mxu1 %v11932_v27  ;;  %5662 = vmatmul.f32.vlgmr.msra.gmra.mxu3 %v11932_v27  ;;  %v5562_v52 = vmul.f32 %v5558_v23, %v5459_v30  ;;  %vm5551_vm3 = vcmp.eq.f32.partialorder %v5550_v21, 8.507059e+37 }
 0x7ab   :  { %v5554_v54 = vsel %vm5551_vm3, %v5553_v50, %v5549_v47  ;;  %6000 = vmatpush.msrb.mxu1 %v221_v43  ;;  %v211_v43 = vld [vmem:[#allocation2 + $0x6c0] sm:$0xff] }
 0x7ac   :  { %v6867_v18 = vpop.eup %6866  ;;  %v5464_v42 = vmul.f32 %v6865_v31, %v5463_v25  ;;  %v5566_v49 = vadd.f32 %v5562_v52, %v12551_v2  ;;  %v5575_v34 = vsub.f32 1.0, %v5554_v54  ;;  %v5583_v5 = vmul.f32 %v5554_v54, %v11608_v40 }
 0x7ad   :  { %v5577_v11 = vmul.f32 %v6867_v18, %v5573_v41  ;;  %v220_v18 = vld [vmem:[#allocation2 + $0x7e0] sm:$0xff] }
 0x7ae   :  { %v5465_v3 = vadd.f32 %v6865_v31, %v5464_v42  ;;  %6868 = vtanh.f32 %v5566_v49  ;;  %6001 = vmatpush.msrb.mxu1 %v220_v18 }
 0x7af   :  { %v5585_v38 = vadd.f32 %v5581_v35, %v5577_v11 }
 0x7b0   :  { %v5469_v36 = vsel %vm5468_vm12, %v6865_v31, %v5465_v3 }
 0x7b1   :  { %v5474_v12 = vsel %vm5471_vm14, %v5473_v32, %v5469_v36  ;;  %v218_v36 = vld [vmem:[#allocation2 + $0x7a0] sm:$0xff] }
 0x7b2   :  { %5607 = vmatmul.f32.gmra.mxu1 %v5585_v38  ;;  %5665 = vmatmul.f32.gmra.mxu3 %v5585_v38  ;;  %v5563_v4 = vmul.f32 %v5559_v16, %v5474_v12  ;;  %v219_v16 = vld [vmem:[#allocation2 + $0x7c0] sm:$0xff] }
 0x7b3   :  { %6002 = vmatpush.msrb.mxu1 %v219_v16 }
 0x7b4   :  { %v6869_v56 = vpop.eup %6868  ;;  %v5567_v59 = vadd.f32 %v5563_v4, %v12552_v28  ;;  %v217_v4 = vld [vmem:[#allocation2 + $0x780] sm:$0xff] }
 0x7b5   :  { %v5578_v22 = vmul.f32 %v6869_v56, %v5574_v24  ;;  %6003 = vmatpush.msrb.mxu1 %v218_v36 }
 0x7b6   :  { %6870 = vtanh.f32 %v5567_v59 }
 0x7b7   :  { %v5586_v45 = vadd.f32 %v5582_v8, %v5578_v22  ;;  %v216_v22 = vld [vmem:[#allocation2 + $0x760] sm:$0xff]  ;;  %6004 = vmatpush.msrb.mxu1 %v217_v4 }
 0x7b8   :  { %v209_v4 = vld [vmem:[#allocation2 + $0x680] sm:$0xff] }
 0x7b9   :  { %6005 = vmatpush.msrb.mxu1 %v216_v22 }
 0x7ba   :  { %5610 = vmatmul.f32.gmra.mxu1 %v5586_v45  ;;  %5668 = vmatmul.f32.gmra.mxu3 %v5586_v45 }
 0x7bc   :  { %v6871_v20 = vpop.eup %6870 }
 0x7bd   :  { %v5579_v17 = vmul.f32 %v6871_v20, %v5575_v34  ;;  %v215_v34 = vld [vmem:[#allocation2 + $0x740] sm:$0xff] }
 0x7be   :  { %6006 = vmatpush.msrb.mxu1 %v215_v34 }
 0x7bf   :  { %v5587_v31 = vadd.f32 %v5583_v5, %v5579_v17 }
 0x7c2   :  { %5613 = vmatmul.f32.gmra.mxu1 %v5587_v31  ;;  %5671 = vmatmul.f32.gmra.mxu3 %v5587_v31 }
 0x7ca   :  { %5720 = vmatmul.f32.vlgmr.msra.gmra.mxu1 %v11932_v27  ;;  %5778 = vmatmul.f32.vlgmr.msrb.gmra.mxu3 %v11932_v27 }
 0x7d2   :  { %5723 = vmatmul.f32.gmra.mxu1 %v5585_v38  ;;  %5781 = vmatmul.f32.gmra.mxu3 %v5585_v38 }
 0x7da   :  { %5726 = vmatmul.f32.gmra.mxu1 %v5586_v45  ;;  %5784 = vmatmul.f32.gmra.mxu3 %v5586_v45 }
 0x7e2   :  { %5729 = vmatmul.f32.gmra.mxu1 %v5587_v31  ;;  %5787 = vmatmul.f32.gmra.mxu3 %v5587_v31 }
 0x7eb   :  { %v5692_v60 = vpop.f32.mrf.mxu0 }
 0x7f1   :  { %v5634_v46 = vpop.f32.mrf.mxu2 }
 0x7f3   :  { %v5695_v40 = vpop.f32.mrf.mxu0 }
 0x7f9   :  { %v5637_v26 = vpop.f32.mrf.mxu2 }
 0x7fb   :  { %v5698_v42 = vpop.f32.mrf.mxu0 }
 0x801   :  { %v5640_v49 = vpop.f32.mrf.mxu2 }
 0x803   :  { %v5701_v21 = vpop.f32.mrf.mxu0 }
 0x809   :  { %v5643_v8 = vpop.f32.mrf.mxu2 }
 0x827   :  { %v5605_v23 = vpop.f32.mrf.mxu1 }
 0x828   :  { %v5606_v14 = vadd.f32 %v5605_v23, %v12314_v44 }
 0x82a   :  { %v5635_v1 = vadd.f32 %v5634_v46, %v5606_v14 }
 0x82c   :  { %v6259_v51 = vmul.f32 -1.442695, %v5635_v1 }
 0x82d   :  { %v5663_v0 = vpop.f32.mrf.mxu3 }
 0x82e   :  { %6872 = vpow2.f32 %v6259_v51  ;;  %v5664_v30 = vadd.f32 %v5663_v0, %v12313_v33  ;;  %v213_v51 = vld [vmem:[#allocation2 + $0x700] sm:$0xff] }
 0x82f   :  { %v5608_v27 = vpop.f32.mrf.mxu1 }
 0x830   :  { %v5693_v7 = vadd.f32 %v5692_v60, %v5664_v30  ;;  %v5609_v25 = vadd.f32 %v5608_v27, %v12314_v44 }
 0x832   :  { %v6263_v58 = vmul.f32 -1.442695, %v5693_v7  ;;  %v5638_v52 = vadd.f32 %v5637_v26, %v5609_v25  ;;  %v212_v25 = vld [vmem:[#allocation2 + $0x6e0] sm:$0xff] }
 0x834   :  { %v6873_v15 = vpop.eup %6872  ;;  %6874 = vpow2.f32 %v6263_v58  ;;  %v6260_v41 = vmul.f32 -1.442695, %v5638_v52  ;;  %v5808_v58 = vpop.f32.mrf.mxu0 }
 0x835   :  { %v11973_v61 = vadd.f32 1.0, %v6873_v15  ;;  %v5666_v63 = vpop.f32.mrf.mxu3 }
 0x836   :  { %6876 = vpow2.f32 %v6260_v41  ;;  %v5667_v2 = vadd.f32 %v5666_v63, %v12313_v33 }
 0x837   :  { %6878 = vrcp.f32 %v11973_v61  ;;  %v5611_v62 = vpop.f32.mrf.mxu1  ;;  %v5847_v7 = vand.u32 2147483648, %v11973_v61  ;;  %vm5841_vm5 = vweird.f32 %v11973_v61 }
 0x838   :  { %v5696_v48 = vadd.f32 %v5695_v40, %v5667_v2  ;;  %v5612_v11 = vadd.f32 %v5611_v62, %v12314_v44  ;;  %v5845_v2 = vand.u32 2147483647, %v11973_v61 }
 0x83a   :  { %v6875_v35 = vpop.eup %6874  ;;  %v6264_v37 = vmul.f32 -1.442695, %v5696_v48  ;;  %v5641_v3 = vadd.f32 %v5640_v49, %v5612_v11  ;;  %v5848_v11 = vor.u32 1.1754944e-38, %v5847_v7  ;;  %vm5846_vm7 = vcmp.eq.f32.partialorder %v5845_v2, 8.507059e+37 }
 0x83b   :  { %v11978_v10 = vadd.f32 1.0, %v6875_v35  ;;  %v210_v35 = vld [vmem:[#allocation2 + $0x6a0] sm:$0xff] }
 0x83c   :  { %v6877_v32 = vpop.eup %6876  ;;  %6880 = vpow2.f32 %v6264_v37  ;;  %v6261_v38 = vmul.f32 -1.442695, %v5641_v3 }
 0x83d   :  { %v11980_v29 = vpop.eup %6878  ;;  %6882 = vrcp.f32 %v11978_v10  ;;  %v11983_v12 = vadd.f32 1.0, %v6877_v32  ;;  %v5669_v9 = vpop.f32.mrf.mxu3  ;;  %v5923_v48 = vand.u32 2147483648, %v11978_v10  ;;  %vm5917_vm9 = vweird.f32 %v11978_v10 }
 0x83e   :  { %6884 = vpow2.f32 %v6261_v38  ;;  %v5670_v39 = vadd.f32 %v5669_v9, %v12313_v33  ;;  %v5837_v24 = vmul.f32 %v11980_v29, %v11973_v61  ;;  %vm5842_vm4 = vweird.f32 %v11980_v29 }
 0x83f   :  { %6886 = vrcp.f32 %v11983_v12  ;;  %v5614_v56 = vpop.f32.mrf.mxu1  ;;  %vm12026_vm6 = vmor %vm5841_vm5, %vm5842_vm4  ;;  %v5924_v34 = vor.u32 1.1754944e-38, %v5923_v48  ;;  %vm5856_vm11 = vweird.f32 %v11983_v12 }
 0x840   :  { %v5699_v28 = vadd.f32 %v5698_v42, %v5670_v39  ;;  %v5615_v59 = vadd.f32 %v5614_v56, %v12314_v44  ;;  %v5838_v54 = vsub.f32 1.0, %v5837_v24  ;;  %v214_v44 = vld [vmem:[#allocation2 + $0x720] sm:$0xff]  ;;  %v5750_v42 = vpop.f32.mrf.mxu2  ;;  %v5860_v56 = vand.u32 2147483647, %v11983_v12 }
 0x841   :  { %6007 = vmatpush.msrb.mxu1 %v214_v44 }
 0x842   :  { %v6881_v47 = vpop.eup %6880  ;;  %v6265_v50 = vmul.f32 -1.442695, %v5699_v28  ;;  %v5644_v45 = vadd.f32 %v5643_v8, %v5615_v59  ;;  %v5839_v40 = vmul.f32 %v11980_v29, %v5838_v54  ;;  %v208_v59 = vld [vmem:[#allocation2 + $0x660] sm:$0xff]  ;;  %vm12057_vm12 = vcmp.eq.f32.partialorder %v5860_v56, 8.507059e+37 }
 0x843   :  { %v11990_v20 = vpop.eup %6882  ;;  %v11992_v17 = vadd.f32 1.0, %v6881_v47  ;;  %6008 = vmatpush.msrb.mxu1 %v213_v51 }
 0x844   :  { %v6885_v5 = vpop.eup %6884  ;;  %v5913_v31 = vmul.f32 %v11990_v20, %v11978_v10  ;;  %6888 = vpow2.f32 %v6265_v50  ;;  %v6262_v60 = vmul.f32 -1.442695, %v5644_v45  ;;  %v5840_v41 = vadd.f32 %v11980_v29, %v5839_v40 }
 0x845   :  { %v11996_v46 = vpop.eup %6886  ;;  %6890 = vrcp.f32 %v11992_v17  ;;  %v11999_v23 = vadd.f32 1.0, %v6885_v5  ;;  %v5672_v14 = vpop.f32.mrf.mxu3  ;;  %6009 = vmatpush.msrb.mxu1 %v212_v25  ;;  %vm5918_vm0 = vweird.f32 %v11990_v20  ;;  %vm5932_vm4 = vweird.f32 %v11992_v17 }
 0x846   :  { %6892 = vpow2.f32 %v6262_v60  ;;  %v5673_v1 = vadd.f32 %v5672_v14, %v12313_v33  ;;  %v5852_v26 = vmul.f32 %v11996_v46, %v11983_v12  ;;  %v5914_v30 = vsub.f32 1.0, %v5913_v31  ;;  %v207_v60 = vld [vmem:[#allocation2 + $0x640] sm:$0xff]  ;;  %v5811_v14 = vpop.f32.mrf.mxu0  ;;  %vm12050_vm10 = vmor %vm5917_vm9, %vm5918_vm0 }
 0x847   :  { %6894 = vrcp.f32 %v11999_v23  ;;  %v5721_v0 = vpop.f32.mrf.mxu1  ;;  %6010 = vmatpush.msrb.mxu1 %v211_v43  ;;  %v5844_v39 = vsel %vm12026_vm6, %v11980_v29, %v5840_v41  ;;  %v5921_v29 = vand.u32 2147483647, %v11978_v10  ;;  %vm5857_vm8 = vweird.f32 %v11996_v46 }
 0x848   :  { %v5702_v27 = vadd.f32 %v5701_v21, %v5673_v1  ;;  %v5853_v52 = vsub.f32 1.0, %v5852_v26  ;;  %v5915_v62 = vmul.f32 %v11990_v20, %v5914_v30  ;;  %v5722_v36 = vadd.f32 %v5721_v0, %v8681_v13  ;;  %vm12064_vm13 = vmor %vm5856_vm11, %vm5857_vm8 }
 0x849   :  { %6011 = vmatpush.msrb.mxu1 %v210_v35  ;;  %v5849_v47 = vsel %vm5846_vm7, %v5848_v11, %v5844_v39  ;;  %v5862_v10 = vand.u32 2147483648, %v11983_v12  ;;  %v5753_v12 = vpop.f32.mrf.mxu2  ;;  %vm5922_vm14 = vcmp.eq.f32.partialorder %v5921_v29, 8.507059e+37  ;;  %v5877_v2 = vand.u32 2147483648, %v11999_v23 }
 0x84a   :  { %v6889_v15 = vpop.eup %6888  ;;  %v6266_v33 = vmul.f32 -1.442695, %v5702_v27  ;;  %v5854_v16 = vmul.f32 %v11996_v46, %v5853_v52  ;;  %v5916_v8 = vadd.f32 %v11990_v20, %v5915_v62  ;;  %v5751_v5 = vadd.f32 %v5750_v42, %v5722_v36  ;;  %v206_v27 = vld [vmem:[#allocation2 + $0x620] sm:$0xff] }
 0x84b   :  { %v12009_v18 = vpop.eup %6890  ;;  %v12011_v63 = vadd.f32 1.0, %v6889_v15  ;;  %6012 = vmatpush.msrb.mxu1 %v209_v4  ;;  %v5863_v42 = vor.u32 1.1754944e-38, %v5862_v10  ;;  %vm5871_vm2 = vweird.f32 %v11999_v23  ;;  %v5875_v4 = vand.u32 2147483647, %v11999_v23 }
 0x84c   :  { %v6893_v49 = vpop.eup %6892  ;;  %6896 = vpow2.f32 %v6266_v33  ;;  %v5928_v3 = vmul.f32 %v12009_v18, %v11992_v17  ;;  %v5855_v50 = vadd.f32 %v11996_v46, %v5854_v16  ;;  %v5920_v7 = vsel %vm12050_vm10, %v11990_v20, %v5916_v8 }
 0x84d   :  { %v12017_v37 = vpop.eup %6894  ;;  %6898 = vrcp.f32 %v12011_v63  ;;  %v12022_v32 = vadd.f32 1.0, %v6893_v49  ;;  %v5779_v38 = vpop.f32.mrf.mxu3  ;;  %6013 = vmatpush.msrb.mxu1 %v208_v59  ;;  %v5925_v49 = vsel %vm5922_vm14, %v5924_v34, %v5920_v7  ;;  %vm5933_vm1 = vweird.f32 %v12009_v18 }
 0x84e   :  { %v5780_v9 = vadd.f32 %v5779_v38, %v8665_v53  ;;  %v5867_v24 = vmul.f32 %v12017_v37, %v11999_v23  ;;  %v5929_v45 = vsub.f32 1.0, %v5928_v3  ;;  %v5859_v33 = vsel %vm12064_vm13, %v11996_v46, %v5855_v50  ;;  %vm12106_vm5 = vmor %vm5932_vm4, %vm5933_vm1 }
 0x84f   :  { %6900 = vrcp.f32 %v12022_v32  ;;  %v5724_v21 = vpop.f32.mrf.mxu1  ;;  %6014 = vmatpush.msrb.mxu1 %v207_v60  ;;  %vm5872_vm15 = vweird.f32 %v12017_v37  ;;  %v5864_v11 = vsel %vm12057_vm12, %v5863_v42, %v5859_v33  ;;  %v5938_v3 = vand.u32 2147483648, %v11992_v17 }
 0x850   :  { %v5809_v28 = vadd.f32 %v5808_v58, %v5780_v9  ;;  %v5868_v22 = vsub.f32 1.0, %v5867_v24  ;;  %v5930_v25 = vmul.f32 %v12009_v18, %v5929_v45  ;;  %v5725_v20 = vadd.f32 %v5724_v21, %v8681_v13  ;;  %vm12096_vm3 = vmor %vm5871_vm2, %vm5872_vm15 }
 0x851   :  { %6015 = vmatpush.msrb.mxu1 %v206_v27  ;;  %v5878_v24 = vor.u32 1.1754944e-38, %v5877_v2  ;;  %v5984_v21 = vsub.f32 1.0, %v5925_v49  ;;  %v5992_v29 = vmul.f32 %v5925_v49, %v11791_v19  ;;  %v5939_v34 = vor.u32 1.1754944e-38, %v5938_v3 }
 0x852   :  { %v6897_v54 = vpop.eup %6896  ;;  %v5972_v31 = vmul.f32 %v5849_v47, %v5809_v28  ;;  %v5869_v30 = vmul.f32 %v12017_v37, %v5868_v22  ;;  %v5931_v48 = vadd.f32 %v12009_v18, %v5930_v25  ;;  %v5754_v61 = vadd.f32 %v5753_v12, %v5725_v20  ;;  %v5814_v47 = vpop.f32.mrf.mxu0 }
 0x853   :  { %v12046_v44 = vpop.eup %6898  ;;  %v12054_v40 = vadd.f32 1.0, %v6897_v54  ;;  %v5936_v28 = vand.u32 2147483647, %v11992_v17  ;;  %vm5876_vm6 = vcmp.eq.f32.partialorder %v5875_v4, 8.507059e+37  ;;  %v5953_v10 = vand.u32 2147483648, %v12011_v63 }
 0x854   :  { %v5976_v26 = vadd.f32 %v5972_v31, %v5751_v5  ;;  %v5943_v52 = vmul.f32 %v12046_v44, %v12011_v63  ;;  %v5870_v46 = vadd.f32 %v12017_v37, %v5869_v30  ;;  %v5935_v23 = vsel %vm12106_vm5, %v12009_v18, %v5931_v48  ;;  %v5756_v31 = vpop.f32.mrf.mxu2 }
 0x855   :  { %v12073_v58 = vpop.eup %6900  ;;  %6902 = vrcp.f32 %v12054_v40  ;;  %v5782_v15 = vpop.f32.mrf.mxu3  ;;  %vm5937_vm0 = vcmp.eq.f32.partialorder %v5936_v28, 8.507059e+37  ;;  %vm5948_vm7 = vweird.f32 %v12046_v44  ;;  %v5892_v25 = vand.u32 2147483648, %v12022_v32 }
 0x856   :  { %6904 = vtanh.f32 %v5976_v26  ;;  %v5783_v41 = vadd.f32 %v5782_v15, %v8665_v53  ;;  %v5882_v43 = vmul.f32 %v12073_v58, %v12022_v32  ;;  %v5944_v38 = vsub.f32 1.0, %v5943_v52 }
 0x857   :  { %v5727_v35 = vpop.f32.mrf.mxu1  ;;  %v5874_v8 = vsel %vm12096_vm3, %v12017_v37, %v5870_v46  ;;  %v5940_v1 = vsel %vm5937_vm0, %v5939_v34, %v5935_v23  ;;  %vm5887_vm8 = vweird.f32 %v12073_v58  ;;  %vm5947_vm9 = vweird.f32 %v12011_v63 }
 0x858   :  { %v5812_v62 = vadd.f32 %v5811_v14, %v5783_v41  ;;  %v5883_v9 = vsub.f32 1.0, %v5882_v43  ;;  %v5945_v17 = vmul.f32 %v12046_v44, %v5944_v38  ;;  %v5728_v5 = vadd.f32 %v5727_v35, %v8681_v13  ;;  %vm12137_vm11 = vmor %vm5947_vm9, %vm5948_vm7 }
 0x859   :  { %v5879_v14 = vsel %vm5876_vm6, %v5878_v24, %v5874_v8  ;;  %v5985_v12 = vsub.f32 1.0, %v5940_v1  ;;  %v5951_v52 = vand.u32 2147483647, %v12011_v63  ;;  %vm5886_vm10 = vweird.f32 %v12022_v32 }
 0x85a   :  { %v5973_v16 = vmul.f32 %v5864_v11, %v5812_v62  ;;  %v5884_v19 = vmul.f32 %v12073_v58, %v5883_v9  ;;  %v5946_v51 = vadd.f32 %v12046_v44, %v5945_v17  ;;  %v5757_v0 = vadd.f32 %v5756_v31, %v5728_v5  ;;  %vm12141_vm12 = vmor %vm5886_vm10, %vm5887_vm8  ;;  %v5817_v11 = vpop.f32.mrf.mxu0 }
 0x85b   :  { %v12101_v39 = vpop.eup %6902  ;;  %v5890_v20 = vand.u32 2147483647, %v12022_v32  ;;  %v5993_v41 = vmul.f32 %v5940_v1, %v11821_v55  ;;  %v5954_v62 = vor.u32 1.1754944e-38, %v5953_v10  ;;  %v5893_v35 = vor.u32 1.1754944e-38, %v5892_v25 }
 0x85c   :  { %v6905_v59 = vpop.eup %6904  ;;  %v5977_v22 = vadd.f32 %v5973_v16, %v5754_v61  ;;  %v5958_v50 = vmul.f32 %v12101_v39, %v12054_v40  ;;  %v5885_v27 = vadd.f32 %v12073_v58, %v5884_v19  ;;  %v5950_v49 = vsel %vm12137_vm11, %v12046_v44, %v5946_v51  ;;  %v5759_v44 = vpop.f32.mrf.mxu2 }
 0x85d   :  { %v5785_v45 = vpop.f32.mrf.mxu3  ;;  %v5988_v54 = vmul.f32 %v6905_v59, %v5984_v21  ;;  %vm5952_vm13 = vcmp.eq.f32.partialorder %v5951_v52, 8.507059e+37  ;;  %vm5891_vm14 = vcmp.eq.f32.partialorder %v5890_v20, 8.507059e+37  ;;  %vm5963_vm15 = vweird.f32 %v12101_v39 }
 0x85e   :  { %6906 = vtanh.f32 %v5977_v22  ;;  %v5786_v37 = vadd.f32 %v5785_v45, %v8665_v53  ;;  %v5959_v26 = vsub.f32 1.0, %v5958_v50  ;;  %v5889_v48 = vsel %vm12141_vm12, %v12073_v58, %v5885_v27 }
 0x85f   :  { %v5996_v60 = vadd.f32 %v5992_v29, %v5988_v54  ;;  %v5730_v7 = vpop.f32.mrf.mxu1  ;;  %v5955_v61 = vsel %vm5952_vm13, %v5954_v62, %v5950_v49  ;;  %v5894_v16 = vsel %vm5891_vm14, %v5893_v35, %v5889_v48  ;;  %v5968_v9 = vand.u32 2147483648, %v12054_v40  ;;  %v234_v54 = vld [vmem:[#allocation2 + $0x822] ss:$0 sm:$0xff] }
 0x860   :  { %v5815_v18 = vadd.f32 %v5814_v47, %v5786_v37  ;;  %v5960_v32 = vmul.f32 %v12101_v39, %v5959_v26  ;;  %v5731_v55 = vadd.f32 %v5730_v7, %v8681_v13  ;;  %v5986_v4 = vsub.f32 1.0, %v5955_v61 }
 0x861   :  { %6016 = vmatmul.f32.vlgmr.msrb.gmra.mxu1 %v5996_v60  ;;  %vm5962_vm1 = vweird.f32 %v12054_v40  ;;  %v5966_v58 = vand.u32 2147483647, %v12054_v40  ;;  %v5994_v28 = vmul.f32 %v5955_v61, %v11836_v6  ;;  %v5969_v22 = vor.u32 1.1754944e-38, %v5968_v9 }
 0x862   :  { %v5974_v30 = vmul.f32 %v5879_v14, %v5815_v18  ;;  %v5961_v36 = vadd.f32 %v12101_v39, %v5960_v32  ;;  %v5760_v13 = vadd.f32 %v5759_v44, %v5731_v55  ;;  %vm5964_vm2 = vmor %vm5962_vm1, %vm5963_vm15  ;;  %vm6033_vm4 = vcmask 130048  }
 0x863   :  { %vm5967_vm3 = vcmp.eq.f32.partialorder %v5966_v58, 8.507059e+37 }
 0x864   :  { %v6907_v15 = vpop.eup %6906  ;;  %v5978_v33 = vadd.f32 %v5974_v30, %v5757_v0  ;;  %v5965_v59 = vsel %vm5964_vm2, %v12101_v39, %v5961_v36 }
 0x865   :  { %v5788_v42 = vpop.f32.mrf.mxu3  ;;  %v5989_v63 = vmul.f32 %v6907_v15, %v5985_v12  ;;  %v5970_v29 = vsel %vm5967_vm3, %v5969_v22, %v5965_v59 }
 0x866   :  { %6908 = vtanh.f32 %v5978_v33  ;;  %v5789_v46 = vadd.f32 %v5788_v42, %v8665_v53  ;;  %v5987_v23 = vsub.f32 1.0, %v5970_v29  ;;  %v5995_v45 = vmul.f32 %v5970_v29, %v11848_v57 }
 0x867   :  { %v5997_v3 = vadd.f32 %v5993_v41, %v5989_v63 }
 0x868   :  { %v5818_v38 = vadd.f32 %v5817_v11, %v5789_v46 }
 0x869   :  { %6019 = vmatmul.f32.gmra.mxu1 %v5997_v3 }
 0x86a   :  { %v5975_v53 = vmul.f32 %v5894_v16, %v5818_v38 }
 0x86c   :  { %v6909_v24 = vpop.eup %6908  ;;  %v5979_v21 = vadd.f32 %v5975_v53, %v5760_v13 }
 0x86d   :  { %v5990_v56 = vmul.f32 %v6909_v24, %v5986_v4 }
 0x86e   :  { %6910 = vtanh.f32 %v5979_v21 }
 0x86f   :  { %v5998_v8 = vadd.f32 %v5994_v28, %v5990_v56 }
 0x871   :  { %6022 = vmatmul.f32.gmra.mxu1 %v5998_v8 }
 0x874   :  { %v6911_v47 = vpop.eup %6910 }
 0x875   :  { %v5991_v50 = vmul.f32 %v6911_v47, %v5987_v23 }
 0x877   :  { %v5999_v40 = vadd.f32 %v5995_v45, %v5991_v50 }
 0x879   :  { %6025 = vmatmul.f32.gmra.mxu1 %v5999_v40 }
 0x8de   :  { %v6017_v34 = vpop.f32.mrf.mxu1 }
 0x8df   :  { %v6029_v17 = vadd.f32 %v6017_v34, %v234_v54 }
 0x8e1   :  { %6034 = vst.msk [vmem:[%s12176_s2] sm:$0xff] %vm6033_vm4, %v6029_v17 }
 0x8e6   :  { %v6020_v6 = vpop.f32.mrf.mxu1 }
 0x8e7   :  { %v6030_v39 = vadd.f32 %v6020_v6, %v234_v54 }
 0x8e9   :  { %6035 = vst.msk [vmem:[%s12176_s2 + $0x8] sm:$0xff] %vm6033_vm4, %v6030_v39 }
 0x8ee   :  { %v6023_v5 = vpop.f32.mrf.mxu1 }
 0x8ef   :  { %v6031_v37 = vadd.f32 %v6023_v5, %v234_v54 }
 0x8f1   :  { %6036 = vst.msk [vmem:[%s12176_s2 + $0x10] sm:$0xff] %vm6033_vm4, %v6031_v37 }
 0x8f6   :  { %v6026_v57 = vpop.f32.mrf.mxu1 }
 0x8f7   :  { %v6032_v19 = vadd.f32 %v6026_v57, %v234_v54 }
 0x8f9   :  { %6037 = vst.msk [vmem:[%s12176_s2 + $0x18] sm:$0xff] %vm6033_vm4, %v6032_v19 }
 0x8fa   :  { %6042 = vsyncpa [#allocation3], 1 }

</bundles_post_ra>
